<compile_context>
chip_gen: v5e
topology: v5e:2x2
jax: 0.10.0
libtpu: 0.0.40
codegen_flags: <defaults>
</compile_context>

<pallas_src>
import jax
import jax.numpy as jnp
from jax.experimental import pallas as pl
from jax.experimental.pallas import tpu as pltpu

# ----------------------------- static geometry ------------------------------
C = 128                 # padded channel / class lane width
H1 = W1 = 16            # conv1 spatial size
H2 = W2 = 8             # after pool1
H3 = W3 = 4             # after pool2
M1 = H1 * W1            # rows per image in the conv1 slab
M2 = H2 * W2            # rows per image in the conv2 slab
PAD1 = 24               # row padding for conv1 shifted reads (>= W1+1, mult of 8)
PAD2 = 16               # row padding for conv2 shifted reads (>= W2+1, mult of 8)


# ------------------------------ fused kernel --------------------------------
def _conv3x3_same(src_ref, w_ref, acc_ref, *, hs, ws, pad):
    """SAME 3x3 conv as 9 shifted MXU matmuls.

    src_ref : [pad + hs*ws + pad, C] bf16; image rows (h*ws + w) start at `pad`;
              the pad regions are zero (handles top/bottom borders for free).
    w_ref   : [9, C, C] bf16, indexed by kh*3 + kw, layout (cin, cout).
    acc_ref : [hs*ws, C] f32 accumulator (overwritten).
    """
    m = hs * ws
    row = jax.lax.broadcasted_iota(jnp.int32, (m, 1), 0)
    ww = row % ws
    acc_ref[...] = jnp.zeros(acc_ref.shape, acc_ref.dtype)
    for kh in range(3):
        for kw in range(3):
            dh, dw = kh - 1, kw - 1
            xs = src_ref[pl.ds(pad + dh * ws + dw, m), :]          # [m, C] bf16
            if dw != 0:  # left/right border taps need a width-validity mask
                valid = (ww + dw >= 0) & (ww + dw < ws)            # [m, 1]
                xs = jnp.where(valid, xs, jnp.zeros_like(xs))
            acc_ref[...] += jnp.dot(xs, w_ref[kh * 3 + kw],
                                    preferred_element_type=jnp.float32)


def _pool2x2(a, ws):
    """2x2/stride-2 max over a [hs*ws, C] row-major slab.

    Returns a [hs*ws, C] array whose row (2*h)*ws + (2*w) holds the pooled
    value for output cell (h, w); all other rows are don't-care (they are
    zeroed out by the selection matmul that follows)."""
    m = jnp.maximum(a, jnp.roll(a, -1, axis=0))        # max over (w, w+1)
    return jnp.maximum(m, jnp.roll(m, -ws, axis=0))    # max over (h, h+1) too


def _cnn_fused_kernel(x_ref, w1_ref, b1_ref, w2_ref, b2_ref,
                      s1_ref, s2_ref, fcw_ref, fcb_ref,
                      out_ref,
                      xpad_ref, acc1_ref, p1pad_ref, acc2_ref):
    # Stage this image's slab into a row-padded, zeroed scratch.
    xpad_ref[...] = jnp.zeros(xpad_ref.shape, xpad_ref.dtype)
    xpad_ref[pl.ds(PAD1, M1), :] = x_ref[...]

    # ---- conv1 + bias + ReLU ------------------------------------  [M1, C] f32
    _conv3x3_same(xpad_ref, w1_ref, acc1_ref, hs=H1, ws=W1, pad=PAD1)
    a1 = jnp.maximum(acc1_ref[...] + b1_ref[...], 0.0)

    # ---- maxpool 2x2 / stride 2 (roll-max + selection matmul) ----  [M2, C]
    mm1 = _pool2x2(a1, W1)
    p1 = jnp.dot(s1_ref[...], mm1.astype(jnp.bfloat16),
                 preferred_element_type=jnp.float32)               # [M2, C]

    p1pad_ref[...] = jnp.zeros(p1pad_ref.shape, p1pad_ref.dtype)
    p1pad_ref[pl.ds(PAD2, M2), :] = p1.astype(jnp.bfloat16)

    # ---- conv2 + bias + ReLU ------------------------------------  [M2, C] f32
    _conv3x3_same(p1pad_ref, w2_ref, acc2_ref, hs=H2, ws=W2, pad=PAD2)
    a2 = jnp.maximum(acc2_ref[...] + b2_ref[...], 0.0)

    # ---- maxpool 2x2 ---------------------------------------------  [16, C]
    mm2 = _pool2x2(a2, W2)
    p2 = jnp.dot(s2_ref[...], mm2.astype(jnp.bfloat16),
                 preferred_element_type=jnp.float32)               # [H3*W3, C]

    # ---- fully-connected head (per spatial cell, 128-deep matmuls) ----------
    p2b = p2.astype(jnp.bfloat16)
    logits = fcb_ref[...]                                          # [1, C] f32
    for r in range(H3 * W3):
        logits = logits + jnp.dot(p2b[r:r + 1, :], fcw_ref[r],
                                  preferred_element_type=jnp.float32)
    out_ref[...] = logits.reshape(1, 1, C)


# ------------------------------ host wrappers --------------------------------
def _make_select(hs, ws):
    """[ (hs//2)*(ws//2), hs*ws ] bf16 0/1 matrix picking row (2h)*ws + 2w."""
    ho, wo = hs // 2, ws // 2
    out_idx = jnp.arange(ho * wo)
    src = (out_idx // wo) * 2 * ws + (out_idx % wo) * 2
    return (jnp.arange(hs * ws)[None, :] == src[:, None]).astype(jnp.bfloat16)


def _pack_params(params):
    """Zero-pad weights to 128-lane layout; cast MXU operands to bf16."""
    cin = params["conv1_w"].shape[2]
    c1 = params["conv1_w"].shape[3]
    c2 = params["conv2_w"].shape[3]
    ncls = params["fc_b"].shape[0]

    w1 = jnp.zeros((3, 3, C, C), jnp.float32).at[:, :, :cin, :c1].set(params["conv1_w"])
    w2 = jnp.zeros((3, 3, C, C), jnp.float32).at[:, :, :c1, :c2].set(params["conv2_w"])
    fcw = params["fc_w"].reshape(H3, W3, c2, ncls)          # NHWC flatten order
    fcwp = jnp.zeros((H3, W3, C, C), jnp.float32).at[:, :, :c2, :ncls].set(fcw)

    return {
        "w1": w1.reshape(9, C, C).astype(jnp.bfloat16),
        "b1": jnp.zeros((1, C), jnp.float32).at[0, :c1].set(params["conv1_b"]),
        "w2": w2.reshape(9, C, C).astype(jnp.bfloat16),
        "b2": jnp.zeros((1, C), jnp.float32).at[0, :c2].set(params["conv2_b"]),
        "fcw": fcwp.reshape(H3 * W3, C, C).astype(jnp.bfloat16),
        "fcb": jnp.zeros((1, C), jnp.float32).at[0, :ncls].set(params["fc_b"]),
        "s1": _make_select(H1, W1),                          # [64, 256]
        "s2": _make_select(H2, W2),                          # [16, 64]
    }


@jax.jit
def cnn_forward(params, x_nchw):
    """CNN.forward: logits [N, num_classes], one fused Pallas kernel."""
    n, cin, h, w = x_nchw.shape
    assert (h, w) == (H1, W1) and cin <= C
    ncls = params["fc_b"].shape[0]
    p = _pack_params(params)

    x = jnp.transpose(x_nchw, (0, 2, 3, 1)).astype(jnp.float32)     # NCHW -> NHWC
    x = jnp.pad(x, ((0, 0), (0, 0), (0, 0), (0, C - cin)))          # pad channels
    x2d = x.reshape(n * M1, C).astype(jnp.bfloat16)                 # [n*256, 128]

    out = pl.pallas_call(
        _cnn_fused_kernel,
        out_shape=jax.ShapeDtypeStruct((n, 1, C), jnp.float32),
        grid=(n,),
        in_specs=[
            pl.BlockSpec((M1, C), lambda i: (i, 0)),                # per-image slab
            pl.BlockSpec((9, C, C), lambda i: (0, 0, 0)),           # conv1 weights
            pl.BlockSpec((1, C), lambda i: (0, 0)),                 # conv1 bias
            pl.BlockSpec((9, C, C), lambda i: (0, 0, 0)),           # conv2 weights
            pl.BlockSpec((1, C), lambda i: (0, 0)),                 # conv2 bias
            pl.BlockSpec((M2, M1), lambda i: (0, 0)),               # pool1 selection
            pl.BlockSpec((H3 * W3, M2), lambda i: (0, 0)),          # pool2 selection
            pl.BlockSpec((H3 * W3, C, C), lambda i: (0, 0, 0)),     # fc weights
            pl.BlockSpec((1, C), lambda i: (0, 0)),                 # fc bias
        ],
        out_specs=pl.BlockSpec((1, 1, C), lambda i: (i, 0, 0)),
        scratch_shapes=[
            pltpu.VMEM((2 * PAD1 + M1, C), jnp.bfloat16),   # padded conv1 input slab
            pltpu.VMEM((M1, C), jnp.float32),               # conv1 accumulator
            pltpu.VMEM((2 * PAD2 + M2, C), jnp.bfloat16),   # padded conv2 input slab
            pltpu.VMEM((M2, C), jnp.float32),               # conv2 accumulator
        ],
        compiler_params=pltpu.CompilerParams(
            dimension_semantics=("parallel",),              # batch across TCs on v7x
            vmem_limit_bytes=32 * 1024 * 1024,
        ),
    )(x2d, p["w1"], p["b1"], p["w2"], p["b2"], p["s1"], p["s2"],
      p["fcw"], p["fcb"])

    return out[:, 0, :ncls]                                 # drop lane padding


def cnn_predict(params, x_nchw):
    """CNN.predict: (preds, logits)."""
    logits = cnn_forward(params, x_nchw)
    preds = jnp.argmax(logits, axis=-1)
    return preds, logits


def init_params(key, num_classes, in_channels=4):
    k1, k2, k3, k4, k5 = jax.random.split(key, 5)
    c1, c2 = 8, 16
    feat = H3 * W3 * c2
    return {
        "conv1_w": 0.10 * jax.random.normal(k1, (3, 3, in_channels, c1), jnp.float32),
        "conv1_b": 0.01 * jax.random.normal(k4, (c1,), jnp.float32),
        "conv2_w": 0.10 * jax.random.normal(k2, (3, 3, c1, c2), jnp.float32),
        "conv2_b": 0.01 * jax.random.normal(k5, (c2,), jnp.float32),
        "fc_w": 0.05 * jax.random.normal(k3, (feat, num_classes), jnp.float32),
        "fc_b": jnp.zeros((num_classes,), jnp.float32),
    }


def _reference_forward(params, x_nchw):
    """Pure-JAX f32 reference: conv3x3-relu-pool x2 + linear, NHWC flatten."""
    x = jnp.transpose(x_nchw, (0, 2, 3, 1)).astype(jnp.float32)

    def conv_relu(x, w, b):
        y = jax.lax.conv_general_dilated(
            x, w, window_strides=(1, 1), padding="SAME",
            dimension_numbers=("NHWC", "HWIO", "NHWC"),
            precision=jax.lax.Precision.HIGHEST)
        return jnp.maximum(y + b, 0.0)

    def pool(x):
        return jax.lax.reduce_window(x, -jnp.inf, jax.lax.max,
                                     (1, 2, 2, 1), (1, 2, 2, 1), "VALID")

    x = pool(conv_relu(x, params["conv1_w"], params["conv1_b"]))
    x = pool(conv_relu(x, params["conv2_w"], params["conv2_b"]))
    x = x.reshape(x.shape[0], -1)
    return x @ params["fc_w"] + params["fc_b"]


if __name__ == "__main__":
    key = jax.random.PRNGKey(0)
    pkey, xkey = jax.random.split(key)
    num_classes = 10
    params = init_params(pkey, num_classes, in_channels=4)

    # PyTorch-convention NCHW input
    x = jax.random.normal(xkey, (2, 4, 16, 16), jnp.float32)

    preds, logits = cnn_predict(params, x)
    logits = jax.block_until_ready(logits)

    assert logits.shape == (2, num_classes)
    assert logits.dtype == jnp.float32
    assert preds.shape == (2,)

    ref = _reference_forward(params, x)
    assert jnp.allclose(logits, ref, atol=5e-2, rtol=5e-2), (
        "max abs err = %f" % float(jnp.max(jnp.abs(logits - ref))))

    print("KERNEL_OK")
</pallas_src>

<mosaic_0001>
module attributes {stable_mosaic.version = 11 : i64} {
  func.func @_cnn_fused_kernel(%arg0: i32, %arg1: memref<256x128xbf16, #tpu.memory_space<vmem>>, %arg2: memref<9x128x128xbf16, #tpu.memory_space<vmem>>, %arg3: memref<1x128xf32, #tpu.memory_space<vmem>>, %arg4: memref<9x128x128xbf16, #tpu.memory_space<vmem>>, %arg5: memref<1x128xf32, #tpu.memory_space<vmem>>, %arg6: memref<64x256xbf16, #tpu.memory_space<vmem>>, %arg7: memref<16x64xbf16, #tpu.memory_space<vmem>>, %arg8: memref<16x128x128xbf16, #tpu.memory_space<vmem>>, %arg9: memref<1x128xf32, #tpu.memory_space<vmem>>, %arg10: memref<1x1x128xf32, #tpu.memory_space<vmem>>, %arg11: memref<304x128xbf16, #tpu.memory_space<vmem>>, %arg12: memref<256x128xf32, #tpu.memory_space<vmem>>, %arg13: memref<96x128xbf16, #tpu.memory_space<vmem>>, %arg14: memref<64x128xf32, #tpu.memory_space<vmem>>) attributes {dimension_semantics = [#tpu.dimension_semantics<parallel>], iteration_bounds = array<i64: 2>, scalar_prefetch = 0 : i64, scratch_operands = 4 : i64, tpu.core_type = #tpu.core_type<tc>, window_params = [{transform_indices = @transform_0, window_bounds = array<i64: 256, 128>}, {pipeline_mode = #tpu.pipeline_mode<synchronous>, transform_indices = @transform_1, window_bounds = array<i64: 9, 128, 128>}, {pipeline_mode = #tpu.pipeline_mode<synchronous>, transform_indices = @transform_2, window_bounds = array<i64: 1, 128>}, {pipeline_mode = #tpu.pipeline_mode<synchronous>, transform_indices = @transform_3, window_bounds = array<i64: 9, 128, 128>}, {pipeline_mode = #tpu.pipeline_mode<synchronous>, transform_indices = @transform_4, window_bounds = array<i64: 1, 128>}, {pipeline_mode = #tpu.pipeline_mode<synchronous>, transform_indices = @transform_5, window_bounds = array<i64: 64, 256>}, {pipeline_mode = #tpu.pipeline_mode<synchronous>, transform_indices = @transform_6, window_bounds = array<i64: 16, 64>}, {pipeline_mode = #tpu.pipeline_mode<synchronous>, transform_indices = @transform_7, window_bounds = array<i64: 16, 128, 128>}, {pipeline_mode = #tpu.pipeline_mode<synchronous>, transform_indices = @transform_8, window_bounds = array<i64: 1, 128>}, {transform_indices = @transform_9, window_bounds = array<i64: 1, 1, 128>}]} {
    %cst = arith.constant 0.000000e+00 : bf16
    %0 = vector.broadcast %cst : bf16 to vector<304x128xbf16>
    %c0 = arith.constant 0 : index
    %c0_0 = arith.constant 0 : index
    %1 = vector.load %arg11[%c0, %c0_0] : memref<304x128xbf16, #tpu.memory_space<vmem>>, vector<304x128xbf16>
    tpu.vector_store %arg11[%c0, %c0_0], %0 {strides = array<i32>} : memref<304x128xbf16, #tpu.memory_space<vmem>>, vector<304x128xbf16>,
    %c0_1 = arith.constant 0 : index
    %c0_2 = arith.constant 0 : index
    %2 = vector.load %arg1[%c0_1, %c0_2] : memref<256x128xbf16, #tpu.memory_space<vmem>>, vector<256x128xbf16>
    %c24 = arith.constant 24 : index
    %c0_3 = arith.constant 0 : index
    %3 = vector.load %arg11[%c24, %c0_3] : memref<304x128xbf16, #tpu.memory_space<vmem>>, vector<256x128xbf16>
    tpu.vector_store %arg11[%c24, %c0_3], %2 {strides = array<i32>} : memref<304x128xbf16, #tpu.memory_space<vmem>>, vector<256x128xbf16>,
    %4 = tpu.iota {dimensions = array<i32: 0>} : vector<256x1xi32>
    %c16_i32 = arith.constant 16 : i32
    %c0_i32 = arith.constant 0 : i32
    %5 = arith.cmpi eq, %c16_i32, %c0_i32 : i32
    %c1_i32 = arith.constant 1 : i32
    %6 = arith.select %5, %c1_i32, %c16_i32 : i32
    %7 = vector.broadcast %6 : i32 to vector<256x1xi32>
    %8 = arith.remsi %4, %7 : vector<256x1xi32>
    %c0_i32_4 = arith.constant 0 : i32
    %9 = vector.broadcast %c0_i32_4 : i32 to vector<256x1xi32>
    %10 = arith.cmpi ne, %8, %9 : vector<256x1xi32>
    %c0_i32_5 = arith.constant 0 : i32
    %11 = vector.broadcast %c0_i32_5 : i32 to vector<256x1xi32>
    %12 = arith.cmpi slt, %8, %11 : vector<256x1xi32>
    %c0_i32_6 = arith.constant 0 : i32
    %13 = arith.cmpi slt, %6, %c0_i32_6 : i32
    %14 = vector.broadcast %13 : i1 to vector<256x1xi1>
    %15 = vector.broadcast %14 : vector<256x1xi1> to vector<256x1xi1>
    %16 = arith.xori %12, %15 : vector<256x1xi1>
    %17 = arith.andi %16, %10 : vector<256x1xi1>
    %18 = vector.broadcast %6 : i32 to vector<256x1xi32>
    %19 = arith.addi %8, %18 : vector<256x1xi32>
    %20 = arith.select %17, %19, %8 : vector<256x1xi1>, vector<256x1xi32>
    %cst_7 = arith.constant 0.000000e+00 : f32
    %21 = vector.broadcast %cst_7 : f32 to vector<256x128xf32>
    %c0_8 = arith.constant 0 : index
    %c0_9 = arith.constant 0 : index
    %22 = vector.load %arg12[%c0_8, %c0_9] : memref<256x128xf32, #tpu.memory_space<vmem>>, vector<256x128xf32>
    tpu.vector_store %arg12[%c0_8, %c0_9], %21 {strides = array<i32>} : memref<256x128xf32, #tpu.memory_space<vmem>>, vector<256x128xf32>,
    %c7 = arith.constant 7 : index
    %c0_10 = arith.constant 0 : index
    %23 = vector.load %arg11[%c7, %c0_10] : memref<304x128xbf16, #tpu.memory_space<vmem>>, vector<256x128xbf16>
    %c-1_i32 = arith.constant -1 : i32
    %24 = vector.broadcast %c-1_i32 : i32 to vector<256x1xi32>
    %25 = arith.addi %20, %24 : vector<256x1xi32>
    %c0_i32_11 = arith.constant 0 : i32
    %26 = vector.broadcast %c0_i32_11 : i32 to vector<256x1xi32>
    %27 = arith.cmpi sge, %25, %26 : vector<256x1xi32>
    %c-1_i32_12 = arith.constant -1 : i32
    %28 = vector.broadcast %c-1_i32_12 : i32 to vector<256x1xi32>
    %29 = arith.addi %20, %28 : vector<256x1xi32>
    %c16_i32_13 = arith.constant 16 : i32
    %30 = vector.broadcast %c16_i32_13 : i32 to vector<256x1xi32>
    %31 = arith.cmpi slt, %29, %30 : vector<256x1xi32>
    %32 = arith.andi %27, %31 : vector<256x1xi1>
    %cst_14 = arith.constant 0.000000e+00 : bf16
    %33 = vector.broadcast %cst_14 : bf16 to vector<256x128xbf16>
    %34 = vector.shape_cast %32 : vector<256x1xi1> to vector<256x1xi1>
    %35 = vector.broadcast %34 : vector<256x1xi1> to vector<256x128xi1>
    %36 = arith.select %35, %23, %33 : vector<256x128xi1>, vector<256x128xbf16>
    %c0_15 = arith.constant 0 : index
    %c0_16 = arith.constant 0 : index
    %37 = vector.load %arg12[%c0_15, %c0_16] : memref<256x128xf32, #tpu.memory_space<vmem>>, vector<256x128xf32>
    %c0_17 = arith.constant 0 : index
    %c0_18 = arith.constant 0 : index
    %c0_19 = arith.constant 0 : index
    %38 = vector.load %arg2[%c0_17, %c0_18, %c0_19] : memref<9x128x128xbf16, #tpu.memory_space<vmem>>, vector<1x128x128xbf16>
    %39 = vector.shape_cast %38 : vector<1x128x128xbf16> to vector<128x128xbf16>
    %cst_20 = arith.constant dense<0.000000e+00> : vector<256x128xf32>
    %40 = tpu.matmul %36, %39, %cst_20 {dimension_numbers = #tpu.dot_dimension_numbers<[1], [0], [0], [1], [0, 0, 1, 1], [], []>} : vector<256x128xbf16>, vector<128x128xbf16>, vector<256x128xf32> -> vector<256x128xf32>
    %41 = arith.addf %37, %40 : vector<256x128xf32>
    %c0_21 = arith.constant 0 : index
    %c0_22 = arith.constant 0 : index
    %42 = vector.load %arg12[%c0_21, %c0_22] : memref<256x128xf32, #tpu.memory_space<vmem>>, vector<256x128xf32>
    tpu.vector_store %arg12[%c0_21, %c0_22], %41 {strides = array<i32>} : memref<256x128xf32, #tpu.memory_space<vmem>>, vector<256x128xf32>,
    %c8 = arith.constant 8 : index
    %c0_23 = arith.constant 0 : index
    %43 = vector.load %arg11[%c8, %c0_23] : memref<304x128xbf16, #tpu.memory_space<vmem>>, vector<256x128xbf16>
    %c0_24 = arith.constant 0 : index
    %c0_25 = arith.constant 0 : index
    %44 = vector.load %arg12[%c0_24, %c0_25] : memref<256x128xf32, #tpu.memory_space<vmem>>, vector<256x128xf32>
    %c1 = arith.constant 1 : index
    %c0_26 = arith.constant 0 : index
    %c0_27 = arith.constant 0 : index
    %45 = vector.load %arg2[%c1, %c0_26, %c0_27] : memref<9x128x128xbf16, #tpu.memory_space<vmem>>, vector<1x128x128xbf16>
    %46 = vector.shape_cast %45 : vector<1x128x128xbf16> to vector<128x128xbf16>
    %cst_28 = arith.constant dense<0.000000e+00> : vector<256x128xf32>
    %47 = tpu.matmul %43, %46, %cst_28 {dimension_numbers = #tpu.dot_dimension_numbers<[1], [0], [0], [1], [0, 0, 1, 1], [], []>} : vector<256x128xbf16>, vector<128x128xbf16>, vector<256x128xf32> -> vector<256x128xf32>
    %48 = arith.addf %44, %47 : vector<256x128xf32>
    %c0_29 = arith.constant 0 : index
    %c0_30 = arith.constant 0 : index
    %49 = vector.load %arg12[%c0_29, %c0_30] : memref<256x128xf32, #tpu.memory_space<vmem>>, vector<256x128xf32>
    tpu.vector_store %arg12[%c0_29, %c0_30], %48 {strides = array<i32>} : memref<256x128xf32, #tpu.memory_space<vmem>>, vector<256x128xf32>,
    %c9 = arith.constant 9 : index
    %c0_31 = arith.constant 0 : index
    %50 = vector.load %arg11[%c9, %c0_31] : memref<304x128xbf16, #tpu.memory_space<vmem>>, vector<256x128xbf16>
    %c1_i32_32 = arith.constant 1 : i32
    %51 = vector.broadcast %c1_i32_32 : i32 to vector<256x1xi32>
    %52 = arith.addi %20, %51 : vector<256x1xi32>
    %c0_i32_33 = arith.constant 0 : i32
    %53 = vector.broadcast %c0_i32_33 : i32 to vector<256x1xi32>
    %54 = arith.cmpi sge, %52, %53 : vector<256x1xi32>
    %c1_i32_34 = arith.constant 1 : i32
    %55 = vector.broadcast %c1_i32_34 : i32 to vector<256x1xi32>
    %56 = arith.addi %20, %55 : vector<256x1xi32>
    %c16_i32_35 = arith.constant 16 : i32
    %57 = vector.broadcast %c16_i32_35 : i32 to vector<256x1xi32>
    %58 = arith.cmpi slt, %56, %57 : vector<256x1xi32>
    %59 = arith.andi %54, %58 : vector<256x1xi1>
    %cst_36 = arith.constant 0.000000e+00 : bf16
    %60 = vector.broadcast %cst_36 : bf16 to vector<256x128xbf16>
    %61 = vector.shape_cast %59 : vector<256x1xi1> to vector<256x1xi1>
    %62 = vector.broadcast %61 : vector<256x1xi1> to vector<256x128xi1>
    %63 = arith.select %62, %50, %60 : vector<256x128xi1>, vector<256x128xbf16>
    %c0_37 = arith.constant 0 : index
    %c0_38 = arith.constant 0 : index
    %64 = vector.load %arg12[%c0_37, %c0_38] : memref<256x128xf32, #tpu.memory_space<vmem>>, vector<256x128xf32>
    %c2 = arith.constant 2 : index
    %c0_39 = arith.constant 0 : index
    %c0_40 = arith.constant 0 : index
    %65 = vector.load %arg2[%c2, %c0_39, %c0_40] : memref<9x128x128xbf16, #tpu.memory_space<vmem>>, vector<1x128x128xbf16>
    %66 = vector.shape_cast %65 : vector<1x128x128xbf16> to vector<128x128xbf16>
    %cst_41 = arith.constant dense<0.000000e+00> : vector<256x128xf32>
    %67 = tpu.matmul %63, %66, %cst_41 {dimension_numbers = #tpu.dot_dimension_numbers<[1], [0], [0], [1], [0, 0, 1, 1], [], []>} : vector<256x128xbf16>, vector<128x128xbf16>, vector<256x128xf32> -> vector<256x128xf32>
    %68 = arith.addf %64, %67 : vector<256x128xf32>
    %c0_42 = arith.constant 0 : index
    %c0_43 = arith.constant 0 : index
    %69 = vector.load %arg12[%c0_42, %c0_43] : memref<256x128xf32, #tpu.memory_space<vmem>>, vector<256x128xf32>
    tpu.vector_store %arg12[%c0_42, %c0_43], %68 {strides = array<i32>} : memref<256x128xf32, #tpu.memory_space<vmem>>, vector<256x128xf32>,
    %c23 = arith.constant 23 : index
    %c0_44 = arith.constant 0 : index
    %70 = vector.load %arg11[%c23, %c0_44] : memref<304x128xbf16, #tpu.memory_space<vmem>>, vector<256x128xbf16>
    %c-1_i32_45 = arith.constant -1 : i32
    %71 = vector.broadcast %c-1_i32_45 : i32 to vector<256x1xi32>
    %72 = arith.addi %20, %71 : vector<256x1xi32>
    %c0_i32_46 = arith.constant 0 : i32
    %73 = vector.broadcast %c0_i32_46 : i32 to vector<256x1xi32>
    %74 = arith.cmpi sge, %72, %73 : vector<256x1xi32>
    %c-1_i32_47 = arith.constant -1 : i32
    %75 = vector.broadcast %c-1_i32_47 : i32 to vector<256x1xi32>
    %76 = arith.addi %20, %75 : vector<256x1xi32>
    %c16_i32_48 = arith.constant 16 : i32
    %77 = vector.broadcast %c16_i32_48 : i32 to vector<256x1xi32>
    %78 = arith.cmpi slt, %76, %77 : vector<256x1xi32>
    %79 = arith.andi %74, %78 : vector<256x1xi1>
    %cst_49 = arith.constant 0.000000e+00 : bf16
    %80 = vector.broadcast %cst_49 : bf16 to vector<256x128xbf16>
    %81 = vector.shape_cast %79 : vector<256x1xi1> to vector<256x1xi1>
    %82 = vector.broadcast %81 : vector<256x1xi1> to vector<256x128xi1>
    %83 = arith.select %82, %70, %80 : vector<256x128xi1>, vector<256x128xbf16>
    %c0_50 = arith.constant 0 : index
    %c0_51 = arith.constant 0 : index
    %84 = vector.load %arg12[%c0_50, %c0_51] : memref<256x128xf32, #tpu.memory_space<vmem>>, vector<256x128xf32>
    %c3 = arith.constant 3 : index
    %c0_52 = arith.constant 0 : index
    %c0_53 = arith.constant 0 : index
    %85 = vector.load %arg2[%c3, %c0_52, %c0_53] : memref<9x128x128xbf16, #tpu.memory_space<vmem>>, vector<1x128x128xbf16>
    %86 = vector.shape_cast %85 : vector<1x128x128xbf16> to vector<128x128xbf16>
    %cst_54 = arith.constant dense<0.000000e+00> : vector<256x128xf32>
    %87 = tpu.matmul %83, %86, %cst_54 {dimension_numbers = #tpu.dot_dimension_numbers<[1], [0], [0], [1], [0, 0, 1, 1], [], []>} : vector<256x128xbf16>, vector<128x128xbf16>, vector<256x128xf32> -> vector<256x128xf32>
    %88 = arith.addf %84, %87 : vector<256x128xf32>
    %c0_55 = arith.constant 0 : index
    %c0_56 = arith.constant 0 : index
    %89 = vector.load %arg12[%c0_55, %c0_56] : memref<256x128xf32, #tpu.memory_space<vmem>>, vector<256x128xf32>
    tpu.vector_store %arg12[%c0_55, %c0_56], %88 {strides = array<i32>} : memref<256x128xf32, #tpu.memory_space<vmem>>, vector<256x128xf32>,
    %c24_57 = arith.constant 24 : index
    %c0_58 = arith.constant 0 : index
    %90 = vector.load %arg11[%c24_57, %c0_58] : memref<304x128xbf16, #tpu.memory_space<vmem>>, vector<256x128xbf16>
    %c0_59 = arith.constant 0 : index
    %c0_60 = arith.constant 0 : index
    %91 = vector.load %arg12[%c0_59, %c0_60] : memref<256x128xf32, #tpu.memory_space<vmem>>, vector<256x128xf32>
    %c4 = arith.constant 4 : index
    %c0_61 = arith.constant 0 : index
    %c0_62 = arith.constant 0 : index
    %92 = vector.load %arg2[%c4, %c0_61, %c0_62] : memref<9x128x128xbf16, #tpu.memory_space<vmem>>, vector<1x128x128xbf16>
    %93 = vector.shape_cast %92 : vector<1x128x128xbf16> to vector<128x128xbf16>
    %cst_63 = arith.constant dense<0.000000e+00> : vector<256x128xf32>
    %94 = tpu.matmul %90, %93, %cst_63 {dimension_numbers = #tpu.dot_dimension_numbers<[1], [0], [0], [1], [0, 0, 1, 1], [], []>} : vector<256x128xbf16>, vector<128x128xbf16>, vector<256x128xf32> -> vector<256x128xf32>
    %95 = arith.addf %91, %94 : vector<256x128xf32>
    %c0_64 = arith.constant 0 : index
    %c0_65 = arith.constant 0 : index
    %96 = vector.load %arg12[%c0_64, %c0_65] : memref<256x128xf32, #tpu.memory_space<vmem>>, vector<256x128xf32>
    tpu.vector_store %arg12[%c0_64, %c0_65], %95 {strides = array<i32>} : memref<256x128xf32, #tpu.memory_space<vmem>>, vector<256x128xf32>,
    %c25 = arith.constant 25 : index
    %c0_66 = arith.constant 0 : index
    %97 = vector.load %arg11[%c25, %c0_66] : memref<304x128xbf16, #tpu.memory_space<vmem>>, vector<256x128xbf16>
    %c1_i32_67 = arith.constant 1 : i32
    %98 = vector.broadcast %c1_i32_67 : i32 to vector<256x1xi32>
    %99 = arith.addi %20, %98 : vector<256x1xi32>
    %c0_i32_68 = arith.constant 0 : i32
    %100 = vector.broadcast %c0_i32_68 : i32 to vector<256x1xi32>
    %101 = arith.cmpi sge, %99, %100 : vector<256x1xi32>
    %c1_i32_69 = arith.constant 1 : i32
    %102 = vector.broadcast %c1_i32_69 : i32 to vector<256x1xi32>
    %103 = arith.addi %20, %102 : vector<256x1xi32>
    %c16_i32_70 = arith.constant 16 : i32
    %104 = vector.broadcast %c16_i32_70 : i32 to vector<256x1xi32>
    %105 = arith.cmpi slt, %103, %104 : vector<256x1xi32>
    %106 = arith.andi %101, %105 : vector<256x1xi1>
    %cst_71 = arith.constant 0.000000e+00 : bf16
    %107 = vector.broadcast %cst_71 : bf16 to vector<256x128xbf16>
    %108 = vector.shape_cast %106 : vector<256x1xi1> to vector<256x1xi1>
    %109 = vector.broadcast %108 : vector<256x1xi1> to vector<256x128xi1>
    %110 = arith.select %109, %97, %107 : vector<256x128xi1>, vector<256x128xbf16>
    %c0_72 = arith.constant 0 : index
    %c0_73 = arith.constant 0 : index
    %111 = vector.load %arg12[%c0_72, %c0_73] : memref<256x128xf32, #tpu.memory_space<vmem>>, vector<256x128xf32>
    %c5 = arith.constant 5 : index
    %c0_74 = arith.constant 0 : index
    %c0_75 = arith.constant 0 : index
    %112 = vector.load %arg2[%c5, %c0_74, %c0_75] : memref<9x128x128xbf16, #tpu.memory_space<vmem>>, vector<1x128x128xbf16>
    %113 = vector.shape_cast %112 : vector<1x128x128xbf16> to vector<128x128xbf16>
    %cst_76 = arith.constant dense<0.000000e+00> : vector<256x128xf32>
    %114 = tpu.matmul %110, %113, %cst_76 {dimension_numbers = #tpu.dot_dimension_numbers<[1], [0], [0], [1], [0, 0, 1, 1], [], []>} : vector<256x128xbf16>, vector<128x128xbf16>, vector<256x128xf32> -> vector<256x128xf32>
    %115 = arith.addf %111, %114 : vector<256x128xf32>
    %c0_77 = arith.constant 0 : index
    %c0_78 = arith.constant 0 : index
    %116 = vector.load %arg12[%c0_77, %c0_78] : memref<256x128xf32, #tpu.memory_space<vmem>>, vector<256x128xf32>
    tpu.vector_store %arg12[%c0_77, %c0_78], %115 {strides = array<i32>} : memref<256x128xf32, #tpu.memory_space<vmem>>, vector<256x128xf32>,
    %c39 = arith.constant 39 : index
    %c0_79 = arith.constant 0 : index
    %117 = vector.load %arg11[%c39, %c0_79] : memref<304x128xbf16, #tpu.memory_space<vmem>>, vector<256x128xbf16>
    %c-1_i32_80 = arith.constant -1 : i32
    %118 = vector.broadcast %c-1_i32_80 : i32 to vector<256x1xi32>
    %119 = arith.addi %20, %118 : vector<256x1xi32>
    %c0_i32_81 = arith.constant 0 : i32
    %120 = vector.broadcast %c0_i32_81 : i32 to vector<256x1xi32>
    %121 = arith.cmpi sge, %119, %120 : vector<256x1xi32>
    %c-1_i32_82 = arith.constant -1 : i32
    %122 = vector.broadcast %c-1_i32_82 : i32 to vector<256x1xi32>
    %123 = arith.addi %20, %122 : vector<256x1xi32>
    %c16_i32_83 = arith.constant 16 : i32
    %124 = vector.broadcast %c16_i32_83 : i32 to vector<256x1xi32>
    %125 = arith.cmpi slt, %123, %124 : vector<256x1xi32>
    %126 = arith.andi %121, %125 : vector<256x1xi1>
    %cst_84 = arith.constant 0.000000e+00 : bf16
    %127 = vector.broadcast %cst_84 : bf16 to vector<256x128xbf16>
    %128 = vector.shape_cast %126 : vector<256x1xi1> to vector<256x1xi1>
    %129 = vector.broadcast %128 : vector<256x1xi1> to vector<256x128xi1>
    %130 = arith.select %129, %117, %127 : vector<256x128xi1>, vector<256x128xbf16>
    %c0_85 = arith.constant 0 : index
    %c0_86 = arith.constant 0 : index
    %131 = vector.load %arg12[%c0_85, %c0_86] : memref<256x128xf32, #tpu.memory_space<vmem>>, vector<256x128xf32>
    %c6 = arith.constant 6 : index
    %c0_87 = arith.constant 0 : index
    %c0_88 = arith.constant 0 : index
    %132 = vector.load %arg2[%c6, %c0_87, %c0_88] : memref<9x128x128xbf16, #tpu.memory_space<vmem>>, vector<1x128x128xbf16>
    %133 = vector.shape_cast %132 : vector<1x128x128xbf16> to vector<128x128xbf16>
    %cst_89 = arith.constant dense<0.000000e+00> : vector<256x128xf32>
    %134 = tpu.matmul %130, %133, %cst_89 {dimension_numbers = #tpu.dot_dimension_numbers<[1], [0], [0], [1], [0, 0, 1, 1], [], []>} : vector<256x128xbf16>, vector<128x128xbf16>, vector<256x128xf32> -> vector<256x128xf32>
    %135 = arith.addf %131, %134 : vector<256x128xf32>
    %c0_90 = arith.constant 0 : index
    %c0_91 = arith.constant 0 : index
    %136 = vector.load %arg12[%c0_90, %c0_91] : memref<256x128xf32, #tpu.memory_space<vmem>>, vector<256x128xf32>
    tpu.vector_store %arg12[%c0_90, %c0_91], %135 {strides = array<i32>} : memref<256x128xf32, #tpu.memory_space<vmem>>, vector<256x128xf32>,
    %c40 = arith.constant 40 : index
    %c0_92 = arith.constant 0 : index
    %137 = vector.load %arg11[%c40, %c0_92] : memref<304x128xbf16, #tpu.memory_space<vmem>>, vector<256x128xbf16>
    %c0_93 = arith.constant 0 : index
    %c0_94 = arith.constant 0 : index
    %138 = vector.load %arg12[%c0_93, %c0_94] : memref<256x128xf32, #tpu.memory_space<vmem>>, vector<256x128xf32>
    %c7_95 = arith.constant 7 : index
    %c0_96 = arith.constant 0 : index
    %c0_97 = arith.constant 0 : index
    %139 = vector.load %arg2[%c7_95, %c0_96, %c0_97] : memref<9x128x128xbf16, #tpu.memory_space<vmem>>, vector<1x128x128xbf16>
    %140 = vector.shape_cast %139 : vector<1x128x128xbf16> to vector<128x128xbf16>
    %cst_98 = arith.constant dense<0.000000e+00> : vector<256x128xf32>
    %141 = tpu.matmul %137, %140, %cst_98 {dimension_numbers = #tpu.dot_dimension_numbers<[1], [0], [0], [1], [0, 0, 1, 1], [], []>} : vector<256x128xbf16>, vector<128x128xbf16>, vector<256x128xf32> -> vector<256x128xf32>
    %142 = arith.addf %138, %141 : vector<256x128xf32>
    %c0_99 = arith.constant 0 : index
    %c0_100 = arith.constant 0 : index
    %143 = vector.load %arg12[%c0_99, %c0_100] : memref<256x128xf32, #tpu.memory_space<vmem>>, vector<256x128xf32>
    tpu.vector_store %arg12[%c0_99, %c0_100], %142 {strides = array<i32>} : memref<256x128xf32, #tpu.memory_space<vmem>>, vector<256x128xf32>,
    %c41 = arith.constant 41 : index
    %c0_101 = arith.constant 0 : index
    %144 = vector.load %arg11[%c41, %c0_101] : memref<304x128xbf16, #tpu.memory_space<vmem>>, vector<256x128xbf16>
    %c1_i32_102 = arith.constant 1 : i32
    %145 = vector.broadcast %c1_i32_102 : i32 to vector<256x1xi32>
    %146 = arith.addi %20, %145 : vector<256x1xi32>
    %c0_i32_103 = arith.constant 0 : i32
    %147 = vector.broadcast %c0_i32_103 : i32 to vector<256x1xi32>
    %148 = arith.cmpi sge, %146, %147 : vector<256x1xi32>
    %c1_i32_104 = arith.constant 1 : i32
    %149 = vector.broadcast %c1_i32_104 : i32 to vector<256x1xi32>
    %150 = arith.addi %20, %149 : vector<256x1xi32>
    %c16_i32_105 = arith.constant 16 : i32
    %151 = vector.broadcast %c16_i32_105 : i32 to vector<256x1xi32>
    %152 = arith.cmpi slt, %150, %151 : vector<256x1xi32>
    %153 = arith.andi %148, %152 : vector<256x1xi1>
    %cst_106 = arith.constant 0.000000e+00 : bf16
    %154 = vector.broadcast %cst_106 : bf16 to vector<256x128xbf16>
    %155 = vector.shape_cast %153 : vector<256x1xi1> to vector<256x1xi1>
    %156 = vector.broadcast %155 : vector<256x1xi1> to vector<256x128xi1>
    %157 = arith.select %156, %144, %154 : vector<256x128xi1>, vector<256x128xbf16>
    %c0_107 = arith.constant 0 : index
    %c0_108 = arith.constant 0 : index
    %158 = vector.load %arg12[%c0_107, %c0_108] : memref<256x128xf32, #tpu.memory_space<vmem>>, vector<256x128xf32>
    %c8_109 = arith.constant 8 : index
    %c0_110 = arith.constant 0 : index
    %c0_111 = arith.constant 0 : index
    %159 = vector.load %arg2[%c8_109, %c0_110, %c0_111] : memref<9x128x128xbf16, #tpu.memory_space<vmem>>, vector<1x128x128xbf16>
    %160 = vector.shape_cast %159 : vector<1x128x128xbf16> to vector<128x128xbf16>
    %cst_112 = arith.constant dense<0.000000e+00> : vector<256x128xf32>
    %161 = tpu.matmul %157, %160, %cst_112 {dimension_numbers = #tpu.dot_dimension_numbers<[1], [0], [0], [1], [0, 0, 1, 1], [], []>} : vector<256x128xbf16>, vector<128x128xbf16>, vector<256x128xf32> -> vector<256x128xf32>
    %162 = arith.addf %158, %161 : vector<256x128xf32>
    %c0_113 = arith.constant 0 : index
    %c0_114 = arith.constant 0 : index
    %163 = vector.load %arg12[%c0_113, %c0_114] : memref<256x128xf32, #tpu.memory_space<vmem>>, vector<256x128xf32>
    tpu.vector_store %arg12[%c0_113, %c0_114], %162 {strides = array<i32>} : memref<256x128xf32, #tpu.memory_space<vmem>>, vector<256x128xf32>,
    %c0_115 = arith.constant 0 : index
    %c0_116 = arith.constant 0 : index
    %164 = vector.load %arg12[%c0_115, %c0_116] : memref<256x128xf32, #tpu.memory_space<vmem>>, vector<256x128xf32>
    %c0_117 = arith.constant 0 : index
    %c0_118 = arith.constant 0 : index
    %165 = vector.load %arg3[%c0_117, %c0_118] : memref<1x128xf32, #tpu.memory_space<vmem>>, vector<1x128xf32>
    %166 = vector.broadcast %165 : vector<1x128xf32> to vector<256x128xf32>
    %167 = arith.addf %164, %166 : vector<256x128xf32>
    %cst_119 = arith.constant 0.000000e+00 : f32
    %168 = vector.broadcast %cst_119 : f32 to vector<256x128xf32>
    %169 = arith.maximumf %167, %168 : vector<256x128xf32>
    %170 = vector.extract_strided_slice %169 {offsets = [1, 0], sizes = [255, 128], strides = [1, 1]} : vector<256x128xf32> to vector<255x128xf32>
    %171 = vector.extract_strided_slice %169 {offsets = [0, 0], sizes = [1, 128], strides = [1, 1]} : vector<256x128xf32> to vector<1x128xf32>
    %172 = tpu.concatenate %170, %171 in 0 : vector<255x128xf32>, vector<1x128xf32> -> vector<256x128xf32>
    %173 = arith.maximumf %169, %172 : vector<256x128xf32>
    %174 = vector.extract_strided_slice %173 {offsets = [16, 0], sizes = [240, 128], strides = [1, 1]} : vector<256x128xf32> to vector<240x128xf32>
    %175 = vector.extract_strided_slice %173 {offsets = [0, 0], sizes = [16, 128], strides = [1, 1]} : vector<256x128xf32> to vector<16x128xf32>
    %176 = tpu.concatenate %174, %175 in 0 : vector<240x128xf32>, vector<16x128xf32> -> vector<256x128xf32>
    %177 = arith.maximumf %173, %176 : vector<256x128xf32>
    %c0_120 = arith.constant 0 : index
    %c0_121 = arith.constant 0 : index
    %178 = vector.load %arg6[%c0_120, %c0_121] : memref<64x256xbf16, #tpu.memory_space<vmem>>, vector<64x256xbf16>
    %179 = arith.truncf %177 : vector<256x128xf32> to vector<256x128xbf16>
    %cst_122 = arith.constant dense<0.000000e+00> : vector<64x128xf32>
    %180 = tpu.matmul %178, %179, %cst_122 {dimension_numbers = #tpu.dot_dimension_numbers<[1], [0], [0], [1], [0, 0, 1, 1], [], []>} : vector<64x256xbf16>, vector<256x128xbf16>, vector<64x128xf32> -> vector<64x128xf32>
    %cst_123 = arith.constant 0.000000e+00 : bf16
    %181 = vector.broadcast %cst_123 : bf16 to vector<96x128xbf16>
    %c0_124 = arith.constant 0 : index
    %c0_125 = arith.constant 0 : index
    %182 = vector.load %arg13[%c0_124, %c0_125] : memref<96x128xbf16, #tpu.memory_space<vmem>>, vector<96x128xbf16>
    tpu.vector_store %arg13[%c0_124, %c0_125], %181 {strides = array<i32>} : memref<96x128xbf16, #tpu.memory_space<vmem>>, vector<96x128xbf16>,
    %183 = arith.truncf %180 : vector<64x128xf32> to vector<64x128xbf16>
    %c16 = arith.constant 16 : index
    %c0_126 = arith.constant 0 : index
    %184 = vector.load %arg13[%c16, %c0_126] : memref<96x128xbf16, #tpu.memory_space<vmem>>, vector<64x128xbf16>
    tpu.vector_store %arg13[%c16, %c0_126], %183 {strides = array<i32>} : memref<96x128xbf16, #tpu.memory_space<vmem>>, vector<64x128xbf16>,
    %185 = tpu.iota {dimensions = array<i32: 0>} : vector<64x1xi32>
    %c8_i32 = arith.constant 8 : i32
    %c0_i32_127 = arith.constant 0 : i32
    %186 = arith.cmpi eq, %c8_i32, %c0_i32_127 : i32
    %c1_i32_128 = arith.constant 1 : i32
    %187 = arith.select %186, %c1_i32_128, %c8_i32 : i32
    %188 = vector.broadcast %187 : i32 to vector<64x1xi32>
    %189 = arith.remsi %185, %188 : vector<64x1xi32>
    %c0_i32_129 = arith.constant 0 : i32
    %190 = vector.broadcast %c0_i32_129 : i32 to vector<64x1xi32>
    %191 = arith.cmpi ne, %189, %190 : vector<64x1xi32>
    %c0_i32_130 = arith.constant 0 : i32
    %192 = vector.broadcast %c0_i32_130 : i32 to vector<64x1xi32>
    %193 = arith.cmpi slt, %189, %192 : vector<64x1xi32>
    %c0_i32_131 = arith.constant 0 : i32
    %194 = arith.cmpi slt, %187, %c0_i32_131 : i32
    %195 = vector.broadcast %194 : i1 to vector<64x1xi1>
    %196 = vector.broadcast %195 : vector<64x1xi1> to vector<64x1xi1>
    %197 = arith.xori %193, %196 : vector<64x1xi1>
    %198 = arith.andi %197, %191 : vector<64x1xi1>
    %199 = vector.broadcast %187 : i32 to vector<64x1xi32>
    %200 = arith.addi %189, %199 : vector<64x1xi32>
    %201 = arith.select %198, %200, %189 : vector<64x1xi1>, vector<64x1xi32>
    %cst_132 = arith.constant 0.000000e+00 : f32
    %202 = vector.broadcast %cst_132 : f32 to vector<64x128xf32>
    %c0_133 = arith.constant 0 : index
    %c0_134 = arith.constant 0 : index
    %203 = vector.load %arg14[%c0_133, %c0_134] : memref<64x128xf32, #tpu.memory_space<vmem>>, vector<64x128xf32>
    tpu.vector_store %arg14[%c0_133, %c0_134], %202 {strides = array<i32>} : memref<64x128xf32, #tpu.memory_space<vmem>>, vector<64x128xf32>,
    %c7_135 = arith.constant 7 : index
    %c0_136 = arith.constant 0 : index
    %204 = vector.load %arg13[%c7_135, %c0_136] : memref<96x128xbf16, #tpu.memory_space<vmem>>, vector<64x128xbf16>
    %c-1_i32_137 = arith.constant -1 : i32
    %205 = vector.broadcast %c-1_i32_137 : i32 to vector<64x1xi32>
    %206 = arith.addi %201, %205 : vector<64x1xi32>
    %c0_i32_138 = arith.constant 0 : i32
    %207 = vector.broadcast %c0_i32_138 : i32 to vector<64x1xi32>
    %208 = arith.cmpi sge, %206, %207 : vector<64x1xi32>
    %c-1_i32_139 = arith.constant -1 : i32
    %209 = vector.broadcast %c-1_i32_139 : i32 to vector<64x1xi32>
    %210 = arith.addi %201, %209 : vector<64x1xi32>
    %c8_i32_140 = arith.constant 8 : i32
    %211 = vector.broadcast %c8_i32_140 : i32 to vector<64x1xi32>
    %212 = arith.cmpi slt, %210, %211 : vector<64x1xi32>
    %213 = arith.andi %208, %212 : vector<64x1xi1>
    %cst_141 = arith.constant 0.000000e+00 : bf16
    %214 = vector.broadcast %cst_141 : bf16 to vector<64x128xbf16>
    %215 = vector.shape_cast %213 : vector<64x1xi1> to vector<64x1xi1>
    %216 = vector.broadcast %215 : vector<64x1xi1> to vector<64x128xi1>
    %217 = arith.select %216, %204, %214 : vector<64x128xi1>, vector<64x128xbf16>
    %c0_142 = arith.constant 0 : index
    %c0_143 = arith.constant 0 : index
    %218 = vector.load %arg14[%c0_142, %c0_143] : memref<64x128xf32, #tpu.memory_space<vmem>>, vector<64x128xf32>
    %c0_144 = arith.constant 0 : index
    %c0_145 = arith.constant 0 : index
    %c0_146 = arith.constant 0 : index
    %219 = vector.load %arg4[%c0_144, %c0_145, %c0_146] : memref<9x128x128xbf16, #tpu.memory_space<vmem>>, vector<1x128x128xbf16>
    %220 = vector.shape_cast %219 : vector<1x128x128xbf16> to vector<128x128xbf16>
    %cst_147 = arith.constant dense<0.000000e+00> : vector<64x128xf32>
    %221 = tpu.matmul %217, %220, %cst_147 {dimension_numbers = #tpu.dot_dimension_numbers<[1], [0], [0], [1], [0, 0, 1, 1], [], []>} : vector<64x128xbf16>, vector<128x128xbf16>, vector<64x128xf32> -> vector<64x128xf32>
    %222 = arith.addf %218, %221 : vector<64x128xf32>
    %c0_148 = arith.constant 0 : index
    %c0_149 = arith.constant 0 : index
    %223 = vector.load %arg14[%c0_148, %c0_149] : memref<64x128xf32, #tpu.memory_space<vmem>>, vector<64x128xf32>
    tpu.vector_store %arg14[%c0_148, %c0_149], %222 {strides = array<i32>} : memref<64x128xf32, #tpu.memory_space<vmem>>, vector<64x128xf32>,
    %c8_150 = arith.constant 8 : index
    %c0_151 = arith.constant 0 : index
    %224 = vector.load %arg13[%c8_150, %c0_151] : memref<96x128xbf16, #tpu.memory_space<vmem>>, vector<64x128xbf16>
    %c0_152 = arith.constant 0 : index
    %c0_153 = arith.constant 0 : index
    %225 = vector.load %arg14[%c0_152, %c0_153] : memref<64x128xf32, #tpu.memory_space<vmem>>, vector<64x128xf32>
    %c1_154 = arith.constant 1 : index
    %c0_155 = arith.constant 0 : index
    %c0_156 = arith.constant 0 : index
    %226 = vector.load %arg4[%c1_154, %c0_155, %c0_156] : memref<9x128x128xbf16, #tpu.memory_space<vmem>>, vector<1x128x128xbf16>
    %227 = vector.shape_cast %226 : vector<1x128x128xbf16> to vector<128x128xbf16>
    %cst_157 = arith.constant dense<0.000000e+00> : vector<64x128xf32>
    %228 = tpu.matmul %224, %227, %cst_157 {dimension_numbers = #tpu.dot_dimension_numbers<[1], [0], [0], [1], [0, 0, 1, 1], [], []>} : vector<64x128xbf16>, vector<128x128xbf16>, vector<64x128xf32> -> vector<64x128xf32>
    %229 = arith.addf %225, %228 : vector<64x128xf32>
    %c0_158 = arith.constant 0 : index
    %c0_159 = arith.constant 0 : index
    %230 = vector.load %arg14[%c0_158, %c0_159] : memref<64x128xf32, #tpu.memory_space<vmem>>, vector<64x128xf32>
    tpu.vector_store %arg14[%c0_158, %c0_159], %229 {strides = array<i32>} : memref<64x128xf32, #tpu.memory_space<vmem>>, vector<64x128xf32>,
    %c9_160 = arith.constant 9 : index
    %c0_161 = arith.constant 0 : index
    %231 = vector.load %arg13[%c9_160, %c0_161] : memref<96x128xbf16, #tpu.memory_space<vmem>>, vector<64x128xbf16>
    %c1_i32_162 = arith.constant 1 : i32
    %232 = vector.broadcast %c1_i32_162 : i32 to vector<64x1xi32>
    %233 = arith.addi %201, %232 : vector<64x1xi32>
    %c0_i32_163 = arith.constant 0 : i32
    %234 = vector.broadcast %c0_i32_163 : i32 to vector<64x1xi32>
    %235 = arith.cmpi sge, %233, %234 : vector<64x1xi32>
    %c1_i32_164 = arith.constant 1 : i32
    %236 = vector.broadcast %c1_i32_164 : i32 to vector<64x1xi32>
    %237 = arith.addi %201, %236 : vector<64x1xi32>
    %c8_i32_165 = arith.constant 8 : i32
    %238 = vector.broadcast %c8_i32_165 : i32 to vector<64x1xi32>
    %239 = arith.cmpi slt, %237, %238 : vector<64x1xi32>
    %240 = arith.andi %235, %239 : vector<64x1xi1>
    %cst_166 = arith.constant 0.000000e+00 : bf16
    %241 = vector.broadcast %cst_166 : bf16 to vector<64x128xbf16>
    %242 = vector.shape_cast %240 : vector<64x1xi1> to vector<64x1xi1>
    %243 = vector.broadcast %242 : vector<64x1xi1> to vector<64x128xi1>
    %244 = arith.select %243, %231, %241 : vector<64x128xi1>, vector<64x128xbf16>
    %c0_167 = arith.constant 0 : index
    %c0_168 = arith.constant 0 : index
    %245 = vector.load %arg14[%c0_167, %c0_168] : memref<64x128xf32, #tpu.memory_space<vmem>>, vector<64x128xf32>
    %c2_169 = arith.constant 2 : index
    %c0_170 = arith.constant 0 : index
    %c0_171 = arith.constant 0 : index
    %246 = vector.load %arg4[%c2_169, %c0_170, %c0_171] : memref<9x128x128xbf16, #tpu.memory_space<vmem>>, vector<1x128x128xbf16>
    %247 = vector.shape_cast %246 : vector<1x128x128xbf16> to vector<128x128xbf16>
    %cst_172 = arith.constant dense<0.000000e+00> : vector<64x128xf32>
    %248 = tpu.matmul %244, %247, %cst_172 {dimension_numbers = #tpu.dot_dimension_numbers<[1], [0], [0], [1], [0, 0, 1, 1], [], []>} : vector<64x128xbf16>, vector<128x128xbf16>, vector<64x128xf32> -> vector<64x128xf32>
    %249 = arith.addf %245, %248 : vector<64x128xf32>
    %c0_173 = arith.constant 0 : index
    %c0_174 = arith.constant 0 : index
    %250 = vector.load %arg14[%c0_173, %c0_174] : memref<64x128xf32, #tpu.memory_space<vmem>>, vector<64x128xf32>
    tpu.vector_store %arg14[%c0_173, %c0_174], %249 {strides = array<i32>} : memref<64x128xf32, #tpu.memory_space<vmem>>, vector<64x128xf32>,
    %c15 = arith.constant 15 : index
    %c0_175 = arith.constant 0 : index
    %251 = vector.load %arg13[%c15, %c0_175] : memref<96x128xbf16, #tpu.memory_space<vmem>>, vector<64x128xbf16>
    %c-1_i32_176 = arith.constant -1 : i32
    %252 = vector.broadcast %c-1_i32_176 : i32 to vector<64x1xi32>
    %253 = arith.addi %201, %252 : vector<64x1xi32>
    %c0_i32_177 = arith.constant 0 : i32
    %254 = vector.broadcast %c0_i32_177 : i32 to vector<64x1xi32>
    %255 = arith.cmpi sge, %253, %254 : vector<64x1xi32>
    %c-1_i32_178 = arith.constant -1 : i32
    %256 = vector.broadcast %c-1_i32_178 : i32 to vector<64x1xi32>
    %257 = arith.addi %201, %256 : vector<64x1xi32>
    %c8_i32_179 = arith.constant 8 : i32
    %258 = vector.broadcast %c8_i32_179 : i32 to vector<64x1xi32>
    %259 = arith.cmpi slt, %257, %258 : vector<64x1xi32>
    %260 = arith.andi %255, %259 : vector<64x1xi1>
    %cst_180 = arith.constant 0.000000e+00 : bf16
    %261 = vector.broadcast %cst_180 : bf16 to vector<64x128xbf16>
    %262 = vector.shape_cast %260 : vector<64x1xi1> to vector<64x1xi1>
    %263 = vector.broadcast %262 : vector<64x1xi1> to vector<64x128xi1>
    %264 = arith.select %263, %251, %261 : vector<64x128xi1>, vector<64x128xbf16>
    %c0_181 = arith.constant 0 : index
    %c0_182 = arith.constant 0 : index
    %265 = vector.load %arg14[%c0_181, %c0_182] : memref<64x128xf32, #tpu.memory_space<vmem>>, vector<64x128xf32>
    %c3_183 = arith.constant 3 : index
    %c0_184 = arith.constant 0 : index
    %c0_185 = arith.constant 0 : index
    %266 = vector.load %arg4[%c3_183, %c0_184, %c0_185] : memref<9x128x128xbf16, #tpu.memory_space<vmem>>, vector<1x128x128xbf16>
    %267 = vector.shape_cast %266 : vector<1x128x128xbf16> to vector<128x128xbf16>
    %cst_186 = arith.constant dense<0.000000e+00> : vector<64x128xf32>
    %268 = tpu.matmul %264, %267, %cst_186 {dimension_numbers = #tpu.dot_dimension_numbers<[1], [0], [0], [1], [0, 0, 1, 1], [], []>} : vector<64x128xbf16>, vector<128x128xbf16>, vector<64x128xf32> -> vector<64x128xf32>
    %269 = arith.addf %265, %268 : vector<64x128xf32>
    %c0_187 = arith.constant 0 : index
    %c0_188 = arith.constant 0 : index
    %270 = vector.load %arg14[%c0_187, %c0_188] : memref<64x128xf32, #tpu.memory_space<vmem>>, vector<64x128xf32>
    tpu.vector_store %arg14[%c0_187, %c0_188], %269 {strides = array<i32>} : memref<64x128xf32, #tpu.memory_space<vmem>>, vector<64x128xf32>,
    %c16_189 = arith.constant 16 : index
    %c0_190 = arith.constant 0 : index
    %271 = vector.load %arg13[%c16_189, %c0_190] : memref<96x128xbf16, #tpu.memory_space<vmem>>, vector<64x128xbf16>
    %c0_191 = arith.constant 0 : index
    %c0_192 = arith.constant 0 : index
    %272 = vector.load %arg14[%c0_191, %c0_192] : memref<64x128xf32, #tpu.memory_space<vmem>>, vector<64x128xf32>
    %c4_193 = arith.constant 4 : index
    %c0_194 = arith.constant 0 : index
    %c0_195 = arith.constant 0 : index
    %273 = vector.load %arg4[%c4_193, %c0_194, %c0_195] : memref<9x128x128xbf16, #tpu.memory_space<vmem>>, vector<1x128x128xbf16>
    %274 = vector.shape_cast %273 : vector<1x128x128xbf16> to vector<128x128xbf16>
    %cst_196 = arith.constant dense<0.000000e+00> : vector<64x128xf32>
    %275 = tpu.matmul %271, %274, %cst_196 {dimension_numbers = #tpu.dot_dimension_numbers<[1], [0], [0], [1], [0, 0, 1, 1], [], []>} : vector<64x128xbf16>, vector<128x128xbf16>, vector<64x128xf32> -> vector<64x128xf32>
    %276 = arith.addf %272, %275 : vector<64x128xf32>
    %c0_197 = arith.constant 0 : index
    %c0_198 = arith.constant 0 : index
    %277 = vector.load %arg14[%c0_197, %c0_198] : memref<64x128xf32, #tpu.memory_space<vmem>>, vector<64x128xf32>
    tpu.vector_store %arg14[%c0_197, %c0_198], %276 {strides = array<i32>} : memref<64x128xf32, #tpu.memory_space<vmem>>, vector<64x128xf32>,
    %c17 = arith.constant 17 : index
    %c0_199 = arith.constant 0 : index
    %278 = vector.load %arg13[%c17, %c0_199] : memref<96x128xbf16, #tpu.memory_space<vmem>>, vector<64x128xbf16>
    %c1_i32_200 = arith.constant 1 : i32
    %279 = vector.broadcast %c1_i32_200 : i32 to vector<64x1xi32>
    %280 = arith.addi %201, %279 : vector<64x1xi32>
    %c0_i32_201 = arith.constant 0 : i32
    %281 = vector.broadcast %c0_i32_201 : i32 to vector<64x1xi32>
    %282 = arith.cmpi sge, %280, %281 : vector<64x1xi32>
    %c1_i32_202 = arith.constant 1 : i32
    %283 = vector.broadcast %c1_i32_202 : i32 to vector<64x1xi32>
    %284 = arith.addi %201, %283 : vector<64x1xi32>
    %c8_i32_203 = arith.constant 8 : i32
    %285 = vector.broadcast %c8_i32_203 : i32 to vector<64x1xi32>
    %286 = arith.cmpi slt, %284, %285 : vector<64x1xi32>
    %287 = arith.andi %282, %286 : vector<64x1xi1>
    %cst_204 = arith.constant 0.000000e+00 : bf16
    %288 = vector.broadcast %cst_204 : bf16 to vector<64x128xbf16>
    %289 = vector.shape_cast %287 : vector<64x1xi1> to vector<64x1xi1>
    %290 = vector.broadcast %289 : vector<64x1xi1> to vector<64x128xi1>
    %291 = arith.select %290, %278, %288 : vector<64x128xi1>, vector<64x128xbf16>
    %c0_205 = arith.constant 0 : index
    %c0_206 = arith.constant 0 : index
    %292 = vector.load %arg14[%c0_205, %c0_206] : memref<64x128xf32, #tpu.memory_space<vmem>>, vector<64x128xf32>
    %c5_207 = arith.constant 5 : index
    %c0_208 = arith.constant 0 : index
    %c0_209 = arith.constant 0 : index
    %293 = vector.load %arg4[%c5_207, %c0_208, %c0_209] : memref<9x128x128xbf16, #tpu.memory_space<vmem>>, vector<1x128x128xbf16>
    %294 = vector.shape_cast %293 : vector<1x128x128xbf16> to vector<128x128xbf16>
    %cst_210 = arith.constant dense<0.000000e+00> : vector<64x128xf32>
    %295 = tpu.matmul %291, %294, %cst_210 {dimension_numbers = #tpu.dot_dimension_numbers<[1], [0], [0], [1], [0, 0, 1, 1], [], []>} : vector<64x128xbf16>, vector<128x128xbf16>, vector<64x128xf32> -> vector<64x128xf32>
    %296 = arith.addf %292, %295 : vector<64x128xf32>
    %c0_211 = arith.constant 0 : index
    %c0_212 = arith.constant 0 : index
    %297 = vector.load %arg14[%c0_211, %c0_212] : memref<64x128xf32, #tpu.memory_space<vmem>>, vector<64x128xf32>
    tpu.vector_store %arg14[%c0_211, %c0_212], %296 {strides = array<i32>} : memref<64x128xf32, #tpu.memory_space<vmem>>, vector<64x128xf32>,
    %c23_213 = arith.constant 23 : index
    %c0_214 = arith.constant 0 : index
    %298 = vector.load %arg13[%c23_213, %c0_214] : memref<96x128xbf16, #tpu.memory_space<vmem>>, vector<64x128xbf16>
    %c-1_i32_215 = arith.constant -1 : i32
    %299 = vector.broadcast %c-1_i32_215 : i32 to vector<64x1xi32>
    %300 = arith.addi %201, %299 : vector<64x1xi32>
    %c0_i32_216 = arith.constant 0 : i32
    %301 = vector.broadcast %c0_i32_216 : i32 to vector<64x1xi32>
    %302 = arith.cmpi sge, %300, %301 : vector<64x1xi32>
    %c-1_i32_217 = arith.constant -1 : i32
    %303 = vector.broadcast %c-1_i32_217 : i32 to vector<64x1xi32>
    %304 = arith.addi %201, %303 : vector<64x1xi32>
    %c8_i32_218 = arith.constant 8 : i32
    %305 = vector.broadcast %c8_i32_218 : i32 to vector<64x1xi32>
    %306 = arith.cmpi slt, %304, %305 : vector<64x1xi32>
    %307 = arith.andi %302, %306 : vector<64x1xi1>
    %cst_219 = arith.constant 0.000000e+00 : bf16
    %308 = vector.broadcast %cst_219 : bf16 to vector<64x128xbf16>
    %309 = vector.shape_cast %307 : vector<64x1xi1> to vector<64x1xi1>
    %310 = vector.broadcast %309 : vector<64x1xi1> to vector<64x128xi1>
    %311 = arith.select %310, %298, %308 : vector<64x128xi1>, vector<64x128xbf16>
    %c0_220 = arith.constant 0 : index
    %c0_221 = arith.constant 0 : index
    %312 = vector.load %arg14[%c0_220, %c0_221] : memref<64x128xf32, #tpu.memory_space<vmem>>, vector<64x128xf32>
    %c6_222 = arith.constant 6 : index
    %c0_223 = arith.constant 0 : index
    %c0_224 = arith.constant 0 : index
    %313 = vector.load %arg4[%c6_222, %c0_223, %c0_224] : memref<9x128x128xbf16, #tpu.memory_space<vmem>>, vector<1x128x128xbf16>
    %314 = vector.shape_cast %313 : vector<1x128x128xbf16> to vector<128x128xbf16>
    %cst_225 = arith.constant dense<0.000000e+00> : vector<64x128xf32>
    %315 = tpu.matmul %311, %314, %cst_225 {dimension_numbers = #tpu.dot_dimension_numbers<[1], [0], [0], [1], [0, 0, 1, 1], [], []>} : vector<64x128xbf16>, vector<128x128xbf16>, vector<64x128xf32> -> vector<64x128xf32>
    %316 = arith.addf %312, %315 : vector<64x128xf32>
    %c0_226 = arith.constant 0 : index
    %c0_227 = arith.constant 0 : index
    %317 = vector.load %arg14[%c0_226, %c0_227] : memref<64x128xf32, #tpu.memory_space<vmem>>, vector<64x128xf32>
    tpu.vector_store %arg14[%c0_226, %c0_227], %316 {strides = array<i32>} : memref<64x128xf32, #tpu.memory_space<vmem>>, vector<64x128xf32>,
    %c24_228 = arith.constant 24 : index
    %c0_229 = arith.constant 0 : index
    %318 = vector.load %arg13[%c24_228, %c0_229] : memref<96x128xbf16, #tpu.memory_space<vmem>>, vector<64x128xbf16>
    %c0_230 = arith.constant 0 : index
    %c0_231 = arith.constant 0 : index
    %319 = vector.load %arg14[%c0_230, %c0_231] : memref<64x128xf32, #tpu.memory_space<vmem>>, vector<64x128xf32>
    %c7_232 = arith.constant 7 : index
    %c0_233 = arith.constant 0 : index
    %c0_234 = arith.constant 0 : index
    %320 = vector.load %arg4[%c7_232, %c0_233, %c0_234] : memref<9x128x128xbf16, #tpu.memory_space<vmem>>, vector<1x128x128xbf16>
    %321 = vector.shape_cast %320 : vector<1x128x128xbf16> to vector<128x128xbf16>
    %cst_235 = arith.constant dense<0.000000e+00> : vector<64x128xf32>
    %322 = tpu.matmul %318, %321, %cst_235 {dimension_numbers = #tpu.dot_dimension_numbers<[1], [0], [0], [1], [0, 0, 1, 1], [], []>} : vector<64x128xbf16>, vector<128x128xbf16>, vector<64x128xf32> -> vector<64x128xf32>
    %323 = arith.addf %319, %322 : vector<64x128xf32>
    %c0_236 = arith.constant 0 : index
    %c0_237 = arith.constant 0 : index
    %324 = vector.load %arg14[%c0_236, %c0_237] : memref<64x128xf32, #tpu.memory_space<vmem>>, vector<64x128xf32>
    tpu.vector_store %arg14[%c0_236, %c0_237], %323 {strides = array<i32>} : memref<64x128xf32, #tpu.memory_space<vmem>>, vector<64x128xf32>,
    %c25_238 = arith.constant 25 : index
    %c0_239 = arith.constant 0 : index
    %325 = vector.load %arg13[%c25_238, %c0_239] : memref<96x128xbf16, #tpu.memory_space<vmem>>, vector<64x128xbf16>
    %c1_i32_240 = arith.constant 1 : i32
    %326 = vector.broadcast %c1_i32_240 : i32 to vector<64x1xi32>
    %327 = arith.addi %201, %326 : vector<64x1xi32>
    %c0_i32_241 = arith.constant 0 : i32
    %328 = vector.broadcast %c0_i32_241 : i32 to vector<64x1xi32>
    %329 = arith.cmpi sge, %327, %328 : vector<64x1xi32>
    %c1_i32_242 = arith.constant 1 : i32
    %330 = vector.broadcast %c1_i32_242 : i32 to vector<64x1xi32>
    %331 = arith.addi %201, %330 : vector<64x1xi32>
    %c8_i32_243 = arith.constant 8 : i32
    %332 = vector.broadcast %c8_i32_243 : i32 to vector<64x1xi32>
    %333 = arith.cmpi slt, %331, %332 : vector<64x1xi32>
    %334 = arith.andi %329, %333 : vector<64x1xi1>
    %cst_244 = arith.constant 0.000000e+00 : bf16
    %335 = vector.broadcast %cst_244 : bf16 to vector<64x128xbf16>
    %336 = vector.shape_cast %334 : vector<64x1xi1> to vector<64x1xi1>
    %337 = vector.broadcast %336 : vector<64x1xi1> to vector<64x128xi1>
    %338 = arith.select %337, %325, %335 : vector<64x128xi1>, vector<64x128xbf16>
    %c0_245 = arith.constant 0 : index
    %c0_246 = arith.constant 0 : index
    %339 = vector.load %arg14[%c0_245, %c0_246] : memref<64x128xf32, #tpu.memory_space<vmem>>, vector<64x128xf32>
    %c8_247 = arith.constant 8 : index
    %c0_248 = arith.constant 0 : index
    %c0_249 = arith.constant 0 : index
    %340 = vector.load %arg4[%c8_247, %c0_248, %c0_249] : memref<9x128x128xbf16, #tpu.memory_space<vmem>>, vector<1x128x128xbf16>
    %341 = vector.shape_cast %340 : vector<1x128x128xbf16> to vector<128x128xbf16>
    %cst_250 = arith.constant dense<0.000000e+00> : vector<64x128xf32>
    %342 = tpu.matmul %338, %341, %cst_250 {dimension_numbers = #tpu.dot_dimension_numbers<[1], [0], [0], [1], [0, 0, 1, 1], [], []>} : vector<64x128xbf16>, vector<128x128xbf16>, vector<64x128xf32> -> vector<64x128xf32>
    %343 = arith.addf %339, %342 : vector<64x128xf32>
    %c0_251 = arith.constant 0 : index
    %c0_252 = arith.constant 0 : index
    %344 = vector.load %arg14[%c0_251, %c0_252] : memref<64x128xf32, #tpu.memory_space<vmem>>, vector<64x128xf32>
    tpu.vector_store %arg14[%c0_251, %c0_252], %343 {strides = array<i32>} : memref<64x128xf32, #tpu.memory_space<vmem>>, vector<64x128xf32>,
    %c0_253 = arith.constant 0 : index
    %c0_254 = arith.constant 0 : index
    %345 = vector.load %arg14[%c0_253, %c0_254] : memref<64x128xf32, #tpu.memory_space<vmem>>, vector<64x128xf32>
    %c0_255 = arith.constant 0 : index
    %c0_256 = arith.constant 0 : index
    %346 = vector.load %arg5[%c0_255, %c0_256] : memref<1x128xf32, #tpu.memory_space<vmem>>, vector<1x128xf32>
    %347 = vector.broadcast %346 : vector<1x128xf32> to vector<64x128xf32>
    %348 = arith.addf %345, %347 : vector<64x128xf32>
    %cst_257 = arith.constant 0.000000e+00 : f32
    %349 = vector.broadcast %cst_257 : f32 to vector<64x128xf32>
    %350 = arith.maximumf %348, %349 : vector<64x128xf32>
    %351 = vector.extract_strided_slice %350 {offsets = [1, 0], sizes = [63, 128], strides = [1, 1]} : vector<64x128xf32> to vector<63x128xf32>
    %352 = vector.extract_strided_slice %350 {offsets = [0, 0], sizes = [1, 128], strides = [1, 1]} : vector<64x128xf32> to vector<1x128xf32>
    %353 = tpu.concatenate %351, %352 in 0 : vector<63x128xf32>, vector<1x128xf32> -> vector<64x128xf32>
    %354 = arith.maximumf %350, %353 : vector<64x128xf32>
    %355 = vector.extract_strided_slice %354 {offsets = [8, 0], sizes = [56, 128], strides = [1, 1]} : vector<64x128xf32> to vector<56x128xf32>
    %356 = vector.extract_strided_slice %354 {offsets = [0, 0], sizes = [8, 128], strides = [1, 1]} : vector<64x128xf32> to vector<8x128xf32>
    %357 = tpu.concatenate %355, %356 in 0 : vector<56x128xf32>, vector<8x128xf32> -> vector<64x128xf32>
    %358 = arith.maximumf %354, %357 : vector<64x128xf32>
    %c0_258 = arith.constant 0 : index
    %c0_259 = arith.constant 0 : index
    %359 = vector.load %arg7[%c0_258, %c0_259] : memref<16x64xbf16, #tpu.memory_space<vmem>>, vector<16x64xbf16>
    %360 = arith.truncf %358 : vector<64x128xf32> to vector<64x128xbf16>
    %cst_260 = arith.constant dense<0.000000e+00> : vector<16x128xf32>
    %361 = tpu.matmul %359, %360, %cst_260 {dimension_numbers = #tpu.dot_dimension_numbers<[1], [0], [0], [1], [0, 0, 1, 1], [], []>} : vector<16x64xbf16>, vector<64x128xbf16>, vector<16x128xf32> -> vector<16x128xf32>
    %362 = arith.truncf %361 : vector<16x128xf32> to vector<16x128xbf16>
    %c0_261 = arith.constant 0 : index
    %c0_262 = arith.constant 0 : index
    %363 = vector.load %arg9[%c0_261, %c0_262] : memref<1x128xf32, #tpu.memory_space<vmem>>, vector<1x128xf32>
    %364 = vector.extract_strided_slice %362 {offsets = [0, 0], sizes = [1, 128], strides = [1, 1]} : vector<16x128xbf16> to vector<1x128xbf16>
    %c0_263 = arith.constant 0 : index
    %c0_264 = arith.constant 0 : index
    %c0_265 = arith.constant 0 : index
    %365 = vector.load %arg8[%c0_263, %c0_264, %c0_265] : memref<16x128x128xbf16, #tpu.memory_space<vmem>>, vector<1x128x128xbf16>
    %366 = vector.shape_cast %365 : vector<1x128x128xbf16> to vector<128x128xbf16>
    %cst_266 = arith.constant dense<0.000000e+00> : vector<1x128xf32>
    %367 = tpu.matmul %364, %366, %cst_266 {dimension_numbers = #tpu.dot_dimension_numbers<[1], [0], [0], [1], [0, 0, 1, 1], [], []>} : vector<1x128xbf16>, vector<128x128xbf16>, vector<1x128xf32> -> vector<1x128xf32>
    %368 = arith.addf %363, %367 : vector<1x128xf32>
    %369 = vector.extract_strided_slice %362 {offsets = [1, 0], sizes = [1, 128], strides = [1, 1]} : vector<16x128xbf16> to vector<1x128xbf16>
    %c1_267 = arith.constant 1 : index
    %c0_268 = arith.constant 0 : index
    %c0_269 = arith.constant 0 : index
    %370 = vector.load %arg8[%c1_267, %c0_268, %c0_269] : memref<16x128x128xbf16, #tpu.memory_space<vmem>>, vector<1x128x128xbf16>
    %371 = vector.shape_cast %370 : vector<1x128x128xbf16> to vector<128x128xbf16>
    %cst_270 = arith.constant dense<0.000000e+00> : vector<1x128xf32>
    %372 = tpu.matmul %369, %371, %cst_270 {dimension_numbers = #tpu.dot_dimension_numbers<[1], [0], [0], [1], [0, 0, 1, 1], [], []>} : vector<1x128xbf16>, vector<128x128xbf16>, vector<1x128xf32> -> vector<1x128xf32>
    %373 = arith.addf %368, %372 : vector<1x128xf32>
    %374 = vector.extract_strided_slice %362 {offsets = [2, 0], sizes = [1, 128], strides = [1, 1]} : vector<16x128xbf16> to vector<1x128xbf16>
    %c2_271 = arith.constant 2 : index
    %c0_272 = arith.constant 0 : index
    %c0_273 = arith.constant 0 : index
    %375 = vector.load %arg8[%c2_271, %c0_272, %c0_273] : memref<16x128x128xbf16, #tpu.memory_space<vmem>>, vector<1x128x128xbf16>
    %376 = vector.shape_cast %375 : vector<1x128x128xbf16> to vector<128x128xbf16>
    %cst_274 = arith.constant dense<0.000000e+00> : vector<1x128xf32>
    %377 = tpu.matmul %374, %376, %cst_274 {dimension_numbers = #tpu.dot_dimension_numbers<[1], [0], [0], [1], [0, 0, 1, 1], [], []>} : vector<1x128xbf16>, vector<128x128xbf16>, vector<1x128xf32> -> vector<1x128xf32>
    %378 = arith.addf %373, %377 : vector<1x128xf32>
    %379 = vector.extract_strided_slice %362 {offsets = [3, 0], sizes = [1, 128], strides = [1, 1]} : vector<16x128xbf16> to vector<1x128xbf16>
    %c3_275 = arith.constant 3 : index
    %c0_276 = arith.constant 0 : index
    %c0_277 = arith.constant 0 : index
    %380 = vector.load %arg8[%c3_275, %c0_276, %c0_277] : memref<16x128x128xbf16, #tpu.memory_space<vmem>>, vector<1x128x128xbf16>
    %381 = vector.shape_cast %380 : vector<1x128x128xbf16> to vector<128x128xbf16>
    %cst_278 = arith.constant dense<0.000000e+00> : vector<1x128xf32>
    %382 = tpu.matmul %379, %381, %cst_278 {dimension_numbers = #tpu.dot_dimension_numbers<[1], [0], [0], [1], [0, 0, 1, 1], [], []>} : vector<1x128xbf16>, vector<128x128xbf16>, vector<1x128xf32> -> vector<1x128xf32>
    %383 = arith.addf %378, %382 : vector<1x128xf32>
    %384 = vector.extract_strided_slice %362 {offsets = [4, 0], sizes = [1, 128], strides = [1, 1]} : vector<16x128xbf16> to vector<1x128xbf16>
    %c4_279 = arith.constant 4 : index
    %c0_280 = arith.constant 0 : index
    %c0_281 = arith.constant 0 : index
    %385 = vector.load %arg8[%c4_279, %c0_280, %c0_281] : memref<16x128x128xbf16, #tpu.memory_space<vmem>>, vector<1x128x128xbf16>
    %386 = vector.shape_cast %385 : vector<1x128x128xbf16> to vector<128x128xbf16>
    %cst_282 = arith.constant dense<0.000000e+00> : vector<1x128xf32>
    %387 = tpu.matmul %384, %386, %cst_282 {dimension_numbers = #tpu.dot_dimension_numbers<[1], [0], [0], [1], [0, 0, 1, 1], [], []>} : vector<1x128xbf16>, vector<128x128xbf16>, vector<1x128xf32> -> vector<1x128xf32>
    %388 = arith.addf %383, %387 : vector<1x128xf32>
    %389 = vector.extract_strided_slice %362 {offsets = [5, 0], sizes = [1, 128], strides = [1, 1]} : vector<16x128xbf16> to vector<1x128xbf16>
    %c5_283 = arith.constant 5 : index
    %c0_284 = arith.constant 0 : index
    %c0_285 = arith.constant 0 : index
    %390 = vector.load %arg8[%c5_283, %c0_284, %c0_285] : memref<16x128x128xbf16, #tpu.memory_space<vmem>>, vector<1x128x128xbf16>
    %391 = vector.shape_cast %390 : vector<1x128x128xbf16> to vector<128x128xbf16>
    %cst_286 = arith.constant dense<0.000000e+00> : vector<1x128xf32>
    %392 = tpu.matmul %389, %391, %cst_286 {dimension_numbers = #tpu.dot_dimension_numbers<[1], [0], [0], [1], [0, 0, 1, 1], [], []>} : vector<1x128xbf16>, vector<128x128xbf16>, vector<1x128xf32> -> vector<1x128xf32>
    %393 = arith.addf %388, %392 : vector<1x128xf32>
    %394 = vector.extract_strided_slice %362 {offsets = [6, 0], sizes = [1, 128], strides = [1, 1]} : vector<16x128xbf16> to vector<1x128xbf16>
    %c6_287 = arith.constant 6 : index
    %c0_288 = arith.constant 0 : index
    %c0_289 = arith.constant 0 : index
    %395 = vector.load %arg8[%c6_287, %c0_288, %c0_289] : memref<16x128x128xbf16, #tpu.memory_space<vmem>>, vector<1x128x128xbf16>
    %396 = vector.shape_cast %395 : vector<1x128x128xbf16> to vector<128x128xbf16>
    %cst_290 = arith.constant dense<0.000000e+00> : vector<1x128xf32>
    %397 = tpu.matmul %394, %396, %cst_290 {dimension_numbers = #tpu.dot_dimension_numbers<[1], [0], [0], [1], [0, 0, 1, 1], [], []>} : vector<1x128xbf16>, vector<128x128xbf16>, vector<1x128xf32> -> vector<1x128xf32>
    %398 = arith.addf %393, %397 : vector<1x128xf32>
    %399 = vector.extract_strided_slice %362 {offsets = [7, 0], sizes = [1, 128], strides = [1, 1]} : vector<16x128xbf16> to vector<1x128xbf16>
    %c7_291 = arith.constant 7 : index
    %c0_292 = arith.constant 0 : index
    %c0_293 = arith.constant 0 : index
    %400 = vector.load %arg8[%c7_291, %c0_292, %c0_293] : memref<16x128x128xbf16, #tpu.memory_space<vmem>>, vector<1x128x128xbf16>
    %401 = vector.shape_cast %400 : vector<1x128x128xbf16> to vector<128x128xbf16>
    %cst_294 = arith.constant dense<0.000000e+00> : vector<1x128xf32>
    %402 = tpu.matmul %399, %401, %cst_294 {dimension_numbers = #tpu.dot_dimension_numbers<[1], [0], [0], [1], [0, 0, 1, 1], [], []>} : vector<1x128xbf16>, vector<128x128xbf16>, vector<1x128xf32> -> vector<1x128xf32>
    %403 = arith.addf %398, %402 : vector<1x128xf32>
    %404 = vector.extract_strided_slice %362 {offsets = [8, 0], sizes = [1, 128], strides = [1, 1]} : vector<16x128xbf16> to vector<1x128xbf16>
    %c8_295 = arith.constant 8 : index
    %c0_296 = arith.constant 0 : index
    %c0_297 = arith.constant 0 : index
    %405 = vector.load %arg8[%c8_295, %c0_296, %c0_297] : memref<16x128x128xbf16, #tpu.memory_space<vmem>>, vector<1x128x128xbf16>
    %406 = vector.shape_cast %405 : vector<1x128x128xbf16> to vector<128x128xbf16>
    %cst_298 = arith.constant dense<0.000000e+00> : vector<1x128xf32>
    %407 = tpu.matmul %404, %406, %cst_298 {dimension_numbers = #tpu.dot_dimension_numbers<[1], [0], [0], [1], [0, 0, 1, 1], [], []>} : vector<1x128xbf16>, vector<128x128xbf16>, vector<1x128xf32> -> vector<1x128xf32>
    %408 = arith.addf %403, %407 : vector<1x128xf32>
    %409 = vector.extract_strided_slice %362 {offsets = [9, 0], sizes = [1, 128], strides = [1, 1]} : vector<16x128xbf16> to vector<1x128xbf16>
    %c9_299 = arith.constant 9 : index
    %c0_300 = arith.constant 0 : index
    %c0_301 = arith.constant 0 : index
    %410 = vector.load %arg8[%c9_299, %c0_300, %c0_301] : memref<16x128x128xbf16, #tpu.memory_space<vmem>>, vector<1x128x128xbf16>
    %411 = vector.shape_cast %410 : vector<1x128x128xbf16> to vector<128x128xbf16>
    %cst_302 = arith.constant dense<0.000000e+00> : vector<1x128xf32>
    %412 = tpu.matmul %409, %411, %cst_302 {dimension_numbers = #tpu.dot_dimension_numbers<[1], [0], [0], [1], [0, 0, 1, 1], [], []>} : vector<1x128xbf16>, vector<128x128xbf16>, vector<1x128xf32> -> vector<1x128xf32>
    %413 = arith.addf %408, %412 : vector<1x128xf32>
    %414 = vector.extract_strided_slice %362 {offsets = [10, 0], sizes = [1, 128], strides = [1, 1]} : vector<16x128xbf16> to vector<1x128xbf16>
    %c10 = arith.constant 10 : index
    %c0_303 = arith.constant 0 : index
    %c0_304 = arith.constant 0 : index
    %415 = vector.load %arg8[%c10, %c0_303, %c0_304] : memref<16x128x128xbf16, #tpu.memory_space<vmem>>, vector<1x128x128xbf16>
    %416 = vector.shape_cast %415 : vector<1x128x128xbf16> to vector<128x128xbf16>
    %cst_305 = arith.constant dense<0.000000e+00> : vector<1x128xf32>
    %417 = tpu.matmul %414, %416, %cst_305 {dimension_numbers = #tpu.dot_dimension_numbers<[1], [0], [0], [1], [0, 0, 1, 1], [], []>} : vector<1x128xbf16>, vector<128x128xbf16>, vector<1x128xf32> -> vector<1x128xf32>
    %418 = arith.addf %413, %417 : vector<1x128xf32>
    %419 = vector.extract_strided_slice %362 {offsets = [11, 0], sizes = [1, 128], strides = [1, 1]} : vector<16x128xbf16> to vector<1x128xbf16>
    %c11 = arith.constant 11 : index
    %c0_306 = arith.constant 0 : index
    %c0_307 = arith.constant 0 : index
    %420 = vector.load %arg8[%c11, %c0_306, %c0_307] : memref<16x128x128xbf16, #tpu.memory_space<vmem>>, vector<1x128x128xbf16>
    %421 = vector.shape_cast %420 : vector<1x128x128xbf16> to vector<128x128xbf16>
    %cst_308 = arith.constant dense<0.000000e+00> : vector<1x128xf32>
    %422 = tpu.matmul %419, %421, %cst_308 {dimension_numbers = #tpu.dot_dimension_numbers<[1], [0], [0], [1], [0, 0, 1, 1], [], []>} : vector<1x128xbf16>, vector<128x128xbf16>, vector<1x128xf32> -> vector<1x128xf32>
    %423 = arith.addf %418, %422 : vector<1x128xf32>
    %424 = vector.extract_strided_slice %362 {offsets = [12, 0], sizes = [1, 128], strides = [1, 1]} : vector<16x128xbf16> to vector<1x128xbf16>
    %c12 = arith.constant 12 : index
    %c0_309 = arith.constant 0 : index
    %c0_310 = arith.constant 0 : index
    %425 = vector.load %arg8[%c12, %c0_309, %c0_310] : memref<16x128x128xbf16, #tpu.memory_space<vmem>>, vector<1x128x128xbf16>
    %426 = vector.shape_cast %425 : vector<1x128x128xbf16> to vector<128x128xbf16>
    %cst_311 = arith.constant dense<0.000000e+00> : vector<1x128xf32>
    %427 = tpu.matmul %424, %426, %cst_311 {dimension_numbers = #tpu.dot_dimension_numbers<[1], [0], [0], [1], [0, 0, 1, 1], [], []>} : vector<1x128xbf16>, vector<128x128xbf16>, vector<1x128xf32> -> vector<1x128xf32>
    %428 = arith.addf %423, %427 : vector<1x128xf32>
    %429 = vector.extract_strided_slice %362 {offsets = [13, 0], sizes = [1, 128], strides = [1, 1]} : vector<16x128xbf16> to vector<1x128xbf16>
    %c13 = arith.constant 13 : index
    %c0_312 = arith.constant 0 : index
    %c0_313 = arith.constant 0 : index
    %430 = vector.load %arg8[%c13, %c0_312, %c0_313] : memref<16x128x128xbf16, #tpu.memory_space<vmem>>, vector<1x128x128xbf16>
    %431 = vector.shape_cast %430 : vector<1x128x128xbf16> to vector<128x128xbf16>
    %cst_314 = arith.constant dense<0.000000e+00> : vector<1x128xf32>
    %432 = tpu.matmul %429, %431, %cst_314 {dimension_numbers = #tpu.dot_dimension_numbers<[1], [0], [0], [1], [0, 0, 1, 1], [], []>} : vector<1x128xbf16>, vector<128x128xbf16>, vector<1x128xf32> -> vector<1x128xf32>
    %433 = arith.addf %428, %432 : vector<1x128xf32>
    %434 = vector.extract_strided_slice %362 {offsets = [14, 0], sizes = [1, 128], strides = [1, 1]} : vector<16x128xbf16> to vector<1x128xbf16>
    %c14 = arith.constant 14 : index
    %c0_315 = arith.constant 0 : index
    %c0_316 = arith.constant 0 : index
    %435 = vector.load %arg8[%c14, %c0_315, %c0_316] : memref<16x128x128xbf16, #tpu.memory_space<vmem>>, vector<1x128x128xbf16>
    %436 = vector.shape_cast %435 : vector<1x128x128xbf16> to vector<128x128xbf16>
    %cst_317 = arith.constant dense<0.000000e+00> : vector<1x128xf32>
    %437 = tpu.matmul %434, %436, %cst_317 {dimension_numbers = #tpu.dot_dimension_numbers<[1], [0], [0], [1], [0, 0, 1, 1], [], []>} : vector<1x128xbf16>, vector<128x128xbf16>, vector<1x128xf32> -> vector<1x128xf32>
    %438 = arith.addf %433, %437 : vector<1x128xf32>
    %439 = vector.extract_strided_slice %362 {offsets = [15, 0], sizes = [1, 128], strides = [1, 1]} : vector<16x128xbf16> to vector<1x128xbf16>
    %c15_318 = arith.constant 15 : index
    %c0_319 = arith.constant 0 : index
    %c0_320 = arith.constant 0 : index
    %440 = vector.load %arg8[%c15_318, %c0_319, %c0_320] : memref<16x128x128xbf16, #tpu.memory_space<vmem>>, vector<1x128x128xbf16>
    %441 = vector.shape_cast %440 : vector<1x128x128xbf16> to vector<128x128xbf16>
    %cst_321 = arith.constant dense<0.000000e+00> : vector<1x128xf32>
    %442 = tpu.matmul %439, %441, %cst_321 {dimension_numbers = #tpu.dot_dimension_numbers<[1], [0], [0], [1], [0, 0, 1, 1], [], []>} : vector<1x128xbf16>, vector<128x128xbf16>, vector<1x128xf32> -> vector<1x128xf32>
    %443 = arith.addf %438, %442 : vector<1x128xf32>
    %444 = vector.shape_cast %443 : vector<1x128xf32> to vector<1x1x128xf32>
    %c0_322 = arith.constant 0 : index
    %c0_323 = arith.constant 0 : index
    %c0_324 = arith.constant 0 : index
    %445 = vector.load %arg10[%c0_322, %c0_323, %c0_324] : memref<1x1x128xf32, #tpu.memory_space<vmem>>, vector<1x1x128xf32>
    tpu.vector_store %arg10[%c0_322, %c0_323, %c0_324], %444 {strides = array<i32>} : memref<1x1x128xf32, #tpu.memory_space<vmem>>, vector<1x1x128xf32>,
    return
  }
  func.func @transform_0(%arg0: i32) -> (i32, i32) {
    %c0_i32 = arith.constant 0 : i32
    %c0_i32_0 = arith.constant 0 : i32
    return %arg0, %c0_i32 : i32, i32
  }
  func.func @transform_1(%arg0: i32) -> (i32, i32, i32) {
    %c0_i32 = arith.constant 0 : i32
    %c0_i32_0 = arith.constant 0 : i32
    %c0_i32_1 = arith.constant 0 : i32
    %c0_i32_2 = arith.constant 0 : i32
    return %c0_i32, %c0_i32_0, %c0_i32_1 : i32, i32, i32
  }
  func.func @transform_2(%arg0: i32) -> (i32, i32) {
    %c0_i32 = arith.constant 0 : i32
    %c0_i32_0 = arith.constant 0 : i32
    %c0_i32_1 = arith.constant 0 : i32
    return %c0_i32, %c0_i32_0 : i32, i32
  }
  func.func @transform_3(%arg0: i32) -> (i32, i32, i32) {
    %c0_i32 = arith.constant 0 : i32
    %c0_i32_0 = arith.constant 0 : i32
    %c0_i32_1 = arith.constant 0 : i32
    %c0_i32_2 = arith.constant 0 : i32
    return %c0_i32, %c0_i32_0, %c0_i32_1 : i32, i32, i32
  }
  func.func @transform_4(%arg0: i32) -> (i32, i32) {
    %c0_i32 = arith.constant 0 : i32
    %c0_i32_0 = arith.constant 0 : i32
    %c0_i32_1 = arith.constant 0 : i32
    return %c0_i32, %c0_i32_0 : i32, i32
  }
  func.func @transform_5(%arg0: i32) -> (i32, i32) {
    %c0_i32 = arith.constant 0 : i32
    %c0_i32_0 = arith.constant 0 : i32
    %c0_i32_1 = arith.constant 0 : i32
    return %c0_i32, %c0_i32_0 : i32, i32
  }
  func.func @transform_6(%arg0: i32) -> (i32, i32) {
    %c0_i32 = arith.constant 0 : i32
    %c0_i32_0 = arith.constant 0 : i32
    %c0_i32_1 = arith.constant 0 : i32
    return %c0_i32, %c0_i32_0 : i32, i32
  }
  func.func @transform_7(%arg0: i32) -> (i32, i32, i32) {
    %c0_i32 = arith.constant 0 : i32
    %c0_i32_0 = arith.constant 0 : i32
    %c0_i32_1 = arith.constant 0 : i32
    %c0_i32_2 = arith.constant 0 : i32
    return %c0_i32, %c0_i32_0, %c0_i32_1 : i32, i32, i32
  }
  func.func @transform_8(%arg0: i32) -> (i32, i32) {
    %c0_i32 = arith.constant 0 : i32
    %c0_i32_0 = arith.constant 0 : i32
    %c0_i32_1 = arith.constant 0 : i32
    return %c0_i32, %c0_i32_0 : i32, i32
  }
  func.func @transform_9(%arg0: i32) -> (i32, i32, i32) {
    %c0_i32 = arith.constant 0 : i32
    %c0_i32_0 = arith.constant 0 : i32
    %c0_i32_1 = arith.constant 0 : i32
    return %arg0, %c0_i32, %c0_i32_0 : i32, i32, i32
  }
}

</mosaic_0001>

<bundles_post_ra>
// kernel: cnn_forward.1
= control target key start
LH: loop header
LB: loop body
LE: loop exit
PB: predicated region body
PF: predicated region fallthrough
CT: control target
= control target key end

     0   :  { %14 = vsyncpa [#allocation7], 0  ;;  %s17493_s0 = inlined_call_operand.vmem [shape: bf16[512,128], index: 0, kind: input, shape index: {}]   ;;  %s17494_s1 = inlined_call_operand.vmem [shape: bf16[9,128,128], index: 1, kind: input, shape index: {}]   ;;  %s17495_s2 = inlined_call_operand.vmem [shape: f32[1,128], index: 2, kind: input, shape index: {}]   ;;  %s17496_s3 = inlined_call_operand.vmem [shape: bf16[9,128,128], index: 3, kind: input, shape index: {}]   ;;  %s17497_s4 = inlined_call_operand.vmem [shape: f32[1,128], index: 4, kind: input, shape index: {}]   ;;  %s17498_s5 = inlined_call_operand.vmem [shape: bf16[64,256], index: 5, kind: input, shape index: {}]   ;;  %s17499_s6 = inlined_call_operand.vmem [shape: bf16[16,64], index: 6, kind: input, shape index: {}]   ;;  %s17500_s7 = inlined_call_operand.vmem [shape: bf16[16,128,128], index: 7, kind: input, shape index: {}]   ;;  %s17501_s8 = inlined_call_operand.vmem [shape: f32[1,128], index: 8, kind: input, shape index: {}]   ;;  %s17502_s9 = inlined_call_operand.hbm [shape: f32[2,1,128], index: 9, kind: output, shape index: {}]  }
   0x1   :  { %16 = vsyncpa [#allocation7 + $0x1], 0  ;;  %s13440_s30 = smov 0   ;;  %s13442_s10 = smov 0  }
   0x2   :  { %s13444_s11 = smov 0   ;;  %s13446_s12 = smov 0  }
   0x3 LB: > { %s13461_s13 = sadd.s32 4294967295, %s13386_s12   ;;  %s11047_s14 = sadd.s32 4294967294, %s13386_s12   ;;  %s13386_s12 = sphi %s13446_s12, %s18451_s12   ;;  %s13382_s11 = sphi %s13444_s11, %s18450_s11   ;;  %s13378_s10 = sphi %s13442_s10, %s18449_s10   ;;  %s13374_s30 = sphi %s13440_s30, %s18448_s30  }
   0x4   : > { %s13465_s15 = sadd.s32 1, %s13386_s12   ;;  %s223_s16 = sadd.s32 1, %s13382_s11 }
   0x5   : > { %s220_s17 = ssub.s32 %s13386_s12, %s13465_s15  ;;  %p233_p0 = scmp.ne.s32.totalorder %s13382_s11, %s13378_s10 }
   0x6   : > { %p221_p1 = scmp.eq.s32.totalorder %s220_s17, 0  ;;  %p234_p2 = scmp.eq.s32.totalorder %s13461_s13, 1 }
   0x7   : > { %p239_p3 = scmp.ne.s32.totalorder %s13378_s10, %s13374_s30  ;;  %p240_p4 = scmp.eq.s32.totalorder %s11047_s14, 1 }
   0x8   : > { %s13476_s18 = scalar_select %p221_p1, %s13382_s11, %s223_s16  }
   0x9   : > { %p13478_p5 = por %p234_p2, %p233_p0  ;;  %p13482_p6 = por %p240_p4, %p239_p3 }
   0xa   : > { %p11050_p7 = scmp.ge.s32.totalorder %s13386_s12, 1  ;;  %p291_p8 = scmp.lt.s32.totalorder %s13386_s12, 3 }
   0xc   : > { %p292_p9 = pnand %p11050_p7, %p291_p8 }
   0xe   : > { %295 = sbr.rel (%p292_p9) target bundleno = 1954 (0x7a2), region = 56 }
  0x13   : > { %v12955_v0 = vld [vmem:[%s17494_s1 + $0xb8] sm:$0xff]  ;;  %s11051_s27 = sshll.u32 %s13461_s13, 5  ;;  %v437_v3 = vlaneseq  ;;  %v17524_v5 = vmov 0   ;;  %v12954_v6 = vld [vmem:[%s17494_s1 + $0xb0] sm:$0xff]  ;;  %v12953_v12 = vld [vmem:[%s17494_s1 + $0xa8] sm:$0xff]  ;;  %vm13389_vm0 = vmmov 1   ;;  %s10988_s14 = scalar_lea.hbm %s17502_s9, %s13461_s13 }
  0x14   : > { %v12923_v1 = vld [vmem:[%s17494_s1 + $0x38] sm:$0xff]  ;;  %p327_p10 = scmp.lt.s32.totalorder %s11051_s27, 63  ;;  %336 = vst [vmem:[#allocation2 + $0x4] sm:$0xf] %v17524_v5  ;;  %3812 = vmatpush.bf16.msra.mxu2 %v12955_v0  ;;  %v12922_v7 = vld [vmem:[%s17494_s1 + $0x30] sm:$0xff]  ;;  %v12921_v13 = vld [vmem:[%s17494_s1 + $0x28] sm:$0xff]  ;;  %v13582_v43 = vunpack.c.l.b16 %v17524_v5  ;;  %v13585_v44 = vunpack.c.h.b16 %v17524_v5 }
  0x15   : > { %v12947_v2 = vld [vmem:[%s17494_s1 + $0x78] sm:$0xff]  ;;  %2109 = vmatpush.bf16.msra.mxu0 %v12923_v1  ;;  %337 = vst [vmem:[#allocation2 + $0x8] sm:$0xf] %v17524_v5  ;;  %v13509_v8 = vshrl.u32 %v437_v3, 7  ;;  %v12946_v9 = vld [vmem:[%s17494_s1 + $0x70] sm:$0xff]  ;;  %v12945_v15 = vld [vmem:[%s17494_s1 + $0x68] sm:$0xff] }
  0x16   : > { %v12963_v4 = vld [vmem:[%s17494_s1 + $0xf8] sm:$0xff]  ;;  %2487 = vmatpush.bf16.msra.mxu1 %v12947_v2  ;;  %v12962_v10 = vld [vmem:[%s17494_s1 + $0xf0] sm:$0xff]  ;;  %s18453_s27 = smov (!%p327_p10, %s11051_s27), 63  ;;  %338 = vst [vmem:[#allocation2 + $0xc] sm:$0xf] %v17524_v5  ;;  %v12961_v16 = vld [vmem:[%s17494_s1 + $0xe8] sm:$0xff] }
  0x17   : > { %17688 = vst [vmem:[#allocation9_spill] sm:$0xff] %v13509_v8  ;;  %4379 = vmatpush.bf16.msra.mxu3 %v12963_v4  ;;  %v13520_v11 = vadd.s32 8, %v13509_v8  ;;  %s11052_s26 = sshll.u32 %s18453_s27, 2  ;;  %v13531_v14 = vadd.s32 24, %v13509_v8  ;;  %v12952_v19 = vld [vmem:[%s17494_s1 + $0xa0] sm:$0xff]  ;;  %vm1112_vm1 = vmpackc.low %vm13389_vm0, %vm13389_vm0  ;;  %v12951_v28 = vld [vmem:[%s17494_s1 + $0x98] sm:$0xff] }
  0x18   : > { %339 = vst [vmem:[#allocation2 + $0x10] sm:$0xf] %v17524_v5  ;;  %3813 = vmatpush.bf16.msra.mxu2 %v12954_v6  ;;  %s13542_s25 = scalar_lea.vmem %s17493_s0, %s11052_s26  ;;  %v12920_v20 = vld [vmem:[%s17494_s1 + $0x20] sm:$0xff]  ;;  %v12919_v29 = vld [vmem:[%s17494_s1 + $0x18] sm:$0xff]  ;;  %v1144_v30 = vsel %vm1112_vm1, 65537, %v17524_v5  ;;  %v17693_v45 = vmov 0 }
  0x19   : > { %17689 = vst [vmem:[#allocation10_spill] sm:$0xff] %v13520_v11  ;;  %2110 = vmatpush.bf16.msra.mxu0 %v12922_v7  ;;  %v481_v17 = vand.u32 15, %v13520_v11  ;;  %v495_v18 = vand.u32 15, %v13531_v14  ;;  %v12944_v22 = vld [vmem:[%s17494_s1 + $0x60] sm:$0xff]  ;;  %v375_v26 = vld [vmem:[%s13542_s25 + $0x8] sm:$0xff]   ;;  %v377_v27 = vld [vmem:[%s13542_s25 + $0x10] sm:$0xff]  }
  0x1a   : > { %340 = vst [vmem:[#allocation2 + $0x14] sm:$0xf] %v17524_v5  ;;  %2488 = vmatpush.bf16.msra.mxu1 %v12946_v9  ;;  %v12960_v23 = vld [vmem:[%s17494_s1 + $0xe0] sm:$0xff]  ;;  %v12943_v31 = vld [vmem:[%s17494_s1 + $0x58] sm:$0xff]  ;;  %v1192_v32 = vshrl.u32 %v1144_v30, 16  ;;  %v1188_v37 = vshll.u32 %v1144_v30, 16 }
  0x1b   : > { %341 = vst [vmem:[#allocation2 + $0x18] sm:$0xf] %v17524_v5  ;;  %4380 = vmatpush.bf16.msra.mxu3 %v12962_v10  ;;  %v2674_v21 = vadd.s32 1, %v481_v17  ;;  %v373_v24 = vld [vmem:[%s13542_s25] sm:$0xff]   ;;  %v2676_v25 = vadd.s32 1, %v495_v18  ;;  %v12959_v36 = vld [vmem:[%s17494_s1 + $0xd8] sm:$0xff] }
  0x1c   : > { %17690 = vst [vmem:[#allocation11_spill] sm:$0xff] %v13531_v14  ;;  %3814 = vmatpush.bf16.msra.mxu2 %v12953_v12  ;;  %vm2929_vm5 = vsmask.f32 256  ;;  %vm2930_vm7 = vsmask.f32 4368  ;;  %v2935_v39 = vrot.slane %v1192_v32, 7 }
  0x1d   : > { %342 = vst [vmem:[#allocation2 + $0x1c] sm:$0xf] %v17524_v5  ;;  %2111 = vmatpush.bf16.msra.mxu0 %v12921_v13  ;;  %vm2738_vm2 = vcmp.lt.s32.totalorder %v2674_v21, 16  ;;  %vm2740_vm4 = vcmp.lt.s32.totalorder %v2676_v25, 16  ;;  %vm13589_vm8 = vmor %vm2929_vm5, %vm2930_vm7  ;;  %v12950_v48 = vld [vmem:[%s17494_s1 + $0x90] sm:$0xff]  ;;  %v13607_v53 = vadd.s32 16, %v13509_v8 }
  0x1e   : > { %343 = vst [vmem:[#allocation2 + $0x20] sm:$0xf] %v17524_v5  ;;  %2489 = vmatpush.bf16.msra.mxu1 %v12945_v15  ;;  %vm2866_vm3 = vmpackc.low %vm2738_vm2, %vm2738_vm2  ;;  %v17694_v45 = vsel %vm13589_vm8, 4294967295, %v17693_v45  ;;  %v13593_v46 = vor.u32 %v2935_v39, %v1188_v37  ;;  %v13595_v47 = vrot.slane %v2935_v39, 4  ;;  %v12918_v49 = vld [vmem:[%s17494_s1 + $0x10] sm:$0xff]  ;;  %v13615_v56 = vrot.slane %v1188_v37, 5 }
  0x1f   : > { %4381 = vmatpush.bf16.msra.mxu3 %v12961_v16  ;;  %405 = vst [vmem:[#allocation2 + $0xc] sm:$0xff] %v373_v24   ;;  %v2898_v33 = vsel %vm2866_vm3, 65537, %v17524_v5  ;;  %vm2868_vm6 = vmpackc.low %vm2740_vm4, %vm2740_vm4  ;;  %v12942_v54 = vld [vmem:[%s17494_s1 + $0x50] sm:$0xff]  ;;  %v13617_v57 = vrot.slane %v1192_v32, 4  ;;  %v474_v63 = vand.u32 15, %v13509_v8  ;;  %v12949_v0 = vld [vmem:[%s17494_s1 + $0x88] sm:$0xff] }
  0x20   : > { %407 = vst [vmem:[#allocation2 + $0x14] sm:$0xff] %v375_v26   ;;  %3815 = vmatpush.bf16.msra.mxu2 %v12952_v19  ;;  %v2941_v34 = vshrl.u32 %v2898_v33, 16  ;;  %v2944_v35 = vshll.u32 %v2898_v33, 16  ;;  %v2900_v38 = vsel %vm2868_vm6, 65537, %v17524_v5  ;;  %v12958_v55 = vld [vmem:[%s17494_s1 + $0xd0] sm:$0xff]  ;;  %v3219_v58 = vunpack.c.l.b16 %v13593_v46  ;;  %v12917_v4 = vld [vmem:[%s17494_s1 + $0x8] sm:$0xff] }
  0x21   : > { %409 = vst [vmem:[#allocation2 + $0x1c] sm:$0xff] %v377_v27   ;;  %2112 = vmatpush.bf16.msra.mxu0 %v12920_v20  ;;  %v2959_v41 = vshrl.u32 %v2900_v38, 16  ;;  %v2962_v42 = vshll.u32 %v2900_v38, 16  ;;  %v3220_v59 = vunpack.c.h.b16 %v13593_v46  ;;  %v2640_v1 = vld [vmem:[#allocation2 + $0x4] sm:$0xf]  ;;  %v488_v13 = vand.u32 15, %v13607_v53 }
  0x22   : > { %335 = vst [vmem:[#allocation2] sm:$0xf] %v17524_v5  ;;  %2490 = vmatpush.bf16.msra.mxu1 %v12944_v22  ;;  %v2943_v40 = vrot.slane %v2941_v34, 7  ;;  %vm3223_vm9 = vcmp.ne.s32.totalorder %v3219_v58, %v13582_v43  ;;  %v2641_v6 = vld [vmem:[#allocation2 + $0x8] sm:$0xf]  ;;  %v12948_v24 = vld [vmem:[%s17494_s1 + $0x80] sm:$0xff]  ;;  %v1195_v38 = vor.u32 %v13617_v57, %v13615_v56 }
  0x23   : > { %4382 = vmatpush.bf16.msra.mxu3 %v12960_v23  ;;  %344 = vst [vmem:[#allocation2 + $0x24] sm:$0xf] %v17524_v5  ;;  %v13604_v52 = vrot.slane %v2959_v41, 7  ;;  %vm3224_vm10 = vcmp.ne.s32.totalorder %v3220_v59, %v13585_v44  ;;  %v12941_v15 = vld [vmem:[%s17494_s1 + $0x48] sm:$0xff]  ;;  %v919_v23 = vadd.s32 4294967295, %v474_v63  ;;  %v17701_v25 = vmov 0 }
  0x24   : > { %345 = vst [vmem:[#allocation2 + $0x28] sm:$0xf] %v17524_v5  ;;  %3816 = vmatpush.bf16.msra.mxu2 %v12951_v28  ;;  %v2946_v50 = vor.u32 %v2944_v35, %v2943_v40  ;;  %v2948_v51 = vrot.slane %v2943_v40, 4  ;;  %vm13642_vm11 = vmpackc.low %vm3224_vm10, %vm3223_vm9  ;;  %v12957_v16 = vld [vmem:[%s17494_s1 + $0xc8] sm:$0xff]  ;;  %v12916_v28 = vld [vmem:[%s17494_s1] sm:$0xff]  ;;  %v17703_v30 = vmov 0 }
  0x25   : > { %17691 = vst [vmem:[#allocation12_spill] sm:$0xff] %v13582_v43  ;;  %2113 = vmatpush.bf16.msra.mxu0 %v12919_v29  ;;  %v2964_v62 = vor.u32 %v2962_v42, %v13604_v52  ;;  %v3450_v22 = vsel %vm13642_vm11, %v2640_v1, 0  ;;  %v12940_v29 = vld [vmem:[%s17494_s1 + $0x40] sm:$0xff]  ;;  %vm17504_vm5 = vsmask.f32 7424  ;;  %v921_v39 = vadd.s32 4294967295, %v488_v13 }
  0x26   : > { %17692 = vst [vmem:[#allocation13_spill] sm:$0xff] %v13585_v44  ;;  %2491 = vmatpush.bf16.msra.mxu1 %v12943_v31  ;;  %v2947_v60 = vsel %vm13589_vm8, %v13595_v47, %v2946_v50  ;;  %v2956_v61 = vsel %vm13589_vm8, %v2948_v51, %v13593_v46  ;;  %v2642_v17 = vld [vmem:[#allocation2 + $0xc] sm:$0xf]  ;;  %v2643_v20 = vld [vmem:[#allocation2 + $0x10] sm:$0xf]  ;;  %v3565_v27 = vunpack.c.l.b16 %v3450_v22  ;;  %v12956_v33 = vld [vmem:[%s17494_s1 + $0xc0] sm:$0xff] }
  0x27   : > { %17695 = vst [vmem:[#allocation14_spill] sm:$0xff] %v17694_v45  ;;  %4383 = vmatpush.bf16.msra.mxu3 %v12959_v36  ;;  %v3226_v2 = vunpack.c.l.b16 %v2947_v60  ;;  %v3227_v3 = vunpack.c.h.b16 %v2947_v60  ;;  %v2965_v7 = vsel %vm13589_vm8, %v13595_v47, %v2964_v62  ;;  %v3233_v10 = vunpack.c.l.b16 %v2956_v61  ;;  %v12924_v40 = vld [vmem:[#allocation2 + $0x4] sm:$0xff]  ;;  %s324_s24 = sand.u32 1, %s13378_s10   ;;  %s10992_s27 = sshll.u32 %s10988_s14, 4  ;;  %s10993_s27 = int_to_ptr.hbm [resolvable:$true] %s10992_s27 }
  0x28   : > { %346 = vst [vmem:[#allocation2 + $0x2c] sm:$0xf] %v17524_v5  ;;  %3817 = vmatpush.bf16.msra.mxu2 %v12950_v48  ;;  %v3234_v12 = vunpack.c.h.b16 %v2956_v61  ;;  %v3240_v18 = vunpack.c.l.b16 %v2965_v7  ;;  %v3241_v19 = vunpack.c.h.b16 %v2965_v7  ;;  %vm951_vm6 = vcmp.ge.s32.totalorder %v919_v23, 0  ;;  %v12988_v23 = vld [vmem:[%s17494_s1 + $0x140] sm:$0xff]  ;;  %s325_s16 = scalar_lea.vmem [#allocation6], %s324_s24  ;;  %s10980_s17 = scalar_lea.sflag [#allocation7], %s324_s24 }
  0x29   : > { %17696 = vst [vmem:[#allocation15_spill] sm:$0xff] %v13607_v53  ;;  %2114 = vmatpush.bf16.msra.mxu0 %v12918_v49  ;;  %vm3230_vm12 = vcmp.ne.s32.totalorder %v3226_v2, %v13582_v43  ;;  %vm3231_vm13 = vcmp.ne.s32.totalorder %v3227_v3, %v13585_v44  ;;  %vm3237_vm15 = vcmp.ne.s32.totalorder %v3233_v10, %v13582_v43  ;;  %vm1111_vm7 = vmpackc.low %vm951_vm6, %vm951_vm6  ;;  %vm1175_vm9 = vsmask.f32 3328  ;;  %s10990_s26 = sshll.u32 %s325_s16, 4  ;;  %s13344_s23 = scalar_lea.hbm %s17502_s9, 2  ;;  %s10991_s26 = int_to_ptr.vmem [resolvable:$true] %s10990_s26 }
  0x2a   : > { %347 = vst [vmem:[#allocation2 + $0x30] sm:$0xf] %v17524_v5  ;;  %2492 = vmatpush.bf16.msra.mxu1 %v12942_v54  ;;  %vm13657_vm14 = vmpackc.low %vm3231_vm13, %vm3230_vm12  ;;  %vm3238_vm0 = vcmp.ne.s32.totalorder %v3234_v12, %v13585_v44  ;;  %vm3244_vm2 = vcmp.ne.s32.totalorder %v3240_v18, %v13582_v43  ;;  %vm3245_vm3 = vcmp.ne.s32.totalorder %v3241_v19, %v13585_v44  ;;  %vm953_vm10 = vcmp.ge.s32.totalorder %v921_v39, 0  ;;  %v3966_v39 = vld [vmem:[#allocation2 + $0xc] sm:$0xf] }
  0x2b   : > { %348 = vst [vmem:[#allocation2 + $0x34] sm:$0xf] %v17524_v5  ;;  %4384 = vmatpush.bf16.msra.mxu3 %v12958_v55  ;;  %vm13669_vm1 = vmpackc.low %vm3238_vm0, %vm3237_vm15  ;;  %v3451_v26 = vsel %vm13657_vm14, %v2641_v6, 0  ;;  %v1143_v49 = vsel %vm1111_vm7, 65537, %v17524_v5  ;;  %vm1176_vm12 = vsmask.f32 7440 }
  0x2c   : > { %349 = vst [vmem:[#allocation2 + $0x38] sm:$0xf] %v17524_v5  ;;  %v17702_v25 = vsel %vm13669_vm1, 4294967295, %v17701_v25  ;;  %3818 = vmatpush.bf16.msra.mxu2 %v12949_v0  ;;  %vm13684_vm4 = vmpackc.low %vm3245_vm3, %vm3244_vm2  ;;  %v3452_v31 = vsel %vm13669_vm1, %v2642_v17, 0  ;;  %v3566_v32 = vunpack.c.l.b16 %v3451_v26  ;;  %v1179_v54 = vshll.u32 %v1143_v49, 16 }
  0x2d   : > { %350 = vst [vmem:[#allocation2 + $0x3c] sm:$0xf] %v17524_v5  ;;  %2115 = vmatpush.bf16.msra.mxu0 %v12917_v4  ;;  %v17704_v30 = vsel %vm13684_vm4, 4294967295, %v17703_v30  ;;  %v3453_v34 = vsel %vm13684_vm4, %v2643_v20, 0  ;;  %v3567_v35 = vunpack.c.l.b16 %v3452_v31  ;;  %vm1113_vm13 = vmpackc.low %vm953_vm10, %vm953_vm10  ;;  %v1182_v55 = vshrl.u32 %v1143_v49, 16 }
  0x2e   : > { %351 = vst [vmem:[#allocation2 + $0x40] sm:$0xf] %v17524_v5  ;;  %2493 = vmatpush.bf16.msra.mxu1 %v12941_v15  ;;  %v3568_v36 = vunpack.c.l.b16 %v3453_v34  ;;  %v3598_v37 = vpack.c.b16 %v3566_v32, %v3565_v27  ;;  %v13708_v57 = vrot.slane %v1195_v38, 4  ;;  %v1145_v58 = vsel %vm1113_vm13, 65537, %v17524_v5  ;;  %v886_v6 = vld [vmem:[#allocation2] sm:$0x8]  ;;  %vm13731_vm15 = vmor %vm1175_vm9, %vm1176_vm12 }
  0x2f   : > { %352 = vst [vmem:[#allocation2 + $0x44] sm:$0xf] %v17524_v5  ;;  %4385 = vmatpush.bf16.msra.mxu3 %v12957_v16  ;;  %v13713_v59 = vadd.s32 40, %v13509_v8  ;;  %v2966_v60 = vrot.slane %v13604_v52, 4  ;;  %v1181_v63 = vrot.slane %v1179_v54, 5  ;;  %v1184_v0 = vrot.slane %v1182_v55, 4 }
  0x30   : > { %353 = vst [vmem:[#allocation2 + $0x48] sm:$0xf] %v17524_v5  ;;  %3819 = vmatpush.bf16.msra.mxu2 %v12948_v24  ;;  %v13701_v41 = vpack.c.b16 %v3568_v36, %v3567_v35  ;;  %v3617_v42 = vshrl.u32 %v3598_v37, 16  ;;  %v3619_v48 = vshll.u32 %v3598_v37, 16  ;;  %v1198_v1 = vshll.u32 %v1145_v58, 16 }
  0x31   : > { %354 = vst [vmem:[#allocation2 + $0x4c] sm:$0xf] %v17524_v5  ;;  %2116 = vmatpush.bf16.msra.mxu0 %v12916_v28  ;;  %v1202_v2 = vshrl.u32 %v1145_v58, 16  ;;  %v509_v3 = vand.u32 15, %v13713_v59  ;;  %v13724_v4 = vsel %vm13589_vm8, %v2966_v60, %v13593_v46  ;;  %v17706_v7 = vmov 0 }
  0x32   : > { %355 = vst [vmem:[#allocation2 + $0x50] sm:$0xf] %v17524_v5  ;;  %2494 = vmatpush.bf16.msra.mxu1 %v12940_v29  ;;  %v3621_v50 = vrot.slane %v3619_v48, 1  ;;  %v3624_v51 = vshll.u32 %v13701_v41, 16  ;;  %v17707_v7 = vsel %vm13731_vm15, 4294967295, %v17706_v7  ;;  %v1185_v10 = vor.u32 %v1184_v0, %v1181_v63 }
  0x33   : > { %356 = vst [vmem:[#allocation2 + $0x54] sm:$0xf] %v17524_v5  ;;  %4386 = vmatpush.bf16.msra.mxu3 %v12956_v33  ;;  %v1497_v12 = vunpack.c.l.b16 %v1181_v63  ;;  %v1498_v13 = vunpack.c.h.b16 %v1181_v63  ;;  %v1200_v15 = vrot.slane %v1198_v1, 5  ;;  %v1204_v16 = vrot.slane %v1202_v2, 4  ;;  %v3965_v24 = vld [vmem:[#allocation2 + $0x8] sm:$0x8] }
  0x34   : > { %357 = vst [vmem:[#allocation2 + $0x58] sm:$0xf] %v17524_v5  ;;  %v3622_v61 = vor.u32 %v3621_v50, %v3617_v42  ;;  %v13716_v62 = vrot.slane %v3624_v51, 1  ;;  %v2678_v17 = vadd.s32 1, %v509_v3  ;;  %v1186_v18 = vrot.slane %v1185_v10, 4 }
  0x35   : > { %358 = vst [vmem:[#allocation2 + $0x5c] sm:$0xf] %v17524_v5  ;;  %2495 = vmatmul.bf16.vlgmr.msra.gmra.mxu1 %v12924_v40  ;;  %vm1501_vm0 = vcmp.ne.s32.totalorder %v1497_v12, %v13582_v43  ;;  %vm1502_vm2 = vcmp.ne.s32.totalorder %v1498_v13, %v13585_v44  ;;  %v3247_v19 = vunpack.c.l.b16 %v13724_v4  ;;  %v1201_v20 = vsel %vm13731_vm15, %v13708_v57, %v1200_v15  ;;  %v887_v27 = vld [vmem:[#allocation2 + $0x4] sm:$0xf]  ;;  %v888_v28 = vld [vmem:[#allocation2 + $0x8] sm:$0xf] }
  0x36   : > { %359 = vst [vmem:[#allocation2 + $0x60] sm:$0xf] %v17524_v5  ;;  %v3627_v52 = vsel %vm17504_vm5, %v3622_v61, %v13716_v62  ;;  %v1205_v22 = vor.u32 %v1204_v16, %v1200_v15  ;;  %vm13744_vm3 = vmpackc.low %vm1502_vm2, %vm1501_vm0  ;;  %vm2742_vm6 = vcmp.lt.s32.totalorder %v2678_v17, 16  ;;  %v3248_v26 = vunpack.c.h.b16 %v13724_v4  ;;  %v3967_v38 = vld [vmem:[#allocation2 + $0x10] sm:$0xf] }
  0x37   : > { %360 = vst [vmem:[#allocation2 + $0x64] sm:$0xf] %v17524_v5  ;;  %3820 = vmatmul.bf16.vlgmr.msra.gmra.mxu2 %v3627_v52  ;;  %v1191_v29 = vsel %vm13731_vm15, %v1186_v18, %v13615_v56  ;;  %v1511_v31 = vunpack.c.l.b16 %v1201_v20  ;;  %v1512_v32 = vunpack.c.h.b16 %v1201_v20  ;;  %v1728_v33 = vsel %vm13744_vm3, %v886_v6, 0  ;;  %vm2870_vm7 = vmpackc.low %vm2742_vm6, %vm2742_vm6  ;;  %v889_v51 = vld [vmem:[#allocation2 + $0xc] sm:$0xf] }
  0x38   : > { %17705 = vst [vmem:[#allocation16_spill] sm:$0xff] %v13713_v59  ;;  %v1206_v34 = vrot.slane %v1205_v22, 4  ;;  %v1504_v35 = vunpack.c.l.b16 %v1191_v29  ;;  %v1505_v36 = vunpack.c.h.b16 %v1191_v29  ;;  %v1842_v37 = vunpack.c.l.b16 %v1728_v33  ;;  %v3968_v1 = vld [vmem:[#allocation2 + $0x14] sm:$0xf] }
  0x39   : > { %361 = vst [vmem:[#allocation2 + $0x68] sm:$0xf] %v17524_v5  ;;  %vm1515_vm9 = vcmp.ne.s32.totalorder %v1511_v31, %v13582_v43  ;;  %vm1516_vm10 = vcmp.ne.s32.totalorder %v1512_v32, %v13585_v44  ;;  %v3998_v40 = vsel %vm13744_vm3, %v3965_v24, 0  ;;  %v2902_v42 = vsel %vm2870_vm7, 65537, %v17524_v5 }
  0x3a   : > { %362 = vst [vmem:[#allocation2 + $0x6c] sm:$0xf] %v17524_v5  ;;  %v1211_v48 = vsel %vm13731_vm15, %v1206_v34, %v13615_v56  ;;  %vm1508_vm12 = vcmp.ne.s32.totalorder %v1504_v35, %v13582_v43  ;;  %vm1509_vm13 = vcmp.ne.s32.totalorder %v1505_v36, %v13585_v44  ;;  %vm13768_vm0 = vmpackc.low %vm1516_vm10, %vm1515_vm9  ;;  %v4113_v50 = vunpack.c.l.b16 %v3998_v40 }
  0x3b   : > { %363 = vst [vmem:[#allocation2 + $0x70] sm:$0xf] %v17524_v5  ;;  %vm13773_vm2 = vmpackc.low %vm1509_vm13, %vm1508_vm12  ;;  %v1518_v55 = vunpack.c.l.b16 %v1211_v48  ;;  %v1519_v58 = vunpack.c.h.b16 %v1211_v48  ;;  %v1730_v60 = vsel %vm13768_vm0, %v888_v28, 0  ;;  %v4000_v61 = vsel %vm13768_vm0, %v3967_v38, 0 }
  0x3c   : > { %17708 = vst [vmem:[#allocation17_spill] sm:$0xff] %v17707_v7  ;;  %v1729_v63 = vsel %vm13773_vm2, %v887_v27, 0  ;;  %v1844_v0 = vunpack.c.l.b16 %v1730_v60  ;;  %v3999_v2 = vsel %vm13773_vm2, %v3966_v39, 0  ;;  %vm13787_vm6 = vcmp.ne.s32.totalorder %v3247_v19, %v13582_v43  ;;  %v2644_v19 = vld [vmem:[#allocation2 + $0x14] sm:$0xf] }
  0x3d   : > { %364 = vst [vmem:[#allocation2 + $0x74] sm:$0xf] %v17524_v5  ;;  %vm1522_vm7 = vcmp.ne.s32.totalorder %v1518_v55, %v13582_v43  ;;  %vm1523_vm9 = vcmp.ne.s32.totalorder %v1519_v58, %v13585_v44  ;;  %v1843_v4 = vunpack.c.l.b16 %v1729_v63  ;;  %v4114_v52 = vunpack.c.l.b16 %v3999_v2 }
  0x3e   : > { %365 = vst [vmem:[#allocation2 + $0x78] sm:$0xf] %v17524_v5  ;;  %vm13795_vm10 = vmpackc.low %vm1523_vm9, %vm1522_vm7  ;;  %v4115_v10 = vunpack.c.l.b16 %v4000_v61  ;;  %v2977_v12 = vshrl.u32 %v2902_v42, 16  ;;  %v2980_v13 = vshll.u32 %v2902_v42, 16  ;;  %vm3252_vm12 = vcmp.ne.s32.totalorder %v3248_v26, %v13585_v44 }
  0x3f   : > { %366 = vst [vmem:[#allocation2 + $0x7c] sm:$0xf] %v17524_v5  ;;  %v1731_v15 = vsel %vm13795_vm10, %v889_v51, 0  ;;  %v1875_v16 = vpack.c.b16 %v1843_v4, %v1842_v37  ;;  %vm17503_vm13 = vsmask.f32 4352  ;;  %v4001_v17 = vsel %vm13795_vm10, %v3968_v1, 0  ;;  %vm13807_vm7 = vmpackc.low %vm3252_vm12, %vm13787_vm6 }
  0x40   : > { %367 = vst [vmem:[#allocation2 + $0x80] sm:$0xf] %v17524_v5  ;;  %v4146_v18 = vpack.c.b16 %v4114_v52, %v4113_v50  ;;  %v17719_v20 = vmov 0  ;;  %v1845_v22 = vunpack.c.l.b16 %v1731_v15  ;;  %v4116_v24 = vunpack.c.l.b16 %v4001_v17  ;;  %v2645_v17 = vld [vmem:[#allocation2 + $0x18] sm:$0xf] }
  0x41   : > { %368 = vst [vmem:[#allocation2 + $0x84] sm:$0xf] %v17524_v5  ;;  %v17720_v20 = vsel %vm13807_vm7, 4294967295, %v17719_v20  ;;  %v2979_v26 = vrot.slane %v2977_v12, 7  ;;  %v3628_v27 = vshrl.u32 %v13701_v41, 16  ;;  %v1894_v28 = vshrl.u32 %v1875_v16, 16 }
  0x42   : > { %369 = vst [vmem:[#allocation2 + $0x88] sm:$0xf] %v17524_v5  ;;  %v1897_v29 = vshll.u32 %v1875_v16, 16  ;;  %v4164_v31 = vshrl.u32 %v4146_v18, 16  ;;  %v4167_v32 = vshll.u32 %v4146_v18, 16  ;;  %v1876_v33 = vpack.c.b16 %v1845_v22, %v1844_v0 }
  0x43   : > { %370 = vst [vmem:[#allocation2 + $0x8c] sm:$0xf] %v17524_v5  ;;  %v4147_v34 = vpack.c.b16 %v4116_v24, %v4115_v10  ;;  %v2982_v35 = vor.u32 %v2980_v13, %v2979_v26  ;;  %v3454_v36 = vsel %vm13807_vm7, %v2644_v19, 0  ;;  %v1896_v37 = vrot.slane %v1894_v28, 3  ;;  %v12925_v10 = vld [vmem:[#allocation2 + $0xc] sm:$0xff]  ;;  %v379_v13 = vld [vmem:[%s13542_s25 + $0x18] sm:$0xff]  }
  0x44   : > { %371 = vst [vmem:[#allocation2 + $0x90] sm:$0xf] %v17524_v5  ;;  %v1899_v38 = vrot.slane %v1897_v29, 4  ;;  %v4166_v39 = vrot.slane %v4164_v31, 3  ;;  %v4169_v40 = vrot.slane %v4167_v32, 4  ;;  %v1902_v42 = vshrl.u32 %v1876_v33, 16 }
  0x45   : > { %372 = vst [vmem:[#allocation2 + $0x94] sm:$0xf] %v17524_v5  ;;  %v1905_v48 = vshll.u32 %v1876_v33, 16  ;;  %v4172_v50 = vshrl.u32 %v4147_v34, 16  ;;  %v4175_v51 = vshll.u32 %v4147_v34, 16  ;;  %v2983_v60 = vsel %vm13589_vm8, %v13595_v47, %v2982_v35  ;;  %2500 = vmatmul.bf16.gmra.mxu1 %v12925_v10 }
  0x46   : > { %7365 = vst [vmem:[#allocation4] sm:$0xf] %v17524_v5  ;;  %v1900_v55 = vor.u32 %v1899_v38, %v1896_v37  ;;  %v4170_v58 = vor.u32 %v4169_v40, %v4166_v39  ;;  %v3569_v61 = vunpack.c.l.b16 %v3454_v36  ;;  %v1904_v63 = vrot.slane %v1902_v42, 3 }
  0x47   : > { %7366 = vst [vmem:[#allocation4 + $0x4] sm:$0xf] %v17524_v5  ;;  %v1907_v0 = vrot.slane %v1905_v48, 4  ;;  %v4174_v1 = vrot.slane %v4172_v50, 3  ;;  %v4177_v2 = vrot.slane %v4175_v51, 4  ;;  %v3254_v3 = vunpack.c.l.b16 %v2983_v60 }
  0x48   : > { %7367 = vst [vmem:[#allocation4 + $0x8] sm:$0xf] %v17524_v5  ;;  %v3255_v4 = vunpack.c.h.b16 %v2983_v60  ;;  %v13826_v52 = vadd.s32 32, %v13509_v8  ;;  %v13829_v12 = vadd.s32 56, %v13509_v8  ;;  %v2984_v18 = vrot.slane %v2979_v26, 4 }
  0x49   : > { %7368 = vst [vmem:[#allocation4 + $0xc] sm:$0xf] %v17524_v5  ;;  %v13833_v15 = vor.u32 %v1907_v0, %v1904_v63  ;;  %v13835_v16 = vor.u32 %v4177_v2, %v4174_v1  ;;  %v13838_v19 = vadd.s32 48, %v13509_v8  ;;  %vm3258_vm6 = vcmp.ne.s32.totalorder %v3254_v3, %v13582_v43  ;;  %v2646_v51 = vld [vmem:[#allocation2 + $0x1c] sm:$0xf] }
  0x4a   : > { %7369 = vst [vmem:[#allocation4 + $0x10] sm:$0xf] %v17524_v5  ;;  %vm3259_vm9 = vcmp.ne.s32.totalorder %v3255_v4, %v13585_v44  ;;  %v502_v22 = vand.u32 15, %v13826_v52  ;;  %v523_v24 = vand.u32 15, %v13829_v12  ;;  %v17724_v26 = vmov 0 }
  0x4b   : > { %7370 = vst [vmem:[#allocation4 + $0x14] sm:$0xf] %v17524_v5  ;;  %v1909_v28 = vsel %vm17503_vm13, %v1900_v55, %v13833_v15  ;;  %v4179_v29 = vsel %vm17503_vm13, %v4170_v58, %v13835_v16  ;;  %vm13848_vm12 = vmpackc.low %vm3259_vm9, %vm3258_vm6  ;;  %v2992_v31 = vsel %vm13589_vm8, %v2984_v18, %v13593_v46  ;;  %v516_v32 = vand.u32 15, %v13838_v19  ;;  %v13019_v9 = vld [vmem:[#allocation2 + $0x8c] sm:$0xff] }
  0x4c   : > { %7371 = vst [vmem:[#allocation4 + $0x18] sm:$0xf] %v17524_v5  ;;  %v17725_v26 = vsel %vm13848_vm12, 4294967295, %v17724_v26  ;;  %2117 = vmatmul.bf16.vlgmr.msra.gmra.mxu0 %v1909_v28  ;;  %4387 = vmatmul.bf16.vlgmr.msra.gmra.mxu3 %v4179_v29  ;;  %v3455_v33 = vsel %vm13848_vm12, %v2645_v17, 0  ;;  %v923_v34 = vadd.s32 4294967295, %v502_v22  ;;  %v2680_v35 = vadd.s32 1, %v523_v24 }
  0x4d   : > { %7372 = vst [vmem:[#allocation4 + $0x1c] sm:$0xf] %v17524_v5  ;;  %v3261_v36 = vunpack.c.l.b16 %v2992_v31  ;;  %v3570_v37 = vunpack.c.l.b16 %v3455_v33  ;;  %v3262_v38 = vunpack.c.h.b16 %v2992_v31  ;;  %v925_v39 = vadd.s32 4294967295, %v516_v32 }
  0x4e   : > { %7373 = vst [vmem:[#allocation4 + $0x20] sm:$0xf] %v17524_v5  ;;  %v447_v40 = vadd.s32 72, %v13509_v8  ;;  %vm955_vm6 = vcmp.ge.s32.totalorder %v923_v34, 0  ;;  %vm2744_vm9 = vcmp.lt.s32.totalorder %v2680_v35, 16  ;;  %v446_v48 = vadd.s32 64, %v13509_v8 }
  0x4f   : > { %7374 = vst [vmem:[#allocation4 + $0x24] sm:$0xf] %v17524_v5  ;;  %vm13860_vm13 = vcmp.ne.s32.totalorder %v3261_v36, %v13582_v43  ;;  %v3600_v50 = vpack.c.b16 %v3570_v37, %v3569_v61  ;;  %vm1115_vm5 = vmpackc.low %vm955_vm6, %vm955_vm6  ;;  %vm3266_vm12 = vcmp.ne.s32.totalorder %v3262_v38, %v13585_v44  ;;  %vm957_vm7 = vcmp.ge.s32.totalorder %v925_v39, 0  ;;  %v381_v35 = vld [vmem:[%s13542_s25 + $0x20] sm:$0xff]   ;;  %v890_v36 = vld [vmem:[#allocation2 + $0x10] sm:$0xf] }
  0x50   : > { %7375 = vst [vmem:[#allocation4 + $0x28] sm:$0xf] %v17524_v5  ;;  %v3630_v55 = vor.u32 %v3628_v27, %v13716_v62  ;;  %v1147_v58 = vsel %vm1115_vm5, 65537, %v17524_v5  ;;  %vm2872_vm4 = vmpackc.low %vm2744_vm9, %vm2744_vm9  ;;  %v537_v60 = vand.u32 15, %v447_v40  ;;  %v530_v63 = vand.u32 15, %v446_v48 }
  0x51   : > { %17721 = vst [vmem:[#allocation18_spill] sm:$0xff] %v13826_v52  ;;  %v3632_v0 = vshll.u32 %v3600_v50, 16  ;;  %v1218_v1 = vshll.u32 %v1147_v58, 16  ;;  %v1222_v2 = vshrl.u32 %v1147_v58, 16  ;;  %v2904_v3 = vsel %vm2872_vm4, 65537, %v17524_v5  ;;  %vm13873_vm6 = vmpackc.low %vm3266_vm12, %vm13860_vm13 }
  0x52   : > { %17722 = vst [vmem:[#allocation19_spill] sm:$0xff] %v13829_v12  ;;  %v17728_v61 = vmov 0  ;;  %v2995_v4 = vshrl.u32 %v2904_v3, 16  ;;  %v2998_v10 = vshll.u32 %v2904_v3, 16  ;;  %v3456_v41 = vsel %vm13873_vm6, %v2646_v51, 0  ;;  %vm1117_vm5 = vmpackc.low %vm957_vm7, %vm957_vm7 }
  0x53   : > { %7376 = vst [vmem:[#allocation4 + $0x2c] sm:$0xf] %v17524_v5  ;;  %v17729_v61 = vsel %vm13873_vm6, 4294967295, %v17728_v61  ;;  %v3636_v62 = vshrl.u32 %v3600_v50, 16  ;;  %v3634_v27 = vrot.slane %v3632_v0, 1  ;;  %v1224_v17 = vrot.slane %v1222_v2, 4 }
  0x54   : > { %17723 = vst [vmem:[#allocation20_spill] sm:$0xff] %v13838_v19  ;;  %v13879_v18 = vunpack.c.l.b16 %v3456_v41  ;;  %v13881_v22 = vrot.slane %v2995_v4, 7  ;;  %v1149_v24 = vsel %vm1117_vm5, 65537, %v17524_v5  ;;  %v2682_v28 = vadd.s32 1, %v537_v60  ;;  %v3969_v48 = vld [vmem:[#allocation2 + $0x18] sm:$0xf] }
  0x55   : > { %411 = vst [vmem:[#allocation2 + $0x24] sm:$0xff] %v379_v13   ;;  %v1220_v13 = vrot.slane %v1218_v1, 5  ;;  %v13884_v29 = vadd.s32 4294967295, %v530_v63  ;;  %vm17730_vm4 = vsmask.f32 7424  ;;  %v13890_v34 = vor.u32 %v3636_v62, %v3634_v27  ;;  %v12926_v60 = vld [vmem:[#allocation2 + $0x14] sm:$0xff] }
  0x56   : > { %v3635_v31 = vsel %vm17730_vm4, %v3630_v55, %v3634_v27  ;;  %v3000_v39 = vor.u32 %v2998_v10, %v13881_v22  ;;  %v1238_v40 = vshll.u32 %v1149_v24, 16  ;;  %413 = vst [vmem:[#allocation2 + $0x2c] sm:$0xff] %v381_v35   ;;  %v1242_v50 = vshrl.u32 %v1149_v24, 16  ;;  %v2647_v27 = vld [vmem:[#allocation2 + $0x20] sm:$0xf]  ;;  %2505 = vmatmul.bf16.gmra.mxu1 %v12926_v60 }
  0x57   : > { %v1221_v32 = vsel %vm13731_vm15, %v13708_v57, %v1220_v13  ;;  %v1225_v33 = vor.u32 %v1224_v17, %v1220_v13  ;;  %3825 = vmatmul.bf16.gmra.mxu2 %v3635_v31  ;;  %vm2746_vm13 = vcmp.lt.s32.totalorder %v2682_v28, 16  ;;  %v3002_v51 = vrot.slane %v13881_v22, 4  ;;  %v891_v17 = vld [vmem:[#allocation2 + $0x14] sm:$0xf]  ;;  %v3970_v24 = vld [vmem:[#allocation2 + $0x1c] sm:$0xf] }
  0x58   : > { %v1525_v37 = vunpack.c.l.b16 %v1221_v32  ;;  %v1526_v38 = vunpack.c.h.b16 %v1221_v32  ;;  %v3001_v55 = vsel %vm13589_vm8, %v13595_v47, %v3000_v39  ;;  %v1240_v58 = vrot.slane %v1238_v40, 5  ;;  %vm13913_vm5 = vmpackc.low %vm2746_vm13, %vm2746_vm13  ;;  %v892_v60 = vld [vmem:[#allocation2 + $0x18] sm:$0xf] }
  0x59   : > { %v1226_v42 = vrot.slane %v1225_v33, 4  ;;  %v17731_v0 = vmov 0  ;;  %v3268_v1 = vunpack.c.l.b16 %v3001_v55  ;;  %v3269_v2 = vunpack.c.h.b16 %v3001_v55 }
  0x5a   : > { %vm1529_vm7 = vcmp.ne.s32.totalorder %v1525_v37, %v13582_v43  ;;  %vm1530_vm12 = vcmp.ne.s32.totalorder %v1526_v38, %v13585_v44  ;;  %v1244_v3 = vrot.slane %v1242_v50, 4  ;;  %v17735_v32 = vmov 0 }
  0x5b   : > { %v1231_v63 = vsel %vm13731_vm15, %v1226_v42, %v13615_v56  ;;  %vm13903_vm9 = vmpackc.low %vm1530_vm12, %vm1529_vm7  ;;  %vm3272_vm4 = vcmp.ne.s32.totalorder %v3268_v1, %v13582_v43  ;;  %vm3273_vm7 = vcmp.ne.s32.totalorder %v3269_v2, %v13585_v44  ;;  %v1241_v28 = vsel %vm13731_vm15, %v13708_v57, %v1240_v58 }
  0x5c   : > { %v17732_v0 = vsel %vm13903_vm9, 4294967295, %v17731_v0  ;;  %v1532_v4 = vunpack.c.l.b16 %v1231_v63  ;;  %v1533_v10 = vunpack.c.h.b16 %v1231_v63  ;;  %v1732_v41 = vsel %vm13903_vm9, %v890_v36, 0  ;;  %v3971_v63 = vld [vmem:[#allocation2 + $0x20] sm:$0xf] }
  0x5d   : > { %v4002_v62 = vsel %vm13903_vm9, %v3969_v48, 0  ;;  %v1846_v22 = vunpack.c.l.b16 %v1732_v41  ;;  %vm13921_vm9 = vmpackc.low %vm3273_vm7, %vm3272_vm4  ;;  %v1245_v33 = vor.u32 %v1244_v3, %v1240_v58  ;;  %v17737_v35 = vmov 0 }
  0x5e   : > { %v4117_v31 = vunpack.c.l.b16 %v4002_v62  ;;  %vm1536_vm12 = vcmp.ne.s32.totalorder %v1532_v4, %v13582_v43  ;;  %vm1537_vm6 = vcmp.ne.s32.totalorder %v1533_v10, %v13585_v44  ;;  %v17736_v32 = vsel %vm13921_vm9, 4294967295, %v17735_v32 }
  0x5f   : > { %vm13928_vm13 = vmpackc.low %vm1537_vm6, %vm1536_vm12  ;;  %v3457_v36 = vsel %vm13921_vm9, %v2647_v27, 0  ;;  %v1539_v37 = vunpack.c.l.b16 %v1241_v28  ;;  %v1540_v38 = vunpack.c.h.b16 %v1241_v28  ;;  %v13937_v39 = vsel %vm13913_vm5, 65537, %v17524_v5 }
  0x60   : > { %v17738_v35 = vsel %vm13928_vm13, 4294967295, %v17737_v35  ;;  %v1733_v40 = vsel %vm13928_vm13, %v891_v17, 0  ;;  %v4003_v42 = vsel %vm13928_vm13, %v3970_v24, 0  ;;  %v3572_v48 = vunpack.c.l.b16 %v3457_v36  ;;  %v893_v17 = vld [vmem:[#allocation2 + $0x1c] sm:$0xf] }
  0x61   : > { %v1246_v50 = vrot.slane %v1245_v33, 4  ;;  %v1847_v55 = vunpack.c.l.b16 %v1733_v40  ;;  %v4118_v58 = vunpack.c.l.b16 %v4003_v42  ;;  %vm1543_vm6 = vcmp.ne.s32.totalorder %v1539_v37, %v13582_v43 }
  0x62   : > { %vm1544_vm4 = vcmp.ne.s32.totalorder %v1540_v38, %v13585_v44  ;;  %v13946_v1 = vpack.c.b16 %v3572_v48, %v13879_v18  ;;  %v17739_v3 = vmov 0  ;;  %v3010_v4 = vsel %vm13589_vm8, %v3002_v51, %v13593_v46 }
  0x63   : > { %v1251_v2 = vsel %vm13731_vm15, %v1246_v50, %v13615_v56  ;;  %vm13951_vm5 = vmpackc.low %vm1544_vm4, %vm1543_vm6  ;;  %v3013_v10 = vshrl.u32 %v13937_v39, 16  ;;  %v1877_v41 = vpack.c.b16 %v1847_v55, %v1846_v22  ;;  %v4148_v62 = vpack.c.b16 %v4118_v58, %v4117_v31  ;;  %v3972_v22 = vld [vmem:[#allocation2 + $0x24] sm:$0xf] }
  0x64   : > { %v17740_v3 = vsel %vm13951_vm5, 4294967295, %v17739_v3  ;;  %v1546_v27 = vunpack.c.l.b16 %v1251_v2  ;;  %v1547_v13 = vunpack.c.h.b16 %v1251_v2  ;;  %v3640_v18 = vshll.u32 %v13946_v1, 16 }
  0x65   : > { %v1734_v24 = vsel %vm13951_vm5, %v892_v60, 0  ;;  %v4004_v28 = vsel %vm13951_vm5, %v3971_v63, 0  ;;  %v13964_v33 = vrot.slane %v3013_v10, 7  ;;  %v1911_v36 = vshrl.u32 %v1877_v41, 16  ;;  %v383_v60 = vld [vmem:[%s13542_s25 + $0x28] sm:$0xff]  }
  0x66   : > { %v1914_v51 = vshll.u32 %v1877_v41, 16  ;;  %v4181_v37 = vshrl.u32 %v4148_v62, 16  ;;  %v4184_v38 = vshll.u32 %v4148_v62, 16  ;;  %v3642_v31 = vrot.slane %v3640_v18, 1  ;;  %415 = vst [vmem:[#allocation2 + $0x34] sm:$0xff] %v383_v60  }
  0x67   : > { %vm1550_vm7 = vcmp.ne.s32.totalorder %v1546_v27, %v13582_v43  ;;  %vm1551_vm12 = vcmp.ne.s32.totalorder %v1547_v13, %v13585_v44  ;;  %v1848_v40 = vunpack.c.l.b16 %v1734_v24  ;;  %v1913_v42 = vrot.slane %v1911_v36, 3 }
  0x68   : > { %v1916_v48 = vrot.slane %v1914_v51, 4  ;;  %v4183_v50 = vrot.slane %v4181_v37, 3  ;;  %v4186_v55 = vrot.slane %v4184_v38, 4  ;;  %vm13968_vm6 = vmpackc.low %vm1551_vm12, %vm1550_vm7  ;;  %v17741_v58 = vmov 0 }
  0x69   : > { %v17742_v58 = vsel %vm13968_vm6, 4294967295, %v17741_v58  ;;  %vm17743_vm4 = vsmask.f32 7424  ;;  %v1735_v2 = vsel %vm13968_vm6, %v893_v17, 0  ;;  %v4005_v10 = vsel %vm13968_vm6, %v3972_v22, 0 }
  0x6a   : > { %v3643_v63 = vsel %vm17743_vm4, %v13890_v34, %v3642_v31  ;;  %v4119_v41 = vunpack.c.l.b16 %v4004_v28  ;;  %v1917_v62 = vor.u32 %v1916_v48, %v1913_v42  ;;  %v4187_v27 = vor.u32 %v4186_v55, %v4183_v50  ;;  %v12927_v34 = vld [vmem:[#allocation2 + $0x1c] sm:$0xff]  ;;  %v2648_v42 = vld [vmem:[#allocation2 + $0x24] sm:$0xf] }
  0x6b   : > { %3830 = vmatmul.bf16.gmra.mxu2 %v3643_v63  ;;  %v1849_v13 = vunpack.c.l.b16 %v1735_v2  ;;  %v4120_v18 = vunpack.c.l.b16 %v4005_v10  ;;  %v3016_v24 = vshll.u32 %v13937_v39, 16  ;;  %v3275_v36 = vunpack.c.l.b16 %v3010_v4  ;;  %2510 = vmatmul.bf16.gmra.mxu1 %v12927_v34  ;;  %v2649_v34 = vld [vmem:[#allocation2 + $0x28] sm:$0xf] }
  0x6c   : > { %v3276_v51 = vunpack.c.h.b16 %v3010_v4  ;;  %v3644_v37 = vshrl.u32 %v13946_v1, 16  ;;  %vm17744_vm7 = vsmask.f32 4352  ;;  %vm959_vm6 = vcmp.ge.s32.totalorder %v13884_v29, 0 }
  0x6d   : > { %v1918_v17 = vsel %vm17744_vm7, %v13833_v15, %v1917_v62  ;;  %vm17745_vm12 = vmmov %vm17744_vm7  ;;  %v1878_v28 = vpack.c.b16 %v1849_v13, %v1848_v40  ;;  %v4149_v22 = vpack.c.b16 %v4120_v18, %v4119_v41  ;;  %v3018_v48 = vor.u32 %v3016_v24, %v13964_v33 }
  0x6e   : > { %v4188_v38 = vsel %vm17745_vm12, %v13835_v16, %v4187_v27  ;;  %2122 = vmatmul.bf16.gmra.mxu0 %v1918_v17  ;;  %vm3279_vm4 = vcmp.ne.s32.totalorder %v3275_v36, %v13582_v43  ;;  %vm3280_vm9 = vcmp.ne.s32.totalorder %v3276_v51, %v13585_v44  ;;  %v17746_v50 = vmov 0  ;;  %vm1119_vm12 = vmpackc.low %vm959_vm6, %vm959_vm6 }
  0x6f   : > { %4392 = vmatmul.bf16.gmra.mxu3 %v4188_v38  ;;  %v1920_v39 = vshrl.u32 %v1878_v28, 16  ;;  %v1923_v1 = vshll.u32 %v1878_v28, 16  ;;  %v4190_v4 = vshrl.u32 %v4149_v22, 16  ;;  %v4193_v15 = vshll.u32 %v4149_v22, 16  ;;  %vm13989_vm7 = vmpackc.low %vm3280_vm9, %vm3279_vm4 }
  0x70   : > { %v17747_v50 = vsel %vm13989_vm7, 4294967295, %v17746_v50  ;;  %v3019_v16 = vsel %vm13589_vm8, %v13595_v47, %v3018_v48  ;;  %v3458_v40 = vsel %vm13989_vm7, %v2648_v42, 0  ;;  %v13998_v55 = vor.u32 %v3644_v37, %v3642_v31 }
  0x71   : > { %v449_v29 = vadd.s32 88, %v13509_v8  ;;  %v1922_v60 = vrot.slane %v1920_v39, 3  ;;  %v1925_v63 = vrot.slane %v1923_v1, 4  ;;  %v4192_v2 = vrot.slane %v4190_v4, 3 }
  0x72   : > { %v4195_v10 = vrot.slane %v4193_v15, 4  ;;  %v3282_v41 = vunpack.c.l.b16 %v3019_v16  ;;  %v3283_v13 = vunpack.c.h.b16 %v3019_v16  ;;  %v3573_v18 = vunpack.c.l.b16 %v3458_v40 }
  0x73   : > { %v1151_v24 = vsel %vm1119_vm12, 65537, %v17524_v5  ;;  %v14002_v36 = vor.u32 %v1925_v63, %v1922_v60  ;;  %v551_v37 = vand.u32 15, %v449_v29  ;;  %v3020_v38 = vrot.slane %v13964_v33, 4 }
  0x74   : > { %v14004_v51 = vor.u32 %v4195_v10, %v4192_v2  ;;  %v1258_v17 = vshll.u32 %v1151_v24, 16  ;;  %v1262_v31 = vshrl.u32 %v1151_v24, 16  ;;  %vm3286_vm9 = vcmp.ne.s32.totalorder %v3282_v41, %v13582_v43  ;;  %v894_v10 = vld [vmem:[#allocation2 + $0x20] sm:$0xf] }
  0x75   : > { %vm3287_vm6 = vcmp.ne.s32.totalorder %v3283_v13, %v13585_v44  ;;  %vm17748_vm4 = vsmask.f32 4352  ;;  %v17750_v42 = vmov 0  ;;  %v2684_v4 = vadd.s32 1, %v551_v37  ;;  %v3973_v13 = vld [vmem:[#allocation2 + $0x28] sm:$0xf] }
  0x76   : > { %v1927_v28 = vsel %vm17748_vm4, %v1917_v62, %v14002_v36  ;;  %vm17749_vm7 = vmmov %vm17748_vm4  ;;  %v1260_v48 = vrot.slane %v1258_v17, 5  ;;  %v1264_v39 = vrot.slane %v1262_v31, 4  ;;  %v3028_v33 = vsel %vm13589_vm8, %v3020_v38, %v13593_v46  ;;  %v2650_v38 = vld [vmem:[#allocation2 + $0x2c] sm:$0xf] }
  0x77   : > { %v4197_v22 = vsel %vm17749_vm7, %v4187_v27, %v14004_v51  ;;  %vm14013_vm12 = vmpackc.low %vm3287_vm6, %vm3286_vm9  ;;  %v448_v15 = vadd.s32 80, %v13509_v8  ;;  %v3289_v40 = vunpack.c.l.b16 %v3028_v33  ;;  %vm2748_vm7 = vcmp.lt.s32.totalorder %v2684_v4, 16 }
  0x78   : > { %v17751_v42 = vsel %vm14013_vm12, 4294967295, %v17750_v42  ;;  %v3459_v1 = vsel %vm14013_vm12, %v2649_v34, 0  ;;  %v1261_v27 = vsel %vm13731_vm15, %v13708_v57, %v1260_v48  ;;  %v1265_v16 = vor.u32 %v1264_v39, %v1260_v48  ;;  %vm2876_vm9 = vmpackc.low %vm2748_vm7, %vm2748_vm7 }
  0x79   : > { %v3574_v62 = vunpack.c.l.b16 %v3459_v1  ;;  %v1553_v29 = vunpack.c.l.b16 %v1261_v27  ;;  %v1554_v60 = vunpack.c.h.b16 %v1261_v27  ;;  %v3290_v63 = vunpack.c.h.b16 %v3028_v33  ;;  %v12928_v27 = vld [vmem:[#allocation2 + $0x24] sm:$0xff] }
  0x7a   : > { %v1266_v41 = vrot.slane %v1265_v16, 4  ;;  %vm14027_vm6 = vcmp.ne.s32.totalorder %v3289_v40, %v13582_v43  ;;  %v544_v34 = vand.u32 15, %v448_v15  ;;  %v2908_v17 = vsel %vm2876_vm9, 65537, %v17524_v5  ;;  %v895_v40 = vld [vmem:[#allocation2 + $0x24] sm:$0xf] }
  0x7b   : > { %v3602_v2 = vpack.c.b16 %v3574_v62, %v3573_v18  ;;  %vm1557_vm4 = vcmp.ne.s32.totalorder %v1553_v29, %v13582_v43  ;;  %vm1558_vm12 = vcmp.ne.s32.totalorder %v1554_v60, %v13585_v44  ;;  %vm3294_vm5 = vcmp.ne.s32.totalorder %v3290_v63, %v13585_v44  ;;  %v3974_v60 = vld [vmem:[#allocation2 + $0x2c] sm:$0xf]  ;;  %2515 = vmatmul.bf16.gmra.mxu1 %v12928_v27 }
  0x7c   : > { %v1271_v18 = vsel %vm13731_vm15, %v1266_v41, %v13615_v56  ;;  %vm14038_vm7 = vmpackc.low %vm1558_vm12, %vm1557_vm4  ;;  %v17754_v37 = vmov 0  ;;  %v3031_v48 = vshrl.u32 %v2908_v17, 16  ;;  %v3034_v39 = vshll.u32 %v2908_v17, 16 }
  0x7d   : > { %v3648_v31 = vshll.u32 %v3602_v2, 16  ;;  %v17755_v37 = vsel %vm14038_vm7, 4294967295, %v17754_v37  ;;  %v1560_v1 = vunpack.c.l.b16 %v1271_v18  ;;  %v1561_v4 = vunpack.c.h.b16 %v1271_v18  ;;  %vm14048_vm9 = vmpackc.low %vm3294_vm5, %vm14027_vm6 }
  0x7e   : > { %v1736_v33 = vsel %vm14038_vm7, %v894_v10, 0  ;;  %v4006_v15 = vsel %vm14038_vm7, %v3973_v13, 0  ;;  %v17756_v62 = vmov 0  ;;  %v14052_v41 = vrot.slane %v3031_v48, 7  ;;  %2127 = vmatmul.bf16.gmra.mxu0 %v1927_v28 }
  0x7f   : > { %v17757_v62 = vsel %vm14048_vm9, 4294967295, %v17756_v62  ;;  %v3650_v16 = vrot.slane %v3648_v31, 1  ;;  %v1850_v29 = vunpack.c.l.b16 %v1736_v33  ;;  %v4121_v63 = vunpack.c.l.b16 %v4006_v15  ;;  %4397 = vmatmul.bf16.gmra.mxu3 %v4197_v22  ;;  %v385_v22 = vld [vmem:[%s13542_s25 + $0x30] sm:$0xff]  }
  0x80   : > { %17758 = vst [vmem:[#allocation21_spill] sm:$0xff] %v17757_v62  ;;  %vm1564_vm12 = vcmp.ne.s32.totalorder %v1560_v1, %v13582_v43  ;;  %vm1565_vm4 = vcmp.ne.s32.totalorder %v1561_v4, %v13585_v44  ;;  %v3460_v10 = vsel %vm14048_vm9, %v2650_v38, 0  ;;  %v3652_v13 = vshrl.u32 %v3602_v2, 16 }
  0x81   : > { %vm17759_vm5 = vsmask.f32 7424  ;;  %vm14060_vm6 = vmpackc.low %vm1565_vm4, %vm1564_vm12  ;;  %v17760_v17 = vmov 0  ;;  %v3036_v31 = vor.u32 %v3034_v39, %v14052_v41  ;;  %v3575_v18 = vunpack.c.l.b16 %v3460_v10  ;;  %417 = vst [vmem:[#allocation2 + $0x3c] sm:$0xff] %v385_v22  }
  0x82   : > { %v3651_v24 = vsel %vm17759_vm5, %v13998_v55, %v3650_v16  ;;  %v17761_v17 = vsel %vm14060_vm6, 4294967295, %v17760_v17  ;;  %v929_v28 = vadd.s32 4294967295, %v544_v34  ;;  %v1737_v48 = vsel %vm14060_vm6, %v895_v40, 0 }
  0x83   : > { %3835 = vmatmul.bf16.gmra.mxu2 %v3651_v24  ;;  %v4007_v2 = vsel %vm14060_vm6, %v3974_v60, 0  ;;  %v14070_v38 = vor.u32 %v3652_v13, %v3650_v16  ;;  %v451_v55 = vadd.s32 104, %v13509_v8  ;;  %v1851_v1 = vunpack.c.l.b16 %v1737_v48  ;;  %v2651_v16 = vld [vmem:[#allocation2 + $0x30] sm:$0xf] }
  0x84   : > { %v4122_v4 = vunpack.c.l.b16 %v4007_v2  ;;  %v3037_v34 = vsel %vm13589_vm8, %v13595_v47, %v3036_v31  ;;  %vm961_vm12 = vcmp.ge.s32.totalorder %v929_v28, 0  ;;  %v3038_v27 = vrot.slane %v14052_v41, 4 }
  0x85   : > { %v3296_v39 = vunpack.c.l.b16 %v3037_v34  ;;  %v3297_v33 = vunpack.c.h.b16 %v3037_v34  ;;  %vm1121_vm4 = vmpackc.low %vm961_vm12, %vm961_vm12  ;;  %v565_v15 = vand.u32 15, %v451_v55  ;;  %v1879_v40 = vpack.c.b16 %v1851_v1, %v1850_v29 }
  0x86   : > { %v4150_v60 = vpack.c.b16 %v4122_v4, %v4121_v63  ;;  %v1153_v10 = vsel %vm1121_vm4, 65537, %v17524_v5  ;;  %v14079_v13 = vadd.s32 96, %v13509_v8  ;;  %v17762_v41 = vmov 0 }
  0x87   : > { %vm3300_vm5 = vcmp.ne.s32.totalorder %v3296_v39, %v13582_v43  ;;  %vm3301_vm9 = vcmp.ne.s32.totalorder %v3297_v33, %v13585_v44  ;;  %v1278_v24 = vshll.u32 %v1153_v10, 16  ;;  %v1282_v31 = vshrl.u32 %v1153_v10, 16 }
  0x88   : > { %v1929_v28 = vshrl.u32 %v1879_v40, 16  ;;  %v1932_v22 = vshll.u32 %v1879_v40, 16  ;;  %v4199_v48 = vshrl.u32 %v4150_v60, 16  ;;  %v4202_v2 = vshll.u32 %v4150_v60, 16  ;;  %vm14083_vm12 = vmpackc.low %vm3301_vm9, %vm3300_vm5 }
  0x89   : > { %v17763_v41 = vsel %vm14083_vm12, 4294967295, %v17762_v41  ;;  %v3461_v29 = vsel %vm14083_vm12, %v2651_v16, 0  ;;  %v1280_v63 = vrot.slane %v1278_v24, 5  ;;  %v1284_v55 = vrot.slane %v1282_v31, 4 }
  0x8a   : > { %17764 = vst [vmem:[#allocation22_spill] sm:$0xff] %v17763_v41  ;;  %v2686_v1 = vadd.s32 1, %v565_v15  ;;  %v1931_v4 = vrot.slane %v1929_v28, 3  ;;  %v1934_v34 = vrot.slane %v1932_v22, 4  ;;  %v4201_v39 = vrot.slane %v4199_v48, 3 }
  0x8b   : > { %v4204_v33 = vrot.slane %v4202_v2, 4  ;;  %v3576_v5 = vunpack.c.l.b16 %v3461_v29  ;;  %v1281_v40 = vsel %vm13731_vm15, %v13708_v57, %v1280_v63  ;;  %v1285_v60 = vor.u32 %v1284_v55, %v1280_v63  ;;  %v896_v15 = vld [vmem:[#allocation2 + $0x28] sm:$0xf]  ;;  %v3975_v28 = vld [vmem:[#allocation2 + $0x30] sm:$0xf] }
  0x8c   : > { %vm2750_vm9 = vcmp.lt.s32.totalorder %v2686_v1, 16  ;;  %v14092_v10 = vor.u32 %v1934_v34, %v1931_v4  ;;  %v1567_v19 = vunpack.c.l.b16 %v1281_v40  ;;  %v1568_v16 = vunpack.c.h.b16 %v1281_v40  ;;  %v897_v1 = vld [vmem:[#allocation2 + $0x2c] sm:$0xf]  ;;  %v3976_v40 = vld [vmem:[#allocation2 + $0x34] sm:$0xf] }
  0x8d   : > { %v14094_v12 = vor.u32 %v4204_v33, %v4201_v39  ;;  %vm2878_vm4 = vmpackc.low %vm2750_vm9, %vm2750_vm9  ;;  %v3603_v24 = vpack.c.b16 %v3576_v5, %v3575_v18  ;;  %v1286_v31 = vrot.slane %v1285_v60, 4  ;;  %v17765_v22 = vmov 0  }
  0x8e   : > { %v2910_v48 = vsel %vm2878_vm4, 65537, %v17765_v22  ;;  %v3046_v2 = vsel %vm13589_vm8, %v3038_v27, %v13593_v46  ;;  %vm17766_vm5 = vsmask.f32 4352  ;;  %vm1571_vm9 = vcmp.ne.s32.totalorder %v1567_v19, %v13582_v43 }
  0x8f   : > { %v1936_v29 = vsel %vm17766_vm5, %v14002_v36, %v14092_v10  ;;  %vm17767_vm12 = vmmov %vm17766_vm5  ;;  %vm1572_vm6 = vcmp.ne.s32.totalorder %v1568_v16, %v13585_v44  ;;  %v3656_v5 = vshll.u32 %v3603_v24, 16  ;;  %v1291_v18 = vsel %vm13731_vm15, %v1286_v31, %v13615_v56  ;;  %v387_v31 = vld [vmem:[%s13542_s25 + $0x38] sm:$0xff]  }
  0x90   : > { %v4206_v63 = vsel %vm17767_vm12, %v14004_v51, %v14094_v12  ;;  %vm14111_vm4 = vmpackc.low %vm1572_vm6, %vm1571_vm9  ;;  %v17768_v27 = vmov 0  ;;  %v3049_v55 = vshrl.u32 %v2910_v48, 16  ;;  %v3052_v36 = vshll.u32 %v2910_v48, 16  ;;  %2132 = vmatmul.bf16.gmra.mxu0 %v1936_v29  ;;  %419 = vst [vmem:[#allocation2 + $0x44] sm:$0xff] %v387_v31   ;;  %v2652_v29 = vld [vmem:[#allocation2 + $0x34] sm:$0xf] }
  0x91   : > { %v17769_v27 = vsel %vm14111_vm4, 4294967295, %v17768_v27  ;;  %v1574_v4 = vunpack.c.l.b16 %v1291_v18  ;;  %v1575_v34 = vunpack.c.h.b16 %v1291_v18  ;;  %v1738_v19 = vsel %vm14111_vm4, %v896_v15, 0  ;;  %4402 = vmatmul.bf16.gmra.mxu3 %v4206_v63 }
  0x92   : > { %v4008_v51 = vsel %vm14111_vm4, %v3975_v28, 0  ;;  %v3658_v39 = vrot.slane %v3656_v5, 1  ;;  %v1852_v33 = vunpack.c.l.b16 %v1738_v19  ;;  %v3051_v16 = vrot.slane %v3049_v55, 7 }
  0x93   : > { %v4123_v60 = vunpack.c.l.b16 %v4008_v51  ;;  %vm1578_vm6 = vcmp.ne.s32.totalorder %v1574_v4, %v13582_v43  ;;  %vm1579_vm12 = vcmp.ne.s32.totalorder %v1575_v34, %v13585_v44  ;;  %v3303_v48 = vunpack.c.l.b16 %v3046_v2 }
  0x94   : > { %v3304_v18 = vunpack.c.h.b16 %v3046_v2  ;;  %vm17770_vm5 = vsmask.f32 7424  ;;  %vm14124_vm9 = vmpackc.low %vm1579_vm12, %vm1578_vm6  ;;  %v17771_v28 = vmov 0  ;;  %v3054_v63 = vor.u32 %v3052_v36, %v3051_v16 }
  0x95   : > { %v3659_v15 = vsel %vm17770_vm5, %v14070_v38, %v3658_v39  ;;  %v17772_v28 = vsel %vm14124_vm9, 4294967295, %v17771_v28  ;;  %v3660_v5 = vshrl.u32 %v3603_v24, 16  ;;  %v558_v55 = vand.u32 15, %v14079_v13  ;;  %v12929_v38 = vld [vmem:[#allocation2 + $0x2c] sm:$0xff] }
  0x96   : > { %3840 = vmatmul.bf16.gmra.mxu2 %v3659_v15  ;;  %v1739_v4 = vsel %vm14124_vm9, %v897_v1, 0  ;;  %v4009_v2 = vsel %vm14124_vm9, %v3976_v40, 0  ;;  %vm3307_vm4 = vcmp.ne.s32.totalorder %v3303_v48, %v13582_v43  ;;  %vm3308_vm5 = vcmp.ne.s32.totalorder %v3304_v18, %v13585_v44  ;;  %2520 = vmatmul.bf16.gmra.mxu1 %v12929_v38  ;;  %v2653_v15 = vld [vmem:[#allocation2 + $0x38] sm:$0xf] }
  0x97   : > { %v1853_v34 = vunpack.c.l.b16 %v1739_v4  ;;  %v4124_v19 = vunpack.c.l.b16 %v4009_v2  ;;  %v3055_v24 = vsel %vm13589_vm8, %v13595_v47, %v3054_v63  ;;  %vm14138_vm6 = vmpackc.low %vm3308_vm5, %vm3307_vm4  ;;  %v17773_v13 = vmov 0 }
  0x98   : > { %v17774_v13 = vsel %vm14138_vm6, 4294967295, %v17773_v13  ;;  %v14142_v36 = vor.u32 %v3660_v5, %v3658_v39  ;;  %v3310_v1 = vunpack.c.l.b16 %v3055_v24  ;;  %v3311_v51 = vunpack.c.h.b16 %v3055_v24 }
  0x99   : > { %17775 = vst [vmem:[#allocation23_spill] sm:$0xff] %v17774_v13  ;;  %v3462_v40 = vsel %vm14138_vm6, %v2652_v29, 0  ;;  %v931_v31 = vadd.s32 4294967295, %v558_v55  ;;  %v1880_v48 = vpack.c.b16 %v1853_v34, %v1852_v33  ;;  %v4151_v18 = vpack.c.b16 %v4124_v19, %v4123_v60 }
  0x9a   : > { %v3577_v4 = vunpack.c.l.b16 %v3462_v40  ;;  %v453_v2 = vadd.s32 120, %v13509_v8  ;;  %vm3314_vm4 = vcmp.ne.s32.totalorder %v3310_v1, %v13582_v43  ;;  %vm3315_vm12 = vcmp.ne.s32.totalorder %v3311_v51, %v13585_v44 }
  0x9b   : > { %vm963_vm5 = vcmp.ge.s32.totalorder %v931_v31, 0  ;;  %v3056_v39 = vrot.slane %v3051_v16, 4  ;;  %v1938_v63 = vshrl.u32 %v1880_v48, 16  ;;  %v1941_v5 = vshll.u32 %v1880_v48, 16  ;;  %vm14149_vm9 = vmpackc.low %vm3315_vm12, %vm3314_vm4 }
  0x9c   : > { %v4208_v24 = vshrl.u32 %v4151_v18, 16  ;;  %v4211_v59 = vshll.u32 %v4151_v18, 16  ;;  %v17776_v29 = vmov 0  ;;  %v3463_v33 = vsel %vm14149_vm9, %v2653_v15, 0  ;;  %vm1123_vm6 = vmpackc.low %vm963_vm5, %vm963_vm5 }
  0x9d   : > { %v17777_v29 = vsel %vm14149_vm9, 4294967295, %v17776_v29  ;;  %v579_v60 = vand.u32 15, %v453_v2  ;;  %v3064_v55 = vsel %vm13589_vm8, %v3056_v39, %v13593_v46  ;;  %v452_v38 = vadd.s32 112, %v13509_v8 }
  0x9e   : > { %17778 = vst [vmem:[#allocation24_spill] sm:$0xff] %v17777_v29  ;;  %v1940_v16 = vrot.slane %v1938_v63, 3  ;;  %v1943_v34 = vrot.slane %v1941_v5, 4  ;;  %v4210_v19 = vrot.slane %v4208_v24, 3  ;;  %v4213_v1 = vrot.slane %v4211_v59, 4 }
  0x9f   : > { %v3578_v51 = vunpack.c.l.b16 %v3463_v33  ;;  %v1155_v40 = vsel %vm1123_vm6, 65537, %v17765_v22  ;;  %v2688_v31 = vadd.s32 1, %v579_v60  ;;  %v3317_v48 = vunpack.c.l.b16 %v3064_v55  ;;  %v2654_v60 = vld [vmem:[#allocation2 + $0x3c] sm:$0xf] }
  0xa0   : > { %v14160_v18 = vor.u32 %v1943_v34, %v1940_v16  ;;  %v14162_v15 = vor.u32 %v4213_v1, %v4210_v19  ;;  %v1298_v2 = vshll.u32 %v1155_v40, 16  ;;  %v1302_v52 = vshrl.u32 %v1155_v40, 16 }
  0xa1   : > { %v3604_v14 = vpack.c.b16 %v3578_v51, %v3577_v4  ;;  %vm2752_vm4 = vcmp.lt.s32.totalorder %v2688_v31, 16  ;;  %v3318_v39 = vunpack.c.h.b16 %v3064_v55  ;;  %vm14165_vm12 = vcmp.ne.s32.totalorder %v3317_v48, %v13582_v43  ;;  %v898_v51 = vld [vmem:[#allocation2 + $0x30] sm:$0xf] }
  0xa2   : > { %vm17781_vm5 = vsmask.f32 4352  ;;  %v1300_v24 = vrot.slane %v1298_v2, 5  ;;  %v1304_v33 = vrot.slane %v1302_v52, 4  ;;  %vm2880_vm9 = vmpackc.low %vm2752_vm4, %vm2752_vm4  ;;  %v17783_v52 = vmov 0 }
  0xa3   : > { %v1945_v59 = vsel %vm17781_vm5, %v14092_v10, %v14160_v18  ;;  %vm17782_vm6 = vmmov %vm17781_vm5  ;;  %v3664_v4 = vshll.u32 %v3604_v14, 16  ;;  %v2912_v55 = vsel %vm2880_vm9, 65537, %v17765_v22  ;;  %vm3322_vm7 = vcmp.ne.s32.totalorder %v3318_v39, %v13585_v44  ;;  %v3977_v2 = vld [vmem:[#allocation2 + $0x38] sm:$0xf] }
  0xa4   : > { %v4215_v5 = vsel %vm17782_vm6, %v14094_v12, %v14162_v15  ;;  %v3668_v16 = vshrl.u32 %v3604_v14, 16  ;;  %2137 = vmatmul.bf16.gmra.mxu0 %v1945_v59  ;;  %v1301_v10 = vsel %vm13731_vm15, %v13708_v57, %v1300_v24  ;;  %v1305_v34 = vor.u32 %v1304_v33, %v1300_v24  ;;  %vm14182_vm5 = vmpackc.low %vm3322_vm7, %vm14165_vm12  ;;  %v12930_v33 = vld [vmem:[#allocation2 + $0x34] sm:$0xff] }
  0xa5   : > { %4407 = vmatmul.bf16.gmra.mxu3 %v4215_v5  ;;  %v3067_v19 = vshrl.u32 %v2912_v55, 16  ;;  %v3070_v1 = vshll.u32 %v2912_v55, 16  ;;  %v17784_v52 = vsel %vm14182_vm5, 4294967295, %v17783_v52  ;;  %v3666_v12 = vrot.slane %v3664_v4, 1 }
  0xa6   : > { %17785 = vst [vmem:[#allocation25_spill] sm:$0xff] %v17784_v52  ;;  %v1581_v40 = vunpack.c.l.b16 %v1301_v10  ;;  %v1582_v31 = vunpack.c.h.b16 %v1301_v10  ;;  %v3464_v14 = vsel %vm14182_vm5, %v2654_v60, 0  ;;  %v1306_v48 = vrot.slane %v1305_v34, 4  ;;  %v389_v10 = vld [vmem:[%s13542_s25 + $0x40] sm:$0xff]   ;;  %2525 = vmatmul.bf16.gmra.mxu1 %v12930_v33 }
  0xa7   : > { %v3069_v39 = vrot.slane %v3067_v19, 7  ;;  %v14188_v59 = vunpack.c.l.b16 %v3464_v14  ;;  %v572_v5 = vand.u32 15, %v452_v38  ;;  %vm17786_vm9 = vsmask.f32 7424  ;;  %v3978_v14 = vld [vmem:[#allocation2 + $0x3c] sm:$0xf] }
  0xa8   : > { %v3667_v63 = vsel %vm17786_vm9, %v14142_v36, %v3666_v12  ;;  %vm1585_vm7 = vcmp.ne.s32.totalorder %v1581_v40, %v13582_v43  ;;  %vm1586_vm4 = vcmp.ne.s32.totalorder %v1582_v31, %v13585_v44  ;;  %v14194_v24 = vor.u32 %v3668_v16, %v3666_v12  ;;  %v899_v40 = vld [vmem:[#allocation2 + $0x34] sm:$0xf]  ;;  %421 = vst [vmem:[#allocation2 + $0x4c] sm:$0xff] %v389_v10  }
  0xa9   : > { %3845 = vmatmul.bf16.gmra.mxu2 %v3667_v63  ;;  %v1311_v60 = vsel %vm13731_vm15, %v1306_v48, %v13615_v56  ;;  %vm14199_vm12 = vmpackc.low %vm1586_vm4, %vm1585_vm7  ;;  %v17787_v4 = vmov 0  ;;  %v3072_v38 = vor.u32 %v3070_v1, %v3069_v39  ;;  %v933_v55 = vadd.s32 4294967295, %v572_v5  ;;  %v2655_v63 = vld [vmem:[#allocation2 + $0x40] sm:$0xf] }
  0xaa   : > { %v17788_v4 = vsel %vm14199_vm12, 4294967295, %v17787_v4  ;;  %v455_v36 = vadd.s32 136, %v13509_v8  ;;  %v1588_v34 = vunpack.c.l.b16 %v1311_v60  ;;  %v1589_v19 = vunpack.c.h.b16 %v1311_v60 }
  0xab   : > { %17789 = vst [vmem:[#allocation26_spill] sm:$0xff] %v17788_v4  ;;  %v1740_v16 = vsel %vm14199_vm12, %v898_v51, 0  ;;  %v4010_v12 = vsel %vm14199_vm12, %v3977_v2, 0  ;;  %v3073_v1 = vsel %vm13589_vm8, %v13595_v47, %v3072_v38  ;;  %vm965_vm6 = vcmp.ge.s32.totalorder %v933_v55, 0 }
  0xac   : > { %v1854_v31 = vunpack.c.l.b16 %v1740_v16  ;;  %v4125_v48 = vunpack.c.l.b16 %v4010_v12  ;;  %vm1592_vm9 = vcmp.ne.s32.totalorder %v1588_v34, %v13582_v43  ;;  %vm1593_vm7 = vcmp.ne.s32.totalorder %v1589_v19, %v13585_v44  ;;  %vm1125_vm4 = vmpackc.low %vm965_vm6, %vm965_vm6 }
  0xad   : > { %v3324_v5 = vunpack.c.l.b16 %v3073_v1  ;;  %v3325_v51 = vunpack.c.h.b16 %v3073_v1  ;;  %vm14214_vm5 = vmpackc.low %vm1593_vm7, %vm1592_vm9  ;;  %v17790_v2 = vmov 0  ;;  %v1157_v33 = vsel %vm1125_vm4, 65537, %v17765_v22 }
  0xae   : > { %v17791_v2 = vsel %vm14214_vm5, 4294967295, %v17790_v2  ;;  %v593_v60 = vand.u32 15, %v455_v36  ;;  %v3074_v16 = vrot.slane %v3069_v39, 4  ;;  %v14220_v38 = vadd.s32 128, %v13509_v8 }
  0xaf   : > { %17792 = vst [vmem:[#allocation27_spill] sm:$0xff] %v17791_v2  ;;  %v1741_v55 = vsel %vm14214_vm5, %v899_v40, 0  ;;  %v4011_v10 = vsel %vm14214_vm5, %v3978_v14, 0  ;;  %vm3328_vm6 = vcmp.ne.s32.totalorder %v3324_v5, %v13582_v43  ;;  %vm3329_vm9 = vcmp.ne.s32.totalorder %v3325_v51, %v13585_v44 }
  0xb0   : > { %v1855_v34 = vunpack.c.l.b16 %v1741_v55  ;;  %v4126_v19 = vunpack.c.l.b16 %v4011_v10  ;;  %vm14228_vm7 = vmpackc.low %vm3329_vm9, %vm3328_vm6  ;;  %v17793_v12 = vmov 0  ;;  %v1318_v39 = vshll.u32 %v1157_v33, 16 }
  0xb1   : > { %v17794_v12 = vsel %vm14228_vm7, 4294967295, %v17793_v12  ;;  %v1322_v36 = vshrl.u32 %v1157_v33, 16  ;;  %v3465_v1 = vsel %vm14228_vm7, %v2655_v63, 0  ;;  %v2690_v53 = vadd.s32 1, %v593_v60 }
  0xb2   : > { %17795 = vst [vmem:[#allocation28_spill] sm:$0xff] %v17794_v12  ;;  %v3082_v40 = vsel %vm13589_vm8, %v3074_v16, %v13593_v46  ;;  %v1881_v5 = vpack.c.b16 %v1855_v34, %v1854_v31  ;;  %v4152_v51 = vpack.c.b16 %v4126_v19, %v4125_v48  ;;  %v3580_v55 = vunpack.c.l.b16 %v3465_v1 }
  0xb3   : > { %v1320_v10 = vrot.slane %v1318_v39, 5  ;;  %v1324_v11 = vrot.slane %v1322_v36, 4  ;;  %vm2754_vm4 = vcmp.lt.s32.totalorder %v2690_v53, 16  ;;  %v3331_v52 = vunpack.c.l.b16 %v3082_v40 }
  0xb4   : > { %v3332_v29 = vunpack.c.h.b16 %v3082_v40  ;;  %v1947_v13 = vshrl.u32 %v1881_v5, 16  ;;  %v1950_v33 = vshll.u32 %v1881_v5, 16  ;;  %v4217_v2 = vshrl.u32 %v4152_v51, 16  ;;  %vm2882_vm6 = vmpackc.low %vm2754_vm4, %vm2754_vm4 }
  0xb5   : > { %v4220_v12 = vshll.u32 %v4152_v51, 16  ;;  %v14239_v63 = vpack.c.b16 %v3580_v55, %v14188_v59  ;;  %v1321_v60 = vsel %vm13731_vm15, %v13708_v57, %v1320_v10  ;;  %v1325_v31 = vor.u32 %v1324_v11, %v1320_v10  ;;  %v900_v51 = vld [vmem:[#allocation2 + $0x38] sm:$0xf]  ;;  %v3979_v55 = vld [vmem:[#allocation2 + $0x40] sm:$0xf] }
  0xb6   : > { %v2914_v48 = vsel %vm2882_vm6, 65537, %v17765_v22  ;;  %v1949_v16 = vrot.slane %v1947_v13, 3  ;;  %v1952_v34 = vrot.slane %v1950_v33, 4  ;;  %v4219_v53 = vrot.slane %v4217_v2, 3  ;;  %v901_v33 = vld [vmem:[#allocation2 + $0x3c] sm:$0xf] }
  0xb7   : > { %v4222_v19 = vrot.slane %v4220_v12, 4  ;;  %v3672_v39 = vshll.u32 %v14239_v63, 16  ;;  %v1326_v36 = vrot.slane %v1325_v31, 4  ;;  %v1595_v1 = vunpack.c.l.b16 %v1321_v60 }
  0xb8   : > { %v1596_v40 = vunpack.c.h.b16 %v1321_v60  ;;  %v14246_v5 = vor.u32 %v1952_v34, %v1949_v16  ;;  %v3085_v14 = vshrl.u32 %v2914_v48, 16  ;;  %v3088_v11 = vshll.u32 %v2914_v48, 16  ;;  %v391_v16 = vld [vmem:[%s13542_s25 + $0x48] sm:$0xff]  }
  0xb9   : > { %v14248_v59 = vor.u32 %v4222_v19, %v4219_v53  ;;  %v3674_v10 = vrot.slane %v3672_v39, 1  ;;  %v1331_v13 = vsel %vm13731_vm15, %v1326_v36, %v13615_v56  ;;  %vm1599_vm9 = vcmp.ne.s32.totalorder %v1595_v1, %v13582_v43  ;;  %v3980_v53 = vld [vmem:[#allocation2 + $0x44] sm:$0xf]  ;;  %423 = vst [vmem:[#allocation2 + $0x54] sm:$0xff] %v391_v16  }
  0xba   : > { %vm1600_vm4 = vcmp.ne.s32.totalorder %v1596_v40, %v13585_v44  ;;  %vm17796_vm6 = vsmask.f32 4352  ;;  %v17798_v60 = vmov 0  ;;  %v1602_v31 = vunpack.c.l.b16 %v1331_v13  ;;  %v2656_v1 = vld [vmem:[#allocation2 + $0x44] sm:$0xf] }
  0xbb   : > { %v1954_v2 = vsel %vm17796_vm6, %v14160_v18, %v14246_v5  ;;  %vm17797_vm7 = vmmov %vm17796_vm6  ;;  %v1603_v48 = vunpack.c.h.b16 %v1331_v13  ;;  %vm17801_vm12 = vsmask.f32 7424  ;;  %v3087_v19 = vrot.slane %v3085_v14, 7 }
  0xbc   : > { %v4224_v12 = vsel %vm17797_vm7, %v14162_v15, %v14248_v59  ;;  %vm14261_vm5 = vmpackc.low %vm1600_vm4, %vm1599_vm9  ;;  %2142 = vmatmul.bf16.gmra.mxu0 %v1954_v2  ;;  %v3675_v34 = vsel %vm17801_vm12, %v14194_v24, %v3674_v10  ;;  %vm1606_vm7 = vcmp.ne.s32.totalorder %v1602_v31, %v13582_v43  ;;  %v17802_v40 = vmov 0 }
  0xbd   : > { %v17799_v60 = vsel %vm14261_vm5, 4294967295, %v17798_v60  ;;  %4412 = vmatmul.bf16.gmra.mxu3 %v4224_v12  ;;  %v1742_v18 = vsel %vm14261_vm5, %v900_v51, 0  ;;  %v4012_v15 = vsel %vm14261_vm5, %v3979_v55, 0  ;;  %3850 = vmatmul.bf16.gmra.mxu2 %v3675_v34  ;;  %vm1607_vm9 = vcmp.ne.s32.totalorder %v1603_v48, %v13585_v44  ;;  %v12931_v51 = vld [vmem:[#allocation2 + $0x3c] sm:$0xff] }
  0xbe   : > { %17800 = vst [vmem:[#allocation29_spill] sm:$0xff] %v17799_v60  ;;  %v1856_v39 = vunpack.c.l.b16 %v1742_v18  ;;  %v4127_v36 = vunpack.c.l.b16 %v4012_v15  ;;  %vm14274_vm4 = vmpackc.low %vm1607_vm9, %vm1606_vm7  ;;  %v3090_v24 = vor.u32 %v3088_v11, %v3087_v19  ;;  %vm3335_vm12 = vcmp.ne.s32.totalorder %v3331_v52, %v13582_v43  ;;  %2530 = vmatmul.bf16.gmra.mxu1 %v12931_v51  ;;  %v2657_v15 = vld [vmem:[#allocation2 + $0x48] sm:$0xf]  ;;  %v14318_v60 = vpop.f32.mrf.mxu1 }
  0xbf   : > { %v17803_v40 = vsel %vm14274_vm4, 4294967295, %v17802_v40  ;;  %vm3336_vm6 = vcmp.ne.s32.totalorder %v3332_v29, %v13585_v44  ;;  %v3676_v14 = vshrl.u32 %v14239_v63, 16  ;;  %v1743_v55 = vsel %vm14274_vm4, %v901_v33, 0 }
  0xc0   : > { %17804 = vst [vmem:[#allocation30_spill] sm:$0xff] %v17803_v40  ;;  %v4013_v13 = vsel %vm14274_vm4, %v3980_v53, 0  ;;  %vm14285_vm5 = vmpackc.low %vm3336_vm6, %vm3335_vm12  ;;  %v17805_v2 = vmov 0  ;;  %v17808_v12 = vand.u32 15, %v14220_v38  ;;  %v457_v52 = vadd.s32 152, %v13509_v8 }
  0xc1   : > { %v17806_v2 = vsel %vm14285_vm5, 4294967295, %v17805_v2  ;;  %v1857_v31 = vunpack.c.l.b16 %v1743_v55  ;;  %v4128_v29 = vunpack.c.l.b16 %v4013_v13  ;;  %v3091_v63 = vsel %vm13589_vm8, %v13595_v47, %v3090_v24 }
  0xc2   : > { %17807 = vst [vmem:[#allocation31_spill] sm:$0xff] %v17806_v2  ;;  %v935_v11 = vadd.s32 4294967295, %v17808_v12  ;;  %v3466_v33 = vsel %vm14285_vm5, %v2656_v1, 0  ;;  %v3338_v48 = vunpack.c.l.b16 %v3091_v63  ;;  %v3339_v16 = vunpack.c.h.b16 %v3091_v63 }
  0xc3   : > { %v3581_v34 = vunpack.c.l.b16 %v3466_v33  ;;  %v14297_v18 = vor.u32 %v3676_v14, %v3674_v10  ;;  %v1882_v53 = vpack.c.b16 %v1857_v31, %v1856_v39  ;;  %v4153_v38 = vpack.c.b16 %v4128_v29, %v4127_v36 }
  0xc4   : > { %vm967_vm7 = vcmp.ge.s32.totalorder %v935_v11, 0  ;;  %v607_v12 = vand.u32 15, %v457_v52  ;;  %vm3342_vm9 = vcmp.ne.s32.totalorder %v3338_v48, %v13582_v43  ;;  %vm3343_vm12 = vcmp.ne.s32.totalorder %v3339_v16, %v13585_v44 }
  0xc5   : > { %vm1127_vm6 = vmpackc.low %vm967_vm7, %vm967_vm7  ;;  %v3092_v24 = vrot.slane %v3087_v19, 4  ;;  %v14302_v55 = vadd.s32 144, %v13509_v8  ;;  %v1956_v1 = vshrl.u32 %v1882_v53, 16  ;;  %v1959_v51 = vshll.u32 %v1882_v53, 16 }
  0xc6   : > { %v4226_v13 = vshrl.u32 %v4153_v38, 16  ;;  %v4229_v63 = vshll.u32 %v4153_v38, 16  ;;  %vm14304_vm5 = vmpackc.low %vm3343_vm12, %vm3342_vm9  ;;  %v17809_v10 = vmov 0  ;;  %v1159_v36 = vsel %vm1127_vm6, 65537, %v17765_v22 }
  0xc7   : > { %v17810_v10 = vsel %vm14304_vm5, 4294967295, %v17809_v10  ;;  %v3467_v39 = vsel %vm14304_vm5, %v2657_v15, 0  ;;  %v2692_v14 = vadd.s32 1, %v607_v12  ;;  %v3100_v19 = vsel %vm13589_vm8, %v3092_v24, %v13593_v46 }
  0xc8   : > { %17811 = vst [vmem:[#allocation32_spill] sm:$0xff] %v17810_v10  ;;  %v1958_v11 = vrot.slane %v1956_v1, 3  ;;  %v1961_v52 = vrot.slane %v1959_v51, 4  ;;  %v4228_v31 = vrot.slane %v4226_v13, 3  ;;  %v4231_v29 = vrot.slane %v4229_v63, 4 }
  0xc9   : > { %v3582_v33 = vunpack.c.l.b16 %v3467_v39  ;;  %v1338_v48 = vshll.u32 %v1159_v36, 16  ;;  %v1342_v16 = vshrl.u32 %v1159_v36, 16  ;;  %vm2756_vm7 = vcmp.lt.s32.totalorder %v2692_v14, 16  ;;  %v2658_v14 = vld [vmem:[#allocation2 + $0x4c] sm:$0xf] }
  0xca   : > { %v14314_v53 = vor.u32 %v1961_v52, %v1958_v11  ;;  %v14316_v38 = vor.u32 %v4231_v29, %v4228_v31  ;;  %vm2884_vm9 = vmpackc.low %vm2756_vm7, %vm2756_vm7  ;;  %v3345_v15 = vunpack.c.l.b16 %v3100_v19  ;;  %v3346_v10 = vunpack.c.h.b16 %v3100_v19  ;;  %v902_v19 = vld [vmem:[#allocation2 + $0x40] sm:$0xf]  ;;  %v3981_v29 = vld [vmem:[#allocation2 + $0x48] sm:$0xf] }
  0xcb   : > { %v3606_v12 = vpack.c.b16 %v3582_v33, %v3581_v34  ;;  %v1340_v2 = vrot.slane %v1338_v48, 5  ;;  %v1344_v40 = vrot.slane %v1342_v16, 4  ;;  %v2916_v24 = vsel %vm2884_vm9, 65537, %v17765_v22 }
  0xcc   : > { %vm17812_vm12 = vsmask.f32 4352  ;;  %v3103_v13 = vshrl.u32 %v2916_v24, 16  ;;  %v3106_v63 = vshll.u32 %v2916_v24, 16  ;;  %vm3349_vm7 = vcmp.ne.s32.totalorder %v3345_v15, %v13582_v43 }
  0xcd   : > { %v1963_v1 = vsel %vm17812_vm12, %v14246_v5, %v14314_v53  ;;  %vm17813_vm6 = vmmov %vm17812_vm12  ;;  %v3680_v39 = vshll.u32 %v3606_v12, 16  ;;  %v1341_v34 = vsel %vm13731_vm15, %v13708_v57, %v1340_v2  ;;  %v1345_v36 = vor.u32 %v1344_v40, %v1340_v2 }
  0xce   : > { %v4233_v51 = vsel %vm17813_vm6, %v14248_v59, %v14316_v38  ;;  %2147 = vmatmul.bf16.gmra.mxu0 %v1963_v1  ;;  %v1609_v11 = vunpack.c.l.b16 %v1341_v34  ;;  %v1610_v5 = vunpack.c.h.b16 %v1341_v34  ;;  %v14331_v52 = vrot.slane %v3103_v13, 7 }
  0xcf   : > { %4417 = vmatmul.bf16.gmra.mxu3 %v4233_v51  ;;  %vm3350_vm9 = vcmp.ne.s32.totalorder %v3346_v10, %v13585_v44  ;;  %v3682_v59 = vrot.slane %v3680_v39, 1  ;;  %v1346_v31 = vrot.slane %v1345_v36, 4  ;;  %v17814_v33 = vmov 0  ;;  %v12932_v10 = vld [vmem:[#allocation2 + $0x44] sm:$0xff] }
  0xd0   : > { %vm14334_vm12 = vmpackc.low %vm3350_vm9, %vm3349_vm7  ;;  %v3684_v40 = vshrl.u32 %v3606_v12, 16  ;;  %v600_v2 = vand.u32 15, %v14302_v55  ;;  %vm1613_vm6 = vcmp.ne.s32.totalorder %v1609_v11, %v13582_v43  ;;  %vm1614_vm5 = vcmp.ne.s32.totalorder %v1610_v5, %v13585_v44  ;;  %2535 = vmatmul.bf16.gmra.mxu1 %v12932_v10  ;;  %v393_v5 = vld [vmem:[%s13542_s25 + $0x50] sm:$0xff]  }
  0xd1   : > { %v17815_v33 = vsel %vm14334_vm12, 4294967295, %v17814_v33  ;;  %v3108_v48 = vor.u32 %v3106_v63, %v14331_v52  ;;  %v3468_v16 = vsel %vm14334_vm12, %v2658_v14, 0  ;;  %vm17817_vm4 = vsmask.f32 7424  ;;  %vm14349_vm7 = vmpackc.low %vm1614_vm5, %vm1613_vm6  ;;  %v3982_v63 = vld [vmem:[#allocation2 + $0x4c] sm:$0xf] }
  0xd2   : > { %17816 = vst [vmem:[#allocation33_spill] sm:$0xff] %v17815_v33  ;;  %v3683_v15 = vsel %vm17817_vm4, %v14297_v18, %v3682_v59  ;;  %v1351_v24 = vsel %vm13731_vm15, %v1346_v31, %v13615_v56  ;;  %v17818_v12 = vmov 0  ;;  %v1744_v51 = vsel %vm14349_vm7, %v902_v19, 0  ;;  %v903_v18 = vld [vmem:[#allocation2 + $0x44] sm:$0xf] }
  0xd3   : > { %v17819_v12 = vsel %vm14349_vm7, 4294967295, %v17818_v12  ;;  %3855 = vmatmul.bf16.gmra.mxu2 %v3683_v15  ;;  %v1616_v55 = vunpack.c.l.b16 %v1351_v24  ;;  %v1617_v1 = vunpack.c.h.b16 %v1351_v24  ;;  %v4014_v13 = vsel %vm14349_vm7, %v3981_v29, 0  ;;  %v2659_v15 = vld [vmem:[#allocation2 + $0x50] sm:$0xf]  ;;  %425 = vst [vmem:[#allocation2 + $0x5c] sm:$0xff] %v393_v5  }
  0xd4   : > { %17820 = vst [vmem:[#allocation34_spill] sm:$0xff] %v17819_v12  ;;  %v3109_v39 = vsel %vm13589_vm8, %v13595_v47, %v3108_v48  ;;  %v3583_v34 = vunpack.c.l.b16 %v3468_v16  ;;  %v14360_v36 = vor.u32 %v3684_v40, %v3682_v59  ;;  %v937_v14 = vadd.s32 4294967295, %v600_v2  ;;  %v3821_v48 = vpop.f32.mrf.mxu2  ;;  %v14369_v16 = vpop.f32.mrf.mxu1 }
  0xd5   : > { %vm1620_vm5 = vcmp.ne.s32.totalorder %v1616_v55, %v13582_v43  ;;  %vm1621_vm4 = vcmp.ne.s32.totalorder %v1617_v1, %v13585_v44  ;;  %v3352_v11 = vunpack.c.l.b16 %v3109_v39  ;;  %v3353_v19 = vunpack.c.h.b16 %v3109_v39  ;;  %17824 = vst [vmem:[#allocation36_spill] sm:$0xff] %v14369_v16  ;;  %v2118_v39 = vpop.f32.mrf.mxu0 }
  0xd6   : > { %vm14365_vm9 = vmpackc.low %vm1621_vm4, %vm1620_vm5  ;;  %v17821_v31 = vmov 0  ;;  %v1858_v29 = vunpack.c.l.b16 %v1744_v51  ;;  %v4129_v10 = vunpack.c.l.b16 %v4014_v13  ;;  %vm969_vm6 = vcmp.ge.s32.totalorder %v937_v14, 0 }
  0xd7   : > { %v17822_v31 = vsel %vm14365_vm9, 4294967295, %v17821_v31  ;;  %v459_v59 = vadd.s32 168, %v13509_v8  ;;  %v1745_v40 = vsel %vm14365_vm9, %v903_v18, 0  ;;  %v4015_v2 = vsel %vm14365_vm9, %v3982_v63, 0  ;;  %vm1129_vm12 = vmpackc.low %vm969_vm6, %vm969_vm6 }
  0xd8   : > { %17823 = vst [vmem:[#allocation35_spill] sm:$0xff] %v17822_v31  ;;  %vm3356_vm5 = vcmp.ne.s32.totalorder %v3352_v11, %v13582_v43  ;;  %vm3357_vm4 = vcmp.ne.s32.totalorder %v3353_v19, %v13585_v44  ;;  %v1859_v24 = vunpack.c.l.b16 %v1745_v40  ;;  %v4130_v55 = vunpack.c.l.b16 %v4015_v2 }
  0xd9   : > { %vm14378_vm7 = vmpackc.low %vm3357_vm4, %vm3356_vm5  ;;  %v17825_v1 = vmov 0  ;;  %v1161_v51 = vsel %vm1129_vm12, 65537, %v17765_v22  ;;  %v621_v13 = vand.u32 15, %v459_v59  ;;  %v3110_v11 = vrot.slane %v14331_v52, 4 }
  0xda   : > { %v17826_v1 = vsel %vm14378_vm7, 4294967295, %v17825_v1  ;;  %v3469_v18 = vsel %vm14378_vm7, %v2659_v15, 0  ;;  %v1358_v63 = vshll.u32 %v1161_v51, 16  ;;  %v1362_v14 = vshrl.u32 %v1161_v51, 16 }
  0xdb   : > { %17827 = vst [vmem:[#allocation37_spill] sm:$0xff] %v17826_v1  ;;  %v1883_v19 = vpack.c.b16 %v1859_v24, %v1858_v29  ;;  %v4154_v16 = vpack.c.b16 %v4130_v55, %v4129_v10  ;;  %v2576_v5 = vadd.f32 %v14318_v60, %v2118_v39  ;;  %v3584_v40 = vunpack.c.l.b16 %v3469_v18 }
  0xdc   : > { %v1360_v2 = vrot.slane %v1358_v63, 5  ;;  %v1364_v33 = vrot.slane %v1362_v14, 4  ;;  %v2694_v31 = vadd.s32 1, %v621_v13  ;;  %v14390_v59 = vsel %vm13589_vm8, %v3110_v11, %v13593_v46  ;;  %v4388_v11 = vpop.f32.mrf.mxu3 }
  0xdd   : > { %v1965_v12 = vshrl.u32 %v1883_v19, 16  ;;  %v1968_v1 = vshll.u32 %v1883_v19, 16  ;;  %v4235_v15 = vshrl.u32 %v4154_v16, 16  ;;  %v4238_v4 = vshll.u32 %v4154_v16, 16  ;;  %v904_v16 = vld [vmem:[#allocation2 + $0x48] sm:$0xf] }
  0xde   : > { %v14392_v51 = vpack.c.b16 %v3584_v40, %v3583_v34  ;;  %v1361_v52 = vsel %vm13731_vm15, %v13708_v57, %v1360_v2  ;;  %v1365_v60 = vor.u32 %v1364_v33, %v1360_v2  ;;  %v3901_v29 = vadd.f32 %v3821_v48, %v2576_v5  ;;  %v3983_v40 = vld [vmem:[#allocation2 + $0x50] sm:$0xf]  ;;  %v14404_v33 = vpop.f32.mrf.mxu2 }
  0xdf   : > { %v1967_v10 = vrot.slane %v1965_v12, 3  ;;  %v1970_v24 = vrot.slane %v1968_v1, 4  ;;  %v4237_v55 = vrot.slane %v4235_v15, 3  ;;  %v4240_v13 = vrot.slane %v4238_v4, 4  ;;  %17829 = vst [vmem:[#allocation39_spill] sm:$0xff] %v14404_v33  ;;  %v14406_v12 = vpop.f32.mrf.mxu1 }
  0xe0   : > { %v3688_v39 = vshll.u32 %v14392_v51, 16  ;;  %v1366_v18 = vrot.slane %v1365_v60, 4  ;;  %v1623_v63 = vunpack.c.l.b16 %v1361_v52  ;;  %v1624_v14 = vunpack.c.h.b16 %v1361_v52 }
  0xe1   : > { %v14398_v19 = vor.u32 %v1970_v24, %v1967_v10  ;;  %v14400_v34 = vor.u32 %v4240_v13, %v4237_v55  ;;  %v14402_v41 = vadd.f32 %v4388_v11, %v3901_v29  ;;  %vm2758_vm12 = vcmp.lt.s32.totalorder %v2694_v31, 16  ;;  %v905_v29 = vld [vmem:[#allocation2 + $0x4c] sm:$0xf]  ;;  %v3984_v10 = vld [vmem:[#allocation2 + $0x54] sm:$0xf] }
  0xe2   : > { %v14408_v4 = vrot.slane %v3688_v39, 1  ;;  %v1371_v48 = vsel %vm13731_vm15, %v1366_v18, %v13615_v56  ;;  %vm1627_vm6 = vcmp.ne.s32.totalorder %v1623_v63, %v13582_v43  ;;  %vm1628_vm5 = vcmp.ne.s32.totalorder %v1624_v14, %v13585_v44  ;;  %vm14415_vm4 = vmpackc.low %vm2758_vm12, %vm2758_vm12  ;;  %v395_v14 = vld [vmem:[%s13542_s25 + $0x58] sm:$0xff]  }
  0xe3   : > { %17828 = vst [vmem:[#allocation38_spill] sm:$0xff] %v14402_v41  ;;  %vm17832_vm7 = vsmask.f32 4352  ;;  %vm14425_vm13 = vmpackc.low %vm1628_vm5, %vm1627_vm6  ;;  %v17834_v2 = vmov 0  ;;  %v1630_v15 = vunpack.c.l.b16 %v1371_v48  ;;  %v1631_v52 = vunpack.c.h.b16 %v1371_v48 }
  0xe4   : > { %v1972_v5 = vsel %vm17832_vm7, %v14314_v53, %v14398_v19  ;;  %vm17833_vm9 = vmmov %vm17832_vm7  ;;  %v17835_v2 = vsel %vm14425_vm13, 4294967295, %v17834_v2  ;;  %vm17837_vm12 = vsmask.f32 7424  ;;  %v1746_v53 = vsel %vm14425_vm13, %v904_v16, 0  ;;  %427 = vst [vmem:[#allocation2 + $0x64] sm:$0xff] %v395_v14  }
  0xe5   : > { %v4242_v31 = vsel %vm17833_vm9, %v14316_v38, %v14400_v34  ;;  %17836 = vst [vmem:[#allocation40_spill] sm:$0xff] %v17835_v2  ;;  %2152 = vmatmul.bf16.gmra.mxu0 %v1972_v5  ;;  %v3691_v60 = vsel %vm17837_vm12, %v14360_v36, %v14408_v4  ;;  %v4016_v38 = vsel %vm14425_vm13, %v3983_v40, 0  ;;  %vm1634_vm7 = vcmp.ne.s32.totalorder %v1630_v15, %v13582_v43  ;;  %v2660_v36 = vld [vmem:[#allocation2 + $0x54] sm:$0xf] }
  0xe6   : > { %4422 = vmatmul.bf16.gmra.mxu3 %v4242_v31  ;;  %3860 = vmatmul.bf16.gmra.mxu2 %v3691_v60  ;;  %vm1635_vm9 = vcmp.ne.s32.totalorder %v1631_v52, %v13585_v44  ;;  %v1860_v24 = vunpack.c.l.b16 %v1746_v53  ;;  %v17838_v55 = vmov 0  ;;  %v4131_v13 = vunpack.c.l.b16 %v4016_v38  ;;  %v12933_v52 = vld [vmem:[#allocation2 + $0x4c] sm:$0xff]  ;;  %v14463_v14 = vpop.f32.mrf.mxu2 }
  0xe7   : > { %vm14438_vm6 = vmpackc.low %vm1635_vm9, %vm1634_vm7  ;;  %v2918_v39 = vsel %vm14415_vm4, 65537, %v17765_v22  ;;  %v3359_v18 = vunpack.c.l.b16 %v14390_v59  ;;  %v3360_v63 = vunpack.c.h.b16 %v14390_v59  ;;  %v17841_v15 = vmov 0  ;;  %2540 = vmatmul.bf16.gmra.mxu1 %v12933_v52  ;;  %v14470_v52 = vpop.f32.mrf.mxu0 }
  0xe8   : > { %v17839_v55 = vsel %vm14438_vm6, 4294967295, %v17838_v55  ;;  %v1747_v11 = vsel %vm14438_vm6, %v905_v29, 0  ;;  %v4017_v16 = vsel %vm14438_vm6, %v3984_v10, 0  ;;  %v3121_v40 = vshrl.u32 %v2918_v39, 16  ;;  %17845 = vst [vmem:[#allocation44_spill] sm:$0xff] %v14470_v52 }
  0xe9   : > { %17840 = vst [vmem:[#allocation41_spill] sm:$0xff] %v17839_v55  ;;  %v3124_v48 = vshll.u32 %v2918_v39, 16  ;;  %v1861_v5 = vunpack.c.l.b16 %v1747_v11  ;;  %v4132_v31 = vunpack.c.l.b16 %v4017_v16  ;;  %vm3363_vm5 = vcmp.ne.s32.totalorder %v3359_v18, %v13582_v43  ;;  %v14465_v11 = vpop.f32.mrf.mxu1  ;;  %v2661_v55 = vld [vmem:[#allocation2 + $0x58] sm:$0xf] }
  0xea   : > { %vm3364_vm4 = vcmp.ne.s32.totalorder %v3360_v63, %v13585_v44  ;;  %v3123_v1 = vrot.slane %v3121_v40, 7  ;;  %v458_v59 = vadd.s32 160, %v13509_v8  ;;  %v461_v10 = vadd.s32 184, %v13509_v8  ;;  %17844 = vst [vmem:[#allocation43_spill] sm:$0xff] %v14465_v11 }
  0xeb   : > { %vm14454_vm12 = vmpackc.low %vm3364_vm4, %vm3363_vm5  ;;  %v1884_v60 = vpack.c.b16 %v1861_v5, %v1860_v24  ;;  %v4155_v29 = vpack.c.b16 %v4132_v31, %v4131_v13  ;;  %vm17846_vm6 = vsmask.f32 4352 }
  0xec   : > { %v17842_v15 = vsel %vm14454_vm12, 4294967295, %v17841_v15  ;;  %v3470_v53 = vsel %vm14454_vm12, %v2660_v36, 0  ;;  %v3126_v38 = vor.u32 %v3124_v48, %v3123_v1  ;;  %v614_v63 = vand.u32 15, %v458_v59 }
  0xed   : > { %17843 = vst [vmem:[#allocation42_spill] sm:$0xff] %v17842_v15  ;;  %v3585_v39 = vunpack.c.l.b16 %v3470_v53  ;;  %v1974_v16 = vshrl.u32 %v1884_v60, 16  ;;  %v1977_v40 = vshll.u32 %v1884_v60, 16  ;;  %v4244_v33 = vshrl.u32 %v4155_v29, 16 }
  0xee   : > { %v4247_v24 = vshll.u32 %v4155_v29, 16  ;;  %v3127_v13 = vsel %vm13589_vm8, %v13595_v47, %v3126_v38  ;;  %v939_v36 = vadd.s32 4294967295, %v614_v63  ;;  %v635_v5 = vand.u32 15, %v461_v10 }
  0xef   : > { %v3128_v48 = vrot.slane %v3123_v1, 4  ;;  %v1976_v31 = vrot.slane %v1974_v16, 3  ;;  %v1979_v53 = vrot.slane %v1977_v40, 4  ;;  %v4246_v18 = vrot.slane %v4244_v33, 3 }
  0xf0   : > { %v4249_v59 = vrot.slane %v4247_v24, 4  ;;  %v3366_v41 = vunpack.c.l.b16 %v3127_v13  ;;  %v3367_v15 = vunpack.c.h.b16 %v3127_v13  ;;  %vm971_vm7 = vcmp.ge.s32.totalorder %v939_v36, 0 }
  0xf1   : > { %v2696_v11 = vadd.s32 1, %v635_v5  ;;  %v14472_v60 = vor.u32 %v1979_v53, %v1976_v31  ;;  %vm1131_vm9 = vmpackc.low %vm971_vm7, %vm971_vm7  ;;  %v3136_v1 = vsel %vm13589_vm8, %v3128_v48, %v13593_v46  ;;  %v460_v10 = vadd.s32 176, %v13509_v8  ;;  %v14498_v48 = vpop.f32.mrf.mxu2  ;;  %v14500_v31 = vpop.f32.mrf.mxu1 }
  0xf2   : > { %v14474_v29 = vor.u32 %v4249_v59, %v4246_v18  ;;  %vm3370_vm5 = vcmp.ne.s32.totalorder %v3366_v41, %v13582_v43  ;;  %vm3371_vm4 = vcmp.ne.s32.totalorder %v3367_v15, %v13585_v44  ;;  %v1163_v33 = vsel %vm1131_vm9, 65537, %v17765_v22  ;;  %vm17847_vm7 = vmmov %vm17846_vm6  ;;  %17852 = vst [vmem:[#allocation47_spill] sm:$0xff] %v14498_v48 }
  0xf3   : > { %vm2760_vm12 = vcmp.lt.s32.totalorder %v2696_v11, 16  ;;  %v1981_v38 = vsel %vm17846_vm6, %v14398_v19, %v14472_v60  ;;  %vm14489_vm13 = vmpackc.low %vm3371_vm4, %vm3370_vm5  ;;  %v17848_v63 = vmov 0  ;;  %v1378_v16 = vshll.u32 %v1163_v33, 16  ;;  %v14495_v19 = vpop.f32.mrf.mxu3 }
  0xf4   : > { %v4251_v18 = vsel %vm17847_vm7, %v14400_v34, %v14474_v29  ;;  %v17849_v63 = vsel %vm14489_vm13, 4294967295, %v17848_v63  ;;  %v1382_v40 = vshrl.u32 %v1163_v33, 16  ;;  %v3471_v41 = vsel %vm14489_vm13, %v2661_v55, 0  ;;  %vm2888_vm1 = vmpackc.low %vm2760_vm12, %vm2760_vm12  ;;  %17851 = vst [vmem:[#allocation46_spill] sm:$0xff] %v14495_v19  ;;  %v906_v19 = vld [vmem:[#allocation2 + $0x50] sm:$0xf] }
  0xf5   : > { %17850 = vst [vmem:[#allocation45_spill] sm:$0xff] %v17849_v63  ;;  %v3373_v15 = vunpack.c.l.b16 %v3136_v1  ;;  %v3374_v11 = vunpack.c.h.b16 %v3136_v1  ;;  %v628_v24 = vand.u32 15, %v460_v10  ;;  %2157 = vmatmul.bf16.gmra.mxu0 %v1981_v38  ;;  %v3586_v13 = vunpack.c.l.b16 %v3471_v41 }
  0xf6   : > { %4427 = vmatmul.bf16.gmra.mxu3 %v4251_v18  ;;  %v1380_v36 = vrot.slane %v1378_v16, 5  ;;  %v1384_v34 = vrot.slane %v1382_v40, 4  ;;  %v2920_v5 = vsel %vm2888_vm1, 65537, %v17765_v22 }
  0xf7   : > { %v3139_v53 = vshrl.u32 %v2920_v5, 16  ;;  %v3142_v59 = vshll.u32 %v2920_v5, 16  ;;  %vm14503_vm6 = vcmp.ne.s32.totalorder %v3373_v15, %v13582_v43  ;;  %vm14508_vm12 = vcmp.ne.s32.totalorder %v3374_v11, %v13585_v44  ;;  %v2123_v15 = vpop.f32.mrf.mxu0 }
  0xf8   : > { %v14512_v10 = vpack.c.b16 %v3586_v13, %v3585_v39  ;;  %v1381_v33 = vsel %vm13731_vm15, %v13708_v57, %v1380_v36  ;;  %v1385_v38 = vor.u32 %v1384_v34, %v1380_v36  ;;  %v941_v18 = vadd.s32 4294967295, %v628_v24  ;;  %v3985_v13 = vld [vmem:[#allocation2 + $0x58] sm:$0xf]  ;;  %v2662_v24 = vld [vmem:[#allocation2 + $0x5c] sm:$0xf]  ;;  %vm14531_vm5 = vmpackc.low %vm14508_vm12, %vm14503_vm6 }
  0xf9   : > { %v1637_v16 = vunpack.c.l.b16 %v1381_v33  ;;  %v1638_v40 = vunpack.c.h.b16 %v1381_v33  ;;  %v14517_v41 = vrot.slane %v3139_v53, 7  ;;  %v17857_v5 = vshrl.u32 %v14392_v51, 16  ;;  %v14579_v63 = vpop.f32.mrf.mxu1 }
  0xfa   : > { %v3696_v48 = vshll.u32 %v14512_v10, 16  ;;  %v1386_v39 = vrot.slane %v1385_v38, 4  ;;  %v2578_v52 = vadd.f32 %v14406_v12, %v2123_v15  ;;  %v17858_v51 = vmov 0  ;;  %v3986_v15 = vld [vmem:[#allocation2 + $0x5c] sm:$0xf]  ;;  %17871 = vst [vmem:[#allocation52_spill] sm:$0xff] %v14579_v63 }
  0xfb   : > { %v3694_v11 = vor.u32 %v17857_v5, %v14408_v4  ;;  %vm1641_vm1 = vcmp.ne.s32.totalorder %v1637_v16, %v13582_v43  ;;  %vm1642_vm9 = vcmp.ne.s32.totalorder %v1638_v40, %v13585_v44  ;;  %v3144_v36 = vor.u32 %v3142_v59, %v14517_v41  ;;  %v12934_v4 = vld [vmem:[#allocation2 + $0x54] sm:$0xff] }
  0xfc   : > { %v17859_v51 = vsel %vm14531_vm5, 4294967295, %v17858_v51  ;;  %v14535_v34 = vrot.slane %v3696_v48, 1  ;;  %v1391_v12 = vsel %vm13731_vm15, %v1386_v39, %v13615_v56  ;;  %vm14540_vm4 = vmpackc.low %vm1642_vm9, %vm1641_vm1  ;;  %v17861_v53 = vmov 0  ;;  %2545 = vmatmul.bf16.gmra.mxu1 %v12934_v4  ;;  %v907_v40 = vld [vmem:[#allocation2 + $0x54] sm:$0xf]  ;;  %v4393_v4 = vpop.f32.mrf.mxu3 }
  0xfd   : > { %17860 = vst [vmem:[#allocation48_spill] sm:$0xff] %v17859_v51  ;;  %v17862_v53 = vsel %vm14540_vm4, 4294967295, %v17861_v53  ;;  %vm973_vm7 = vcmp.ge.s32.totalorder %v941_v18, 0  ;;  %v463_v59 = vadd.s32 200, %v13509_v8  ;;  %v1644_v55 = vunpack.c.l.b16 %v1391_v12  ;;  %v14577_v51 = vpop.f32.mrf.mxu2 }
  0xfe   : > { %17863 = vst [vmem:[#allocation49_spill] sm:$0xff] %v17862_v53  ;;  %v1645_v1 = vunpack.c.h.b16 %v1391_v12  ;;  %v1748_v33 = vsel %vm14540_vm4, %v906_v19, 0  ;;  %v4018_v48 = vsel %vm14540_vm4, %v3985_v13, 0  ;;  %vm14549_vm6 = vmpackc.low %vm973_vm7, %vm973_vm7  ;;  %vm17866_vm12 = vsmask.f32 7424 }
  0xff   : > { %v3699_v16 = vsel %vm17866_vm12, %v3694_v11, %v14535_v34  ;;  %v1862_v18 = vunpack.c.l.b16 %v1748_v33  ;;  %v3903_v5 = vadd.f32 %v14463_v14, %v2578_v52  ;;  %v3472_v19 = vsel %vm14531_vm5, %v2662_v24, 0  ;;  %v14581_v53 = vpop.f32.mrf.mxu0 }
 0x100   : > { %3865 = vmatmul.bf16.gmra.mxu2 %v3699_v16  ;;  %vm1648_vm1 = vcmp.ne.s32.totalorder %v1644_v55, %v13582_v43  ;;  %vm1649_vm9 = vcmp.ne.s32.totalorder %v1645_v1, %v13585_v44  ;;  %v4133_v39 = vunpack.c.l.b16 %v4018_v48  ;;  %v3145_v13 = vsel %vm13589_vm8, %v13595_v47, %v3144_v36  ;;  %v397_v55 = vld [vmem:[%s13542_s25 + $0x60] sm:$0xff]   ;;  %17872 = vst [vmem:[#allocation53_spill] sm:$0xff] %v14581_v53 }
 0x101   : > { %vm14563_vm7 = vmpackc.low %vm1649_vm9, %vm1648_vm1  ;;  %v17867_v11 = vmov 0  ;;  %v3380_v12 = vunpack.c.l.b16 %v3145_v13  ;;  %v3381_v14 = vunpack.c.h.b16 %v3145_v13  ;;  %v1165_v52 = vsel %vm14549_vm6, 65537, %v17765_v22  ;;  %v2663_v48 = vld [vmem:[#allocation2 + $0x60] sm:$0xf]  ;;  %429 = vst [vmem:[#allocation2 + $0x6c] sm:$0xff] %v397_v55  }
 0x102   : > { %v17868_v11 = vsel %vm14563_vm7, 4294967295, %v17867_v11  ;;  %v649_v24 = vand.u32 15, %v463_v59  ;;  %v1749_v1 = vsel %vm14563_vm7, %v907_v40, 0  ;;  %v4019_v33 = vsel %vm14563_vm7, %v3986_v15, 0 }
 0x103   : > { %17869 = vst [vmem:[#allocation50_spill] sm:$0xff] %v17868_v11  ;;  %v14575_v36 = vadd.f32 %v4393_v4, %v3903_v5  ;;  %v1398_v16 = vshll.u32 %v1165_v52, 16  ;;  %v1863_v13 = vunpack.c.l.b16 %v1749_v1  ;;  %v4134_v38 = vunpack.c.l.b16 %v4019_v33 }
 0x104   : > { %vm3384_vm6 = vcmp.ne.s32.totalorder %v3380_v12, %v13582_v43  ;;  %vm3385_vm12 = vcmp.ne.s32.totalorder %v3381_v14, %v13585_v44  ;;  %v17873_v59 = vmov 0  ;;  %v3587_v40 = vunpack.c.l.b16 %v3472_v19 }
 0x105   : > { %17870 = vst [vmem:[#allocation51_spill] sm:$0xff] %v14575_v36  ;;  %vm14585_vm1 = vmpackc.low %vm3385_vm12, %vm3384_vm6  ;;  %v3700_v15 = vshrl.u32 %v14512_v10, 16  ;;  %v1400_v5 = vrot.slane %v1398_v16, 5  ;;  %v1402_v4 = vshrl.u32 %v1165_v52, 16  ;;  %v1885_v36 = vpack.c.b16 %v1863_v13, %v1862_v18 }
 0x106   : > { %v17874_v59 = vsel %vm14585_vm1, 4294967295, %v17873_v59  ;;  %v4156_v63 = vpack.c.b16 %v4134_v38, %v4133_v39  ;;  %v3473_v55 = vsel %vm14585_vm1, %v2663_v48, 0  ;;  %v2698_v1 = vadd.s32 1, %v649_v24 }
 0x107   : > { %17875 = vst [vmem:[#allocation54_spill] sm:$0xff] %v17874_v59  ;;  %v3588_v33 = vunpack.c.l.b16 %v3473_v55  ;;  %v1401_v12 = vsel %vm13731_vm15, %v13708_v57, %v1400_v5  ;;  %v1404_v14 = vrot.slane %v1402_v4, 4  ;;  %v3146_v53 = vrot.slane %v14517_v41, 4  ;;  %v14598_v55 = vpop.f32.mrf.mxu3 }
 0x108   : > { %v1983_v11 = vshrl.u32 %v1885_v36, 16  ;;  %v1986_v19 = vshll.u32 %v1885_v36, 16  ;;  %v4253_v2 = vshrl.u32 %v4156_v63, 16  ;;  %v4256_v10 = vshll.u32 %v4156_v63, 16  ;;  %17876 = vst [vmem:[#allocation55_spill] sm:$0xff] %v14598_v55 }
 0x109   : > { %v14596_v16 = vpack.c.b16 %v3588_v33, %v3587_v40  ;;  %v1405_v18 = vor.u32 %v1404_v14, %v1400_v5  ;;  %v1651_v39 = vunpack.c.l.b16 %v1401_v12  ;;  %v1652_v52 = vunpack.c.h.b16 %v1401_v12  ;;  %v2128_v40 = vpop.f32.mrf.mxu0  ;;  %v908_v5 = vld [vmem:[#allocation2 + $0x58] sm:$0xf]  ;;  %v14618_v12 = vpop.f32.mrf.mxu2 }
 0x10a   : > { %v1985_v13 = vrot.slane %v1983_v11, 3  ;;  %v1988_v48 = vrot.slane %v1986_v19, 4  ;;  %v4255_v24 = vrot.slane %v4253_v2, 3  ;;  %v4258_v38 = vrot.slane %v4256_v10, 4  ;;  %v3987_v11 = vld [vmem:[#allocation2 + $0x60] sm:$0xf]  ;;  %v14620_v14 = vpop.f32.mrf.mxu1 }
 0x10b   : > { %v3702_v59 = vor.u32 %v3700_v15, %v14535_v34  ;;  %v3704_v4 = vshll.u32 %v14596_v16, 16  ;;  %v1406_v41 = vrot.slane %v1405_v18, 4  ;;  %vm1655_vm9 = vcmp.ne.s32.totalorder %v1651_v39, %v13582_v43  ;;  %17879 = vst [vmem:[#allocation56_spill] sm:$0xff] %v14618_v12 }
 0x10c   : > { %v14603_v36 = vor.u32 %v1988_v48, %v1985_v13  ;;  %v14605_v63 = vor.u32 %v4258_v38, %v4255_v24  ;;  %vm1656_vm6 = vcmp.ne.s32.totalorder %v1652_v52, %v13585_v44  ;;  %vm2762_vm12 = vcmp.lt.s32.totalorder %v2698_v1, 16  ;;  %v909_v52 = vld [vmem:[#allocation2 + $0x5c] sm:$0xf]  ;;  %v3988_v13 = vld [vmem:[#allocation2 + $0x64] sm:$0xf] }
 0x10d   : > { %v2580_v2 = vadd.f32 %v14500_v31, %v2128_v40  ;;  %v14609_v33 = vrot.slane %v3704_v4, 1  ;;  %v1411_v34 = vsel %vm13731_vm15, %v1406_v41, %v13615_v56  ;;  %vm14614_vm1 = vmpackc.low %vm1656_vm6, %vm1655_vm9  ;;  %v17877_v15 = vmov 0 }
 0x10e   : > { %v17878_v15 = vsel %vm14614_vm1, 4294967295, %v17877_v15  ;;  %v3154_v1 = vsel %vm13589_vm8, %v3146_v53, %v13593_v46  ;;  %vm17880_vm5 = vsmask.f32 4352  ;;  %v1658_v10 = vunpack.c.l.b16 %v1411_v34  ;;  %vm2890_vm9 = vmpackc.low %vm2762_vm12, %vm2762_vm12 }
 0x10f   : > { %v1990_v31 = vsel %vm17880_vm5, %v14472_v60, %v14603_v36  ;;  %vm17881_vm13 = vmmov %vm17880_vm5  ;;  %v1659_v18 = vunpack.c.h.b16 %v1411_v34  ;;  %vm17882_vm6 = vsmask.f32 7424  ;;  %v1750_v53 = vsel %vm14614_vm1, %v908_v5, 0  ;;  %v4398_v5 = vpop.f32.mrf.mxu3 }
 0x110   : > { %v4260_v19 = vsel %vm17881_vm13, %v14474_v29, %v14605_v63  ;;  %2162 = vmatmul.bf16.gmra.mxu0 %v1990_v31  ;;  %v3707_v39 = vsel %vm17882_vm6, %v3702_v59, %v14609_v33  ;;  %v4020_v60 = vsel %vm14614_vm1, %v3987_v11, 0  ;;  %v3905_v48 = vadd.f32 %v14577_v51, %v2580_v2 }
 0x111   : > { %4432 = vmatmul.bf16.gmra.mxu3 %v4260_v19  ;;  %vm1662_vm13 = vcmp.ne.s32.totalorder %v1658_v10, %v13582_v43  ;;  %vm1663_vm5 = vcmp.ne.s32.totalorder %v1659_v18, %v13585_v44  ;;  %v1864_v29 = vunpack.c.l.b16 %v1750_v53  ;;  %3870 = vmatmul.bf16.gmra.mxu2 %v3707_v39  ;;  %v17883_v24 = vmov 0  ;;  %v14652_v10 = vpop.f32.mrf.mxu0  ;;  %v2664_v18 = vld [vmem:[#allocation2 + $0x64] sm:$0xf] }
 0x112   : > { %vm14640_vm12 = vmpackc.low %vm1663_vm5, %vm1662_vm13  ;;  %v4135_v59 = vunpack.c.l.b16 %v4020_v60  ;;  %v2922_v38 = vsel %vm2890_vm9, 65537, %v17765_v22  ;;  %v3387_v4 = vunpack.c.l.b16 %v3154_v1  ;;  %v3388_v41 = vunpack.c.h.b16 %v3154_v1  ;;  %17887 = vst [vmem:[#allocation59_spill] sm:$0xff] %v14652_v10  ;;  %v12935_v60 = vld [vmem:[#allocation2 + $0x5c] sm:$0xff] }
 0x113   : > { %v17884_v24 = vsel %vm14640_vm12, 4294967295, %v17883_v24  ;;  %v1751_v40 = vsel %vm14640_vm12, %v909_v52, 0  ;;  %v4021_v51 = vsel %vm14640_vm12, %v3988_v13, 0  ;;  %v3157_v11 = vshrl.u32 %v2922_v38, 16  ;;  %2550 = vmatmul.bf16.gmra.mxu1 %v12935_v60 }
 0x114   : > { %17885 = vst [vmem:[#allocation57_spill] sm:$0xff] %v17884_v24  ;;  %v3160_v2 = vshll.u32 %v2922_v38, 16  ;;  %v1865_v34 = vunpack.c.l.b16 %v1751_v40  ;;  %v4136_v31 = vunpack.c.l.b16 %v4021_v51  ;;  %v14649_v19 = vadd.f32 %v4398_v5, %v3905_v48  ;;  %v399_v38 = vld [vmem:[%s13542_s25 + $0x68] sm:$0xff]  }
 0x115   : > { %vm3391_vm6 = vcmp.ne.s32.totalorder %v3387_v4, %v13582_v43  ;;  %v3159_v1 = vrot.slane %v3157_v11, 7  ;;  %vm3392_vm9 = vcmp.ne.s32.totalorder %v3388_v41, %v13585_v44  ;;  %v462_v39 = vadd.s32 192, %v13509_v8  ;;  %431 = vst [vmem:[#allocation2 + $0x74] sm:$0xff] %v399_v38  }
 0x116   : > { %17886 = vst [vmem:[#allocation58_spill] sm:$0xff] %v14649_v19  ;;  %v1886_v52 = vpack.c.b16 %v1865_v34, %v1864_v29  ;;  %v4157_v53 = vpack.c.b16 %v4136_v31, %v4135_v59  ;;  %vm14656_vm13 = vmpackc.low %vm3392_vm9, %vm3391_vm6  ;;  %v17888_v13 = vmov 0  ;;  %v465_v4 = vadd.s32 216, %v13509_v8  ;;  %v3836_v19 = vpop.f32.mrf.mxu2  ;;  %v14662_v29 = vpop.f32.mrf.mxu1 }
 0x117   : > { %v17889_v13 = vsel %vm14656_vm13, 4294967295, %v17888_v13  ;;  %v3162_v48 = vor.u32 %v3160_v2, %v3159_v1  ;;  %v642_v40 = vand.u32 15, %v462_v39  ;;  %v3164_v51 = vrot.slane %v3159_v1, 4  ;;  %17891 = vst [vmem:[#allocation61_spill] sm:$0xff] %v14662_v29  ;;  %v14670_v10 = vpop.f32.mrf.mxu3 }
 0x118   : > { %17890 = vst [vmem:[#allocation60_spill] sm:$0xff] %v17889_v13  ;;  %v1992_v5 = vshrl.u32 %v1886_v52, 16  ;;  %v1995_v11 = vshll.u32 %v1886_v52, 16  ;;  %v4262_v12 = vshrl.u32 %v4157_v53, 16  ;;  %v4265_v41 = vshll.u32 %v4157_v53, 16 }
 0x119   : > { %v3163_v59 = vsel %vm13589_vm8, %v13595_v47, %v3162_v48  ;;  %v3474_v2 = vsel %vm14656_vm13, %v2664_v18, 0  ;;  %v3708_v34 = vshrl.u32 %v14596_v16, 16  ;;  %v943_v31 = vadd.s32 4294967295, %v642_v40  ;;  %17892 = vst [vmem:[#allocation62_spill] sm:$0xff] %v14670_v10  ;;  %v2665_v48 = vld [vmem:[#allocation2 + $0x68] sm:$0xf]  ;;  %v2133_v18 = vpop.f32.mrf.mxu0 }
 0x11a   : > { %v1994_v1 = vrot.slane %v1992_v5, 3  ;;  %v1997_v39 = vrot.slane %v1995_v11, 4  ;;  %v4264_v38 = vrot.slane %v4262_v12, 3  ;;  %v4267_v52 = vrot.slane %v4265_v41, 4 }
 0x11b   : > { %v3394_v53 = vunpack.c.l.b16 %v3163_v59  ;;  %v3395_v60 = vunpack.c.h.b16 %v3163_v59  ;;  %vm975_vm5 = vcmp.ge.s32.totalorder %v943_v31, 0  ;;  %v663_v29 = vand.u32 15, %v465_v4 }
 0x11c   : > { %v14672_v55 = vor.u32 %v1997_v39, %v1994_v1  ;;  %v14674_v24 = vor.u32 %v4267_v52, %v4264_v38  ;;  %v3589_v13 = vunpack.c.l.b16 %v3474_v2  ;;  %vm1135_vm6 = vmpackc.low %vm975_vm5, %vm975_vm5  ;;  %v3172_v16 = vsel %vm13589_vm8, %v3164_v51, %v13593_v46 }
 0x11d   : > { %vm3398_vm9 = vcmp.ne.s32.totalorder %v3394_v53, %v13582_v43  ;;  %vm3399_vm13 = vcmp.ne.s32.totalorder %v3395_v60, %v13585_v44  ;;  %v1167_v12 = vsel %vm1135_vm6, 65537, %v17765_v22  ;;  %v2700_v40 = vadd.s32 1, %v663_v29 }
 0x11e   : > { %vm17893_vm12 = vsmask.f32 4352  ;;  %v2582_v11 = vadd.f32 %v14620_v14, %v2133_v18  ;;  %vm14689_vm5 = vmpackc.low %vm3399_vm13, %vm3398_vm9  ;;  %v17895_v51 = vmov 0  ;;  %v1418_v41 = vshll.u32 %v1167_v12, 16 }
 0x11f   : > { %v1999_v4 = vsel %vm17893_vm12, %v14603_v36, %v14672_v55  ;;  %vm17894_vm1 = vmmov %vm17893_vm12  ;;  %v17896_v51 = vsel %vm14689_vm5, 4294967295, %v17895_v51  ;;  %v3475_v59 = vsel %vm14689_vm5, %v2665_v48, 0  ;;  %v1422_v2 = vshrl.u32 %v1167_v12, 16  ;;  %v14707_v48 = vpop.f32.mrf.mxu2 }
 0x120   : > { %v4269_v5 = vsel %vm17894_vm1, %v14605_v63, %v14674_v24  ;;  %17897 = vst [vmem:[#allocation63_spill] sm:$0xff] %v17896_v51  ;;  %vm2764_vm6 = vcmp.lt.s32.totalorder %v2700_v40, 16  ;;  %v3401_v29 = vunpack.c.l.b16 %v3172_v16  ;;  %2167 = vmatmul.bf16.gmra.mxu0 %v1999_v4  ;;  %v3590_v36 = vunpack.c.l.b16 %v3475_v59 }
 0x121   : > { %4437 = vmatmul.bf16.gmra.mxu3 %v4269_v5  ;;  %v1420_v31 = vrot.slane %v1418_v41, 5  ;;  %v3907_v1 = vadd.f32 %v3836_v19, %v2582_v11  ;;  %vm2892_vm12 = vmpackc.low %vm2764_vm6, %vm2764_vm6  ;;  %v3402_v63 = vunpack.c.h.b16 %v3172_v16  ;;  %v1424_v39 = vrot.slane %v1422_v2, 4  ;;  %17900 = vst [vmem:[#allocation64_spill] sm:$0xff] %v14707_v48  ;;  %v2516_v19 = vpop.f32.mrf.mxu1  ;;  %v4403_v5 = vpop.f32.mrf.mxu3  ;;  %v910_v41 = vld [vmem:[#allocation2 + $0x60] sm:$0xf] }
 0x122   : > { %v2924_v14 = vsel %vm2892_vm12, 65537, %v17765_v22  ;;  %vm14697_vm1 = vcmp.ne.s32.totalorder %v3401_v29, %v13582_v43  ;;  %v464_v52 = vadd.s32 208, %v13509_v8  ;;  %v14702_v53 = vpack.c.b16 %v3590_v36, %v3589_v13  ;;  %v3989_v36 = vld [vmem:[#allocation2 + $0x68] sm:$0xf] }
 0x123   : > { %v1421_v60 = vsel %vm13731_vm15, %v13708_v57, %v1420_v31  ;;  %v3175_v16 = vshrl.u32 %v2924_v14, 16  ;;  %v3178_v18 = vshll.u32 %v2924_v14, 16  ;;  %v1425_v12 = vor.u32 %v1424_v39, %v1420_v31  ;;  %v14718_v31 = vpop.f32.mrf.mxu0 }
 0x124   : > { %v1665_v40 = vunpack.c.l.b16 %v1421_v60  ;;  %v1666_v4 = vunpack.c.h.b16 %v1421_v60  ;;  %vm3406_vm13 = vcmp.ne.s32.totalorder %v3402_v63, %v13585_v44  ;;  %v3710_v11 = vor.u32 %v3708_v34, %v14609_v33  ;;  %17902 = vst [vmem:[#allocation66_spill] sm:$0xff] %v14718_v31 }
 0x125   : > { %v3712_v13 = vshll.u32 %v14702_v53, 16  ;;  %v14712_v59 = vadd.f32 %v4403_v5, %v3907_v1  ;;  %v14714_v2 = vrot.slane %v3175_v16, 7  ;;  %v1426_v29 = vrot.slane %v1425_v12, 4  ;;  %vm14722_vm12 = vmpackc.low %vm3406_vm13, %vm14697_vm1  ;;  %v2666_v1 = vld [vmem:[#allocation2 + $0x6c] sm:$0xf] }
 0x126   : > { %vm1669_vm9 = vcmp.ne.s32.totalorder %v1665_v40, %v13582_v43  ;;  %vm1670_vm6 = vcmp.ne.s32.totalorder %v1666_v4, %v13585_v44  ;;  %v17903_v63 = vmov 0  ;;  %v17906_v34 = vmov 0  ;;  %v911_v12 = vld [vmem:[#allocation2 + $0x64] sm:$0xf] }
 0x127   : > { %17901 = vst [vmem:[#allocation65_spill] sm:$0xff] %v14712_v59  ;;  %v17904_v63 = vsel %vm14722_vm12, 4294967295, %v17903_v63  ;;  %v3714_v33 = vrot.slane %v3712_v13, 1  ;;  %vm14726_vm5 = vmpackc.low %vm1670_vm6, %vm1669_vm9  ;;  %v3180_v39 = vor.u32 %v3178_v18, %v14714_v2  ;;  %v1431_v14 = vsel %vm13731_vm15, %v1426_v29, %v13615_v56  ;;  %v3990_v13 = vld [vmem:[#allocation2 + $0x6c] sm:$0xf] }
 0x128   : > { %17905 = vst [vmem:[#allocation67_spill] sm:$0xff] %v17904_v63  ;;  %v17907_v34 = vsel %vm14726_vm5, 4294967295, %v17906_v34  ;;  %v1752_v60 = vsel %vm14726_vm5, %v910_v41, 0  ;;  %v656_v38 = vand.u32 15, %v464_v52  ;;  %vm17909_vm1 = vsmask.f32 7424 }
 0x129   : > { %17908 = vst [vmem:[#allocation68_spill] sm:$0xff] %v17907_v34  ;;  %v3715_v16 = vsel %vm17909_vm1, %v3710_v11, %v3714_v33  ;;  %v1672_v40 = vunpack.c.l.b16 %v1431_v14  ;;  %v1673_v4 = vunpack.c.h.b16 %v1431_v14  ;;  %v4022_v5 = vsel %vm14726_vm5, %v3989_v36, 0  ;;  %v12936_v52 = vld [vmem:[#allocation2 + $0x64] sm:$0xff]  ;;  %v14759_v31 = vpop.f32.mrf.mxu1 }
 0x12a   : > { %3875 = vmatmul.bf16.gmra.mxu2 %v3715_v16  ;;  %v3181_v18 = vsel %vm13589_vm8, %v13595_v47, %v3180_v39  ;;  %v3476_v29 = vsel %vm14722_vm12, %v2666_v1, 0  ;;  %v3716_v41 = vshrl.u32 %v14702_v53, 16  ;;  %v17910_v36 = vmov 0  ;;  %v14751_v39 = vpop.f32.mrf.mxu3  ;;  %2555 = vmatmul.bf16.gmra.mxu1 %v12936_v52  ;;  %17914 = vst [vmem:[#allocation71_spill] sm:$0xff] %v14759_v31 }
 0x12b   : > { %vm1676_vm13 = vcmp.ne.s32.totalorder %v1672_v40, %v13582_v43  ;;  %vm1677_vm9 = vcmp.ne.s32.totalorder %v1673_v4, %v13585_v44  ;;  %v3408_v11 = vunpack.c.l.b16 %v3181_v18  ;;  %v3409_v14 = vunpack.c.h.b16 %v3181_v18  ;;  %17913 = vst [vmem:[#allocation70_spill] sm:$0xff] %v14751_v39  ;;  %v2667_v4 = vld [vmem:[#allocation2 + $0x70] sm:$0xf]  ;;  %v3841_v18 = vpop.f32.mrf.mxu2  ;;  %v2138_v39 = vpop.f32.mrf.mxu0 }
 0x12c   : > { %vm14747_vm6 = vmpackc.low %vm1677_vm9, %vm1676_vm13  ;;  %v1866_v16 = vunpack.c.l.b16 %v1752_v60  ;;  %v4137_v48 = vunpack.c.l.b16 %v4022_v5  ;;  %v945_v59 = vadd.s32 4294967295, %v656_v38  ;;  %v467_v53 = vadd.s32 232, %v13509_v8  ;;  %v401_v60 = vld [vmem:[%s13542_s25 + $0x70] sm:$0xff]  }
 0x12d   : > { %v17911_v36 = vsel %vm14747_vm6, 4294967295, %v17910_v36  ;;  %v1753_v1 = vsel %vm14747_vm6, %v911_v12, 0  ;;  %v4023_v40 = vsel %vm14747_vm6, %v3990_v13, 0  ;;  %vm3412_vm1 = vcmp.ne.s32.totalorder %v3408_v11, %v13582_v43  ;;  %433 = vst [vmem:[#allocation2 + $0x7c] sm:$0xff] %v401_v60  }
 0x12e   : > { %17912 = vst [vmem:[#allocation69_spill] sm:$0xff] %v17911_v36  ;;  %v1867_v5 = vunpack.c.l.b16 %v1753_v1  ;;  %v4138_v10 = vunpack.c.l.b16 %v4023_v40  ;;  %vm3413_vm13 = vcmp.ne.s32.totalorder %v3409_v14, %v13585_v44  ;;  %vm977_vm9 = vcmp.ge.s32.totalorder %v945_v59, 0 }
 0x12f   : > { %v2584_v38 = vadd.f32 %v2516_v19, %v2138_v39  ;;  %vm14763_vm12 = vmpackc.low %vm3413_vm13, %vm3412_vm1  ;;  %v17915_v12 = vmov 0  ;;  %v3591_v13 = vunpack.c.l.b16 %v3476_v29  ;;  %v3718_v52 = vor.u32 %v3716_v41, %v3714_v33 }
 0x130   : > { %v17916_v12 = vsel %vm14763_vm12, 4294967295, %v17915_v12  ;;  %v677_v63 = vand.u32 15, %v467_v53  ;;  %v1887_v11 = vpack.c.b16 %v1867_v5, %v1866_v16  ;;  %v4158_v51 = vpack.c.b16 %v4138_v10, %v4137_v48  ;;  %vm1137_vm6 = vmpackc.low %vm977_vm9, %vm977_vm9 }
 0x131   : > { %17917 = vst [vmem:[#allocation72_spill] sm:$0xff] %v17916_v12  ;;  %v3477_v31 = vsel %vm14763_vm12, %v2667_v4, 0  ;;  %v3182_v1 = vrot.slane %v14714_v2, 4  ;;  %v1169_v59 = vsel %vm1137_vm6, 65537, %v17765_v22  ;;  %v3909_v14 = vadd.f32 %v3841_v18, %v2584_v38 }
 0x132   : > { %v3592_v40 = vunpack.c.l.b16 %v3477_v31  ;;  %v2702_v19 = vadd.s32 1, %v677_v63  ;;  %v2001_v39 = vshrl.u32 %v1887_v11, 16  ;;  %v2004_v60 = vshll.u32 %v1887_v11, 16  ;;  %v4408_v4 = vpop.f32.mrf.mxu3 }
 0x133   : > { %v4271_v36 = vshrl.u32 %v4158_v51, 16  ;;  %v4274_v34 = vshll.u32 %v4158_v51, 16  ;;  %v1438_v33 = vshll.u32 %v1169_v59, 16  ;;  %v1442_v41 = vshrl.u32 %v1169_v59, 16  ;;  %v14786_v11 = vpop.f32.mrf.mxu2 }
 0x134   : > { %v14771_v29 = vpack.c.b16 %v3592_v40, %v3591_v13  ;;  %vm2766_vm1 = vcmp.lt.s32.totalorder %v2702_v19, 16  ;;  %v2003_v10 = vrot.slane %v2001_v39, 3  ;;  %v2006_v48 = vrot.slane %v2004_v60, 4  ;;  %17919 = vst [vmem:[#allocation74_spill] sm:$0xff] %v14786_v11  ;;  %v14788_v40 = vpop.f32.mrf.mxu1 }
 0x135   : > { %v4273_v16 = vrot.slane %v4271_v36, 3  ;;  %v4276_v53 = vrot.slane %v4274_v34, 4  ;;  %vm2894_vm13 = vmpackc.low %vm2766_vm1, %vm2766_vm1  ;;  %v1440_v31 = vrot.slane %v1438_v33, 5  ;;  %v1444_v18 = vrot.slane %v1442_v41, 4  ;;  %v912_v41 = vld [vmem:[#allocation2 + $0x68] sm:$0xf] }
 0x136   : > { %v3720_v2 = vshll.u32 %v14771_v29, 16  ;;  %v14774_v63 = vadd.f32 %v4408_v4, %v3909_v14  ;;  %v14776_v5 = vor.u32 %v2006_v48, %v2003_v10  ;;  %v2926_v38 = vsel %vm2894_vm13, 65537, %v17765_v22  ;;  %v3991_v48 = vld [vmem:[#allocation2 + $0x70] sm:$0xf] }
 0x137   : > { %v14778_v51 = vor.u32 %v4276_v53, %v4273_v16  ;;  %v1441_v34 = vsel %vm13731_vm15, %v13708_v57, %v1440_v31  ;;  %v1445_v36 = vor.u32 %v1444_v18, %v1440_v31  ;;  %v3190_v59 = vsel %vm13589_vm8, %v3182_v1, %v13593_v46  ;;  %v14801_v16 = vpop.f32.mrf.mxu0 }
 0x138   : > { %17918 = vst [vmem:[#allocation73_spill] sm:$0xff] %v14774_v63  ;;  %v14781_v13 = vrot.slane %v3720_v2, 1  ;;  %vm17920_vm6 = vsmask.f32 4352  ;;  %v1679_v39 = vunpack.c.l.b16 %v1441_v34  ;;  %v1680_v60 = vunpack.c.h.b16 %v1441_v34 }
 0x139   : > { %v2008_v14 = vsel %vm17920_vm6, %v14672_v55, %v14776_v5  ;;  %vm17921_vm9 = vmmov %vm17920_vm6  ;;  %vm17922_vm1 = vsmask.f32 7424  ;;  %v1446_v10 = vrot.slane %v1445_v36, 4  ;;  %17923 = vst [vmem:[#allocation75_spill] sm:$0xff] %v14801_v16  ;;  %v3193_v1 = vshrl.u32 %v2926_v38, 16 }
 0x13a   : > { %v4278_v19 = vsel %vm17921_vm9, %v14674_v24, %v14778_v51  ;;  %2172 = vmatmul.bf16.gmra.mxu0 %v2008_v14  ;;  %v3723_v33 = vsel %vm17922_vm1, %v3718_v52, %v14781_v13  ;;  %vm1683_vm13 = vcmp.ne.s32.totalorder %v1679_v39, %v13582_v43  ;;  %vm1684_vm6 = vcmp.ne.s32.totalorder %v1680_v60, %v13585_v44  ;;  %v913_v14 = vld [vmem:[#allocation2 + $0x6c] sm:$0xf]  ;;  %v3992_v39 = vld [vmem:[#allocation2 + $0x74] sm:$0xf] }
 0x13b   : > { %4442 = vmatmul.bf16.gmra.mxu3 %v4278_v19  ;;  %3880 = vmatmul.bf16.gmra.mxu2 %v3723_v33  ;;  %v3196_v55 = vshll.u32 %v2926_v38, 16  ;;  %v3415_v24 = vunpack.c.l.b16 %v3190_v59  ;;  %v1451_v53 = vsel %vm13731_vm15, %v1446_v10, %v13615_v56  ;;  %vm14808_vm9 = vmpackc.low %vm1684_vm6, %vm1683_vm13  ;;  %v17924_v4 = vmov 0  ;;  %v2668_v10 = vld [vmem:[#allocation2 + $0x74] sm:$0xf]  ;;  %v3846_v63 = vpop.f32.mrf.mxu2 }
 0x13c   : > { %v17925_v4 = vsel %vm14808_vm9, 4294967295, %v17924_v4  ;;  %v14812_v52 = vrot.slane %v3193_v1, 7  ;;  %v3416_v2 = vunpack.c.h.b16 %v3190_v59  ;;  %v466_v31 = vadd.s32 224, %v13509_v8  ;;  %v14832_v1 = vpop.f32.mrf.mxu3 }
 0x13d   : > { %v1686_v18 = vunpack.c.l.b16 %v1451_v53  ;;  %v1687_v34 = vunpack.c.h.b16 %v1451_v53  ;;  %v1754_v36 = vsel %vm14808_vm9, %v912_v41, 0  ;;  %v4024_v38 = vsel %vm14808_vm9, %v3991_v48, 0  ;;  %17928 = vst [vmem:[#allocation76_spill] sm:$0xff] %v14832_v1  ;;  %v12937_v53 = vld [vmem:[#allocation2 + $0x6c] sm:$0xff] }
 0x13e   : > { %v1868_v19 = vunpack.c.l.b16 %v1754_v36  ;;  %v3198_v60 = vor.u32 %v3196_v55, %v14812_v52  ;;  %v3724_v33 = vshrl.u32 %v14771_v29, 16  ;;  %v14822_v59 = vadd.s32 240, %v13509_v8  ;;  %2560 = vmatmul.bf16.gmra.mxu1 %v12937_v53 }
 0x13f   : > { %vm1690_vm1 = vcmp.ne.s32.totalorder %v1686_v18, %v13582_v43  ;;  %vm1691_vm13 = vcmp.ne.s32.totalorder %v1687_v34, %v13585_v44  ;;  %vm3419_vm6 = vcmp.ne.s32.totalorder %v3415_v24, %v13582_v43  ;;  %vm3420_vm12 = vcmp.ne.s32.totalorder %v3416_v2, %v13585_v44  ;;  %v403_v34 = vld [vmem:[%s13542_s25 + $0x78] sm:$0xff]   ;;  %s13338_s25 = sshra.s32 %s10993_s27, 4  ;;  %s13339_s25 = int_to_ptr.hbm [resolvable:$true] %s13338_s25 }
 0x140   : > { %vm14828_vm9 = vmpackc.low %vm1691_vm13, %vm1690_vm1  ;;  %v17926_v41 = vmov 0  ;;  %v4139_v48 = vunpack.c.l.b16 %v4024_v38  ;;  %v3199_v29 = vsel %vm13589_vm8, %v13595_v47, %v3198_v60  ;;  %v670_v55 = vand.u32 15, %v466_v31  ;;  %435 = vst [vmem:[#allocation2 + $0x84] sm:$0xff] %v403_v34   ;;  %v2669_v31 = vld [vmem:[#allocation2 + $0x78] sm:$0xf]  ;;  %s13340_s21 = scalar_lea.hbm %s13339_s25, 1  ;;  %p13345_p0 = scmp.lt.s32.totalorder %s13339_s25, %s17502_s9 }
 0x141   : > { %v17927_v41 = vsel %vm14828_vm9, 4294967295, %v17926_v41  ;;  %v469_v18 = vadd.s32 248, %v13509_v8  ;;  %v1755_v24 = vsel %vm14828_vm9, %v913_v14, 0  ;;  %v4025_v2 = vsel %vm14828_vm9, %v3992_v39, 0  ;;  %vm14843_vm1 = vmpackc.low %vm3420_vm12, %vm3419_vm6  ;;  %v14849_v14 = vpop.f32.mrf.mxu1  ;;  %p13341_p11 = scmp.ne.s32.totalorder %s13339_s25, %s13340_s21  ;;  %p13346_p1 = scmp.lt.s32.totalorder %s13344_s23, %s13340_s21 }
 0x142   : > { %v17929_v36 = vmov 0  ;;  %v3422_v38 = vunpack.c.l.b16 %v3199_v29  ;;  %v3423_v1 = vunpack.c.h.b16 %v3199_v29  ;;  %v1869_v11 = vunpack.c.l.b16 %v1755_v24  ;;  %17932 = vst [vmem:[#allocation78_spill] sm:$0xff] %v14849_v14  ;;  %v13003_v29 = vld [vmem:[%s17494_s1 + $0x1b8] sm:$0xff] }
 0x143   : > { %v17930_v36 = vsel %vm14843_vm1, 4294967295, %v17929_v36  ;;  %v4140_v60 = vunpack.c.l.b16 %v4025_v2  ;;  %v3478_v8 = vsel %vm14843_vm1, %v2668_v10, 0  ;;  %v947_v16 = vadd.s32 4294967295, %v670_v55  ;;  %v2143_v2 = vpop.f32.mrf.mxu0  ;;  %5871 = vmatpush.bf16.msrb.mxu2 %v13003_v29  ;;  %p13342_p12 = pnand %p13341_p11, %p13478_p5  ;;  %p13347_p2 = por %p13346_p1, %p13345_p0 }
 0x144   : > { %17931 = vst [vmem:[#allocation77_spill] sm:$0xff] %v17930_v36  ;;  %vm3426_vm13 = vcmp.ne.s32.totalorder %v3422_v38, %v13582_v43  ;;  %vm3427_vm12 = vcmp.ne.s32.totalorder %v3423_v1, %v13585_v44  ;;  %v3726_v39 = vor.u32 %v3724_v33, %v14781_v13  ;;  %v691_v12 = vand.u32 15, %v469_v18 }
 0x145   : > { %v1888_v34 = vpack.c.b16 %v1869_v11, %v1868_v19  ;;  %v4159_v24 = vpack.c.b16 %v4140_v60, %v4139_v48  ;;  %vm14857_vm6 = vmpackc.low %vm3427_vm12, %vm3426_vm13  ;;  %v17933_v10 = vmov 0  ;;  %v3593_v55 = vunpack.c.l.b16 %v3478_v8  ;;  %p13343_p13 = pneg %p13342_p12 }
 0x146   : > { %v17934_v10 = vsel %vm14857_vm6, 4294967295, %v17933_v10  ;;  %vm979_vm1 = vcmp.ge.s32.totalorder %v947_v16, 0  ;;  %v2586_v53 = vadd.f32 %v14788_v40, %v2143_v2  ;;  %v3479_v1 = vsel %vm14857_vm6, %v2669_v31, 0 }
 0x147   : > { %17935 = vst [vmem:[#allocation79_spill] sm:$0xff] %v17934_v10  ;;  %vm1139_vm9 = vmpackc.low %vm979_vm1, %vm979_vm1  ;;  %v2704_v13 = vadd.s32 1, %v691_v12  ;;  %v3200_v33 = vrot.slane %v14812_v52, 4  ;;  %v2010_v18 = vshrl.u32 %v1888_v34, 16  ;;  %v2013_v11 = vshll.u32 %v1888_v34, 16  ;;  %p13348_p3 = pnand %p13347_p2, %p13343_p13 }
 0x148   : > { %v4280_v19 = vshrl.u32 %v4159_v24, 16  ;;  %v4283_v48 = vshll.u32 %v4159_v24, 16  ;;  %v3594_v38 = vunpack.c.l.b16 %v3479_v1  ;;  %v1171_v60 = vsel %vm1139_vm9, 65537, %v17765_v22  ;;  %v4413_v24 = vpop.f32.mrf.mxu3 }
 0x149   : > { %v3911_v14 = vadd.f32 %v3846_v63, %v2586_v53  ;;  %vm2768_vm13 = vcmp.lt.s32.totalorder %v2704_v13, 16  ;;  %v2012_v8 = vrot.slane %v2010_v18, 3  ;;  %v2015_v16 = vrot.slane %v2013_v11, 4  ;;  %v14879_v11 = vpop.f32.mrf.mxu2 }
 0x14a   : > { %v4282_v40 = vrot.slane %v4280_v19, 3  ;;  %v4285_v2 = vrot.slane %v4283_v48, 4  ;;  %vm2896_vm12 = vmpackc.low %vm2768_vm13, %vm2768_vm13  ;;  %v14866_v31 = vpack.c.b16 %v3594_v38, %v3593_v55  ;;  %v1458_v12 = vshll.u32 %v1171_v60, 16  ;;  %17937 = vst [vmem:[#allocation81_spill] sm:$0xff] %v14879_v11  ;;  %v2526_v19 = vpop.f32.mrf.mxu1  ;;  %v13002_v11 = vld [vmem:[%s17494_s1 + $0x1b0] sm:$0xff] }
 0x14b   : > { %v1462_v10 = vshrl.u32 %v1171_v60, 16  ;;  %v2928_v52 = vsel %vm2896_vm12, 65537, %v17765_v22  ;;  %v14869_v29 = vor.u32 %v2015_v16, %v2012_v8  ;;  %v3208_v63 = vsel %vm13589_vm8, %v3200_v33, %v13593_v46  ;;  %v14887_v60 = vpop.f32.mrf.mxu0  ;;  %5872 = vmatpush.bf16.msrb.mxu2 %v13002_v11 }
 0x14c   : > { %v14871_v34 = vor.u32 %v4285_v2, %v4282_v40  ;;  %v3211_v53 = vshrl.u32 %v2928_v52, 16  ;;  %v3728_v1 = vshll.u32 %v14866_v31, 16  ;;  %v1460_v13 = vrot.slane %v1458_v12, 5  ;;  %17940 = vst [vmem:[#allocation82_spill] sm:$0xff] %v14887_v60  ;;  %v914_v12 = vld [vmem:[#allocation2 + $0x70] sm:$0xf] }
 0x14d   : > { %v1464_v18 = vrot.slane %v1462_v10, 4  ;;  %v14877_v55 = vadd.f32 %v4413_v24, %v3911_v14  ;;  %vm17938_vm9 = vsmask.f32 4352  ;;  %v3214_v33 = vshll.u32 %v2928_v52, 16  ;;  %v3993_v52 = vld [vmem:[#allocation2 + $0x78] sm:$0xf] }
 0x14e   : > { %v2017_v48 = vsel %vm17938_vm9, %v14776_v5, %v14869_v29  ;;  %vm17939_vm1 = vmmov %vm17938_vm9  ;;  %v14889_v46 = vrot.slane %v3211_v53, 7  ;;  %v14891_v14 = vrot.slane %v3728_v1, 1  ;;  %v1461_v10 = vsel %vm13731_vm15, %v13708_v57, %v1460_v13 }
 0x14f   : > { %17936 = vst [vmem:[#allocation80_spill] sm:$0xff] %v14877_v55  ;;  %v4287_v38 = vsel %vm17939_vm1, %v14778_v51, %v14871_v34  ;;  %2177 = vmatmul.bf16.gmra.mxu0 %v2017_v48  ;;  %v1465_v8 = vor.u32 %v1464_v18, %v1460_v13  ;;  %v1693_v16 = vunpack.c.l.b16 %v1461_v10  ;;  %v1694_v5 = vunpack.c.h.b16 %v1461_v10 }
 0x150   : > { %4447 = vmatmul.bf16.gmra.mxu3 %v4287_v38  ;;  %v3216_v40 = vor.u32 %v3214_v33, %v14889_v46  ;;  %v3429_v2 = vunpack.c.l.b16 %v3208_v63  ;;  %vm17941_vm13 = vsmask.f32 7424  ;;  %v3430_v53 = vunpack.c.h.b16 %v3208_v63 }
 0x151   : > { %v3731_v51 = vsel %vm17941_vm13, %v3726_v39, %v14891_v14  ;;  %v1466_v24 = vrot.slane %v1465_v8, 4  ;;  %v684_v1 = vand.u32 15, %v14822_v59  ;;  %vm1697_vm12 = vcmp.ne.s32.totalorder %v1693_v16, %v13582_v43  ;;  %v2670_v59 = vld [vmem:[#allocation2 + $0x7c] sm:$0xf]  ;;  %v14918_v8 = vpop.f32.mrf.mxu3 }
 0x152   : > { %3885 = vmatmul.bf16.gmra.mxu2 %v3731_v51  ;;  %vm1698_vm9 = vcmp.ne.s32.totalorder %v1694_v5, %v13585_v44  ;;  %v3217_v13 = vsel %vm13589_vm8, %v13595_v47, %v3216_v40  ;;  %vm3433_vm1 = vcmp.ne.s32.totalorder %v3429_v2, %v13582_v43  ;;  %vm3434_vm6 = vcmp.ne.s32.totalorder %v3430_v53, %v13585_v44  ;;  %v915_v5 = vld [vmem:[#allocation2 + $0x74] sm:$0xf]  ;;  %v3994_v2 = vld [vmem:[#allocation2 + $0x7c] sm:$0xf]  ;;  %v14955_v60 = vpop.f32.mrf.mxu1 }
 0x153   : > { %v1471_v39 = vsel %vm13731_vm15, %v1466_v24, %v13615_v56  ;;  %vm14909_vm13 = vmpackc.low %vm1698_vm9, %vm1697_vm12  ;;  %v3436_v63 = vunpack.c.l.b16 %v3217_v13  ;;  %v3437_v48 = vunpack.c.h.b16 %v3217_v13  ;;  %17944 = vst [vmem:[#allocation83_spill] sm:$0xff] %v14918_v8  ;;  %v17945_v16 = vmov 0  ;;  %v12938_v24 = vld [vmem:[#allocation2 + $0x74] sm:$0xff]  ;;  %v3851_v8 = vpop.f32.mrf.mxu2 }
 0x154   : > { %v1700_v38 = vunpack.c.l.b16 %v1471_v39  ;;  %v1701_v33 = vunpack.c.h.b16 %v1471_v39  ;;  %v1756_v47 = vsel %vm14909_vm13, %v914_v12, 0  ;;  %v4026_v10 = vsel %vm14909_vm13, %v3993_v52, 0  ;;  %vm14920_vm8 = vmpackc.low %vm3434_vm6, %vm3433_vm1  ;;  %v2148_v12 = vpop.f32.mrf.mxu0  ;;  %v2671_v52 = vld [vmem:[#allocation2 + $0x80] sm:$0xf]  ;;  %v12987_v39 = vld [vmem:[%s17494_s1 + $0x138] sm:$0xff]  ;;  %2565 = vmatmul.bf16.gmra.mxu1 %v12938_v24  ;;  %17955 = vst [vmem:[#allocation86_spill] sm:$0xff] %v14955_v60 }
 0x155   : > { %v17946_v16 = vsel %vm14920_vm8, 4294967295, %v17945_v16  ;;  %v1870_v40 = vunpack.c.l.b16 %v1756_v47  ;;  %vm14925_vm12 = vcmp.ne.s32.totalorder %v3436_v63, %v13582_v43  ;;  %vm14932_vm6 = vcmp.ne.s32.totalorder %v3437_v48, %v13585_v44  ;;  %v13027_v63 = vld [vmem:[%s17494_s1 + $0x1f8] sm:$0xff]  ;;  %4757 = vmatpush.bf16.msrb.mxu0 %v12987_v39  ;;  %v12994_v53 = vld [vmem:[%s17494_s1 + $0x170] sm:$0xff] }
 0x156   : > { %17947 = vst [vmem:[#allocation84_spill] sm:$0xff] %v17946_v16  ;;  %vm1704_vm9 = vcmp.ne.s32.totalorder %v1700_v38, %v13582_v43  ;;  %vm1705_vm5 = vcmp.ne.s32.totalorder %v1701_v33, %v13585_v44  ;;  %v3480_v13 = vsel %vm14920_vm8, %v2670_v59, 0  ;;  %v17952_v38 = vmov 0  ;;  %v12995_v59 = vld [vmem:[%s17494_s1 + $0x178] sm:$0xff]  ;;  %6249 = vmatpush.bf16.msrb.mxu3 %v13027_v63 }
 0x157   : > { %vm14944_vm1 = vmpackc.low %vm1705_vm5, %vm1704_vm9  ;;  %v4141_v33 = vunpack.c.l.b16 %v4026_v10  ;;  %v2588_v48 = vadd.f32 %v2526_v19, %v2148_v12  ;;  %v3732_v47 = vshrl.u32 %v14866_v31, 16  ;;  %v949_v45 = vadd.s32 4294967295, %v684_v1  ;;  %v12986_v10 = vld [vmem:[%s17494_s1 + $0x130] sm:$0xff]  ;;  %5304 = vmatpush.bf16.msrb.mxu1 %v12995_v59 }
 0x158   : > { %v17953_v38 = vsel %vm14944_vm1, 4294967295, %v17952_v38  ;;  %v1757_v55 = vsel %vm14944_vm1, %v915_v5, 0  ;;  %v4027_v19 = vsel %vm14944_vm1, %v3994_v2, 0  ;;  %vm14965_vm5 = vmpackc.low %vm14932_vm6, %vm14925_vm12  ;;  %v17956_v31 = vmov 0  ;;  %v13026_v5 = vld [vmem:[%s17494_s1 + $0x1f0] sm:$0xff] }
 0x159   : > { %17954 = vst [vmem:[#allocation85_spill] sm:$0xff] %v17953_v38  ;;  %v17957_v31 = vsel %vm14965_vm5, 4294967295, %v17956_v31  ;;  %v3595_v1 = vunpack.c.l.b16 %v3480_v13  ;;  %v3218_v2 = vrot.slane %v14889_v46, 4  ;;  %v1871_v51 = vunpack.c.l.b16 %v1757_v55  ;;  %v13001_v13 = vld [vmem:[%s17494_s1 + $0x1a8] sm:$0xff]  ;;  %4758 = vmatpush.bf16.msrb.mxu0 %v12986_v10  ;;  %v13000_v10 = vld [vmem:[%s17494_s1 + $0x1a0] sm:$0xff] }
 0x15a   : > { %17958 = vst [vmem:[#allocation87_spill] sm:$0xff] %v17957_v31  ;;  %v4142_v24 = vunpack.c.l.b16 %v4027_v19  ;;  %v3481_v12 = vsel %vm14965_vm5, %v2671_v52, 0  ;;  %vm981_vm12 = vcmp.ge.s32.totalorder %v949_v45, 0  ;;  %v3913_v63 = vadd.f32 %v3851_v8, %v2588_v48  ;;  %v4418_v31 = vpop.f32.mrf.mxu3  ;;  %6250 = vmatpush.bf16.msrb.mxu3 %v13026_v5  ;;  %v12985_v45 = vld [vmem:[%s17494_s1 + $0x128] sm:$0xff]  ;;  %5873 = vmatpush.bf16.msrb.mxu2 %v13001_v13  ;;  %v15007_v13 = vpop.f32.mrf.mxu1 }
 0x15b   : > { %v3596_v39 = vunpack.c.l.b16 %v3481_v12  ;;  %v3443_v60 = vunpack.c.l.b16 %v3218_v2  ;;  %v1889_v46 = vpack.c.b16 %v1871_v51, %v1870_v40  ;;  %v3734_v19 = vor.u32 %v3732_v47, %v14891_v14  ;;  %vm1141_vm9 = vmpackc.low %vm981_vm12, %vm981_vm12  ;;  %v13025_v8 = vld [vmem:[%s17494_s1 + $0x1e8] sm:$0xff]  ;;  %5305 = vmatpush.bf16.msrb.mxu1 %v12994_v53  ;;  %v15005_v53 = vpop.f32.mrf.mxu2 }
 0x15c   : > { %v4160_v55 = vpack.c.b16 %v4142_v24, %v4141_v33  ;;  %v1721_v52 = vunpack.c.l.b16 %v13708_v57  ;;  %v1173_v59 = vsel %vm1141_vm9, 65537, %v17765_v22  ;;  %v3444_v40 = vunpack.c.h.b16 %v3218_v2  ;;  %17960 = vst [vmem:[#allocation89_spill] sm:$0xff] %v15005_v53  ;;  %v15011_v38 = vpop.f32.mrf.mxu0 }
 0x15d   : > { %v14986_v11 = vpack.c.b16 %v3596_v39, %v3595_v1  ;;  %vm3447_vm6 = vcmp.ne.s32.totalorder %v3443_v60, %v13582_v43  ;;  %v2019_v14 = vshrl.u32 %v1889_v46, 16  ;;  %v2022_v33 = vshll.u32 %v1889_v46, 16  ;;  %v12993_v1 = vld [vmem:[%s17494_s1 + $0x168] sm:$0xff]  ;;  %17961 = vst [vmem:[#allocation90_spill] sm:$0xff] %v15011_v38  ;;  %4759 = vmatpush.bf16.msrb.mxu0 %v12985_v45 }
 0x15e   : > { %v4289_v48 = vshrl.u32 %v4160_v55, 16  ;;  %v4292_v47 = vshll.u32 %v4160_v55, 16  ;;  %v1478_v51 = vshll.u32 %v1173_v59, 16  ;;  %v1482_v2 = vshrl.u32 %v1173_v59, 16  ;;  %6251 = vmatpush.bf16.msrb.mxu3 %v13025_v8  ;;  %5874 = vmatpush.bf16.msrb.mxu2 %v13000_v10  ;;  %v12992_v10 = vld [vmem:[%s17494_s1 + $0x160] sm:$0xff] }
 0x15f   : > { %v3736_v5 = vshll.u32 %v14986_v11, 16  ;;  %v15003_v24 = vadd.f32 %v4418_v31, %v3913_v63  ;;  %v2021_v12 = vrot.slane %v2019_v14, 3  ;;  %v2024_v39 = vrot.slane %v2022_v33, 4  ;;  %5306 = vmatpush.bf16.msrb.mxu1 %v12993_v1  ;;  %v12984_v14 = vld [vmem:[%s17494_s1 + $0x120] sm:$0xff] }
 0x160   : > { %v4291_v46 = vrot.slane %v4289_v48, 3  ;;  %v4294_v55 = vrot.slane %v4292_v47, 4  ;;  %v1480_v16 = vrot.slane %v1478_v51, 5  ;;  %v1484_v36 = vrot.slane %v1482_v2, 4  ;;  %v13024_v33 = vld [vmem:[%s17494_s1 + $0x1e0] sm:$0xff] }
 0x161   : > { %17959 = vst [vmem:[#allocation88_spill] sm:$0xff] %v15003_v24  ;;  %v15009_v22 = vrot.slane %v3736_v5, 1  ;;  %v1722_v59 = vunpack.c.h.b16 %v13708_v57  ;;  %v15014_v31 = vor.u32 %v2024_v39, %v2021_v12  ;;  %v2672_v48 = vld [vmem:[#allocation2 + $0x84] sm:$0x1]  ;;  %vm3448_vm12 = vcmp.ne.s32.totalorder %v3444_v40, %v13585_v44  ;;  %v12999_v40 = vld [vmem:[%s17494_s1 + $0x198] sm:$0xff]  ;;  %4760 = vmatpush.bf16.msrb.mxu0 %v12984_v14 }
 0x162   : > { %v15016_v63 = vor.u32 %v4294_v55, %v4291_v46  ;;  %vm17962_vm9 = vsmask.f32 7424  ;;  %v1481_v8 = vsel %vm13731_vm15, %v13708_v57, %v1480_v16  ;;  %v1485_v47 = vor.u32 %v1484_v36, %v1480_v16  ;;  %vm15032_vm5 = vmpackc.low %vm3448_vm12, %vm3447_vm6  ;;  %v918_v5 = vld [vmem:[#allocation2 + $0x80] sm:$0xf]  ;;  %v3997_v51 = vld [vmem:[#allocation2 + $0x88] sm:$0xf]  ;;  %6252 = vmatpush.bf16.msrb.mxu3 %v13024_v33  ;;  %5875 = vmatpush.bf16.msrb.mxu2 %v12999_v40 }
 0x163   : > { %v3739_v45 = vsel %vm17962_vm9, %v3734_v19, %v15009_v22  ;;  %v17963_v1 = vmov 0  ;;  %vm15043_vm9 = vcmp.ne.s32.totalorder %v1721_v52, %v13582_v43  ;;  %vm17967_vm8 = vsmask.f32 4352  ;;  %v916_v2 = vld [vmem:[#allocation2 + $0x78] sm:$0xf]  ;;  %v12939_v46 = vld [vmem:[#allocation2 + $0x7c] sm:$0xff]  ;;  %5307 = vmatpush.bf16.msrb.mxu1 %v12992_v10  ;;  %v3856_v40 = vpop.f32.mrf.mxu2 }
 0x164   : > { %v17964_v1 = vsel %vm15032_vm5, 4294967295, %v17963_v1  ;;  %v2026_v57 = vsel %vm17967_vm8, %v14869_v29, %v15014_v31  ;;  %vm17968_vm6 = vmmov %vm17967_vm8  ;;  %3890 = vmatmul.bf16.gmra.mxu2 %v3739_v45  ;;  %v1707_v60 = vunpack.c.l.b16 %v1481_v8  ;;  %v1708_v16 = vunpack.c.h.b16 %v1481_v8  ;;  %v3995_v12 = vld [vmem:[#allocation2 + $0x80] sm:$0xf]  ;;  %v13023_v8 = vld [vmem:[%s17494_s1 + $0x1d8] sm:$0xff]  ;;  %2570 = vmatmul.bf16.gmra.mxu1 %v12939_v46 }
 0x165   : > { %v4296_v36 = vsel %vm17968_vm6, %v14871_v34, %v15016_v63  ;;  %2182 = vmatmul.bf16.gmra.mxu0 %v2026_v57  ;;  %v1486_v52 = vrot.slane %v1485_v47, 4  ;;  %v3482_v39 = vsel %vm15032_vm5, %v2672_v48, 0  ;;  %vm1726_vm12 = vcmp.ne.s32.totalorder %v1722_v59, %v13585_v44  ;;  %v15071_v48 = vpop.f32.mrf.mxu3  ;;  %v12991_v57 = vld [vmem:[%s17494_s1 + $0x158] sm:$0xff]  ;;  %v4941_v59 = vld [vmem:[#allocation2 + $0x88] sm:$0xf] }
 0x166   : > { %4452 = vmatmul.bf16.gmra.mxu3 %v4296_v36  ;;  %vm1711_vm8 = vcmp.ne.s32.totalorder %v1707_v60, %v13582_v43  ;;  %vm1712_vm1 = vcmp.ne.s32.totalorder %v1708_v16, %v13585_v44  ;;  %v3597_v29 = vunpack.c.l.b16 %v3482_v39  ;;  %vm15060_vm6 = vmpackc.low %vm1726_vm12, %vm15043_vm9  ;;  %17973 = vst [vmem:[#allocation91_spill] sm:$0xff] %v15071_v48  ;;  %v3740_v14 = vshrl.u32 %v14986_v11, 16  ;;  %v12998_v36 = vld [vmem:[%s17494_s1 + $0x190] sm:$0xff]  ;;  %v15094_v60 = vpop.f32.mrf.mxu1  ;;  %v917_v16 = vld [vmem:[#allocation2 + $0x7c] sm:$0xf] }
 0x167   : > { %v1491_v55 = vsel %vm13731_vm15, %v1486_v52, %v13615_v56  ;;  %vm15067_vm5 = vmpackc.low %vm1712_vm1, %vm1711_vm8  ;;  %v1760_v33 = vsel %vm15060_vm6, %v918_v5, 0  ;;  %v4030_v45 = vsel %vm15060_vm6, %v3997_v51, 0  ;;  %v12983_v56 = vld [vmem:[%s17494_s1 + $0x118] sm:$0xff]  ;;  %17974 = vst [vmem:[#allocation92_spill] sm:$0xff] %v15094_v60  ;;  %v3996_v5 = vld [vmem:[#allocation2 + $0x84] sm:$0xf]  ;;  %6253 = vmatpush.bf16.msrb.mxu3 %v13023_v8  ;;  %5308 = vmatpush.bf16.msrb.mxu1 %v12991_v57 }
 0x168   : > { %v1714_v47 = vunpack.c.l.b16 %v1491_v55  ;;  %v1715_v19 = vunpack.c.h.b16 %v1491_v55  ;;  %v1758_v11 = vsel %vm15067_vm5, %v916_v2, 0  ;;  %v4028_v10 = vsel %vm15067_vm5, %v3995_v12, 0  ;;  %4761 = vmatpush.bf16.msrb.mxu0 %v12983_v56  ;;  %v12982_v12 = vld [vmem:[%s17494_s1 + $0x110] sm:$0xff]  ;;  %5876 = vmatpush.bf16.msrb.mxu2 %v12998_v36  ;;  %v12997_v8 = vld [vmem:[%s17494_s1 + $0x188] sm:$0xff] }
 0x169   : > { %v3614_v51 = vpack.c.b16 %v3597_v29, %v3597_v29  ;;  %v1874_v52 = vunpack.c.l.b16 %v1760_v33  ;;  %v4145_v2 = vunpack.c.l.b16 %v4030_v45  ;;  %v13022_v39 = vld [vmem:[%s17494_s1 + $0x1d0] sm:$0xff]  ;;  %v1872_v29 = vunpack.c.l.b16 %v1758_v11  ;;  %v2153_v33 = vpop.f32.mrf.mxu0  ;;  %v13033_v34 = vld [vmem:[%s17494_s1 + $0x228] sm:$0xff] }
 0x16a   : > { %vm1718_vm1 = vcmp.ne.s32.totalorder %v1714_v47, %v13582_v43  ;;  %vm1719_vm9 = vcmp.ne.s32.totalorder %v1715_v19, %v13585_v44  ;;  %v4143_v55 = vunpack.c.l.b16 %v4028_v10  ;;  %v3742_v47 = vor.u32 %v3740_v14, %v15009_v22  ;;  %v12990_v56 = vld [vmem:[%s17494_s1 + $0x150] sm:$0xff] }
 0x16b   : > { %vm15104_vm12 = vmpackc.low %vm1719_vm9, %vm1718_vm1  ;;  %v3744_v45 = vshll.u32 %v3614_v51, 16  ;;  %v2590_v10 = vadd.f32 %v15007_v13, %v2153_v33  ;;  %v15120_v22 = vpack.c.b16 %v1874_v52, %v1874_v52  ;;  %v5457_v51 = vld [vmem:[#allocation2 + $0x10] sm:$0x8]  ;;  %v15122_v44 = vpack.c.b16 %v4145_v2, %v4145_v2  ;;  %6254 = vmatpush.bf16.msrb.mxu3 %v13022_v39  ;;  %5309 = vmatpush.bf16.msrb.mxu1 %v12990_v56  ;;  %v12989_v2 = vld [vmem:[%s17494_s1 + $0x148] sm:$0xff] }
 0x16c   : > { %v1759_v19 = vsel %vm15104_vm12, %v917_v16, 0  ;;  %v4029_v11 = vsel %vm15104_vm12, %v3996_v5, 0  ;;  %4762 = vmatpush.bf16.msrb.mxu0 %v12982_v12  ;;  %v12981_v16 = vld [vmem:[%s17494_s1 + $0x108] sm:$0xff]  ;;  %5877 = vmatpush.bf16.msrb.mxu2 %v12997_v8  ;;  %v5458_v12 = vld [vmem:[#allocation2 + $0x14] sm:$0xf]  ;;  %v5490_v8 = vsel %vm13744_vm3, %v5457_v51, 0  ;;  %vm17984_vm1 = vnez %v17732_v0 }
 0x16d   : > { %v1873_v14 = vunpack.c.l.b16 %v1759_v19  ;;  %v4144_v57 = vunpack.c.l.b16 %v4029_v11  ;;  %v3746_v36 = vrot.slane %v3744_v45, 1  ;;  %v3915_v43 = vadd.f32 %v3856_v40, %v2590_v10  ;;  %v13021_v5 = vld [vmem:[%s17494_s1 + $0x1c8] sm:$0xff]  ;;  %v12996_v40 = vld [vmem:[%s17494_s1 + $0x180] sm:$0xff]  ;;  %v15138_v45 = vpop.f32.mrf.mxu2  ;;  %v5459_v56 = vld [vmem:[#allocation2 + $0x18] sm:$0xf] }
 0x16e   : > { %vm17977_vm8 = vsmask.f32 7424  ;;  %v2037_v33 = vshrl.u32 %v15120_v22, 16  ;;  %17978 = vst [vmem:[#allocation93_spill] sm:$0xff] %v15138_v45  ;;  %v15140_v19 = vpop.f32.mrf.mxu1  ;;  %v2040_v7 = vshll.u32 %v15120_v22, 16  ;;  %v4307_v48 = vshrl.u32 %v15122_v44, 16 }
 0x16f   : > { %v1890_v13 = vpack.c.b16 %v1873_v14, %v1872_v29  ;;  %v4161_v52 = vpack.c.b16 %v4144_v57, %v4143_v55  ;;  %v3747_v39 = vsel %vm17977_vm8, %v3742_v47, %v3746_v36  ;;  %v12980_v29 = vld [vmem:[%s17494_s1 + $0x100] sm:$0xff]  ;;  %v4423_v57 = vpop.f32.mrf.mxu3  ;;  %v5460_v36 = vld [vmem:[#allocation2 + $0x1c] sm:$0xf]  ;;  %6255 = vmatpush.bf16.msrb.mxu3 %v13021_v5  ;;  %v5491_v38 = vsel %vm13773_vm2, %v5458_v12, 0  ;;  %v4910_v51 = vld [vmem:[#allocation2 + $0xc] sm:$0xf]  ;;  %5310 = vmatpush.bf16.msrb.mxu1 %v12989_v2 }
 0x170   : > { %v13020_v55 = vld [vmem:[%s17494_s1 + $0x1c0] sm:$0xff]  ;;  %v15152_v53 = vadd.f32 %v4423_v57, %v3915_v43  ;;  %4763 = vmatpush.bf16.msrb.mxu0 %v12981_v16  ;;  %5878 = vmatpush.bf16.msrb.mxu2 %v12996_v40  ;;  %v4911_v43 = vld [vmem:[#allocation2 + $0x10] sm:$0xf]  ;;  %v4310_v22 = vshll.u32 %v15122_v44, 16  ;;  %v5492_v54 = vsel %vm13768_vm0, %v5459_v56, 0  ;;  %v5493_v16 = vsel %vm13795_vm10, %v5460_v36, 0 }
 0x171   : > { %v2028_v11 = vshrl.u32 %v1890_v13, 16  ;;  %v2031_v47 = vshll.u32 %v1890_v13, 16  ;;  %v4298_v10 = vshrl.u32 %v4161_v52, 16  ;;  %v4301_v14 = vshll.u32 %v4161_v52, 16  ;;  %v15159_v24 = vpop.f32.mrf.mxu0  ;;  %v4913_v2 = vld [vmem:[#allocation2 + $0x18] sm:$0xf] }
 0x172   : > { %v5605_v5 = vunpack.c.l.b16 %v5490_v8  ;;  %v15170_v40 = vrot.slane %v2037_v33, 3  ;;  %v5608_v44 = vunpack.c.l.b16 %v5493_v16  ;;  %v4943_v49 = vsel %vm13642_vm11, %v4910_v51, 0  ;;  %v5461_v57 = vld [vmem:[#allocation2 + $0x20] sm:$0xf] }
 0x173   : > { %v2030_v13 = vrot.slane %v2028_v11, 3  ;;  %v2033_v52 = vrot.slane %v2031_v47, 4  ;;  %v4300_v45 = vrot.slane %v4298_v10, 3  ;;  %v4303_v60 = vrot.slane %v4301_v14, 4  ;;  %v4912_v14 = vld [vmem:[#allocation2 + $0x14] sm:$0xf]  ;;  %6256 = vmatpush.bf16.msrb.mxu3 %v13020_v55  ;;  %5311 = vmatpush.bf16.msrb.mxu1 %v12988_v23 }
 0x174   : > { %3895 = vmatmul.bf16.gmra.mxu2 %v3747_v39  ;;  %v5606_v47 = vunpack.c.l.b16 %v5491_v38  ;;  %v5607_v10 = vunpack.c.l.b16 %v5492_v54  ;;  %4764 = vmatpush.bf16.msrb.mxu0 %v12980_v29  ;;  %v4944_v6 = vsel %vm13657_vm14, %v4911_v43, 0  ;;  %vm17979_vm3 = vsmask.f32 4352 }
 0x175   : > { %v15166_v12 = vor.u32 %v2033_v52, %v2030_v13  ;;  %v15168_v11 = vor.u32 %v4303_v60, %v4300_v45  ;;  %vm17980_vm0 = vmmov %vm17979_vm3  ;;  %v15182_v39 = vrot.slane %v2040_v7, 4  ;;  %v15184_v33 = vrot.slane %v4307_v48, 3  ;;  %v3861_v55 = vpop.f32.mrf.mxu2 }
 0x176   : > { %v5638_v45 = vpack.c.b16 %v5606_v47, %v5605_v5  ;;  %v5639_v29 = vpack.c.b16 %v5608_v44, %v5607_v10  ;;  %vm17981_vm2 = vnez %v17702_v25  ;;  %vm17982_vm10 = vnez %v17704_v30  ;;  %v15190_v8 = vpop.f32.mrf.mxu1  ;;  %v5462_v10 = vld [vmem:[#allocation2 + $0x24] sm:$0xf]  ;;  %vm17990_vm15 = vmmov %vm17980_vm0  ;;  %v18149_v30 = vld [vmem:[#allocation93_spill] sm:$0xff] }
 0x177   : > { %v2035_v60 = vsel %vm17979_vm3, %v15014_v31, %v15166_v12  ;;  %v4305_v38 = vsel %vm17980_vm0, %v15016_v63, %v15168_v11  ;;  %v4945_v56 = vsel %vm17981_vm2, %v4912_v14, 0  ;;  %v4946_v31 = vsel %vm17982_vm10, %v4913_v2, 0  ;;  %17983 = vst [vmem:[#allocation94_spill] sm:$0xff] %v15190_v8  ;;  %v15192_v63 = vpop.f32.mrf.mxu3  ;;  %v4915_v8 = vld [vmem:[#allocation2 + $0x20] sm:$0xf] }
 0x178   : > { %2187 = vmatmul.bf16.gmra.mxu0 %v2035_v60  ;;  %4457 = vmatmul.bf16.gmra.mxu3 %v4305_v38  ;;  %v5058_v7 = vunpack.c.l.b16 %v4943_v49  ;;  %v5059_v48 = vunpack.c.l.b16 %v4944_v6  ;;  %v5060_v36 = vunpack.c.l.b16 %v4945_v56  ;;  %v5061_v23 = vunpack.c.l.b16 %v4946_v31 }
 0x179   : > { %v4312_v51 = vrot.slane %v4310_v22, 4  ;;  %v5656_v13 = vshrl.u32 %v5638_v45, 16  ;;  %v5659_v52 = vshll.u32 %v5638_v45, 16  ;;  %v5664_v43 = vshrl.u32 %v5639_v29, 16  ;;  %v2158_v54 = vpop.f32.mrf.mxu0 }
 0x17a   : > { %v5667_v16 = vshll.u32 %v5639_v29, 16  ;;  %v5091_v5 = vpack.c.b16 %v5059_v48, %v5058_v7  ;;  %v5092_v47 = vpack.c.b16 %v5061_v23, %v5060_v36  ;;  %v5494_v14 = vsel %vm17984_vm1, %v5461_v57, 0  ;;  %v4914_v57 = vld [vmem:[#allocation2 + $0x1c] sm:$0xf] }
 0x17b   : > { %v2592_v2 = vadd.f32 %v15140_v19, %v2158_v54  ;;  %v5658_v44 = vrot.slane %v5656_v13, 3  ;;  %v5661_v60 = vrot.slane %v5659_v52, 4  ;;  %v5666_v49 = vrot.slane %v5664_v43, 3 }
 0x17c   : > { %v5669_v6 = vrot.slane %v5667_v16, 4  ;;  %v5109_v38 = vshrl.u32 %v5091_v5, 16  ;;  %v5111_v56 = vshll.u32 %v5091_v5, 16  ;;  %v5116_v22 = vshll.u32 %v5092_v47, 16 }
 0x17d   : > { %v5662_v31 = vor.u32 %v5661_v60, %v5658_v44  ;;  %v3917_v45 = vadd.f32 %v3861_v55, %v2592_v2  ;;  %vm17985_vm9 = vnez %v17738_v35  ;;  %v5609_v7 = vunpack.c.l.b16 %v5494_v14  ;;  %v15202_v52 = vpop.f32.mrf.mxu2 }
 0x17e   : > { %v5495_v29 = vsel %vm17985_vm9, %v5462_v10, 0  ;;  %v5670_v48 = vor.u32 %v5669_v6, %v5666_v49  ;;  %v5113_v36 = vrot.slane %v5111_v56, 1  ;;  %v5118_v23 = vrot.slane %v5116_v22, 1  ;;  %v2541_v43 = vpop.f32.mrf.mxu1  ;;  %vm17989_vm9 = vmmov %vm17980_vm0  ;;  %v5463_v22 = vld [vmem:[#allocation2 + $0x28] sm:$0xf] }
 0x17f   : > { %v5610_v0 = vunpack.c.l.b16 %v5495_v29  ;;  %v2043_v19 = vor.u32 %v15182_v39, %v15170_v40  ;;  %v4313_v13 = vor.u32 %v4312_v51, %v15184_v33  ;;  %vm17986_vm8 = vnez %v17720_v20  ;;  %v4428_v5 = vpop.f32.mrf.mxu3 }
 0x180   : > { %v4947_v55 = vsel %vm17986_vm8, %v4914_v57, 0  ;;  %vm17987_vm3 = vnez %v17725_v26  ;;  %v5671_v54 = vsel %vm17980_vm0, %v5662_v31, %v5670_v48  ;;  %v5114_v16 = vor.u32 %v5113_v36, %v5109_v38  ;;  %v5464_v31 = vld [vmem:[#allocation2 + $0x2c] sm:$0xf] }
 0x181   : > { %v4948_v35 = vsel %vm17987_vm3, %v4915_v8, 0  ;;  %v5640_v10 = vpack.c.b16 %v5610_v0, %v5609_v7  ;;  %v5062_v14 = vunpack.c.l.b16 %v4947_v55  ;;  %v15209_v2 = vadd.f32 %v4428_v5, %v3917_v45  ;;  %v15216_v49 = vpop.f32.mrf.mxu0 }
 0x182   : > { %v5063_v40 = vunpack.c.l.b16 %v4948_v35  ;;  %vm17988_vm1 = vsmask.f32 7424  ;;  %v2044_v44 = vsel %vm17989_vm9, %v15166_v12, %v2043_v19  ;;  %v4314_v8 = vsel %vm17990_vm15, %v15168_v11, %v4313_v13  ;;  %v4916_v35 = vld [vmem:[#allocation2 + $0x24] sm:$0xf] }
 0x183   : > { %v5119_v39 = vsel %vm17988_vm1, %v5114_v16, %v5118_v23  ;;  %v5673_v33 = vshrl.u32 %v5640_v10, 16  ;;  %v5676_v51 = vshll.u32 %v5640_v10, 16  ;;  %v5120_v45 = vshrl.u32 %v5092_v47, 16 }
 0x184   : > { %5879 = vmatmul.bf16.vlgmr.msrb.gmra.mxu2 %v5671_v54  ;;  %5312 = vmatmul.bf16.vlgmr.msrb.gmra.mxu1 %v5119_v39  ;;  %v5093_v60 = vpack.c.b16 %v5063_v40, %v5062_v14  ;;  %vm17991_vm0 = vnez %v17740_v3  ;;  %vm17992_vm1 = vnez %v17742_v58  ;;  %v4917_v54 = vld [vmem:[#allocation2 + $0x28] sm:$0xf]  ;;  %vm17993_vm15 = vnez %v17729_v61 }
 0x185   : > { %v5675_v6 = vrot.slane %v5673_v33, 3  ;;  %v5678_v38 = vrot.slane %v5676_v51, 4  ;;  %v5496_v7 = vsel %vm17991_vm0, %v5463_v22, 0  ;;  %v5497_v12 = vsel %vm17992_vm1, %v5464_v31, 0  ;;  %v3866_v11 = vpop.f32.mrf.mxu2  ;;  %v12964_v51 = vld [vmem:[#allocation2 + $0xc] sm:$0xff] }
 0x186   : > { %v15218_v56 = vpop.f32.mrf.mxu1  ;;  %v5124_v29 = vshll.u32 %v5093_v60, 16  ;;  %v5611_v36 = vunpack.c.l.b16 %v5496_v7  ;;  %v5612_v0 = vunpack.c.l.b16 %v5497_v12  ;;  %v5122_v19 = vor.u32 %v5120_v45, %v5118_v23 }
 0x187   : > { %v5679_v57 = vor.u32 %v5678_v38, %v5675_v6  ;;  %v15224_v55 = vpop.f32.mrf.mxu3  ;;  %v4949_v47 = vsel %vm17993_vm15, %v4916_v35, 0  ;;  %vm17994_vm9 = vnez %v17736_v32  ;;  %vm17995_vm0 = vsmask.f32 4352 }
 0x188   : > { %2192 = vmatmul.bf16.gmra.mxu0 %v2044_v44  ;;  %4462 = vmatmul.bf16.gmra.mxu3 %v4314_v8  ;;  %v5126_v13 = vrot.slane %v5124_v29, 1  ;;  %v5641_v5 = vpack.c.b16 %v5612_v0, %v5611_v36  ;;  %v4950_v3 = vsel %vm17994_vm9, %v4917_v54, 0  ;;  %vm17996_vm1 = vsmask.f32 7424  ;;  %v13004_v44 = vld [vmem:[#allocation2 + $0x14] sm:$0xff] }
 0x189   : > { %v5680_v58 = vsel %vm17995_vm0, %v5670_v48, %v5679_v57  ;;  %v5064_v14 = vunpack.c.l.b16 %v4949_v47  ;;  %v5065_v40 = vunpack.c.l.b16 %v4950_v3  ;;  %v5465_v36 = vld [vmem:[#allocation2 + $0x30] sm:$0xf]  ;;  %v5466_v0 = vld [vmem:[#allocation2 + $0x34] sm:$0xf]  ;;  %vm17998_vm0 = vnez %v17755_v37 }
 0x18a   : > { %v5127_v10 = vsel %vm17996_vm1, %v5122_v19, %v5126_v13  ;;  %v5682_v8 = vshrl.u32 %v5641_v5, 16  ;;  %v5685_v6 = vshll.u32 %v5641_v5, 16  ;;  %v5498_v35 = vsel %vm17998_vm0, %v5465_v36, 0 }
 0x18b   : > { %v5094_v22 = vpack.c.b16 %v5065_v40, %v5064_v14  ;;  %vm17999_vm1 = vnez %v17761_v17  ;;  %v5613_v54 = vunpack.c.l.b16 %v5498_v35  ;;  %v4918_v14 = vld [vmem:[#allocation2 + $0x2c] sm:$0xf]  ;;  %v4919_v40 = vld [vmem:[#allocation2 + $0x30] sm:$0xf]  ;;  %vm18000_vm9 = vnez %v17747_v50 }
 0x18c   : > { %v5684_v48 = vrot.slane %v5682_v8, 3  ;;  %v5687_v45 = vrot.slane %v5685_v6, 4  ;;  %v4951_v37 = vsel %vm18000_vm9, %v4918_v14, 0  ;;  %vm18001_vm0 = vnez %v17751_v42  ;;  %v5467_v14 = vld [vmem:[#allocation2 + $0x38] sm:$0xf] }
 0x18d   : > { %v2163_v23 = vpop.f32.mrf.mxu0  ;;  %v15232_v33 = vpop.f32.mrf.mxu2  ;;  %v5132_v12 = vshll.u32 %v5094_v22, 16  ;;  %v4952_v17 = vsel %vm18001_vm0, %v4919_v40, 0  ;;  %vm18003_vm15 = vsmask.f32 7424  ;;  %v5066_v8 = vunpack.c.l.b16 %v4951_v37  ;;  %v5468_v40 = vld [vmem:[#allocation2 + $0x3c] sm:$0xf] }
 0x18e   : > { %v2546_v16 = vpop.f32.mrf.mxu1  ;;  %v2594_v39 = vadd.f32 %v2541_v43, %v2163_v23  ;;  %v5128_v43 = vshrl.u32 %v5093_v60, 16  ;;  %v5688_v47 = vor.u32 %v5687_v45, %v5684_v48  ;;  %v5067_v6 = vunpack.c.l.b16 %v4952_v17  ;;  %v13005_v48 = vld [vmem:[#allocation2 + $0x1c] sm:$0xff] }
 0x18f   : > { %vm18009_vm0 = vnez %v17757_v62  ;;  %v4923_v62 = vld [vmem:[#allocation2 + $0x40] sm:$0xf] }
 0x190   : > { %v3919_v38 = vadd.f32 %v3866_v11, %v2594_v39  ;;  %v5499_v11 = vsel %vm17999_vm1, %v5466_v0, 0  ;;  %vm18002_vm1 = vsmask.f32 4352  ;;  %v5095_v36 = vpack.c.b16 %v5067_v6, %v5066_v8  ;;  %v4921_v6 = vld [vmem:[#allocation2 + $0x38] sm:$0xf] }
 0x191   : > { %v5614_v5 = vunpack.c.l.b16 %v5499_v11 }
 0x193   : > { %v5642_v39 = vpack.c.b16 %v5614_v5, %v5613_v54  ;;  %v5136_v5 = vshrl.u32 %v5094_v22, 16 }
 0x194   : > { %5884 = vmatmul.bf16.gmra.mxu2 %v5680_v58  ;;  %5317 = vmatmul.bf16.gmra.mxu1 %v5127_v10  ;;  %v4433_v31 = vpop.f32.mrf.mxu3  ;;  %v5130_v58 = vor.u32 %v5128_v43, %v5126_v13  ;;  %v5134_v10 = vrot.slane %v5132_v12, 1 }
 0x195   : > { %v15236_v7 = vadd.f32 %v4433_v31, %v3919_v38  ;;  %v15238_v19 = vpop.f32.mrf.mxu0  ;;  %v3871_v3 = vpop.f32.mrf.mxu2  ;;  %v12965_v31 = vld [vmem:[#allocation2 + $0x14] sm:$0xff]  ;;  %v5691_v45 = vshrl.u32 %v5642_v39, 16  ;;  %v5694_v43 = vshll.u32 %v5642_v39, 16 }
 0x196   : > { %v15234_v29 = vpop.f32.mrf.mxu1 }
 0x197   : > { %17997 = vst [vmem:[#allocation95_spill] sm:$0xff] %v15234_v29  ;;  %v5696_v11 = vrot.slane %v5694_v43, 4 }
 0x198   : > { %4765 = vmatmul.bf16.vlgmr.msrb.gmra.mxu0 %v12964_v51  ;;  %6257 = vmatmul.bf16.vlgmr.msrb.gmra.mxu3 %v13004_v44  ;;  %v5689_v51 = vsel %vm18002_vm1, %v5679_v57, %v5688_v47  ;;  %v5135_v44 = vsel %vm18003_vm15, %v5130_v58, %v5134_v10  ;;  %v5693_v57 = vrot.slane %v5691_v45, 3  ;;  %v5140_v58 = vshll.u32 %v5095_v36, 16 }
 0x199   : > { %vm18006_vm15 = vnez %v17769_v27  ;;  %vm18007_vm1 = vnez %v17772_v28 }
 0x19a   : > { %v5500_v39 = vsel %vm18006_vm15, %v5467_v14, 0  ;;  %v5142_v8 = vrot.slane %v5140_v58, 1  ;;  %vm18012_vm15 = vsmask.f32 4352 }
 0x19b   : > { %v5615_v37 = vunpack.c.l.b16 %v5500_v39 }
 0x19c   : > { %v15244_v60 = vpop.f32.mrf.mxu3 }
 0x19d   : > { %v2168_v13 = vpop.f32.mrf.mxu0  ;;  %v15254_v0 = vpop.f32.mrf.mxu2 }
 0x19e   : > { %v15246_v23 = vpop.f32.mrf.mxu1  ;;  %v2596_v38 = vadd.f32 %v2546_v16, %v2168_v13  ;;  %18004 = vst [vmem:[#allocation96_spill] sm:$0xff] %v15254_v0  ;;  %v4920_v13 = vld [vmem:[#allocation2 + $0x34] sm:$0xf] }
 0x1a0   : > { %v3921_v12 = vadd.f32 %v3871_v3, %v2596_v38  ;;  %v5501_v3 = vsel %vm18007_vm1, %v5468_v40, 0  ;;  %vm18013_vm1 = vsmask.f32 7424 }
 0x1a1   : > { %v5616_v17 = vunpack.c.l.b16 %v5501_v3 }
 0x1a3   : > { %v5643_v22 = vpack.c.b16 %v5616_v17, %v5615_v37  ;;  %v5144_v37 = vshrl.u32 %v5095_v36, 16 }
 0x1a4   : > { %5889 = vmatmul.bf16.gmra.mxu2 %v5689_v51  ;;  %5322 = vmatmul.bf16.gmra.mxu1 %v5135_v44  ;;  %v4438_v35 = vpop.f32.mrf.mxu3  ;;  %v5697_v51 = vor.u32 %v5696_v11, %v5693_v57  ;;  %v5138_v44 = vor.u32 %v5136_v5, %v5134_v10  ;;  %v12966_v57 = vld [vmem:[#allocation2 + $0x1c] sm:$0xff]  ;;  %v13006_v11 = vld [vmem:[#allocation2 + $0x24] sm:$0xff] }
 0x1a5   : > { %v15256_v54 = vadd.f32 %v4438_v35, %v3921_v12  ;;  %v15264_v38 = vpop.f32.mrf.mxu0  ;;  %v5700_v5 = vshrl.u32 %v5643_v22, 16  ;;  %v5703_v58 = vshll.u32 %v5643_v22, 16 }
 0x1a6   : > { %v15258_v16 = vpop.f32.mrf.mxu1  ;;  %18008 = vst [vmem:[#allocation98_spill] sm:$0xff] %v15264_v38  ;;  %v5698_v45 = vsel %vm18012_vm15, %v5688_v47, %v5697_v51  ;;  %v5143_v43 = vsel %vm18013_vm1, %v5138_v44, %v5142_v8  ;;  %v5469_v44 = vld [vmem:[#allocation2 + $0x40] sm:$0xf] }
 0x1a7   : > { %18005 = vst [vmem:[#allocation97_spill] sm:$0xff] %v15256_v54  ;;  %v5702_v47 = vrot.slane %v5700_v5, 3  ;;  %v5705_v39 = vrot.slane %v5703_v58, 4  ;;  %v5146_v5 = vor.u32 %v5144_v37, %v5142_v8  ;;  %v18019_v54 = vld [vmem:[#allocation23_spill] sm:$0xff] }
 0x1a8   : > { %4770 = vmatmul.bf16.gmra.mxu0 %v12965_v31  ;;  %6262 = vmatmul.bf16.gmra.mxu3 %v13005_v48  ;;  %v4953_v31 = vsel %vm18009_vm0, %v4920_v13, 0  ;;  %v18010_v48 = vld [vmem:[#allocation22_spill] sm:$0xff]  ;;  %v5470_v13 = vld [vmem:[#allocation2 + $0x44] sm:$0xf]  ;;  %vm18025_vm0 = vsmask.f32 7424 }
 0x1a9   : > { %vm18011_vm9 = vnez %v18010_v48  ;;  %v5068_v12 = vunpack.c.l.b16 %v4953_v31  ;;  %v18015_v31 = vld [vmem:[#allocation26_spill] sm:$0xff]  ;;  %v4922_v48 = vld [vmem:[#allocation2 + $0x3c] sm:$0xf] }
 0x1aa   : > { %v4954_v27 = vsel %vm18011_vm9, %v4921_v6, 0  ;;  %vm18016_vm15 = vnez %v18015_v31  ;;  %vm18020_vm9 = vnez %v18019_v54  ;;  %v18021_v31 = vld [vmem:[#allocation24_spill] sm:$0xff]  ;;  %v18031_v54 = vld [vmem:[#allocation25_spill] sm:$0xff]  ;;  %v18093_v38 = vld [vmem:[#allocation63_spill] sm:$0xff] }
 0x1ab   : > { %v5069_v35 = vunpack.c.l.b16 %v4954_v27  ;;  %v5502_v27 = vsel %vm18016_vm15, %v5469_v44, 0  ;;  %v4955_v44 = vsel %vm18020_vm9, %v4922_v48, 0  ;;  %vm18022_vm15 = vnez %v18021_v31 }
 0x1ac   : > { %v15276_v40 = vpop.f32.mrf.mxu3  ;;  %v5070_v8 = vunpack.c.l.b16 %v4955_v44  ;;  %v5471_v44 = vld [vmem:[#allocation2 + $0x48] sm:$0xf]  ;;  %vm18036_vm9 = vsmask.f32 7424 }
 0x1ad   : > { %v3876_v28 = vpop.f32.mrf.mxu2  ;;  %v15274_v14 = vpack.c.b16 %v5069_v35, %v5068_v12  ;;  %18014 = vst [vmem:[#allocation99_spill] sm:$0xff] %v15276_v40  ;;  %v5617_v12 = vunpack.c.l.b16 %v5502_v27  ;;  %v13007_v27 = vld [vmem:[#allocation2 + $0x2c] sm:$0xff] }
 0x1ae   : > { %v15272_v10 = vpop.f32.mrf.mxu1 }
 0x1af   : > { %v5148_v17 = vshll.u32 %v15274_v14, 16 }
 0x1b1   : > { %v5150_v58 = vrot.slane %v5148_v17, 1 }
 0x1b4   : > { %5894 = vmatmul.bf16.gmra.mxu2 %v5698_v45  ;;  %5327 = vmatmul.bf16.gmra.mxu1 %v5143_v43  ;;  %v18017_v45 = vld [vmem:[#allocation27_spill] sm:$0xff] }
 0x1b5   : > { %v3878_v3 = vpop.f32.mrf.mxu2  ;;  %vm18018_vm1 = vnez %v18017_v45 }
 0x1b6   : > { %v5503_v22 = vsel %vm18018_vm1, %v5470_v13, 0  ;;  %v15284_v36 = vpop.f32.mrf.mxu1  ;;  %v4956_v13 = vsel %vm18022_vm15, %v4923_v62, 0  ;;  %vm18024_vm1 = vsmask.f32 4352  ;;  %vm18032_vm15 = vnez %v18031_v54 }
 0x1b7   : > { %v2173_v6 = vpop.f32.mrf.mxu0  ;;  %v5618_v35 = vunpack.c.l.b16 %v5503_v22  ;;  %v5071_v37 = vunpack.c.l.b16 %v4956_v13  ;;  %v5472_v13 = vld [vmem:[#allocation2 + $0x4c] sm:$0xf] }
 0x1b8   : > { %4775 = vmatmul.bf16.gmra.mxu0 %v12966_v57  ;;  %6267 = vmatmul.bf16.gmra.mxu3 %v13006_v11  ;;  %v2598_v43 = vadd.f32 %v15246_v23, %v2173_v6  ;;  %v5706_v11 = vor.u32 %v5705_v39, %v5702_v47  ;;  %v12967_v6 = vld [vmem:[#allocation2 + $0x24] sm:$0xff] }
 0x1b9   : > { %v5644_v0 = vpack.c.b16 %v5618_v35, %v5617_v12  ;;  %v15295_v62 = vpack.c.b16 %v5071_v37, %v5070_v8 }
 0x1ba   : > { %v3923_v57 = vadd.f32 %v3876_v28, %v2598_v43  ;;  %v5707_v23 = vsel %vm18024_vm1, %v5697_v51, %v5706_v11  ;;  %v5151_v28 = vsel %vm18025_vm0, %v5146_v5, %v5150_v58 }
 0x1bb   : > { %v5709_v48 = vshrl.u32 %v5644_v0, 16  ;;  %v5712_v22 = vshll.u32 %v5644_v0, 16  ;;  %v5156_v5 = vshll.u32 %v15295_v62, 16 }
 0x1bd   : > { %v5711_v12 = vrot.slane %v5709_v48, 3  ;;  %v5714_v35 = vrot.slane %v5712_v22, 4  ;;  %v5158_v48 = vrot.slane %v5156_v5, 1 }
 0x1be   : > { %v4443_v40 = vpop.f32.mrf.mxu3  ;;  %v3881_v39 = vpop.f32.mrf.mxu2 }
 0x1bf   : > { %v15290_v45 = vadd.f32 %v4443_v40, %v3923_v57  ;;  %v2175_v47 = vpop.f32.mrf.mxu0  ;;  %v15297_v40 = vpop.f32.mrf.mxu1 }
 0x1c0   : > { %v2599_v17 = vadd.f32 %v15258_v16, %v2175_v47  ;;  %v5152_v16 = vshrl.u32 %v15274_v14, 16  ;;  %v4924_v14 = vld [vmem:[#allocation2 + $0x44] sm:$0xf] }
 0x1c1   : > { %18023 = vst [vmem:[#allocation26_spill] sm:$0xff] %v15290_v45 }
 0x1c2   : > { %v3924_v43 = vadd.f32 %v3878_v3, %v2599_v17  ;;  %v18029_v3 = vld [vmem:[#allocation30_spill] sm:$0xff] }
 0x1c3   : > { %vm18030_vm1 = vnez %v18029_v3 }
 0x1c4   : > { %5899 = vmatmul.bf16.gmra.mxu2 %v5707_v23  ;;  %5332 = vmatmul.bf16.gmra.mxu1 %v5151_v28  ;;  %v18027_v23 = vld [vmem:[#allocation29_spill] sm:$0xff]  ;;  %v5505_v28 = vsel %vm18030_vm1, %v5472_v13, 0  ;;  %vm18035_vm1 = vsmask.f32 4352 }
 0x1c5   : > { %vm18028_vm0 = vnez %v18027_v23  ;;  %v5620_v37 = vunpack.c.l.b16 %v5505_v28  ;;  %v4957_v23 = vsel %vm18032_vm15, %v4924_v14, 0  ;;  %vm18048_vm15 = vsmask.f32 7424 }
 0x1c6   : > { %v4445_v51 = vpop.f32.mrf.mxu3  ;;  %v5504_v0 = vsel %vm18028_vm0, %v5471_v44, 0  ;;  %v3883_v8 = vpop.f32.mrf.mxu2  ;;  %v18033_v44 = vld [vmem:[#allocation28_spill] sm:$0xff] }
 0x1c7   : > { %v15299_v57 = vadd.f32 %v4445_v51, %v3924_v43  ;;  %v5619_v47 = vunpack.c.l.b16 %v5504_v0  ;;  %v4925_v43 = vld [vmem:[#allocation2 + $0x48] sm:$0xf]  ;;  %vm18034_vm0 = vnez %v18033_v44  ;;  %v15314_v28 = vpop.f32.mrf.mxu1  ;;  %v4927_v44 = vld [vmem:[#allocation2 + $0x50] sm:$0xf] }
 0x1c8   : > { %4780 = vmatmul.bf16.gmra.mxu0 %v12967_v6  ;;  %6272 = vmatmul.bf16.gmra.mxu3 %v13007_v27  ;;  %v5715_v6 = vor.u32 %v5714_v35, %v5711_v12  ;;  %v5154_v27 = vor.u32 %v5152_v16, %v5150_v58  ;;  %v4958_v3 = vsel %vm18034_vm0, %v4925_v43, 0  ;;  %v5072_v58 = vunpack.c.l.b16 %v4957_v23  ;;  %v13008_v16 = vld [vmem:[#allocation2 + $0x34] sm:$0xff] }
 0x1c9   : > { %18026 = vst [vmem:[#allocation27_spill] sm:$0xff] %v15299_v57  ;;  %v5645_v31 = vpack.c.b16 %v5620_v37, %v5619_v47  ;;  %v5073_v12 = vunpack.c.l.b16 %v4958_v3  ;;  %v5160_v23 = vshrl.u32 %v15295_v62, 16  ;;  %v5473_v3 = vld [vmem:[#allocation2 + $0x50] sm:$0xf] }
 0x1ca   : > { %v5716_v13 = vsel %vm18035_vm1, %v5706_v11, %v5715_v6  ;;  %v5159_v0 = vsel %vm18036_vm9, %v5154_v27, %v5158_v48 }
 0x1cb   : > { %v5721_v47 = vshll.u32 %v5645_v31, 16 }
 0x1cc   : > { %v2178_v17 = vpop.f32.mrf.mxu0 }
 0x1cd   : > { %v2600_v22 = vadd.f32 %v15272_v10, %v2178_v17  ;;  %v12968_v10 = vld [vmem:[#allocation2 + $0x2c] sm:$0xff]  ;;  %v15318_v17 = vpack.c.b16 %v5073_v12, %v5072_v58  ;;  %v5723_v43 = vrot.slane %v5721_v47, 4  ;;  %v5162_v47 = vor.u32 %v5160_v23, %v5158_v48 }
 0x1cf   : > { %v3925_v51 = vadd.f32 %v3881_v39, %v2600_v22  ;;  %v5718_v39 = vshrl.u32 %v5645_v31, 16 }
 0x1d1   : > { %v5720_v14 = vrot.slane %v5718_v39, 3 }
 0x1d3   : > { %v4448_v35 = vpop.f32.mrf.mxu3  ;;  %v5724_v39 = vor.u32 %v5723_v43, %v5720_v14  ;;  %v12969_v14 = vld [vmem:[#allocation2 + $0x34] sm:$0xff]  ;;  %v13009_v43 = vld [vmem:[#allocation2 + $0x3c] sm:$0xff] }
 0x1d4   : > { %v15316_v5 = vadd.f32 %v4448_v35, %v3925_v51  ;;  %5904 = vmatmul.bf16.gmra.mxu2 %v5716_v13  ;;  %5337 = vmatmul.bf16.gmra.mxu1 %v5159_v0  ;;  %v2180_v37 = vpop.f32.mrf.mxu0  ;;  %v5164_v51 = vshll.u32 %v15318_v17, 16  ;;  %v5474_v13 = vld [vmem:[#allocation2 + $0x54] sm:$0xf]  ;;  %v18040_v35 = vld [vmem:[#allocation35_spill] sm:$0xff] }
 0x1d5   : > { %v2601_v11 = vadd.f32 %v15284_v36, %v2180_v37  ;;  %v3886_v22 = vpop.f32.mrf.mxu2  ;;  %v18038_v0 = vld [vmem:[#allocation34_spill] sm:$0xff]  ;;  %vm18041_vm1 = vnez %v18040_v35  ;;  %v15327_v36 = vpop.f32.mrf.mxu1 }
 0x1d6   : > { %18037 = vst [vmem:[#allocation29_spill] sm:$0xff] %v15316_v5  ;;  %vm18039_vm9 = vnez %v18038_v0  ;;  %v5507_v58 = vsel %vm18041_vm1, %v5474_v13, 0  ;;  %v5166_v62 = vrot.slane %v5164_v51, 1  ;;  %v18043_v5 = vld [vmem:[#allocation31_spill] sm:$0xff]  ;;  %v18045_v0 = vld [vmem:[#allocation32_spill] sm:$0xff] }
 0x1d7   : > { %v3926_v27 = vadd.f32 %v3883_v8, %v2601_v11  ;;  %v5506_v31 = vsel %vm18039_vm9, %v5473_v3, 0  ;;  %v4926_v11 = vld [vmem:[#allocation2 + $0x4c] sm:$0xf]  ;;  %vm18044_vm0 = vnez %v18043_v5  ;;  %vm18046_vm9 = vnez %v18045_v0 }
 0x1d8   : > { %4785 = vmatmul.bf16.gmra.mxu0 %v12968_v10  ;;  %6277 = vmatmul.bf16.gmra.mxu3 %v13008_v16  ;;  %v5621_v8 = vunpack.c.l.b16 %v5506_v31  ;;  %v5622_v16 = vunpack.c.l.b16 %v5507_v58  ;;  %v4959_v3 = vsel %vm18044_vm0, %v4926_v11, 0  ;;  %v4960_v13 = vsel %vm18046_vm9, %v4927_v44, 0 }
 0x1d9   : > { %vm18047_vm1 = vsmask.f32 4352  ;;  %v5075_v31 = vunpack.c.l.b16 %v4960_v13  ;;  %vm18059_vm9 = vsmask.f32 4352  ;;  %vm18060_vm0 = vsmask.f32 7424 }
 0x1da   : > { %v5646_v54 = vpack.c.b16 %v5622_v16, %v5621_v8  ;;  %v5725_v35 = vsel %vm18047_vm1, %v5715_v6, %v5724_v39 }
 0x1db   : > { %v4450_v12 = vpop.f32.mrf.mxu3 }
 0x1dc   : > { %v15329_v10 = vadd.f32 %v4450_v12, %v3926_v27  ;;  %v5167_v27 = vsel %vm18048_vm15, %v5162_v47, %v5166_v62  ;;  %v5074_v12 = vunpack.c.l.b16 %v4959_v3  ;;  %v5727_v23 = vshrl.u32 %v5646_v54, 16 }
 0x1dd   : > { %v3888_v37 = vpop.f32.mrf.mxu2  ;;  %v5730_v51 = vshll.u32 %v5646_v54, 16  ;;  %v15338_v16 = vpop.f32.mrf.mxu1 }
 0x1de   : > { %18042 = vst [vmem:[#allocation30_spill] sm:$0xff] %v15329_v10  ;;  %v15340_v11 = vpack.c.b16 %v5075_v31, %v5074_v12  ;;  %v5729_v47 = vrot.slane %v5727_v23, 3  ;;  %v18052_v12 = vld [vmem:[#allocation41_spill] sm:$0xff]  ;;  %v4929_v10 = vld [vmem:[#allocation2 + $0x58] sm:$0xf] }
 0x1df   : > { %v5732_v3 = vrot.slane %v5730_v51, 4  ;;  %vm18053_vm1 = vnez %v18052_v12  ;;  %v18056_v12 = vld [vmem:[#allocation37_spill] sm:$0xff] }
 0x1e2   : > { %v2183_v58 = vpop.f32.mrf.mxu0 }
 0x1e3   : > { %v2602_v48 = vadd.f32 %v15297_v40, %v2183_v58  ;;  %v5168_v40 = vshrl.u32 %v15318_v17, 16  ;;  %v5476_v58 = vld [vmem:[#allocation2 + $0x5c] sm:$0xf] }
 0x1e4   : > { %5909 = vmatmul.bf16.gmra.mxu2 %v5725_v35  ;;  %5342 = vmatmul.bf16.gmra.mxu1 %v5167_v27  ;;  %v5172_v35 = vshll.u32 %v15340_v11, 16  ;;  %v5475_v27 = vld [vmem:[#allocation2 + $0x58] sm:$0xf]  ;;  %v5509_v31 = vsel %vm18053_vm1, %v5476_v58, 0  ;;  %vm18057_vm1 = vnez %v18056_v12  ;;  %v4930_v12 = vld [vmem:[#allocation2 + $0x5c] sm:$0xf] }
 0x1e5   : > { %v3927_v8 = vadd.f32 %v3886_v22, %v2602_v48  ;;  %v18050_v22 = vld [vmem:[#allocation40_spill] sm:$0xff]  ;;  %v5624_v23 = vunpack.c.l.b16 %v5509_v31  ;;  %v15351_v5 = vpop.f32.mrf.mxu1  ;;  %v4962_v58 = vsel %vm18057_vm1, %v4929_v10, 0 }
 0x1e6   : > { %vm18051_vm15 = vnez %v18050_v22  ;;  %v5174_v0 = vrot.slane %v5172_v35, 1  ;;  %v18054_v22 = vld [vmem:[#allocation33_spill] sm:$0xff] }
 0x1e7   : > { %v3891_v44 = vpop.f32.mrf.mxu2  ;;  %v5508_v48 = vsel %vm18051_vm15, %v5475_v27, 0  ;;  %vm18055_vm15 = vnez %v18054_v22  ;;  %v13010_v35 = vld [vmem:[#allocation2 + $0x44] sm:$0xff]  ;;  %v4931_v22 = vld [vmem:[#allocation2 + $0x60] sm:$0xf] }
 0x1e8   : > { %4790 = vmatmul.bf16.gmra.mxu0 %v12969_v14  ;;  %6282 = vmatmul.bf16.gmra.mxu3 %v13009_v43  ;;  %v5623_v43 = vunpack.c.l.b16 %v5508_v48 }
 0x1e9   : > { %v4453_v6 = vpop.f32.mrf.mxu3 }
 0x1ea   : > { %v15342_v13 = vadd.f32 %v4453_v6, %v3927_v8  ;;  %v2185_v54 = vpop.f32.mrf.mxu0  ;;  %v5733_v8 = vor.u32 %v5732_v3, %v5729_v47  ;;  %v5170_v6 = vor.u32 %v5168_v40, %v5166_v62  ;;  %v5647_v45 = vpack.c.b16 %v5624_v23, %v5623_v43  ;;  %v12970_v40 = vld [vmem:[#allocation2 + $0x3c] sm:$0xff] }
 0x1eb   : > { %v2603_v14 = vadd.f32 %v15314_v28, %v2185_v54  ;;  %v5077_v3 = vunpack.c.l.b16 %v4962_v58  ;;  %v5478_v58 = vld [vmem:[#allocation2 + $0x64] sm:$0xf] }
 0x1ec   : > { %18049 = vst [vmem:[#allocation34_spill] sm:$0xff] %v15342_v13  ;;  %v4928_v13 = vld [vmem:[#allocation2 + $0x54] sm:$0xf]  ;;  %v5175_v62 = vsel %vm18060_vm0, %v5170_v6, %v5174_v0  ;;  %v5736_v54 = vshrl.u32 %v5647_v45, 16  ;;  %v5739_v48 = vshll.u32 %v5647_v45, 16  ;;  %vm18068_vm0 = vmmov %vm18059_vm9 }
 0x1ed   : > { %v3928_v51 = vadd.f32 %v3888_v37, %v2603_v14  ;;  %v4961_v27 = vsel %vm18055_vm15, %v4928_v13, 0  ;;  %v5734_v37 = vsel %vm18059_vm9, %v5724_v39, %v5733_v8  ;;  %v2573_v23 = vpop.f32.mrf.mxu1  ;;  %vm18069_vm9 = vsmask.f32 7424 }
 0x1ee   : > { %v5076_v47 = vunpack.c.l.b16 %v4961_v27  ;;  %v5738_v39 = vrot.slane %v5736_v54, 3  ;;  %v5741_v43 = vrot.slane %v5739_v48, 4  ;;  %v5477_v27 = vld [vmem:[#allocation2 + $0x60] sm:$0xf] }
 0x1ef   : > { %v3893_v17 = vpop.f32.mrf.mxu2  ;;  %v5510_v45 = vsel %vm14540_vm4, %v5477_v27, 0  ;;  %v18064_v27 = vld [vmem:[#allocation42_spill] sm:$0xff] }
 0x1f0   : > { %v15361_v14 = vpack.c.b16 %v5077_v3, %v5076_v47  ;;  %v5511_v47 = vsel %vm14563_vm7, %v5478_v58, 0  ;;  %v5742_v54 = vor.u32 %v5741_v43, %v5738_v39  ;;  %vm18065_vm4 = vnez %v18064_v27  ;;  %v18066_v58 = vld [vmem:[#allocation45_spill] sm:$0xff] }
 0x1f1   : > { %v4455_v57 = vpop.f32.mrf.mxu3  ;;  %vm18067_vm7 = vnez %v18066_v58  ;;  %v4932_v58 = vld [vmem:[#allocation2 + $0x64] sm:$0xf]  ;;  %v4933_v27 = vld [vmem:[#allocation2 + $0x68] sm:$0xf] }
 0x1f2   : > { %v15357_v28 = vadd.f32 %v4455_v57, %v3928_v51  ;;  %v5176_v51 = vshrl.u32 %v15340_v11, 16  ;;  %v5180_v6 = vshll.u32 %v15361_v14, 16 }
 0x1f4   : > { %18058 = vst [vmem:[#allocation35_spill] sm:$0xff] %v15357_v28  ;;  %5914 = vmatmul.bf16.gmra.mxu2 %v5734_v37  ;;  %5347 = vmatmul.bf16.gmra.mxu1 %v5175_v62  ;;  %v5178_v48 = vor.u32 %v5176_v51, %v5174_v0  ;;  %v4963_v62 = vsel %vm18065_vm4, %v4930_v12, 0  ;;  %vm18080_vm4 = vsmask.f32 7424 }
 0x1f5   : > { %v2188_v31 = vpop.f32.mrf.mxu0  ;;  %v5078_v39 = vunpack.c.l.b16 %v4963_v62 }
 0x1f6   : > { %v2604_v13 = vadd.f32 %v15327_v36, %v2188_v31  ;;  %v5182_v31 = vrot.slane %v5180_v6, 1  ;;  %v12971_v6 = vld [vmem:[#allocation2 + $0x44] sm:$0xff] }
 0x1f7   : > { %v3896_v10 = vpop.f32.mrf.mxu2 }
 0x1f8   : > { %4795 = vmatmul.bf16.gmra.mxu0 %v12970_v40  ;;  %6287 = vmatmul.bf16.gmra.mxu3 %v13010_v35  ;;  %v3929_v57 = vadd.f32 %v3891_v44, %v2604_v13  ;;  %v5625_v40 = vunpack.c.l.b16 %v5510_v45  ;;  %v5626_v44 = vunpack.c.l.b16 %v5511_v47  ;;  %v5743_v45 = vsel %vm18068_vm0, %v5733_v8, %v5742_v54 }
 0x1f9   : > { %v5183_v0 = vsel %vm18069_vm9, %v5178_v48, %v5182_v31  ;;  %vm18071_vm0 = vnez %v17878_v15  ;;  %v18075_v15 = vld [vmem:[#allocation48_spill] sm:$0xff] }
 0x1fa   : > { %v5648_v37 = vpack.c.b16 %v5626_v44, %v5625_v40 }
 0x1fb   : > { %v4458_v36 = vpop.f32.mrf.mxu3 }
 0x1fc   : > { %v15370_v3 = vadd.f32 %v4458_v36, %v3929_v57  ;;  %v4964_v57 = vsel %vm18067_vm7, %v4931_v22, 0  ;;  %v5745_v36 = vshrl.u32 %v5648_v37, 16  ;;  %v5748_v12 = vshll.u32 %v5648_v37, 16 }
 0x1fd   : > { %v2190_v35 = vpop.f32.mrf.mxu0  ;;  %v5079_v43 = vunpack.c.l.b16 %v4964_v57  ;;  %vm18079_vm7 = vsmask.f32 4352 }
 0x1fe   : > { %18063 = vst [vmem:[#allocation40_spill] sm:$0xff] %v15370_v3  ;;  %v2605_v11 = vadd.f32 %v15338_v16, %v2190_v35  ;;  %v5747_v48 = vrot.slane %v5745_v36, 3 }
 0x1ff   : > { %v3898_v13 = vpop.f32.mrf.mxu2  ;;  %v15383_v44 = vpack.c.b16 %v5079_v43, %v5078_v39  ;;  %v18072_v39 = vld [vmem:[#allocation57_spill] sm:$0xff] }
 0x200   : > { %v3930_v28 = vadd.f32 %v3893_v17, %v2605_v11  ;;  %v13011_v17 = vld [vmem:[#allocation2 + $0x4c] sm:$0xff]  ;;  %v5750_v11 = vrot.slane %v5748_v12, 4  ;;  %vm18073_vm9 = vnez %v18072_v39 }
 0x201   : > { %v15378_v47 = vpop.f32.mrf.mxu1  ;;  %v5188_v57 = vshll.u32 %v15383_v44, 16  ;;  %v18077_v39 = vld [vmem:[#allocation54_spill] sm:$0xff] }
 0x202   : > { %v5751_v36 = vor.u32 %v5750_v11, %v5747_v48 }
 0x203   : > { %v4460_v16 = vpop.f32.mrf.mxu3 }
 0x204   : > { %v15381_v51 = vadd.f32 %v4460_v16, %v3930_v28  ;;  %5919 = vmatmul.bf16.gmra.mxu2 %v5743_v45  ;;  %5352 = vmatmul.bf16.gmra.mxu1 %v5183_v0  ;;  %v5184_v28 = vshrl.u32 %v15361_v14, 16  ;;  %v5479_v45 = vld [vmem:[#allocation2 + $0x68] sm:$0xf]  ;;  %v5480_v0 = vld [vmem:[#allocation2 + $0x6c] sm:$0xf] }
 0x205   : > { %v2193_v40 = vpop.f32.mrf.mxu0  ;;  %v5512_v37 = vsel %vm18071_vm0, %v5479_v45, 0  ;;  %vm18076_vm0 = vnez %v18075_v15 }
 0x206   : > { %18070 = vst [vmem:[#allocation41_spill] sm:$0xff] %v15381_v51  ;;  %v2606_v8 = vadd.f32 %v15351_v5, %v2193_v40  ;;  %v5513_v5 = vsel %vm18073_vm9, %v5480_v0, 0  ;;  %v5186_v12 = vor.u32 %v5184_v28, %v5182_v31  ;;  %v5190_v40 = vrot.slane %v5188_v57, 1  ;;  %v12972_v57 = vld [vmem:[#allocation2 + $0x4c] sm:$0xff] }
 0x207   : > { %v5880_v22 = vpop.f32.mrf.mxu2  ;;  %v4965_v45 = vsel %vm18076_vm0, %v4932_v58, 0  ;;  %vm18078_vm9 = vnez %v18077_v39  ;;  %v5482_v39 = vld [vmem:[#allocation2 + $0x74] sm:$0xf]  ;;  %vm18096_vm0 = vsmask.f32 7424 }
 0x208   : > { %4800 = vmatmul.bf16.gmra.mxu0 %v12971_v6  ;;  %6292 = vmatmul.bf16.gmra.mxu3 %v13011_v17  ;;  %v3931_v35 = vadd.f32 %v3896_v10, %v2606_v8  ;;  %v5627_v10 = vunpack.c.l.b16 %v5512_v37  ;;  %v5628_v6 = vunpack.c.l.b16 %v5513_v5  ;;  %v4966_v0 = vsel %vm18078_vm9, %v4933_v27, 0  ;;  %v18082_v27 = vld [vmem:[#allocation44_spill] sm:$0xff] }
 0x209   : > { %v15386_v62 = vpop.f32.mrf.mxu1  ;;  %v5191_v48 = vsel %vm18080_vm4, %v5186_v12, %v5190_v40  ;;  %v5080_v31 = vunpack.c.l.b16 %v4965_v45  ;;  %v5081_v11 = vunpack.c.l.b16 %v4966_v0  ;;  %v18085_v45 = vld [vmem:[#allocation39_spill] sm:$0xff]  ;;  %vm18095_vm9 = vsmask.f32 4352 }
 0x20a   : > { %v5649_v3 = vpack.c.b16 %v5628_v6, %v5627_v10 }
 0x20b   : > { %v4463_v43 = vpop.f32.mrf.mxu3  ;;  %v15406_v10 = vpack.c.b16 %v5081_v11, %v5080_v31  ;;  %v5481_v11 = vld [vmem:[#allocation2 + $0x70] sm:$0xf] }
 0x20c   : > { %v15394_v16 = vadd.f32 %v4463_v43, %v3931_v35  ;;  %v5752_v35 = vsel %vm18079_vm7, %v5742_v54, %v5751_v36  ;;  %v5754_v5 = vshrl.u32 %v5649_v3, 16  ;;  %v5757_v58 = vshll.u32 %v5649_v3, 16  ;;  %v18083_v54 = vld [vmem:[#allocation36_spill] sm:$0xff] }
 0x20d   : > { %v2195_v17 = vpop.f32.mrf.mxu0  ;;  %v2577_v6 = vadd.f32 %v18083_v54, %v18082_v27  ;;  %v5192_v3 = vshrl.u32 %v15383_v44, 16  ;;  %v5196_v31 = vshll.u32 %v15406_v10, 16  ;;  %v18086_v54 = vld [vmem:[#allocation68_spill] sm:$0xff] }
 0x20e   : > { %18074 = vst [vmem:[#allocation49_spill] sm:$0xff] %v15394_v16  ;;  %v2607_v14 = vadd.f32 %v2573_v23, %v2195_v17  ;;  %v18084_v17 = vld [vmem:[#allocation38_spill] sm:$0xff]  ;;  %vm18087_vm4 = vnez %v18086_v54 }
 0x20f   : > { %v5882_v8 = vpop.f32.mrf.mxu2  ;;  %v3902_v0 = vadd.f32 %v18085_v45, %v2577_v6  ;;  %v5194_v15 = vor.u32 %v5192_v3, %v5190_v40 }
 0x210   : > { %v3932_v51 = vadd.f32 %v3898_v13, %v2607_v14  ;;  %v13012_v13 = vld [vmem:[#allocation2 + $0x54] sm:$0xff] }
 0x211   : > { %v15401_v37 = vpop.f32.mrf.mxu1 }
 0x213   : > { %v4465_v23 = vpop.f32.mrf.mxu3 }
 0x214   : > { %v15404_v28 = vadd.f32 %v4465_v23, %v3932_v51  ;;  %5924 = vmatmul.bf16.gmra.mxu2 %v5752_v35  ;;  %5357 = vmatmul.bf16.gmra.mxu1 %v5191_v48  ;;  %v5756_v23 = vrot.slane %v5754_v5, 3  ;;  %v5759_v35 = vrot.slane %v5757_v58, 4 }
 0x215   : > { %v4766_v43 = vpop.f32.mrf.mxu0 }
 0x216   : > { %18081 = vst [vmem:[#allocation50_spill] sm:$0xff] %v15404_v28  ;;  %v4846_v14 = vadd.f32 %v4766_v43, %v18084_v17  ;;  %v5514_v43 = vsel %vm18087_vm4, %v5481_v11, 0  ;;  %v18088_v17 = vld [vmem:[#allocation69_spill] sm:$0xff]  ;;  %v5760_v44 = vor.u32 %v5759_v35, %v5756_v23  ;;  %v5198_v28 = vrot.slane %v5196_v31, 1 }
 0x217   : > { %v5885_v12 = vpop.f32.mrf.mxu2  ;;  %vm18089_vm7 = vnez %v18088_v17  ;;  %v5629_v58 = vunpack.c.l.b16 %v5514_v43  ;;  %v18091_v17 = vld [vmem:[#allocation60_spill] sm:$0xff] }
 0x218   : > { %v5393_v51 = vadd.f32 %v15378_v47, %v4846_v14  ;;  %4805 = vmatmul.bf16.gmra.mxu0 %v12972_v57  ;;  %6297 = vmatmul.bf16.gmra.mxu3 %v13012_v13  ;;  %v5515_v6 = vsel %vm18089_vm7, %v5482_v39, 0  ;;  %v18090_v57 = vld [vmem:[#allocation46_spill] sm:$0xff]  ;;  %vm18092_vm4 = vnez %v18091_v17  ;;  %vm18094_vm7 = vnez %v18093_v38  ;;  %v18106_v17 = vld [vmem:[#allocation72_spill] sm:$0xff] }
 0x219   : > { %v15413_v48 = vpop.f32.mrf.mxu1  ;;  %v4469_v13 = vadd.f32 %v18090_v57, %v3902_v0  ;;  %v5630_v14 = vunpack.c.l.b16 %v5515_v6  ;;  %v5199_v40 = vsel %vm18096_vm0, %v5194_v15, %v5198_v28  ;;  %vm18101_vm0 = vnez %v17925_v4 }
 0x21a   : > { %v5960_v27 = vadd.f32 %v5880_v22, %v5393_v51  ;;  %v4934_v22 = vld [vmem:[#allocation2 + $0x6c] sm:$0xf]  ;;  %v4935_v51 = vld [vmem:[#allocation2 + $0x70] sm:$0xf] }
 0x21b   : > { %v6258_v47 = vpop.f32.mrf.mxu3  ;;  %v5650_v54 = vpack.c.b16 %v5630_v14, %v5629_v58  ;;  %v4967_v39 = vsel %vm18092_vm4, %v4934_v22, 0  ;;  %v4968_v0 = vsel %vm18094_vm7, %v4935_v51, 0  ;;  %v18098_v14 = vld [vmem:[#allocation43_spill] sm:$0xff]  ;;  %vm18108_vm7 = vsmask.f32 4352 }
 0x21c   : > { %v15422_v5 = vadd.f32 %v6258_v47, %v5960_v27  ;;  %v5761_v27 = vsel %vm18095_vm9, %v5751_v36, %v5760_v44  ;;  %v5082_v23 = vunpack.c.l.b16 %v4967_v39  ;;  %v5083_v35 = vunpack.c.l.b16 %v4968_v0  ;;  %v18097_v36 = vld [vmem:[#allocation53_spill] sm:$0xff]  ;;  %v18099_v22 = vld [vmem:[#allocation51_spill] sm:$0xff] }
 0x21d   : > { %v4768_v45 = vpop.f32.mrf.mxu0  ;;  %v5763_v47 = vshrl.u32 %v5650_v54, 16  ;;  %v5766_v57 = vshll.u32 %v5650_v54, 16  ;;  %v18100_v39 = vld [vmem:[#allocation47_spill] sm:$0xff]  ;;  %v5200_v54 = vshrl.u32 %v15406_v10, 16  ;;  %vm18102_vm9 = vnez %v17927_v41 }
 0x21e   : > { %v4847_v16 = vadd.f32 %v4768_v45, %v4469_v13  ;;  %v15435_v58 = vpack.c.b16 %v5083_v35, %v5082_v23  ;;  %v2579_v45 = vadd.f32 %v18098_v14, %v18097_v36  ;;  %v5483_v35 = vld [vmem:[#allocation2 + $0x78] sm:$0xf]  ;;  %vm18109_vm4 = vsmask.f32 7424 }
 0x21f   : > { %v5887_v29 = vpop.f32.mrf.mxu2  ;;  %v5765_v0 = vrot.slane %v5763_v47, 3  ;;  %v18104_v41 = vld [vmem:[#allocation67_spill] sm:$0xff] }
 0x220   : > { %v5394_v11 = vadd.f32 %v15386_v62, %v4847_v16  ;;  %v12973_v62 = vld [vmem:[#allocation2 + $0x54] sm:$0xff]  ;;  %v13013_v16 = vld [vmem:[#allocation2 + $0x5c] sm:$0xff]  ;;  %v5204_v23 = vshll.u32 %v15435_v58, 16 }
 0x221   : > { %v15430_v43 = vpop.f32.mrf.mxu1 }
 0x222   : > { %v5961_v3 = vadd.f32 %v5882_v8, %v5394_v11  ;;  %v3904_v8 = vadd.f32 %v18100_v39, %v2579_v45 }
 0x223   : > { %v6260_v31 = vpop.f32.mrf.mxu3 }
 0x224   : > { %v15433_v6 = vadd.f32 %v6260_v31, %v5961_v3  ;;  %5929 = vmatmul.bf16.gmra.mxu2 %v5761_v27  ;;  %5362 = vmatmul.bf16.gmra.mxu1 %v5199_v40  ;;  %v5768_v27 = vrot.slane %v5766_v57, 4  ;;  %v5484_v3 = vld [vmem:[#allocation2 + $0x7c] sm:$0xf] }
 0x225   : > { %v4771_v13 = vpop.f32.mrf.mxu0  ;;  %v5517_v36 = vsel %vm18102_vm9, %v5484_v3, 0  ;;  %vm18107_vm9 = vnez %v18106_v17 }
 0x226   : > { %v4848_v15 = vadd.f32 %v4771_v13, %v18099_v22  ;;  %v5516_v13 = vsel %vm18101_vm0, %v5483_v35, 0  ;;  %v5632_v14 = vunpack.c.l.b16 %v5517_v36  ;;  %v5769_v10 = vor.u32 %v5768_v27, %v5765_v0 }
 0x227   : > { %v5890_v51 = vpop.f32.mrf.mxu2  ;;  %v5631_v57 = vunpack.c.l.b16 %v5516_v13  ;;  %v5202_v22 = vor.u32 %v5200_v54, %v5198_v28  ;;  %vm18105_vm0 = vnez %v18104_v41 }
 0x228   : > { %v5395_v11 = vadd.f32 %v15401_v37, %v4848_v15  ;;  %4810 = vmatmul.bf16.gmra.mxu0 %v12973_v62  ;;  %6302 = vmatmul.bf16.gmra.mxu3 %v13013_v16  ;;  %v18103_v62 = vld [vmem:[#allocation55_spill] sm:$0xff]  ;;  %v5206_v15 = vrot.slane %v5204_v23, 1 }
 0x229   : > { %v15442_v40 = vpop.f32.mrf.mxu1  ;;  %v4471_v16 = vadd.f32 %v18103_v62, %v3904_v8  ;;  %v5651_v35 = vpack.c.b16 %v5632_v14, %v5631_v57 }
 0x22a   : > { %v5962_v31 = vadd.f32 %v5885_v12, %v5395_v11  ;;  %v4936_v12 = vld [vmem:[#allocation2 + $0x74] sm:$0xf]  ;;  %v4937_v11 = vld [vmem:[#allocation2 + $0x78] sm:$0xf]  ;;  %v5207_v28 = vsel %vm18109_vm4, %v5202_v22, %v5206_v15 }
 0x22b   : > { %v6263_v37 = vpop.f32.mrf.mxu3  ;;  %v4969_v3 = vsel %vm18105_vm0, %v4936_v12, 0  ;;  %v4970_v8 = vsel %vm18107_vm9, %v4937_v11, 0  ;;  %v5772_v62 = vshrl.u32 %v5651_v35, 16  ;;  %v18113_v12 = vld [vmem:[#allocation58_spill] sm:$0xff]  ;;  %vm18123_vm9 = vsmask.f32 7424 }
 0x22c   : > { %v15451_v47 = vadd.f32 %v6263_v37, %v5962_v31  ;;  %v5770_v31 = vsel %vm18108_vm7, %v5760_v44, %v5769_v10  ;;  %v5084_v0 = vunpack.c.l.b16 %v4969_v3  ;;  %v5085_v27 = vunpack.c.l.b16 %v4970_v8  ;;  %v13014_v37 = vld [vmem:[#allocation2 + $0x64] sm:$0xff]  ;;  %v18111_v44 = vld [vmem:[#allocation59_spill] sm:$0xff] }
 0x22d   : > { %v4773_v45 = vpop.f32.mrf.mxu0  ;;  %v18114_v3 = vld [vmem:[#allocation56_spill] sm:$0xff]  ;;  %v5774_v8 = vrot.slane %v5772_v62, 3 }
 0x22e   : > { %v4849_v39 = vadd.f32 %v4773_v45, %v4471_v16  ;;  %v5775_v16 = vshll.u32 %v5651_v35, 16  ;;  %v15464_v14 = vpack.c.b16 %v5085_v27, %v5084_v0  ;;  %v18112_v45 = vld [vmem:[#allocation52_spill] sm:$0xff]  ;;  %v5208_v35 = vshrl.u32 %v15435_v58, 16 }
 0x22f   : > { %v5892_v38 = vpop.f32.mrf.mxu2  ;;  %v5485_v27 = vld [vmem:[#allocation2 + $0x80] sm:$0xf] }
 0x230   : > { %v5396_v4 = vadd.f32 %v15413_v48, %v4849_v39  ;;  %v12974_v48 = vld [vmem:[#allocation2 + $0x5c] sm:$0xff]  ;;  %v2581_v39 = vadd.f32 %v18112_v45, %v18111_v44  ;;  %v5212_v0 = vshll.u32 %v15464_v14, 16  ;;  %v18115_v44 = vld [vmem:[#allocation85_spill] sm:$0xff] }
 0x231   : > { %v15459_v13 = vpop.f32.mrf.mxu1  ;;  %vm18116_vm4 = vnez %v18115_v44  ;;  %v18118_v44 = vld [vmem:[#allocation77_spill] sm:$0xff] }
 0x232   : > { %v5963_v54 = vadd.f32 %v5887_v29, %v5396_v4  ;;  %v3906_v29 = vadd.f32 %v18114_v3, %v2581_v39  ;;  %v5214_v3 = vrot.slane %v5212_v0, 1 }
 0x233   : > { %v6265_v23 = vpop.f32.mrf.mxu3 }
 0x234   : > { %v15462_v36 = vadd.f32 %v6265_v23, %v5963_v54  ;;  %5934 = vmatmul.bf16.gmra.mxu2 %v5770_v31  ;;  %5367 = vmatmul.bf16.gmra.mxu1 %v5207_v28  ;;  %v5777_v31 = vrot.slane %v5775_v16, 4  ;;  %v5486_v54 = vld [vmem:[#allocation2 + $0x84] sm:$0xf] }
 0x235   : > { %v4776_v57 = vpop.f32.mrf.mxu0  ;;  %v5519_v45 = vsel %vm18116_vm4, %v5486_v54, 0  ;;  %vm18122_vm4 = vsmask.f32 4352 }
 0x236   : > { %18110 = vst [vmem:[#allocation57_spill] sm:$0xff] %v15462_v36  ;;  %v4850_v22 = vadd.f32 %v4776_v57, %v18113_v12  ;;  %v5518_v57 = vsel %vm14909_vm13, %v5485_v27, 0  ;;  %v5634_v39 = vunpack.c.l.b16 %v5519_v45  ;;  %v5778_v58 = vor.u32 %v5777_v31, %v5774_v8  ;;  %v18120_v36 = vld [vmem:[#allocation79_spill] sm:$0xff] }
 0x237   : > { %v5895_v11 = vpop.f32.mrf.mxu2  ;;  %v5633_v16 = vunpack.c.l.b16 %v5518_v57  ;;  %vm18119_vm13 = vnez %v18118_v44  ;;  %vm18121_vm7 = vnez %v18120_v36  ;;  %v18247_v44 = vld [vmem:[#allocation82_spill] sm:$0xff] }
 0x238   : > { %v5397_v4 = vadd.f32 %v15430_v43, %v4850_v22  ;;  %4815 = vmatmul.bf16.gmra.mxu0 %v12974_v48  ;;  %6307 = vmatmul.bf16.gmra.mxu3 %v13014_v37  ;;  %v18117_v48 = vld [vmem:[#allocation62_spill] sm:$0xff]  ;;  %v5210_v22 = vor.u32 %v5208_v35, %v5206_v15 }
 0x239   : > { %v15471_v28 = vpop.f32.mrf.mxu1  ;;  %v4473_v37 = vadd.f32 %v18117_v48, %v3906_v29  ;;  %v5652_v27 = vpack.c.b16 %v5634_v39, %v5633_v16  ;;  %v18125_v39 = vld [vmem:[#allocation61_spill] sm:$0xff] }
 0x23a   : > { %v5964_v23 = vadd.f32 %v5890_v51, %v5397_v4  ;;  %v4938_v51 = vld [vmem:[#allocation2 + $0x7c] sm:$0xf]  ;;  %v4939_v4 = vld [vmem:[#allocation2 + $0x80] sm:$0xf]  ;;  %v5215_v15 = vsel %vm18123_vm9, %v5210_v22, %v5214_v3 }
 0x23b   : > { %v6268_v43 = vpop.f32.mrf.mxu3  ;;  %v4971_v54 = vsel %vm18119_vm13, %v4938_v51, 0  ;;  %v4972_v29 = vsel %vm18121_vm7, %v4939_v4, 0  ;;  %v5784_v48 = vshll.u32 %v5652_v27, 16  ;;  %v18126_v51 = vld [vmem:[#allocation65_spill] sm:$0xff] }
 0x23c   : > { %v15480_v62 = vadd.f32 %v6268_v43, %v5964_v23  ;;  %v5779_v23 = vsel %vm18122_vm4, %v5769_v10, %v5778_v58  ;;  %v5086_v8 = vunpack.c.l.b16 %v4971_v54  ;;  %v5087_v31 = vunpack.c.l.b16 %v4972_v29  ;;  %v18124_v10 = vld [vmem:[#allocation66_spill] sm:$0xff]  ;;  %v18127_v54 = vld [vmem:[#allocation64_spill] sm:$0xff] }
 0x23d   : > { %v4778_v12 = vpop.f32.mrf.mxu0  ;;  %v5781_v43 = vshrl.u32 %v5652_v27, 16  ;;  %v5216_v27 = vshrl.u32 %v15464_v14, 16 }
 0x23e   : > { %v4851_v17 = vadd.f32 %v4778_v12, %v4473_v37  ;;  %v15493_v16 = vpack.c.b16 %v5087_v31, %v5086_v8  ;;  %v2583_v12 = vadd.f32 %v18125_v39, %v18124_v10  ;;  %v5487_v31 = vld [vmem:[#allocation2 + $0x88] sm:$0xf] }
 0x23f   : > { %v5897_v41 = vpop.f32.mrf.mxu2  ;;  %v5783_v29 = vrot.slane %v5781_v43, 3 }
 0x240   : > { %v5398_v18 = vadd.f32 %v15442_v40, %v4851_v17  ;;  %v12975_v17 = vld [vmem:[#allocation2 + $0x64] sm:$0xff]  ;;  %v13015_v40 = vld [vmem:[#allocation2 + $0x6c] sm:$0xff]  ;;  %v5220_v8 = vshll.u32 %v15493_v16, 16 }
 0x241   : > { %v15488_v57 = vpop.f32.mrf.mxu1 }
 0x242   : > { %v5965_v35 = vadd.f32 %v5892_v38, %v5398_v18  ;;  %v3908_v38 = vadd.f32 %v18127_v54, %v2583_v12  ;;  %v5218_v12 = vor.u32 %v5216_v27, %v5214_v3  ;;  %v5222_v14 = vrot.slane %v5220_v8, 1 }
 0x243   : > { %v6270_v0 = vpop.f32.mrf.mxu3 }
 0x244   : > { %v15491_v45 = vadd.f32 %v6270_v0, %v5965_v35  ;;  %5939 = vmatmul.bf16.gmra.mxu2 %v5779_v23  ;;  %5372 = vmatmul.bf16.gmra.mxu1 %v5215_v15  ;;  %v5786_v23 = vrot.slane %v5784_v48, 4  ;;  %v5488_v35 = vld [vmem:[#allocation2 + $0x8c] sm:$0xf] }
 0x245   : > { %v4781_v37 = vpop.f32.mrf.mxu0  ;;  %v5521_v10 = vsel %vm15104_vm12, %v5488_v35, 0  ;;  %v18133_v35 = vld [vmem:[#allocation87_spill] sm:$0xff] }
 0x246   : > { %v4852_v22 = vadd.f32 %v4781_v37, %v18126_v51  ;;  %v5520_v37 = vsel %vm15067_vm5, %v5487_v31, 0  ;;  %v5787_v48 = vor.u32 %v5786_v23, %v5783_v29  ;;  %vm18130_vm5 = vmmov %vm18122_vm4  ;;  %v18131_v31 = vld [vmem:[#allocation84_spill] sm:$0xff]  ;;  %vm18134_vm9 = vnez %v18133_v35 }
 0x247   : > { %v5900_v4 = vpop.f32.mrf.mxu2  ;;  %v5635_v51 = vunpack.c.l.b16 %v5520_v37  ;;  %vm18132_vm12 = vnez %v18131_v31  ;;  %v4974_v29 = vsel %vm18134_vm9, %v4941_v59, 0  ;;  %vm18135_vm4 = vsmask.f32 7424  ;;  %v18253_v31 = vld [vmem:[#allocation90_spill] sm:$0xff] }
 0x248   : > { %v5399_v18 = vadd.f32 %v15459_v13, %v4852_v22  ;;  %4820 = vmatmul.bf16.gmra.mxu0 %v12975_v17  ;;  %6312 = vmatmul.bf16.gmra.mxu3 %v13015_v40  ;;  %v18129_v17 = vld [vmem:[#allocation70_spill] sm:$0xff]  ;;  %v5636_v22 = vunpack.c.l.b16 %v5521_v10  ;;  %v5788_v46 = vsel %vm18130_vm5, %v5778_v58, %v5787_v48  ;;  %v5223_v3 = vsel %vm18135_vm4, %v5218_v12, %v5222_v14 }
 0x249   : > { %v15500_v15 = vpop.f32.mrf.mxu1  ;;  %v4475_v40 = vadd.f32 %v18129_v17, %v3908_v38  ;;  %v13016_v17 = vld [vmem:[#allocation2 + $0x74] sm:$0xff] }
 0x24a   : > { %18128 = vst [vmem:[#allocation44_spill] sm:$0xff] %v15500_v15  ;;  %v5966_v0 = vadd.f32 %v5895_v11, %v5399_v18  ;;  %v4940_v11 = vld [vmem:[#allocation2 + $0x84] sm:$0xf]  ;;  %v5653_v27 = vpack.c.b16 %v5636_v22, %v5635_v51  ;;  %v13035_v12 = vld [vmem:[%s17494_s1 + $0x238] sm:$0xff] }
 0x24b   : > { %v6273_v13 = vpop.f32.mrf.mxu3  ;;  %v4973_v38 = vsel %vm18132_vm12, %v4940_v11, 0  ;;  %v18136_v11 = vld [vmem:[#allocation73_spill] sm:$0xff]  ;;  %6796 = vmatpush.bf16.msra.mxu0 %v13035_v12 }
 0x24c   : > { %v15509_v43 = vadd.f32 %v6273_v13, %v5966_v0  ;;  %v5088_v8 = vunpack.c.l.b16 %v4973_v38  ;;  %v5089_v0 = vunpack.c.l.b16 %v4974_v29  ;;  %v5489_v29 = vld [vmem:[#allocation2 + $0x90] sm:$0xf] }
 0x24d   : > { %v4783_v39 = vpop.f32.mrf.mxu0 }
 0x24e   : > { %v4853_v54 = vadd.f32 %v4783_v39, %v4475_v40  ;;  %v5790_v40 = vshrl.u32 %v5653_v27, 16  ;;  %v5793_v39 = vshll.u32 %v5653_v27, 16  ;;  %v5522_v27 = vsel %vm15060_vm6, %v5489_v29, 0 }
 0x24f   : > { %v15511_v15 = vpop.f32.mrf.mxu2  ;;  %vm18137_vm6 = vnez %v17964_v1 }
 0x250   : > { %v5400_v18 = vadd.f32 %v15471_v28, %v4853_v54  ;;  %v12976_v28 = vld [vmem:[#allocation2 + $0x6c] sm:$0xff]  ;;  %v15524_v54 = vpack.c.b16 %v5089_v0, %v5088_v8  ;;  %v5792_v22 = vrot.slane %v5790_v40, 3 }
 0x251   : > { %v15519_v23 = vpop.f32.mrf.mxu1 }
 0x252   : > { %v5967_v37 = vadd.f32 %v5897_v41, %v5400_v18  ;;  %v5795_v18 = vrot.slane %v5793_v39, 4  ;;  %v5228_v38 = vshll.u32 %v15524_v54, 16 }
 0x253   : > { %v6275_v10 = vpop.f32.mrf.mxu3 }
 0x254   : > { %v15522_v13 = vadd.f32 %v6275_v10, %v5967_v37  ;;  %5944 = vmatmul.bf16.gmra.mxu2 %v5788_v46  ;;  %5377 = vmatmul.bf16.gmra.mxu1 %v5223_v3  ;;  %v5224_v46 = vshrl.u32 %v15493_v16, 16  ;;  %v5796_v10 = vor.u32 %v5795_v18, %v5792_v22  ;;  %v5637_v16 = vunpack.c.l.b16 %v5522_v27  ;;  %v13032_v22 = vld [vmem:[%s17494_s1 + $0x220] sm:$0xff]  ;;  %v12977_v18 = vld [vmem:[#allocation2 + $0x74] sm:$0xff] }
 0x255   : > { %v4786_v58 = vpop.f32.mrf.mxu0  ;;  %v18138_v27 = vld [vmem:[#allocation80_spill] sm:$0xff] }
 0x256   : > { %v4854_v59 = vadd.f32 %v4786_v58, %v18136_v11  ;;  %v5797_v39 = vsel %vm18130_vm5, %v5787_v48, %v5796_v10 }
 0x257   : > { %v5905_v35 = vpop.f32.mrf.mxu2 }
 0x258   : > { %v5401_v41 = vadd.f32 %v15488_v57, %v4854_v59  ;;  %4825 = vmatmul.bf16.gmra.mxu0 %v12976_v28  ;;  %6317 = vmatmul.bf16.gmra.mxu3 %v13016_v17  ;;  %v13034_v57 = vld [vmem:[%s17494_s1 + $0x230] sm:$0xff]  ;;  %v5226_v28 = vor.u32 %v5224_v46, %v5222_v14  ;;  %v5230_v17 = vrot.slane %v5228_v38, 1  ;;  %v5654_v14 = vpack.c.b16 %v5637_v16, %v5637_v16  ;;  %v13017_v46 = vld [vmem:[#allocation2 + $0x7c] sm:$0xff] }
 0x259   : > { %v15531_v51 = vpop.f32.mrf.mxu1  ;;  %6797 = vmatpush.bf16.msra.mxu0 %v13034_v57 }
 0x25a   : > { %v5968_v3 = vadd.f32 %v5900_v4, %v5401_v41  ;;  %v4942_v4 = vld [vmem:[#allocation2 + $0x8c] sm:$0x1]  ;;  %v5231_v59 = vsel %vm18135_vm4, %v5226_v28, %v5230_v17  ;;  %v5799_v48 = vshrl.u32 %v5654_v14, 16  ;;  %v5802_v29 = vshll.u32 %v5654_v14, 16  ;;  %v13031_v28 = vld [vmem:[%s17494_s1 + $0x218] sm:$0xff] }
 0x25b   : > { %v6278_v8 = vpop.f32.mrf.mxu3  ;;  %v4975_v40 = vsel %vm18137_vm6, %v4942_v4, 0 }
 0x25c   : > { %v15540_v0 = vadd.f32 %v6278_v8, %v5968_v3  ;;  %v5090_v12 = vunpack.c.l.b16 %v4975_v40  ;;  %v5801_v4 = vrot.slane %v5799_v48, 3  ;;  %v5804_v40 = vrot.slane %v5802_v29, 4 }
 0x25d   : > { %v15542_v37 = vpop.f32.mrf.mxu0  ;;  %6798 = vmatpush.bf16.msra.mxu0 %v13033_v34 }
 0x25e   : > { %v5107_v3 = vpack.c.b16 %v5090_v12, %v5090_v12 }
 0x25f   : > { %v15544_v58 = vpop.f32.mrf.mxu2 }
 0x261   : > { %v15552_v11 = vpop.f32.mrf.mxu1  ;;  %6799 = vmatpush.bf16.msra.mxu0 %v13032_v22  ;;  %v13030_v22 = vld [vmem:[%s17494_s1 + $0x210] sm:$0xff] }
 0x263   : > { %v15555_v41 = vpop.f32.mrf.mxu3 }
 0x264   : > { %5949 = vmatmul.bf16.gmra.mxu2 %v5797_v39  ;;  %5382 = vmatmul.bf16.gmra.mxu1 %v5231_v59  ;;  %v5232_v39 = vshrl.u32 %v15524_v54, 16  ;;  %v5236_v59 = vshll.u32 %v5107_v3, 16  ;;  %v13029_v54 = vld [vmem:[%s17494_s1 + $0x208] sm:$0xff] }
 0x265   : > { %v4791_v38 = vpop.f32.mrf.mxu0  ;;  %6800 = vmatpush.bf16.msra.mxu0 %v13031_v28  ;;  %v12978_v28 = vld [vmem:[#allocation2 + $0x7c] sm:$0xff] }
 0x266   : > { %v4856_v8 = vadd.f32 %v4791_v38, %v18138_v27 }
 0x267   : > { %v15561_v57 = vpop.f32.mrf.mxu2 }
 0x268   : > { %v5403_v16 = vadd.f32 %v15519_v23, %v4856_v8  ;;  %4830 = vmatmul.bf16.gmra.mxu0 %v12977_v18  ;;  %6322 = vmatmul.bf16.gmra.mxu3 %v13017_v46  ;;  %v5805_v23 = vor.u32 %v5804_v40, %v5801_v4  ;;  %v5234_v18 = vor.u32 %v5232_v39, %v5230_v17  ;;  %v5238_v46 = vrot.slane %v5236_v59, 1  ;;  %v13028_v17 = vld [vmem:[%s17494_s1 + $0x200] sm:$0xff]  ;;  %v6402_v59 = vld [vmem:[#allocation2 + $0x14] sm:$0xf] }
 0x269   : > { %v15567_v34 = vpop.f32.mrf.mxu1  ;;  %6801 = vmatpush.bf16.msra.mxu0 %v13030_v22  ;;  %v18141_v40 = vld [vmem:[#allocation88_spill] sm:$0xff] }
 0x26a   : > { %v5970_v14 = vadd.f32 %v5905_v35, %v5403_v16  ;;  %v5806_v35 = vsel %vm18130_vm5, %v5796_v10, %v5805_v23  ;;  %v5239_v3 = vsel %vm18135_vm4, %v5234_v18, %v5238_v46  ;;  %v13018_v16 = vld [vmem:[#allocation2 + $0x84] sm:$0xff]  ;;  %v6435_v18 = vsel %vm13642_vm11, %v6402_v59, 0  ;;  %vm18150_vm11 = vmmov %vm18135_vm4 }
 0x26b   : > { %v6283_v12 = vpop.f32.mrf.mxu3  ;;  %vm18163_vm5 = vmmov %vm18135_vm4 }
 0x26c   : > { %v15573_v38 = vadd.f32 %v6283_v12, %v5970_v14  ;;  %v6403_v14 = vld [vmem:[#allocation2 + $0x18] sm:$0xf] }
 0x26d   : > { %v15575_v27 = vpop.f32.mrf.mxu0  ;;  %6802 = vmatpush.bf16.msra.mxu0 %v13029_v54  ;;  %v6436_v46 = vsel %vm13657_vm14, %v6403_v14, 0  ;;  %v6404_v54 = vld [vmem:[#allocation2 + $0x1c] sm:$0xf]  ;;  %vm18153_vm14 = vnez %v17729_v61 }
 0x26f   : > { %v15577_v48 = vpop.f32.mrf.mxu2 }
 0x270   : > { %18139 = vst [vmem:[#allocation36_spill] sm:$0xff] %v15577_v48 }
 0x271   : > { %v15583_v29 = vpop.f32.mrf.mxu1  ;;  %6803 = vmatpush.bf16.msra.mxu0 %v13028_v17  ;;  %v6550_v17 = vunpack.c.l.b16 %v6435_v18 }
 0x272   : > { %18140 = vst [vmem:[#allocation38_spill] sm:$0xff] %v15583_v29 }
 0x273   : > { %v15586_v8 = vpop.f32.mrf.mxu3 }
 0x274   : > { %5954 = vmatmul.bf16.gmra.mxu2 %v5806_v35  ;;  %5387 = vmatmul.bf16.gmra.mxu1 %v5239_v3  ;;  %v6405_v35 = vld [vmem:[#allocation2 + $0x20] sm:$0xf] }
 0x275   : > { %v4796_v4 = vpop.f32.mrf.mxu0 }
 0x276   : > { %v15592_v39 = vadd.f32 %v4796_v4, %v18141_v40  ;;  %v6438_v4 = vsel %vm17982_vm10, %v6405_v35, 0  ;;  %vm18156_vm10 = vmmov %vm18135_vm4 }
 0x277   : > { %v15594_v10 = vpop.f32.mrf.mxu2 }
 0x278   : > { %18142 = vst [vmem:[#allocation39_spill] sm:$0xff] %v15594_v10  ;;  %4835 = vmatmul.bf16.gmra.mxu0 %v12978_v28  ;;  %6327 = vmatmul.bf16.gmra.mxu3 %v13018_v16  ;;  %v6551_v28 = vunpack.c.l.b16 %v6436_v46  ;;  %v6437_v16 = vsel %vm17981_vm2, %v6404_v54, 0  ;;  %v6553_v10 = vunpack.c.l.b16 %v6438_v4  ;;  %vm18154_vm2 = vnez %v17736_v32 }
 0x279   : > { %v15598_v22 = vpop.f32.mrf.mxu1  ;;  %v6552_v59 = vunpack.c.l.b16 %v6437_v16 }
 0x27a   : > { %18143 = vst [vmem:[#allocation68_spill] sm:$0xff] %v15598_v22  ;;  %v12979_v22 = vld [vmem:[#allocation2 + $0x84] sm:$0xff]  ;;  %v6583_v29 = vpack.c.b16 %v6551_v28, %v6550_v17 }
 0x27b   : > { %v15596_v12 = vpop.f32.mrf.mxu3  ;;  %v6584_v35 = vpack.c.b16 %v6553_v10, %v6552_v59 }
 0x27c   : > { %v6601_v17 = vshrl.u32 %v6583_v29, 16 }
 0x27d   : > { %v15600_v23 = vpop.f32.mrf.mxu0  ;;  %v6608_v48 = vshll.u32 %v6584_v35, 16 }
 0x27f   : > { %v15606_v3 = vpop.f32.mrf.mxu2 }
 0x280   : > { %18144 = vst [vmem:[#allocation69_spill] sm:$0xff] %v15606_v3  ;;  %v18147_v3 = vld [vmem:[#allocation92_spill] sm:$0xff] }
 0x281   : > { %v15614_v14 = vpop.f32.mrf.mxu1  ;;  %v2591_v18 = vadd.f32 %v18147_v3, %v15159_v24  ;;  %v6406_v3 = vld [vmem:[#allocation2 + $0x24] sm:$0xf] }
 0x282   : > { %18146 = vst [vmem:[#allocation53_spill] sm:$0xff] %v15614_v14  ;;  %v6439_v10 = vsel %vm17986_vm8, %v6406_v3, 0  ;;  %vm18160_vm8 = vnez %v17747_v50 }
 0x283   : > { %v15612_v40 = vpop.f32.mrf.mxu3  ;;  %v3916_v54 = vadd.f32 %v18149_v30, %v2591_v18  ;;  %v6610_v18 = vrot.slane %v6608_v48, 1  ;;  %v6554_v59 = vunpack.c.l.b16 %v6439_v10  ;;  %v18151_v30 = vld [vmem:[#allocation94_spill] sm:$0xff] }
 0x284   : > { %18145 = vst [vmem:[#allocation46_spill] sm:$0xff] %v15612_v40  ;;  %v6603_v40 = vshll.u32 %v6583_v29, 16 }
 0x285   : > { %v4801_v21 = vpop.f32.mrf.mxu0  ;;  %v4483_v4 = vadd.f32 %v15192_v63, %v3916_v54  ;;  %v2593_v54 = vadd.f32 %v18151_v30, %v15216_v49  ;;  %v6408_v49 = vld [vmem:[#allocation2 + $0x2c] sm:$0xf] }
 0x286   : > { %v15619_v46 = vadd.f32 %v4801_v21, %v15152_v53  ;;  %v6605_v28 = vrot.slane %v6603_v40, 1  ;;  %v6407_v21 = vld [vmem:[#allocation2 + $0x28] sm:$0xf] }
 0x287   : > { %v15621_v25 = vpop.f32.mrf.mxu2  ;;  %v6440_v63 = vsel %vm17987_vm3, %v6407_v21, 0  ;;  %v6612_v21 = vshrl.u32 %v6584_v35, 16  ;;  %vm18161_vm3 = vnez %v17751_v42 }
 0x288   : > { %18148 = vst [vmem:[#allocation43_spill] sm:$0xff] %v15621_v25  ;;  %4840 = vmatmul.bf16.gmra.mxu0 %v12979_v22  ;;  %6332 = vmatmul.bf16.gmra.mxu3 %v13019_v9  ;;  %v6606_v25 = vor.u32 %v6605_v28, %v6601_v17 }
 0x289   : > { %v15629_v53 = vpop.f32.mrf.mxu1 }
 0x28a   : > { %v6611_v40 = vsel %vm18150_vm11, %v6606_v25, %v6610_v18 }
 0x28b   : > { %v15624_v16 = vpop.f32.mrf.mxu3 }
 0x28d   : > { %v4803_v14 = vpop.f32.mrf.mxu0 }
 0x28e   : > { %v15627_v24 = vadd.f32 %v4803_v14, %v4483_v4  ;;  %v6555_v14 = vunpack.c.l.b16 %v6440_v63  ;;  %v3918_v4 = vadd.f32 %v15202_v52, %v2593_v54  ;;  %v6441_v52 = vsel %vm18153_vm14, %v6408_v49, 0  ;;  %vm18177_vm14 = vmmov %vm18163_vm5 }
 0x28f   : > { %v15631_v22 = vpop.f32.mrf.mxu2 }
 0x290   : > { %v6585_v26 = vpack.c.b16 %v6555_v14, %v6554_v59  ;;  %v4485_v25 = vadd.f32 %v15224_v55, %v3918_v4  ;;  %v6556_v4 = vunpack.c.l.b16 %v6441_v52 }
 0x291   : > { %v15646_v20 = vpop.f32.mrf.mxu1 }
 0x292   : > { %v6616_v10 = vshll.u32 %v6585_v26, 16 }
 0x293   : > { %v15637_v9 = vpop.f32.mrf.mxu3 }
 0x294   : > { %v6618_v30 = vrot.slane %v6616_v10, 1 }
 0x295   : > { %v4806_v29 = vpop.f32.mrf.mxu0 }
 0x296   : > { %v15643_v48 = vadd.f32 %v4806_v29, %v15209_v2  ;;  %v6409_v2 = vld [vmem:[#allocation2 + $0x30] sm:$0xf]  ;;  %v6614_v29 = vor.u32 %v6612_v21, %v6610_v18  ;;  %v2595_v18 = vadd.f32 %v15218_v56, %v15238_v19  ;;  %v6411_v56 = vld [vmem:[#allocation2 + $0x38] sm:$0xf] }
 0x297   : > { %v15650_v28 = vpop.f32.mrf.mxu2 }
 0x298   : > { %6804 = vmatmul.bf16.vlgmr.msra.gmra.mxu0 %v6611_v40  ;;  %18152 = vst [vmem:[#allocation51_spill] sm:$0xff] %v15650_v28  ;;  %v6442_v40 = vsel %vm18154_vm2, %v6409_v2, 0  ;;  %v6619_v35 = vsel %vm18156_vm10, %v6614_v29, %v6618_v30  ;;  %v3920_v32 = vadd.f32 %v15232_v33, %v2595_v18  ;;  %v6620_v29 = vshrl.u32 %v6585_v26, 16  ;;  %v18164_v18 = vld [vmem:[#allocation98_spill] sm:$0xff] }
 0x299   : > { %v15661_v14 = vpop.f32.mrf.mxu1 }
 0x29a   : > { %18155 = vst [vmem:[#allocation47_spill] sm:$0xff] %v15661_v14  ;;  %v4487_v10 = vadd.f32 %v15244_v60, %v3920_v32  ;;  %v6410_v14 = vld [vmem:[#allocation2 + $0x34] sm:$0xf]  ;;  %v6622_v19 = vor.u32 %v6620_v29, %v6618_v30  ;;  %v18165_v32 = vld [vmem:[#allocation95_spill] sm:$0xff] }
 0x29b   : > { %v15648_v17 = vpop.f32.mrf.mxu3  ;;  %v6443_v33 = vsel %vm18160_vm8, %v6410_v14, 0  ;;  %vm18189_vm8 = vmmov %vm18163_vm5 }
 0x29c   : > { %v6558_v26 = vunpack.c.l.b16 %v6443_v33 }
 0x29d   : > { %v4808_v3 = vpop.f32.mrf.mxu0 }
 0x29e   : > { %v15653_v63 = vadd.f32 %v4808_v3, %v4485_v25  ;;  %v6557_v25 = vunpack.c.l.b16 %v6442_v40 }
 0x29f   : > { %v15664_v54 = vpop.f32.mrf.mxu2 }
 0x2a0   : > { %18157 = vst [vmem:[#allocation55_spill] sm:$0xff] %v15664_v54  ;;  %v6586_v3 = vpack.c.b16 %v6557_v25, %v6556_v4 }
 0x2a1   : > { %v5363_v2 = vpop.f32.mrf.mxu1 }
 0x2a2   : > { %v6624_v54 = vshll.u32 %v6586_v3, 16  ;;  %v6628_v28 = vshrl.u32 %v6586_v3, 16 }
 0x2a3   : > { %v15659_v59 = vpop.f32.mrf.mxu3 }
 0x2a5   : > { %v4811_v55 = vpop.f32.mrf.mxu0 }
 0x2a6   : > { %v15669_v61 = vadd.f32 %v4811_v55, %v15236_v7  ;;  %v6626_v7 = vrot.slane %v6624_v54, 1  ;;  %v6444_v55 = vsel %vm18161_vm3, %v6411_v56, 0  ;;  %v18168_v54 = vld [vmem:[#allocation96_spill] sm:$0xff] }
 0x2a7   : > { %v5930_v40 = vpop.f32.mrf.mxu2  ;;  %v6559_v25 = vunpack.c.l.b16 %v6444_v55 }
 0x2a8   : > { %6809 = vmatmul.bf16.gmra.mxu0 %v6619_v35  ;;  %v6627_v4 = vsel %vm18163_vm5, %v6622_v19, %v6626_v7 }
 0x2a9   : > { %v15687_v30 = vpop.f32.mrf.mxu1  ;;  %v6587_v29 = vpack.c.b16 %v6559_v25, %v6558_v26  ;;  %v18174_v26 = vld [vmem:[#allocation22_spill] sm:$0xff] }
 0x2aa   : > { %18167 = vst [vmem:[#allocation56_spill] sm:$0xff] %v15687_v30  ;;  %vm18175_vm11 = vnez %v18174_v26 }
 0x2ab   : > { %v15672_v21 = vpop.f32.mrf.mxu3  ;;  %v6636_v26 = vshrl.u32 %v6587_v29, 16 }
 0x2ac   : > { %18158 = vst [vmem:[#allocation59_spill] sm:$0xff] %v15672_v21  ;;  %v18170_v21 = vld [vmem:[#allocation99_spill] sm:$0xff] }
 0x2ad   : > { %v4813_v49 = vpop.f32.mrf.mxu0 }
 0x2ae   : > { %v15675_v52 = vadd.f32 %v4813_v49, %v4487_v10  ;;  %v2597_v10 = vadd.f32 %v18165_v32, %v18164_v18  ;;  %v18166_v49 = vld [vmem:[#allocation97_spill] sm:$0xff]  ;;  %v6632_v18 = vshll.u32 %v6587_v29, 16 }
 0x2af   : > { %v15690_v42 = vpop.f32.mrf.mxu2 }
 0x2b0   : > { %18159 = vst [vmem:[#allocation52_spill] sm:$0xff] %v15675_v52  ;;  %v3922_v50 = vadd.f32 %v18168_v54, %v2597_v10  ;;  %v6630_v10 = vor.u32 %v6628_v28, %v6626_v7 }
 0x2b1   : > { %18169 = vst [vmem:[#allocation85_spill] sm:$0xff] %v15690_v42  ;;  %v5368_v30 = vpop.f32.mrf.mxu1  ;;  %v18182_v42 = vld [vmem:[#allocation27_spill] sm:$0xff] }
 0x2b2   : > { %v4489_v19 = vadd.f32 %v18170_v21, %v3922_v50 }
 0x2b3   : > { %v15681_v35 = vpop.f32.mrf.mxu3 }
 0x2b4   : > { %18162 = vst [vmem:[#allocation58_spill] sm:$0xff] %v15681_v35 }
 0x2b5   : > { %v4816_v60 = vpop.f32.mrf.mxu0 }
 0x2b6   : > { %v4866_v52 = vadd.f32 %v4816_v60, %v18166_v49  ;;  %v6412_v60 = vld [vmem:[#allocation2 + $0x3c] sm:$0xf]  ;;  %v6413_v49 = vld [vmem:[#allocation2 + $0x40] sm:$0xf] }
 0x2b7   : > { %v5935_v21 = vpop.f32.mrf.mxu2 }
 0x2b8   : > { %v5413_v14 = vadd.f32 %v5363_v2, %v4866_v52  ;;  %6814 = vmatmul.bf16.gmra.mxu0 %v6627_v4  ;;  %v6634_v2 = vrot.slane %v6632_v18, 1  ;;  %v18172_v52 = vld [vmem:[#allocation21_spill] sm:$0xff] }
 0x2b9   : > { %vm18173_vm4 = vnez %v18172_v52  ;;  %v15705_v18 = vpop.f32.mrf.mxu1 }
 0x2ba   : > { %v5980_v56 = vadd.f32 %v5930_v40, %v5413_v14  ;;  %v6445_v4 = vsel %vm18173_vm4, %v6412_v60, 0  ;;  %v6446_v40 = vsel %vm18175_vm11, %v6413_v49, 0  ;;  %v6635_v3 = vsel %vm18177_vm14, %v6630_v10, %v6634_v2  ;;  %v18178_v14 = vld [vmem:[#allocation26_spill] sm:$0xff]  ;;  %18179 = vst [vmem:[#allocation79_spill] sm:$0xff] %v15705_v18  ;;  %vm18198_vm4 = vmmov %vm18189_vm8 }
 0x2bb   : > { %v6308_v35 = vpop.f32.mrf.mxu3  ;;  %v6560_v54 = vunpack.c.l.b16 %v6445_v4  ;;  %v6561_v50 = vunpack.c.l.b16 %v6446_v40  ;;  %v6414_v4 = vld [vmem:[#allocation2 + $0x44] sm:$0xf]  ;;  %v6415_v40 = vld [vmem:[#allocation2 + $0x48] sm:$0xf] }
 0x2bc   : > { %v15693_v33 = vadd.f32 %v6308_v35, %v5980_v56 }
 0x2bd   : > { %v4818_v55 = vpop.f32.mrf.mxu0  ;;  %v6588_v28 = vpack.c.b16 %v6561_v50, %v6560_v54  ;;  %v18186_v54 = vld [vmem:[#allocation24_spill] sm:$0xff] }
 0x2be   : > { %18171 = vst [vmem:[#allocation62_spill] sm:$0xff] %v15693_v33  ;;  %v15695_v32 = vadd.f32 %v4818_v55, %v4489_v19  ;;  %vm18187_vm10 = vnez %v18186_v54  ;;  %v18194_v33 = vld [vmem:[#allocation25_spill] sm:$0xff] }
 0x2bf   : > { %v15709_v52 = vpop.f32.mrf.mxu2  ;;  %v6448_v50 = vsel %vm18187_vm10, %v6415_v40, 0  ;;  %v6644_v40 = vshrl.u32 %v6588_v28, 16  ;;  %vm18195_vm3 = vnez %v18194_v33  ;;  %v6418_v33 = vld [vmem:[#allocation2 + $0x54] sm:$0xf] }
 0x2c0   : > { %18181 = vst [vmem:[#allocation61_spill] sm:$0xff] %v15709_v52 }
 0x2c3   : > { %v15701_v25 = vpop.f32.mrf.mxu3 }
 0x2c4   : > { %18176 = vst [vmem:[#allocation77_spill] sm:$0xff] %v15701_v25  ;;  %v6640_v25 = vshll.u32 %v6588_v28, 16  ;;  %v18199_v28 = vld [vmem:[#allocation34_spill] sm:$0xff] }
 0x2c5   : > { %v4821_v35 = vpop.f32.mrf.mxu0 }
 0x2c6   : > { %v4868_v56 = vadd.f32 %v4821_v35, %v18178_v14  ;;  %v6638_v35 = vor.u32 %v6636_v26, %v6634_v2 }
 0x2c7   : > { %v5940_v52 = vpop.f32.mrf.mxu2 }
 0x2c8   : > { %v5415_v19 = vadd.f32 %v5368_v30, %v4868_v56  ;;  %6819 = vmatmul.bf16.gmra.mxu0 %v6635_v3  ;;  %v6642_v30 = vrot.slane %v6640_v25, 1  ;;  %v18184_v3 = vld [vmem:[#allocation23_spill] sm:$0xff] }
 0x2c9   : > { %vm18185_vm2 = vnez %v18184_v3 }
 0x2ca   : > { %v5982_v7 = vadd.f32 %v5935_v21, %v5415_v19  ;;  %v6447_v21 = vsel %vm18185_vm2, %v6414_v4, 0  ;;  %v5373_v19 = vpop.f32.mrf.mxu1  ;;  %v6643_v29 = vsel %vm18189_vm8, %v6638_v35, %v6642_v30  ;;  %v6417_v35 = vld [vmem:[#allocation2 + $0x50] sm:$0xf]  ;;  %vm18207_vm2 = vmmov %vm18198_vm4 }
 0x2cb   : > { %v6313_v55 = vpop.f32.mrf.mxu3  ;;  %vm18214_vm10 = vmmov %vm18207_vm2 }
 0x2cc   : > { %v15707_v60 = vadd.f32 %v6313_v55, %v5982_v7  ;;  %v6562_v7 = vunpack.c.l.b16 %v6447_v21  ;;  %v6563_v55 = vunpack.c.l.b16 %v6448_v50  ;;  %v6646_v21 = vor.u32 %v6644_v40, %v6642_v30  ;;  %vm18223_vm8 = vmmov %vm18207_vm2 }
 0x2cd   : > { %v4823_v49 = vpop.f32.mrf.mxu0 }
 0x2ce   : > { %18180 = vst [vmem:[#allocation66_spill] sm:$0xff] %v15707_v60  ;;  %v15712_v10 = vadd.f32 %v4823_v49, %v18182_v42  ;;  %v18190_v42 = vld [vmem:[#allocation29_spill] sm:$0xff]  ;;  %v6589_v2 = vpack.c.b16 %v6563_v55, %v6562_v7 }
 0x2d0   : > { %18183 = vst [vmem:[#allocation65_spill] sm:$0xff] %v15712_v10  ;;  %v6648_v54 = vshll.u32 %v6589_v2, 16  ;;  %v6416_v10 = vld [vmem:[#allocation2 + $0x4c] sm:$0xf] }
 0x2d2   : > { %v6650_v50 = vrot.slane %v6648_v54, 1 }
 0x2d3   : > { %v15718_v14 = vpop.f32.mrf.mxu3 }
 0x2d4   : > { %18188 = vst [vmem:[#allocation64_spill] sm:$0xff] %v15718_v14  ;;  %v18192_v14 = vld [vmem:[#allocation30_spill] sm:$0xff] }
 0x2d5   : > { %v4826_v56 = vpop.f32.mrf.mxu0 }
 0x2d6   : > { %v4870_v49 = vadd.f32 %v4826_v56, %v18190_v42  ;;  %v6449_v56 = vsel %vm18195_vm3, %v6416_v10, 0  ;;  %v6419_v10 = vld [vmem:[#allocation2 + $0x58] sm:$0xf] }
 0x2d7   : > { %v6564_v7 = vunpack.c.l.b16 %v6449_v56  ;;  %v18205_v56 = vld [vmem:[#allocation32_spill] sm:$0xff] }
 0x2d8   : > { %v5417_v60 = vadd.f32 %v5373_v19, %v4870_v49  ;;  %6824 = vmatmul.bf16.gmra.mxu0 %v6643_v29  ;;  %v18196_v19 = vld [vmem:[#allocation28_spill] sm:$0xff]  ;;  %vm18206_vm14 = vnez %v18205_v56 }
 0x2d9   : > { %vm18197_vm5 = vnez %v18196_v19  ;;  %v6452_v19 = vsel %vm18206_vm14, %v6419_v10, 0 }
 0x2da   : > { %v5984_v25 = vadd.f32 %v5940_v52, %v5417_v60  ;;  %v6450_v29 = vsel %vm18197_vm5, %v6417_v35, 0  ;;  %v6651_v52 = vsel %vm18198_vm4, %v6646_v21, %v6650_v50  ;;  %v18203_v35 = vld [vmem:[#allocation31_spill] sm:$0xff]  ;;  %vm17675_vm4 = vcmask 1046528  }
 0x2db   : > { %v6318_v26 = vpop.f32.mrf.mxu3  ;;  %v6565_v55 = vunpack.c.l.b16 %v6450_v29  ;;  %vm18204_vm11 = vnez %v18203_v35  ;;  %v6421_v35 = vld [vmem:[#allocation2 + $0x60] sm:$0xf] }
 0x2dc   : > { %v15722_v4 = vadd.f32 %v6318_v26, %v5984_v25  ;;  %v6652_v25 = vshrl.u32 %v6589_v2, 16  ;;  %v18201_v26 = vld [vmem:[#allocation35_spill] sm:$0xff]  ;;  %v6451_v21 = vsel %vm18204_vm11, %v6418_v33, 0  ;;  %v18208_v2 = vld [vmem:[#allocation40_spill] sm:$0xff]  ;;  %vm18229_vm11 = vmmov %vm18207_vm2 }
 0x2dd   : > { %v4828_v3 = vpop.f32.mrf.mxu0  ;;  %v6420_v33 = vld [vmem:[#allocation2 + $0x5c] sm:$0xf] }
 0x2de   : > { %18191 = vst [vmem:[#allocation70_spill] sm:$0xff] %v15722_v4  ;;  %v15725_v18 = vadd.f32 %v4828_v3, %v18192_v14  ;;  %v6590_v14 = vpack.c.b16 %v6565_v55, %v6564_v7  ;;  %v6654_v40 = vor.u32 %v6652_v25, %v6650_v50  ;;  %v6567_v7 = vunpack.c.l.b16 %v6452_v19  ;;  %v18210_v25 = vld [vmem:[#allocation41_spill] sm:$0xff] }
 0x2df   : > { %v6454_v19 = vsel %vm18057_vm1, %v6421_v35, 0 }
 0x2e0   : > { %18193 = vst [vmem:[#allocation84_spill] sm:$0xff] %v15725_v18  ;;  %v6656_v30 = vshll.u32 %v6590_v14, 16 }
 0x2e2   : > { %v6658_v54 = vrot.slane %v6656_v30, 1 }
 0x2e5   : > { %v4831_v60 = vpop.f32.mrf.mxu0 }
 0x2e6   : > { %v15733_v42 = vadd.f32 %v4831_v60, %v18199_v28  ;;  %v6659_v60 = vsel %vm18207_vm2, %v6654_v40, %v6658_v54  ;;  %v6453_v40 = vsel %vm18055_vm15, %v6420_v33, 0  ;;  %v6423_v33 = vld [vmem:[#allocation2 + $0x68] sm:$0xf] }
 0x2e8   : > { %18200 = vst [vmem:[#allocation73_spill] sm:$0xff] %v15733_v42  ;;  %6829 = vmatmul.bf16.gmra.mxu0 %v6651_v52  ;;  %v6566_v52 = vunpack.c.l.b16 %v6451_v21  ;;  %v18231_v42 = vld [vmem:[#allocation57_spill] sm:$0xff] }
 0x2ea   : > { %v6591_v28 = vpack.c.b16 %v6567_v7, %v6566_v52  ;;  %v6568_v52 = vunpack.c.l.b16 %v6453_v40  ;;  %v6569_v7 = vunpack.c.l.b16 %v6454_v19  ;;  %v18221_v40 = vld [vmem:[#allocation45_spill] sm:$0xff] }
 0x2eb   : > { %vm18222_vm1 = vnez %v18221_v40 }
 0x2ec   : > { %v6664_v50 = vshll.u32 %v6591_v28, 16  ;;  %v6456_v19 = vsel %vm18222_vm1, %v6423_v33, 0  ;;  %v6425_v33 = vld [vmem:[#allocation2 + $0x70] sm:$0xf]  ;;  %vm18240_vm1 = vmmov %vm18223_vm8 }
 0x2ed   : > { %v4833_v49 = vpop.f32.mrf.mxu0 }
 0x2ee   : > { %v15736_v3 = vadd.f32 %v4833_v49, %v18201_v26  ;;  %v6660_v26 = vshrl.u32 %v6590_v14, 16  ;;  %v6666_v10 = vrot.slane %v6664_v50, 1  ;;  %v18215_v14 = vld [vmem:[#allocation49_spill] sm:$0xff] }
 0x2f0   : > { %18202 = vst [vmem:[#allocation80_spill] sm:$0xff] %v15736_v3  ;;  %v6662_v56 = vor.u32 %v6660_v26, %v6658_v54  ;;  %v18217_v26 = vld [vmem:[#allocation50_spill] sm:$0xff]  ;;  %v6422_v3 = vld [vmem:[#allocation2 + $0x64] sm:$0xf] }
 0x2f5   : > { %v4836_v29 = vpop.f32.mrf.mxu0 }
 0x2f6   : > { %v15744_v55 = vadd.f32 %v4836_v29, %v18208_v2 }
 0x2f8   : > { %18209 = vst [vmem:[#allocation88_spill] sm:$0xff] %v15744_v55  ;;  %6834 = vmatmul.bf16.gmra.mxu0 %v6659_v60  ;;  %v6667_v60 = vsel %vm18214_vm10, %v6662_v56, %v6666_v10  ;;  %v18219_v55 = vld [vmem:[#allocation42_spill] sm:$0xff]  ;;  %vm18236_vm10 = vmmov %vm18223_vm8 }
 0x2f9   : > { %vm18220_vm15 = vnez %v18219_v55 }
 0x2fa   : > { %v6455_v56 = vsel %vm18220_vm15, %v6422_v3, 0  ;;  %v6424_v3 = vld [vmem:[#allocation2 + $0x6c] sm:$0xf] }
 0x2fd   : > { %v4838_v49 = vpop.f32.mrf.mxu0 }
 0x2fe   : > { %v15747_v30 = vadd.f32 %v4838_v49, %v18210_v25  ;;  %v6592_v49 = vpack.c.b16 %v6569_v7, %v6568_v52  ;;  %v6570_v52 = vunpack.c.l.b16 %v6455_v56  ;;  %v6571_v7 = vunpack.c.l.b16 %v6456_v19 }
 0x300   : > { %18211 = vst [vmem:[#allocation92_spill] sm:$0xff] %v15747_v30  ;;  %v6668_v30 = vshrl.u32 %v6591_v28, 16  ;;  %v6672_v54 = vshll.u32 %v6592_v49, 16 }
 0x302   : > { %v6670_v21 = vor.u32 %v6668_v30, %v6666_v10  ;;  %v6674_v35 = vrot.slane %v6672_v54, 1  ;;  %v6593_v30 = vpack.c.b16 %v6571_v7, %v6570_v52 }
 0x304   : > { %v6680_v54 = vshll.u32 %v6593_v30, 16 }
 0x305   : > { %v4841_v29 = vpop.f32.mrf.mxu0 }
 0x306   : > { %v15755_v2 = vadd.f32 %v4841_v29, %v18215_v14  ;;  %v15769_v14 = vld [vmem:[%s17495_s2] ss:$0 sm:$0xff]  ;;  %v6682_v40 = vrot.slane %v6680_v54, 1 }
 0x308   : > { %18216 = vst [vmem:[#allocation93_spill] sm:$0xff] %v15755_v2  ;;  %6839 = vmatmul.bf16.gmra.mxu0 %v6667_v60  ;;  %v6675_v60 = vsel %vm18223_vm8, %v6670_v21, %v6674_v35 }
 0x30d   : > { %v4843_v25 = vpop.f32.mrf.mxu0 }
 0x30e   : > { %v15758_v50 = vadd.f32 %v4843_v25, %v18217_v26  ;;  %v6676_v25 = vshrl.u32 %v6592_v49, 16 }
 0x310   : > { %18218 = vst [vmem:[#allocation94_spill] sm:$0xff] %v15758_v50 }
 0x315   : > { %v6805_v29 = vpop.f32.mrf.mxu0 }
 0x316   : > { %v6885_v28 = vadd.f32 %v6805_v29, %v15422_v5  ;;  %v6678_v5 = vor.u32 %v6676_v25, %v6674_v35  ;;  %v18224_v29 = vld [vmem:[#allocation48_spill] sm:$0xff] }
 0x317   : > { %vm18225_vm3 = vnez %v18224_v29 }
 0x318   : > { %6844 = vmatmul.bf16.gmra.mxu0 %v6675_v60  ;;  %v6985_v55 = vadd.f32 %v15769_v14, %v6885_v28  ;;  %v6457_v50 = vsel %vm18225_vm3, %v6424_v3, 0  ;;  %v18226_v60 = vld [vmem:[#allocation54_spill] sm:$0xff] }
 0x319   : > { %vm18227_vm5 = vnez %v18226_v60  ;;  %v6684_v60 = vshrl.u32 %v6593_v30, 16 }
 0x31a   : > { %v7017_v21 = vmax.f32 %v6985_v55, 0.0  ;;  %v6458_v52 = vsel %vm18227_vm5, %v6425_v33, 0 }
 0x31b   : > { %v6573_v55 = vunpack.c.l.b16 %v6458_v52  ;;  %v6426_v52 = vld [vmem:[#allocation2 + $0x74] sm:$0xf] }
 0x31c   : > { %v15778_v7 = vrot.slane %v7017_v21, 1 }
 0x31d   : > { %v6807_v10 = vpop.f32.mrf.mxu0 }
 0x31e   : > { %v6886_v26 = vadd.f32 %v6807_v10, %v15433_v6  ;;  %18228 = vst [vmem:[#allocation98_spill] sm:$0xff] %v15778_v7  ;;  %v6683_v6 = vsel %vm18229_vm11, %v6678_v5, %v6682_v40  ;;  %v6572_v10 = vunpack.c.l.b16 %v6457_v50 }
 0x320   : > { %v6986_v56 = vadd.f32 %v15769_v14, %v6886_v26  ;;  %v6594_v3 = vpack.c.b16 %v6573_v55, %v6572_v10  ;;  %v18234_v55 = vld [vmem:[#allocation63_spill] sm:$0xff] }
 0x321   : > { %vm18235_vm2 = vnez %v18234_v55 }
 0x322   : > { %v7018_v19 = vmax.f32 %v6986_v56, 0.0  ;;  %v6688_v2 = vshll.u32 %v6594_v3, 16 }
 0x324   : > { %v7083_v49 = vrot.slane %v7018_v19, 1 }
 0x325   : > { %v6810_v28 = vpop.f32.mrf.mxu0 }
 0x326   : > { %v6887_v26 = vadd.f32 %v6810_v28, %v15451_v47  ;;  %v7084_v35 = vsel %vm17675_vm4, %v15778_v7, %v7083_v49  ;;  %v6427_v47 = vld [vmem:[#allocation2 + $0x78] sm:$0xf]  ;;  %v6690_v7 = vrot.slane %v6688_v2, 1 }
 0x327   : > { %v15784_v25 = vmax.f32 %v7017_v21, %v7084_v35  ;;  %v6686_v35 = vor.u32 %v6684_v60, %v6682_v40  ;;  %v6460_v30 = vsel %vm18235_vm2, %v6427_v47, 0 }
 0x328   : > { %v6987_v54 = vadd.f32 %v15769_v14, %v6887_v26  ;;  %6849 = vmatmul.bf16.gmra.mxu0 %v6683_v6  ;;  %v18232_v6 = vld [vmem:[#allocation60_spill] sm:$0xff] }
 0x329   : > { %18230 = vst [vmem:[#allocation95_spill] sm:$0xff] %v15784_v25  ;;  %vm18233_vm14 = vnez %v18232_v6  ;;  %v6692_v6 = vshrl.u32 %v6594_v3, 16 }
 0x32a   : > { %v7019_v33 = vmax.f32 %v6987_v54, 0.0  ;;  %v6459_v10 = vsel %vm18233_vm14, %v6426_v52, 0 }
 0x32c   : > { %v7085_v56 = vrot.slane %v7019_v33, 1 }
 0x32d   : > { %v6812_v29 = vpop.f32.mrf.mxu0 }
 0x32e   : > { %v6888_v5 = vadd.f32 %v6812_v29, %v18231_v42  ;;  %v7086_v50 = vsel %vm17675_vm4, %v7083_v49, %v7085_v56  ;;  %v6691_v42 = vsel %vm18236_vm10, %v6686_v35, %v6690_v7  ;;  %v6574_v49 = vunpack.c.l.b16 %v6459_v10  ;;  %v6428_v10 = vld [vmem:[#allocation2 + $0x7c] sm:$0xf] }
 0x32f   : > { %v15789_v28 = vmax.f32 %v7018_v19, %v7086_v50  ;;  %v6575_v29 = vunpack.c.l.b16 %v6460_v30  ;;  %v6429_v30 = vld [vmem:[#allocation2 + $0x80] sm:$0xf]  ;;  %v6461_v3 = vsel %vm18105_vm0, %v6428_v10, 0  ;;  %vm18246_vm0 = vmmov %vm18240_vm1 }
 0x330   : > { %v6988_v21 = vadd.f32 %v15769_v14, %v6888_v5 }
 0x331   : > { %v6595_v40 = vpack.c.b16 %v6575_v29, %v6574_v49 }
 0x332   : > { %v7020_v26 = vmax.f32 %v6988_v21, 0.0 }
 0x333   : > { %v6696_v47 = vshll.u32 %v6595_v40, 16 }
 0x334   : > { %v7087_v54 = vrot.slane %v7020_v26, 1 }
 0x335   : > { %v6815_v4 = vpop.f32.mrf.mxu0 }
 0x336   : > { %v6889_v19 = vadd.f32 %v6815_v4, %v15480_v62  ;;  %v7088_v50 = vsel %vm17675_vm4, %v7085_v56, %v7087_v54  ;;  %v6694_v4 = vor.u32 %v6692_v6, %v6690_v7 }
 0x337   : > { %v7181_v5 = vmax.f32 %v7019_v33, %v7088_v50  ;;  %v6698_v33 = vrot.slane %v6696_v47, 1 }
 0x338   : > { %v6989_v2 = vadd.f32 %v15769_v14, %v6889_v19  ;;  %6854 = vmatmul.bf16.gmra.mxu0 %v6691_v42  ;;  %v18238_v19 = vld [vmem:[#allocation72_spill] sm:$0xff] }
 0x339   : > { %v7211_v56 = vmax.f32 %v15784_v25, %v7181_v5  ;;  %vm18239_vm15 = vnez %v18238_v19  ;;  %v6700_v25 = vshrl.u32 %v6595_v40, 16 }
 0x33a   : > { %v7021_v60 = vmax.f32 %v6989_v2, 0.0 }
 0x33c   : > { %v7089_v52 = vrot.slane %v7021_v60, 1 }
 0x33d   : > { %v6817_v21 = vpop.f32.mrf.mxu0 }
 0x33e   : > { %v6890_v55 = vadd.f32 %v6817_v21, %v15491_v45  ;;  %v7090_v35 = vsel %vm17675_vm4, %v7087_v54, %v7089_v52  ;;  %v6462_v45 = vsel %vm18239_vm15, %v6429_v30, 0  ;;  %v6576_v21 = vunpack.c.l.b16 %v6461_v3 }
 0x33f   : > { %v7182_v18 = vmax.f32 %v7020_v26, %v7090_v35  ;;  %v6699_v26 = vsel %vm18240_vm1, %v6694_v4, %v6698_v33  ;;  %v6577_v7 = vunpack.c.l.b16 %v6462_v45  ;;  %v18241_v35 = vld [vmem:[#allocation75_spill] sm:$0xff] }
 0x340   : > { %v6990_v62 = vadd.f32 %v15769_v14, %v6890_v55 }
 0x341   : > { %v7212_v42 = vmax.f32 %v15789_v28, %v7182_v18  ;;  %v6596_v30 = vpack.c.b16 %v6577_v7, %v6576_v21  ;;  %v6702_v21 = vor.u32 %v6700_v25, %v6698_v33 }
 0x342   : > { %v7022_v49 = vmax.f32 %v6990_v62, 0.0  ;;  %v18242_v62 = vld [vmem:[#allocation71_spill] sm:$0xff] }
 0x343   : > { %v15809_v50 = vpack.c.bf16 %v7212_v42, %v7211_v56  ;;  %v2585_v10 = vadd.f32 %v18242_v62, %v18241_v35  ;;  %v18243_v42 = vld [vmem:[#allocation74_spill] sm:$0xff]  ;;  %v6430_v35 = vld [vmem:[#allocation2 + $0x84] sm:$0xf]  ;;  %v6431_v62 = vld [vmem:[#allocation2 + $0x88] sm:$0xf] }
 0x344   : > { %v7091_v54 = vrot.slane %v7022_v49, 1  ;;  %v6463_v40 = vsel %vm18119_vm13, %v6430_v35, 0  ;;  %vm18252_vm13 = vmmov %vm18246_vm0 }
 0x345   : > { %v6820_v2 = vpop.f32.mrf.mxu0  ;;  %v3910_v19 = vadd.f32 %v18243_v42, %v2585_v10  ;;  %v6464_v42 = vsel %vm18121_vm7, %v6431_v62, 0  ;;  %v18249_v62 = vld [vmem:[#allocation81_spill] sm:$0xff]  ;;  %vm18257_vm7 = vmmov %vm18246_vm0 }
 0x346   : > { %v6891_v6 = vadd.f32 %v6820_v2, %v15509_v43  ;;  %v7092_v47 = vsel %vm17675_vm4, %v7089_v52, %v7091_v54  ;;  %v6704_v43 = vshll.u32 %v6596_v30, 16  ;;  %v18244_v2 = vld [vmem:[#allocation76_spill] sm:$0xff] }
 0x347   : > { %v15814_v55 = vmax.f32 %v7021_v60, %v7092_v47  ;;  %v4477_v52 = vadd.f32 %v18244_v2, %v3910_v19  ;;  %v6578_v2 = vunpack.c.l.b16 %v6463_v40  ;;  %v18250_v40 = vld [vmem:[#allocation83_spill] sm:$0xff] }
 0x348   : > { %v6991_v29 = vadd.f32 %v15769_v14, %v6891_v6  ;;  %6859 = vmatmul.bf16.gmra.mxu0 %v6699_v26  ;;  %v6706_v7 = vrot.slane %v6704_v43, 1  ;;  %v18248_v43 = vld [vmem:[#allocation78_spill] sm:$0xff] }
 0x349   : > { %v7213_v56 = vmax.f32 %v7181_v5, %v15814_v55  ;;  %v4855_v26 = vadd.f32 %v15542_v37, %v4477_v52  ;;  %v6579_v52 = vunpack.c.l.b16 %v6464_v42  ;;  %v2587_v36 = vadd.f32 %v18248_v43, %v18247_v44 }
 0x34a   : > { %v7023_v4 = vmax.f32 %v6991_v29, 0.0  ;;  %v6707_v37 = vsel %vm18246_vm0, %v6702_v21, %v6706_v7  ;;  %v6708_v21 = vshrl.u32 %v6596_v30, 16 }
 0x34c   : > { %v7093_v3 = vrot.slane %v7023_v4, 1 }
 0x34d   : > { %v6822_v45 = vpop.f32.mrf.mxu0 }
 0x34e   : > { %v6892_v60 = vadd.f32 %v6822_v45, %v15522_v13  ;;  %v7094_v47 = vsel %vm17675_vm4, %v7091_v54, %v7093_v3  ;;  %v18245_v54 = vld [vmem:[#allocation44_spill] sm:$0xff] }
 0x34f   : > { %v7184_v6 = vmax.f32 %v7022_v49, %v7094_v47  ;;  %v5402_v19 = vadd.f32 %v18245_v54, %v4855_v26  ;;  %v6597_v47 = vpack.c.b16 %v6579_v52, %v6578_v2  ;;  %v3912_v26 = vadd.f32 %v18249_v62, %v2587_v36 }
 0x350   : > { %v6992_v5 = vadd.f32 %v15769_v14, %v6892_v60  ;;  %v6710_v52 = vor.u32 %v6708_v21, %v6706_v7 }
 0x351   : > { %v7214_v10 = vmax.f32 %v7182_v18, %v7184_v6  ;;  %v4479_v42 = vadd.f32 %v18250_v40, %v3912_v26  ;;  %v18255_v40 = vld [vmem:[#allocation89_spill] sm:$0xff] }
 0x352   : > { %v7024_v29 = vmax.f32 %v6992_v5, 0.0 }
 0x353   : > { %v15830_v13 = vpack.c.bf16 %v7214_v10, %v7213_v56  ;;  %v5969_v56 = vadd.f32 %v15511_v15, %v5402_v19  ;;  %v6712_v10 = vshll.u32 %v6597_v47, 16  ;;  %v6432_v19 = vld [vmem:[#allocation2 + $0x8c] sm:$0xf]  ;;  %v4857_v2 = vadd.f32 %v15575_v27, %v4479_v42 }
 0x354   : > { %v7095_v45 = vrot.slane %v7024_v29, 1  ;;  %v6465_v30 = vsel %vm18132_vm12, %v6432_v19, 0  ;;  %v6716_v19 = vshrl.u32 %v6597_v47, 16  ;;  %vm18263_vm12 = vmmov %vm18246_vm0 }
 0x355   : > { %v6825_v49 = vpop.f32.mrf.mxu0 }
 0x356   : > { %v6893_v25 = vadd.f32 %v6825_v49, %v15540_v0  ;;  %v7096_v18 = vsel %vm17675_vm4, %v7093_v3, %v7095_v45  ;;  %v6347_v0 = vadd.f32 %v15555_v41, %v5969_v56  ;;  %v6433_v49 = vld [vmem:[#allocation2 + $0x90] sm:$0xf] }
 0x357   : > { %v15836_v33 = vmax.f32 %v7023_v4, %v7096_v18  ;;  %v6466_v43 = vsel %vm18134_vm9, %v6433_v49, 0 }
 0x358   : > { %v6993_v60 = vadd.f32 %v15769_v14, %v6893_v25  ;;  %6864 = vmatmul.bf16.gmra.mxu0 %v6707_v37  ;;  %v6714_v25 = vrot.slane %v6712_v10, 1  ;;  %v6581_v62 = vunpack.c.l.b16 %v6466_v43 }
 0x359   : > { %v7215_v35 = vmax.f32 %v15814_v55, %v15836_v33 }
 0x35a   : > { %v7025_v5 = vmax.f32 %v6993_v60, 0.0  ;;  %v6715_v27 = vsel %vm18252_vm13, %v6710_v52, %v6714_v25  ;;  %v6580_v60 = vunpack.c.l.b16 %v6465_v30  ;;  %v6718_v43 = vor.u32 %v6716_v19, %v6714_v25 }
 0x35c   : > { %v7097_v3 = vrot.slane %v7025_v5, 1 }
 0x35d   : > { %v6827_v4 = vpop.f32.mrf.mxu0 }
 0x35e   : > { %v6894_v54 = vadd.f32 %v6827_v4, %v6347_v0  ;;  %v7098_v15 = vsel %vm17675_vm4, %v7095_v45, %v7097_v3  ;;  %v5404_v45 = vadd.f32 %v15531_v51, %v4857_v2  ;;  %v18254_v0 = vld [vmem:[#allocation86_spill] sm:$0xff]  ;;  %v6598_v51 = vpack.c.b16 %v6581_v62, %v6580_v60  ;;  %v18256_v2 = vld [vmem:[#allocation91_spill] sm:$0xff] }
 0x35f   : > { %v7186_v37 = vmax.f32 %v7024_v29, %v7098_v15  ;;  %v2589_v4 = vadd.f32 %v18254_v0, %v18253_v31 }
 0x360   : > { %v6994_v55 = vadd.f32 %v15769_v14, %v6894_v54  ;;  %v5971_v21 = vadd.f32 %v15544_v58, %v5404_v45  ;;  %v6720_v49 = vshll.u32 %v6598_v51, 16 }
 0x361   : > { %v7216_v18 = vmax.f32 %v7184_v6, %v7186_v37  ;;  %v3914_v42 = vadd.f32 %v18255_v40, %v2589_v4 }
 0x362   : > { %v7026_v41 = vmax.f32 %v6994_v55, 0.0  ;;  %v6349_v15 = vadd.f32 %v15586_v8, %v5971_v21  ;;  %v6722_v45 = vrot.slane %v6720_v49, 1 }
 0x363   : > { %v15854_v36 = vpack.c.bf16 %v7216_v18, %v7215_v35  ;;  %v4481_v58 = vadd.f32 %v18256_v2, %v3914_v42  ;;  %v6434_v18 = vld [vmem:[#allocation2 + $0x94] sm:$0x1]  ;;  %v6724_v42 = vshrl.u32 %v6598_v51, 16 }
 0x364   : > { %v7099_v56 = vrot.slane %v7026_v41, 1  ;;  %v6467_v47 = vsel %vm18137_vm6, %v6434_v18, 0  ;;  %v18262_v18 = vld [vmem:[#allocation68_spill] sm:$0xff] }
 0x365   : > { %v6830_v29 = vpop.f32.mrf.mxu0  ;;  %v4859_v44 = vadd.f32 %v15600_v23, %v4481_v58  ;;  %v6582_v23 = vunpack.c.l.b16 %v6467_v47  ;;  %v6726_v2 = vor.u32 %v6724_v42, %v6722_v45  ;;  %v5408_v51 = vadd.f32 %v18262_v18, %v15627_v24  ;;  %v18264_v47 = vld [vmem:[#allocation69_spill] sm:$0xff]  ;;  %v18269_v18 = vld [vmem:[#allocation52_spill] sm:$0xff] }
 0x366   : > { %v6895_v7 = vadd.f32 %v6830_v29, %v15573_v38  ;;  %v7100_v6 = vsel %vm17675_vm4, %v7097_v3, %v7099_v56  ;;  %v5405_v38 = vadd.f32 %v15552_v11, %v15592_v39 }
 0x367   : > { %v7187_v26 = vmax.f32 %v7025_v5, %v7100_v6  ;;  %v6599_v31 = vpack.c.b16 %v6582_v23, %v6582_v23 }
 0x368   : > { %v6995_v35 = vadd.f32 %v15769_v14, %v6895_v7  ;;  %6869 = vmatmul.bf16.gmra.mxu0 %v6715_v27 }
 0x369   : > { %v7217_v10 = vmax.f32 %v15836_v33, %v7187_v26  ;;  %v5972_v33 = vadd.f32 %v15561_v57, %v5405_v38  ;;  %v6723_v57 = vsel %vm18257_vm7, %v6718_v43, %v6722_v45  ;;  %v5975_v45 = vadd.f32 %v18264_v47, %v5408_v51 }
 0x36a   : > { %v7027_v54 = vmax.f32 %v6995_v35, 0.0 }
 0x36b   : > { %v6350_v27 = vadd.f32 %v15596_v12, %v5972_v33  ;;  %v18259_v12 = vld [vmem:[#allocation46_spill] sm:$0xff] }
 0x36c   : > { %v7101_v5 = vrot.slane %v7027_v54, 1 }
 0x36d   : > { %v6832_v3 = vpop.f32.mrf.mxu0 }
 0x36e   : > { %v6896_v55 = vadd.f32 %v6832_v3, %v6349_v15  ;;  %v7102_v52 = vsel %vm17675_vm4, %v7099_v56, %v7101_v5  ;;  %v5406_v56 = vadd.f32 %v15567_v34, %v4859_v44  ;;  %v18260_v34 = vld [vmem:[#allocation38_spill] sm:$0xff]  ;;  %v6728_v15 = vshll.u32 %v6599_v31, 16  ;;  %v18261_v3 = vld [vmem:[#allocation39_spill] sm:$0xff] }
 0x36f   : > { %v7188_v30 = vmax.f32 %v7026_v41, %v7102_v52  ;;  %v5407_v35 = vadd.f32 %v18260_v34, %v15619_v46 }
 0x370   : > { %v6996_v8 = vadd.f32 %v15769_v14, %v6896_v55 }
 0x371   : > { %v7218_v11 = vmax.f32 %v7186_v37, %v7188_v30  ;;  %v18258_v37 = vld [vmem:[#allocation36_spill] sm:$0xff]  ;;  %v5974_v19 = vadd.f32 %v18261_v3, %v5407_v35 }
 0x372   : > { %v7028_v39 = vmax.f32 %v6996_v8, 0.0  ;;  %v5973_v6 = vadd.f32 %v18258_v37, %v5406_v56  ;;  %v18266_v37 = vld [vmem:[#allocation43_spill] sm:$0xff] }
 0x373   : > { %v15876_v29 = vpack.c.bf16 %v7218_v11, %v7217_v10  ;;  %v6352_v46 = vadd.f32 %v15624_v16, %v5974_v19  ;;  %v6353_v16 = vadd.f32 %v15637_v9, %v5975_v45  ;;  %v5410_v9 = vadd.f32 %v15629_v53, %v15653_v63  ;;  %v18267_v19 = vld [vmem:[#allocation51_spill] sm:$0xff] }
 0x374   : > { %v7103_v41 = vrot.slane %v7028_v39, 1  ;;  %v6351_v21 = vadd.f32 %v18259_v12, %v5973_v6 }
 0x375   : > { %v6835_v60 = vpop.f32.mrf.mxu0 }
 0x376   : > { %v6897_v62 = vadd.f32 %v6835_v60, %v6350_v27  ;;  %v7104_v25 = vsel %vm17675_vm4, %v7101_v5, %v7103_v41 }
 0x377   : > { %v7189_v7 = vmax.f32 %v7027_v54, %v7104_v25 }
 0x378   : > { %v6997_v1 = vadd.f32 %v15769_v14, %v6897_v62  ;;  %6874 = vmatmul.bf16.gmra.mxu0 %v6723_v57 }
 0x379   : > { %v7219_v0 = vmax.f32 %v7187_v26, %v7189_v7  ;;  %v6730_v26 = vrot.slane %v6728_v15, 1 }
 0x37a   : > { %v7029_v4 = vmax.f32 %v6997_v1, 0.0 }
 0x37b   : > { %v6731_v8 = vsel %vm18263_vm12, %v6726_v2, %v6730_v26 }
 0x37c   : > { %v7105_v10 = vrot.slane %v7029_v4, 1 }
 0x37d   : > { %v6837_v40 = vpop.f32.mrf.mxu0 }
 0x37e   : > { %v6898_v38 = vadd.f32 %v6837_v40, %v6351_v21  ;;  %v7106_v54 = vsel %vm17675_vm4, %v7103_v41, %v7105_v10  ;;  %v18265_v41 = vld [vmem:[#allocation53_spill] sm:$0xff] }
 0x37f   : > { %v7190_v5 = vmax.f32 %v7028_v39, %v7106_v54  ;;  %v5409_v24 = vadd.f32 %v18265_v41, %v15643_v48 }
 0x380   : > { %v6998_v49 = vadd.f32 %v15769_v14, %v6898_v38 }
 0x381   : > { %v7220_v58 = vmax.f32 %v7188_v30, %v7190_v5  ;;  %v5976_v6 = vadd.f32 %v18266_v37, %v5409_v24  ;;  %v18273_v37 = vld [vmem:[#allocation56_spill] sm:$0xff] }
 0x382   : > { %v7030_v55 = vmax.f32 %v6998_v49, 0.0 }
 0x383   : > { %v15890_v52 = vpack.c.bf16 %v7220_v58, %v7219_v0 }
 0x384   : > { %v7107_v33 = vrot.slane %v7030_v55, 1 }
 0x385   : > { %v6840_v44 = vpop.f32.mrf.mxu0 }
 0x386   : > { %v6899_v43 = vadd.f32 %v6840_v44, %v6352_v46  ;;  %v7108_v11 = vsel %vm17675_vm4, %v7105_v10, %v7107_v33  ;;  %v5977_v10 = vadd.f32 %v15631_v22, %v5410_v9 }
 0x387   : > { %v7191_v39 = vmax.f32 %v7029_v4, %v7108_v11 }
 0x388   : > { %v6999_v30 = vadd.f32 %v15769_v14, %v6899_v43  ;;  %6879 = vmatmul.bf16.gmra.mxu0 %v6731_v8  ;;  %v6355_v38 = vadd.f32 %v15659_v59, %v5977_v10  ;;  %v18270_v59 = vld [vmem:[#allocation47_spill] sm:$0xff] }
 0x389   : > { %v7221_v27 = vmax.f32 %v7189_v7, %v7191_v39  ;;  %v6354_v7 = vadd.f32 %v15648_v17, %v5976_v6  ;;  %v5411_v17 = vadd.f32 %v15646_v20, %v15669_v61  ;;  %v5412_v51 = vadd.f32 %v18270_v59, %v18269_v18  ;;  %v18271_v43 = vld [vmem:[#allocation55_spill] sm:$0xff]  ;;  %v18280_v59 = vld [vmem:[#allocation61_spill] sm:$0xff] }
 0x38a   : > { %v7031_v56 = vmax.f32 %v6999_v30, 0.0  ;;  %v18272_v30 = vld [vmem:[#allocation58_spill] sm:$0xff]  ;;  %v5414_v6 = vadd.f32 %v18273_v37, %v15695_v32 }
 0x38b   : > { %v5978_v49 = vadd.f32 %v18267_v19, %v5411_v17  ;;  %v5979_v11 = vadd.f32 %v18271_v43, %v5412_v51  ;;  %v18277_v19 = vld [vmem:[#allocation65_spill] sm:$0xff] }
 0x38c   : > { %v7109_v60 = vrot.slane %v7031_v56, 1 }
 0x38d   : > { %v6842_v57 = vpop.f32.mrf.mxu0 }
 0x38e   : > { %v6900_v23 = vadd.f32 %v6842_v57, %v6353_v16  ;;  %v7110_v62 = vsel %vm17675_vm4, %v7107_v33, %v7109_v60 }
 0x38f   : > { %v7192_v25 = vmax.f32 %v7030_v55, %v7110_v62  ;;  %v18268_v55 = vld [vmem:[#allocation59_spill] sm:$0xff] }
 0x390   : > { %v7000_v1 = vadd.f32 %v15769_v14, %v6900_v23  ;;  %v6356_v46 = vadd.f32 %v18268_v55, %v5978_v49  ;;  %v18278_v49 = vld [vmem:[#allocation79_spill] sm:$0xff] }
 0x391   : > { %v7222_v31 = vmax.f32 %v7190_v5, %v7192_v25 }
 0x392   : > { %v7032_v0 = vmax.f32 %v7000_v1, 0.0 }
 0x393   : > { %v7256_v4 = vpack.c.bf16 %v7222_v31, %v7221_v27  ;;  %v6357_v27 = vadd.f32 %v18272_v30, %v5979_v11  ;;  %v6320_v11 = vpop.f32.mrf.mxu3 }
 0x394   : > { %v7111_v12 = vrot.slane %v7032_v0, 1 }
 0x395   : > { %v6845_v48 = vpop.f32.mrf.mxu0 }
 0x396   : > { %v7112_v21 = vsel %vm17675_vm4, %v7109_v60, %v7111_v12  ;;  %v6901_v34 = vadd.f32 %v6845_v48, %v6354_v7  ;;  %v18275_v48 = vld [vmem:[#allocation85_spill] sm:$0xff] }
 0x397   : > { %v7193_v35 = vmax.f32 %v7031_v56, %v7112_v21  ;;  %v5981_v21 = vadd.f32 %v18275_v48, %v5414_v6 }
 0x398   : > { %v7001_v40 = vadd.f32 %v15769_v14, %v6901_v34 }
 0x399   : > { %v7223_v42 = vmax.f32 %v7191_v39, %v7193_v35 }
 0x39a   : > { %v7033_v15 = vmax.f32 %v7001_v40, 0.0  ;;  %v18276_v40 = vld [vmem:[#allocation77_spill] sm:$0xff] }
 0x39b   : > { %v6323_v37 = vpop.f32.mrf.mxu3 }
 0x39c   : > { %v7113_v54 = vrot.slane %v7033_v15, 1 }
 0x39d   : > { %v6847_v5 = vpop.f32.mrf.mxu0 }
 0x39e   : > { %v7114_v53 = vsel %vm17675_vm4, %v7111_v12, %v7113_v54  ;;  %v6902_v63 = vadd.f32 %v6847_v5, %v6355_v38 }
 0x39f   : > { %v7194_v3 = vmax.f32 %v7032_v0, %v7114_v53  ;;  %v18274_v0 = vld [vmem:[#allocation62_spill] sm:$0xff] }
 0x3a0   : > { %v7002_v2 = vadd.f32 %v15769_v14, %v6902_v63 }
 0x3a1   : > { %v7224_v22 = vmax.f32 %v7192_v25, %v7194_v3 }
 0x3a2   : > { %v7034_v26 = vmax.f32 %v7002_v2, 0.0  ;;  %v5416_v2 = vadd.f32 %v18278_v49, %v18277_v19  ;;  %v18285_v19 = vld [vmem:[#allocation80_spill] sm:$0xff] }
 0x3a3   : > { %v7257_v58 = vpack.c.bf16 %v7224_v22, %v7223_v42  ;;  %v6359_v42 = vadd.f32 %v18276_v40, %v5981_v21 }
 0x3a4   : > { %v7115_v33 = vrot.slane %v7034_v26, 1  ;;  %v5983_v51 = vadd.f32 %v18280_v59, %v5416_v2 }
 0x3a5   : > { %v6850_v20 = vpop.f32.mrf.mxu0 }
 0x3a6   : > { %v7116_v61 = vsel %vm17675_vm4, %v7113_v54, %v7115_v33  ;;  %v6903_v44 = vadd.f32 %v6850_v20, %v6356_v46 }
 0x3a7   : > { %v7195_v8 = vmax.f32 %v7033_v15, %v7116_v61 }
 0x3a8   : > { %v7003_v39 = vadd.f32 %v15769_v14, %v6903_v44  ;;  %v18281_v44 = vld [vmem:[#allocation64_spill] sm:$0xff] }
 0x3a9   : > { %v7225_v47 = vmax.f32 %v7193_v35, %v7195_v8 }
 0x3aa   : > { %v7035_v45 = vmax.f32 %v7003_v39, 0.0 }
 0x3ac   : > { %v7117_v56 = vrot.slane %v7035_v45, 1 }
 0x3ad   : > { %v6852_v16 = vpop.f32.mrf.mxu0 }
 0x3ae   : > { %v7118_v41 = vsel %vm17675_vm4, %v7115_v33, %v7117_v56  ;;  %v6904_v24 = vadd.f32 %v6852_v16, %v6357_v27  ;;  %v5942_v33 = vpop.f32.mrf.mxu2 }
 0x3af   : > { %v7196_v60 = vmax.f32 %v7034_v26, %v7118_v41  ;;  %v5375_v26 = vpop.f32.mrf.mxu1 }
 0x3b0   : > { %v7004_v57 = vadd.f32 %v15769_v14, %v6904_v24  ;;  %v18282_v24 = vld [vmem:[#allocation84_spill] sm:$0xff] }
 0x3b1   : > { %v7226_v23 = vmax.f32 %v7194_v3, %v7196_v60 }
 0x3b2   : > { %v7036_v62 = vmax.f32 %v7004_v57, 0.0 }
 0x3b3   : > { %v7258_v25 = vpack.c.bf16 %v7226_v23, %v7225_v47 }
 0x3b4   : > { %v7119_v1 = vrot.slane %v7036_v62, 1 }
 0x3b5   : > { %v6855_v31 = vpop.f32.mrf.mxu0  ;;  %7307 = vmatpush.bf16.msra.mxu1 %v7258_v25 }
 0x3b6   : > { %v6905_v7 = vadd.f32 %v6855_v31, %v18274_v0  ;;  %v7120_v9 = vsel %vm17675_vm4, %v7117_v56, %v7119_v1  ;;  %v5945_v16 = vpop.f32.mrf.mxu2 }
 0x3b7   : > { %v7197_v12 = vmax.f32 %v7035_v45, %v7120_v9  ;;  %v5378_v45 = vpop.f32.mrf.mxu1 }
 0x3b8   : > { %v7005_v34 = vadd.f32 %v15769_v14, %v6905_v7 }
 0x3b9   : > { %7308 = vmatpush.bf16.msra.mxu1 %v7257_v58  ;;  %v7227_v35 = vmax.f32 %v7195_v8, %v7197_v12  ;;  %v6361_v8 = vadd.f32 %v18281_v44, %v5983_v51 }
 0x3ba   : > { %v7037_v10 = vmax.f32 %v7005_v34, 0.0 }
 0x3bc   : > { %v7121_v15 = vrot.slane %v7037_v10, 1 }
 0x3bd   : > { %v6857_v38 = vpop.f32.mrf.mxu0  ;;  %7309 = vmatpush.bf16.msra.mxu1 %v7256_v4  ;;  %v18279_v4 = vld [vmem:[#allocation66_spill] sm:$0xff] }
 0x3be   : > { %v6906_v32 = vadd.f32 %v6857_v38, %v6359_v42  ;;  %v7122_v17 = vsel %vm17675_vm4, %v7119_v1, %v7121_v15  ;;  %v5947_v34 = vpop.f32.mrf.mxu2 }
 0x3bf   : > { %v7198_v54 = vmax.f32 %v7036_v62, %v7122_v17  ;;  %v18283_v62 = vld [vmem:[#allocation70_spill] sm:$0xff]  ;;  %v5380_v0 = vpop.f32.mrf.mxu1 }
 0x3c0   : > { %v7006_v5 = vadd.f32 %v15769_v14, %v6906_v32  ;;  %v6325_v32 = vpop.f32.mrf.mxu3  ;;  %v5420_v49 = vadd.f32 %v5380_v0, %v18285_v19  ;;  %v18289_v19 = vld [vmem:[#allocation94_spill] sm:$0xff] }
 0x3c1   : > { %7310 = vmatpush.bf16.msra.mxu1 %v15890_v52  ;;  %v7228_v53 = vmax.f32 %v7196_v60, %v7198_v54  ;;  %v5418_v60 = vadd.f32 %v5375_v26, %v18282_v24  ;;  %v18287_v24 = vld [vmem:[#allocation92_spill] sm:$0xff] }
 0x3c2   : > { %v7038_v63 = vmax.f32 %v7006_v5, 0.0 }
 0x3c3   : > { %v15936_v3 = vpack.c.bf16 %v7228_v53, %v7227_v35  ;;  %v5985_v1 = vadd.f32 %v5942_v33, %v5418_v60 }
 0x3c4   : > { %v7123_v22 = vrot.slane %v7038_v63, 1 }
 0x3c5   : > { %v6860_v58 = vpop.f32.mrf.mxu0  ;;  %7311 = vmatpush.bf16.msra.mxu1 %v15876_v29  ;;  %v6363_v9 = vadd.f32 %v6320_v11, %v5985_v1 }
 0x3c6   : > { %v6907_v55 = vadd.f32 %v6860_v58, %v18279_v4  ;;  %v7124_v46 = vsel %vm17675_vm4, %v7121_v15, %v7123_v22  ;;  %v5950_v4 = vpop.f32.mrf.mxu2 }
 0x3c7   : > { %v7199_v18 = vmax.f32 %v7037_v10, %v7124_v46  ;;  %v5383_v5 = vpop.f32.mrf.mxu1  ;;  %v5987_v46 = vadd.f32 %v5947_v34, %v5420_v49 }
 0x3c8   : > { %v7007_v52 = vadd.f32 %v15769_v14, %v6907_v55 }
 0x3c9   : > { %7312 = vmatpush.bf16.msra.mxu1 %v15854_v36  ;;  %v7229_v20 = vmax.f32 %v7197_v12, %v7199_v18  ;;  %v18284_v12 = vld [vmem:[#allocation73_spill] sm:$0xff]  ;;  %v6365_v33 = vadd.f32 %v6325_v32, %v5987_v46 }
 0x3ca   : > { %v7039_v61 = vmax.f32 %v7007_v52, 0.0  ;;  %v5419_v48 = vadd.f32 %v5378_v45, %v18284_v12  ;;  %v6328_v52 = vpop.f32.mrf.mxu3  ;;  %v18288_v12 = vld [vmem:[#allocation93_spill] sm:$0xff] }
 0x3cc   : > { %v7125_v43 = vrot.slane %v7039_v61, 1  ;;  %v5986_v15 = vadd.f32 %v5945_v16, %v5419_v48 }
 0x3cd   : > { %v6862_v39 = vpop.f32.mrf.mxu0  ;;  %7313 = vmatpush.bf16.msra.mxu1 %v15830_v13 }
 0x3ce   : > { %v6908_v29 = vadd.f32 %v6862_v39, %v6361_v8  ;;  %v7126_v47 = vsel %vm17675_vm4, %v7123_v22, %v7125_v43 }
 0x3cf   : > { %v7200_v30 = vmax.f32 %v7038_v63, %v7126_v47  ;;  %v6364_v63 = vadd.f32 %v6323_v37, %v5986_v15  ;;  %v5385_v8 = vpop.f32.mrf.mxu1 }
 0x3d0   : > { %v7008_v27 = vadd.f32 %v15769_v14, %v6908_v29  ;;  %v5422_v60 = vadd.f32 %v5385_v8, %v18287_v24 }
 0x3d1   : > { %7314 = vmatpush.bf16.msra.mxu1 %v15809_v50  ;;  %v7230_v56 = vmax.f32 %v7198_v54, %v7200_v30 }
 0x3d2   : > { %v7040_v36 = vmax.f32 %v7008_v27, 0.0 }
 0x3d3   : > { %v15951_v41 = vpack.c.bf16 %v7230_v56, %v7229_v20  ;;  %v18286_v20 = vld [vmem:[#allocation88_spill] sm:$0xff] }
 0x3d4   : > { %v7127_v57 = vrot.slane %v7040_v36, 1 }
 0x3d5   : > { %v6865_v23 = vpop.f32.mrf.mxu0 }
 0x3d6   : > { %v6909_v13 = vadd.f32 %v6865_v23, %v18283_v62  ;;  %v7128_v25 = vsel %vm17675_vm4, %v7125_v43, %v7127_v57  ;;  %v6330_v23 = vpop.f32.mrf.mxu3 }
 0x3d7   : > { %v7201_v6 = vmax.f32 %v7039_v61, %v7128_v25  ;;  %v5421_v61 = vadd.f32 %v5383_v5, %v18286_v20  ;;  %v5388_v37 = vpop.f32.mrf.mxu1 }
 0x3d8   : > { %v7009_v31 = vadd.f32 %v15769_v14, %v6909_v13  ;;  %v5423_v48 = vadd.f32 %v5388_v37, %v18288_v12 }
 0x3d9   : > { %v7231_v50 = vmax.f32 %v7199_v18, %v7201_v6  ;;  %v5988_v47 = vadd.f32 %v5950_v4, %v5421_v61 }
 0x3da   : > { %v7041_v7 = vmax.f32 %v7009_v31, 0.0 }
 0x3db   : > { %v6366_v16 = vadd.f32 %v6328_v52, %v5988_v47 }
 0x3dc   : > { %v7129_v21 = vrot.slane %v7041_v7, 1 }
 0x3dd   : > { %v6867_v35 = vpop.f32.mrf.mxu0 }
 0x3de   : > { %v6910_v10 = vadd.f32 %v6867_v35, %v6363_v9  ;;  %v7130_v40 = vsel %vm17675_vm4, %v7127_v57, %v7129_v21 }
 0x3df   : > { %v7202_v42 = vmax.f32 %v7040_v36, %v7130_v40  ;;  %v6333_v40 = vpop.f32.mrf.mxu3  ;;  %v5390_v32 = vpop.f32.mrf.mxu1 }
 0x3e0   : > { %v7010_v38 = vadd.f32 %v15769_v14, %v6910_v10  ;;  %v5424_v49 = vadd.f32 %v5390_v32, %v18289_v19 }
 0x3e1   : > { %v7232_v17 = vmax.f32 %v7200_v30, %v7202_v42  ;;  %v5952_v30 = vpop.f32.mrf.mxu2 }
 0x3e2   : > { %v7042_v54 = vmax.f32 %v7010_v38, 0.0  ;;  %v5989_v1 = vadd.f32 %v5952_v30, %v5422_v60  ;;  %v11663_v60 = vld [vmem:[%s17498_s5] sm:$0xf] }
 0x3e3   : > { %v15960_v53 = vpack.c.bf16 %v7232_v17, %v7231_v50 }
 0x3e4   : > { %v7131_v2 = vrot.slane %v7042_v54, 1  ;;  %v6367_v9 = vadd.f32 %v6330_v23, %v5989_v1 }
 0x3e5   : > { %v6870_v22 = vpop.f32.mrf.mxu0 }
 0x3e6   : > { %v6911_v26 = vadd.f32 %v6870_v22, %v6364_v63  ;;  %v7132_v58 = vsel %vm17675_vm4, %v7129_v21, %v7131_v2 }
 0x3e7   : > { %v7203_v55 = vmax.f32 %v7041_v7, %v7132_v58 }
 0x3e8   : > { %v7011_v18 = vadd.f32 %v15769_v14, %v6911_v26 }
 0x3e9   : > { %v7233_v59 = vmax.f32 %v7201_v6, %v7203_v55  ;;  %v5955_v7 = vpop.f32.mrf.mxu2 }
 0x3ea   : > { %v7043_v51 = vmax.f32 %v7011_v18, 0.0  ;;  %v5990_v15 = vadd.f32 %v5955_v7, %v5423_v48  ;;  %v11665_v7 = vld [vmem:[%s17498_s5 + $0x8] sm:$0xf0]  ;;  %v11673_v48 = vld [vmem:[%s17498_s5 + $0x18] sm:$0xf0] }
 0x3ec   : > { %v7133_v44 = vrot.slane %v7043_v51, 1  ;;  %v6368_v63 = vadd.f32 %v6333_v40, %v5990_v15  ;;  %v11681_v40 = vld [vmem:[%s17498_s5 + $0x28] sm:$0xf0]  ;;  %v13042_v15 = vld [vmem:[%s17498_s5 + $0x34] sm:$0xf] }
 0x3ed   : > { %v6872_v43 = vpop.f32.mrf.mxu0 }
 0x3ee   : > { %v6912_v11 = vadd.f32 %v6872_v43, %v6365_v33  ;;  %v7134_v39 = vsel %vm17675_vm4, %v7131_v2, %v7133_v44 }
 0x3ef   : > { %v7204_v29 = vmax.f32 %v7042_v54, %v7134_v39 }
 0x3f0   : > { %v7012_v45 = vadd.f32 %v15769_v14, %v6912_v11 }
 0x3f1   : > { %v7234_v27 = vmax.f32 %v7202_v42, %v7204_v29  ;;  %v5957_v22 = vpop.f32.mrf.mxu2 }
 0x3f2   : > { %v7044_v56 = vmax.f32 %v7012_v45, 0.0  ;;  %v5991_v46 = vadd.f32 %v5957_v22, %v5424_v49  ;;  %v18293_v49 = vld [vmem:[#allocation15_spill] sm:$0xff] }
 0x3f3   : > { %v15968_v36 = vpack.c.bf16 %v7234_v27, %v7233_v59  ;;  %v6335_v59 = vpop.f32.mrf.mxu3  ;;  %v18290_v27 = vld [vmem:[#allocation98_spill] sm:$0xff] }
 0x3f4   : > { %v7135_v57 = vrot.slane %v7044_v56, 1  ;;  %v6369_v33 = vadd.f32 %v6335_v59, %v5991_v46  ;;  %v13051_v22 = vld [vmem:[%s17496_s3 + $0x38] sm:$0xff] }
 0x3f5   : > { %v6875_v62 = vpop.f32.mrf.mxu0  ;;  %7864 = vmatpush.bf16.msra.mxu3 %v13051_v22  ;;  %v18302_v22 = vld [vmem:[#allocation13_spill] sm:$0xff] }
 0x3f6   : > { %v6913_v13 = vadd.f32 %v6875_v62, %v6366_v16  ;;  %v7136_v25 = vsel %vm17675_vm4, %v7133_v44, %v7135_v57  ;;  %v18291_v62 = vld [vmem:[#allocation95_spill] sm:$0xff] }
 0x3f7   : > { %v7205_v6 = vmax.f32 %v7043_v51, %v7136_v25 }
 0x3f8   : > { %v7013_v31 = vadd.f32 %v15769_v14, %v6913_v13 }
 0x3f9   : > { %v7235_v0 = vmax.f32 %v7203_v55, %v7205_v6 }
 0x3fa   : > { %v7045_v50 = vmax.f32 %v7013_v31, 0.0  ;;  %v11671_v31 = vld [vmem:[%s17498_s5 + $0x10] sm:$0xf] }
 0x3fc   : > { %v7137_v21 = vrot.slane %v7045_v50, 1 }
 0x3fd   : > { %v6877_v34 = vpop.f32.mrf.mxu0 }
 0x3fe   : > { %v6914_v35 = vadd.f32 %v6877_v34, %v6367_v9  ;;  %v7138_v10 = vsel %vm17675_vm4, %v7135_v57, %v7137_v21  ;;  %v13037_v57 = vld [vmem:[%s17498_s5 + $0x4] sm:$0xf0]  ;;  %v11679_v9 = vld [vmem:[%s17498_s5 + $0x20] sm:$0xf]  ;;  %v13043_v34 = vld [vmem:[%s17498_s5 + $0x34] sm:$0xf0] }
 0x3ff   : > { %v7206_v42 = vmax.f32 %v7044_v56, %v7138_v10  ;;  %v13040_v10 = vld [vmem:[%s17498_s5 + $0x24] sm:$0xf] }
 0x400   : > { %v7014_v38 = vadd.f32 %v15769_v14, %v6914_v35 }
 0x401   : > { %v7236_v17 = vmax.f32 %v7204_v29, %v7206_v42 }
 0x402   : > { %v7046_v54 = vmax.f32 %v7014_v38, 0.0  ;;  %v11689_v38 = vld [vmem:[%s17498_s5 + $0x38] sm:$0xf0] }
 0x403   : > { %v7263_v5 = vpack.c.bf16 %v7236_v17, %v7235_v0  ;;  %v13039_v0 = vld [vmem:[%s17498_s5 + $0x14] sm:$0xf0]  ;;  %v11692_v32 = vor.u32 %v13042_v15, %v11689_v38 }
 0x404   : > { %v7139_v2 = vrot.slane %v7046_v54, 1  ;;  %v13063_v17 = vld [vmem:[%s17496_s3 + $0x78] sm:$0xff] }
 0x405   : > { %v6880_v26 = vpop.f32.mrf.mxu0  ;;  %8014 = vmatpush.bf16.msrb.mxu1 %v13063_v17 }
 0x406   : > { %v6915_v58 = vadd.f32 %v6880_v26, %v6368_v63  ;;  %v7140_v4 = vsel %vm17675_vm4, %v7137_v21, %v7139_v2  ;;  %v11687_v21 = vld [vmem:[%s17498_s5 + $0x30] sm:$0xf]  ;;  %v13060_v26 = vld [vmem:[%s17496_s3 + $0x60] sm:$0xff] }
 0x407   : > { %v7207_v55 = vmax.f32 %v7045_v50, %v7140_v4  ;;  %v11672_v50 = vor.u32 %v13039_v0, %v11671_v31  ;;  %v18292_v63 = vld [vmem:[#allocation10_spill] sm:$0xff] }
 0x408   : > { %v7015_v18 = vadd.f32 %v15769_v14, %v6915_v58  ;;  %v7404_v19 = vand.u32 7, %v18292_v63  ;;  %v18294_v58 = vld [vmem:[#allocation9_spill] sm:$0xff] }
 0x409   : > { %v7237_v51 = vmax.f32 %v7205_v6, %v7207_v55  ;;  %v7397_v4 = vand.u32 7, %v18294_v58  ;;  %v13069_v58 = vld [vmem:[%s17496_s3 + $0xa8] sm:$0xff] }
 0x40a   : > { %v7047_v52 = vmax.f32 %v7015_v18, 0.0  ;;  %v7507_v59 = vadd.s32 4294967295, %v7404_v19 }
 0x40b   : > { %v7506_v18 = vadd.s32 4294967295, %v7397_v4 }
 0x40c   : > { %v7141_v20 = vrot.slane %v7047_v52, 1  ;;  %vm7515_vm6 = vcmp.ge.s32.totalorder %v7507_v59, 0 }
 0x40d   : > { %v6882_v61 = vpop.f32.mrf.mxu0  ;;  %vm7514_vm9 = vcmp.ge.s32.totalorder %v7506_v18, 0  ;;  %vm7555_vm5 = vmpackc.low %vm7515_vm6, %vm7515_vm6 }
 0x40e   : > { %v6916_v44 = vadd.f32 %v6882_v61, %v6369_v33  ;;  %v7142_v8 = vsel %vm17675_vm4, %v7139_v2, %v7141_v20  ;;  %v7411_v2 = vand.u32 7, %v18293_v49  ;;  %v13059_v33 = vld [vmem:[%s17496_s3 + $0x58] sm:$0xff]  ;;  %vm7554_vm3 = vmpackc.low %vm7514_vm9, %vm7514_vm9  ;;  %v13046_v49 = vld [vmem:[%s17496_s3 + $0x10] sm:$0xff] }
 0x40f   : > { %v7208_v43 = vmax.f32 %v7046_v54, %v7142_v8  ;;  %v13062_v54 = vld [vmem:[%s17496_s3 + $0x70] sm:$0xff] }
 0x410   : > { %v7016_v11 = vadd.f32 %v15769_v14, %v6916_v44  ;;  %v11664_v14 = vor.u32 %v13037_v57, %v11663_v60  ;;  %8015 = vmatpush.bf16.msrb.mxu1 %v13062_v54  ;;  %v18296_v44 = vmov 0  }
 0x411   : > { %v7238_v39 = vmax.f32 %v7206_v42, %v7208_v43  ;;  %v11684_v42 = vor.u32 %v13040_v10, %v11681_v40  ;;  %v7562_v8 = vsel %vm7554_vm3, 65537, %v18296_v44  ;;  %v13070_v10 = vld [vmem:[%s17496_s3 + $0xb0] sm:$0xff] }
 0x412   : > { %v7048_v29 = vmax.f32 %v7016_v11, 0.0  ;;  %7315 = vmatmul.bf16.vlgmr.msra.gmra.mxu1 %v11664_v14  ;;  %v8070_v11 = vadd.s32 1, %v7411_v2 }
 0x413   : > { %v7264_v47 = vpack.c.bf16 %v7238_v39, %v7237_v51  ;;  %v7508_v51 = vadd.s32 4294967295, %v7411_v2  ;;  %v13049_v39 = vld [vmem:[%s17496_s3 + $0x28] sm:$0xff] }
 0x414   : > { %v7143_v45 = vrot.slane %v7048_v29, 1  ;;  %vm8086_vm0 = vcmp.lt.s32.totalorder %v8070_v11, 8  ;;  %v18301_v2 = vld [vmem:[#allocation12_spill] sm:$0xff] }
 0x415   : > { %vm7516_vm8 = vcmp.ge.s32.totalorder %v7508_v51, 0  ;;  %vm8118_vm12 = vmpackc.low %vm8086_vm0, %vm8086_vm0  ;;  %v18303_v51 = vmov 0  ;;  %v13068_v11 = vld [vmem:[%s17496_s3 + $0xa0] sm:$0xff] }
 0x416   : > { %v7144_v30 = vsel %vm17675_vm4, %v7141_v20, %v7143_v45  ;;  %v7178_v56 = vsel %vm17675_vm4, %v7143_v45, %v18290_v27  ;;  %v8068_v20 = vadd.s32 1, %v7397_v4  ;;  %vm7556_vm11 = vmpackc.low %vm7516_vm8, %vm7516_vm8  ;;  %v7574_v45 = vshrl.u32 %v7562_v8, 16 }
 0x417   : > { %v7209_v16 = vmax.f32 %v7047_v52, %v7144_v30  ;;  %v7210_v24 = vmax.f32 %v7048_v29, %v7178_v56  ;;  %v13050_v52 = vld [vmem:[%s17496_s3 + $0x30] sm:$0xff]  ;;  %v7563_v29 = vsel %vm7555_vm5, 65537, %v18296_v44  ;;  %v7564_v27 = vsel %vm7556_vm11, 65537, %v18296_v44 }
 0x418   : > { %7865 = vmatpush.bf16.msra.mxu3 %v13050_v52  ;;  %vm8084_vm14 = vcmp.lt.s32.totalorder %v8068_v20, 8  ;;  %v13058_v30 = vld [vmem:[%s17496_s3 + $0x50] sm:$0xff]  ;;  %v7580_v56 = vshll.u32 %v7563_v29, 16  ;;  %v7576_v60 = vrot.slane %v7574_v45, 4  ;;  %v7590_v57 = vshll.u32 %v7564_v27, 16  ;;  %v13045_v52 = vld [vmem:[%s17496_s3 + $0x8] sm:$0xff] }
 0x419   : > { %v7242_v23 = vmax.f32 %v7210_v24, %v15789_v28  ;;  %v7241_v13 = vmax.f32 %v7209_v16, %v18291_v62  ;;  %v7239_v25 = vmax.f32 %v7207_v55, %v7209_v16  ;;  %v7240_v37 = vmax.f32 %v7208_v43, %v7210_v24  ;;  %v13036_v28 = vld [vmem:[%s17498_s5 + $0x4] sm:$0xf]  ;;  %v18295_v55 = vld [vmem:[#allocation11_spill] sm:$0xff]  ;;  %vm16094_vm13 = vmpackc.low %vm8084_vm14, %vm8084_vm14 }
 0x41a   : > { %v11668_v12 = vor.u32 %v13036_v28, %v11665_v7  ;;  %v7418_v46 = vand.u32 7, %v18295_v55  ;;  %v8069_v43 = vadd.s32 1, %v7404_v19  ;;  %v7584_v16 = vshrl.u32 %v7563_v29, 16  ;;  %v13071_v7 = vld [vmem:[%s17496_s3 + $0xb8] sm:$0xff] }
 0x41b   : > { %v7266_v6 = vpack.c.bf16 %v7242_v23, %v7241_v13  ;;  %v7265_v1 = vpack.c.bf16 %v7240_v37, %v7239_v25  ;;  %v7594_v14 = vshrl.u32 %v7564_v27, 16  ;;  %v7582_v62 = vrot.slane %v7580_v56, 5  ;;  %v13048_v25 = vld [vmem:[%s17496_s3 + $0x20] sm:$0xff] }
 0x41c   : > { %v7509_v61 = vadd.s32 4294967295, %v7418_v46  ;;  %7866 = vmatpush.bf16.msra.mxu3 %v13049_v39  ;;  %v7586_v13 = vrot.slane %v7584_v16, 4  ;;  %vm8085_vm15 = vcmp.lt.s32.totalorder %v8069_v43, 8  ;;  %v8124_v63 = vsel %vm16094_vm13, 65537, %v18296_v44  ;;  %v13044_v56 = vld [vmem:[%s17496_s3] sm:$0xff] }
 0x41d   : > { %7336 = vmatpush.bf16.msra.mxu2 %v7266_v6  ;;  %v7592_v6 = vrot.slane %v7590_v57, 5  ;;  %vm8117_vm1 = vmpackc.low %vm8085_vm15, %vm8085_vm15  ;;  %v8126_v19 = vsel %vm8118_vm12, 65537, %v18296_v44  ;;  %v8071_v4 = vadd.s32 1, %v7418_v46  ;;  %v8133_v18 = vshrl.u32 %v8124_v63, 16  ;;  %v7497_v46 = vld [vmem:[#allocation4] sm:$0x8] }
 0x41e   : > { %vm7517_vm2 = vcmp.ge.s32.totalorder %v7509_v61, 0  ;;  %v7587_v0 = vor.u32 %v7586_v13, %v7582_v62  ;;  %v16085_v28 = vsel %vm8117_vm1, 65537, %v18296_v44  ;;  %v8150_v59 = vshrl.u32 %v8126_v19, 16 }
 0x41f   : > { %vm7557_vm10 = vmpackc.low %vm7517_vm2, %vm7517_vm2  ;;  %vm8087_vm14 = vcmp.lt.s32.totalorder %v8071_v4, 8  ;;  %v8153_v55 = vshll.u32 %v8126_v19, 16  ;;  %v8136_v43 = vshll.u32 %v8124_v63, 16  ;;  %v8135_v29 = vrot.slane %v8133_v18, 7 }
 0x420   : > { %v16075_v23 = vsel %vm7557_vm10, 65537, %v18296_v44  ;;  %7867 = vmatpush.bf16.msra.mxu3 %v13048_v25  ;;  %v8152_v61 = vrot.slane %v8150_v59, 7  ;;  %vm8119_vm2 = vmpackc.low %vm8087_vm14, %vm8087_vm14  ;;  %v13065_v59 = vld [vmem:[%s17496_s3 + $0x88] sm:$0xff] }
 0x421   : > { %7337 = vmatpush.bf16.msra.mxu2 %v7265_v1  ;;  %v7596_v1 = vrot.slane %v7594_v14, 4  ;;  %v7600_v31 = vshll.u32 %v16075_v23, 16  ;;  %v8127_v39 = vsel %vm8119_vm2, 65537, %v18296_v44  ;;  %v18309_v14 = vld [vmem:[#allocation18_spill] sm:$0xff] }
 0x422   : > { %7320 = vmatmul.bf16.gmra.mxu1 %v11672_v50  ;;  %v13057_v50 = vld [vmem:[%s17496_s3 + $0x48] sm:$0xff]  ;;  %v8155_v45 = vor.u32 %v8153_v55, %v8152_v61  ;;  %v8162_v25 = vshll.u32 %v8127_v39, 16 }
 0x425   : > { %7338 = vmatpush.bf16.msra.mxu2 %v7264_v47  ;;  %v7571_v47 = vshll.u32 %v7562_v8, 16  ;;  %v7498_v8 = vld [vmem:[#allocation4 + $0x4] sm:$0xf] }
 0x427   : > { %v7573_v24 = vrot.slane %v7571_v47, 5  ;;  %v8144_v47 = vshll.u32 %v16085_v28, 16 }
 0x429   : > { %7339 = vmatpush.bf16.msra.mxu2 %v7263_v5  ;;  %v13061_v5 = vld [vmem:[%s17496_s3 + $0x68] sm:$0xff]  ;;  %v7577_v37 = vor.u32 %v7576_v60, %v7573_v24  ;;  %v7650_v15 = vunpack.c.h.b16 %v7573_v24  ;;  %v18307_v60 = vld [vmem:[#allocation14_spill] sm:$0xff] }
 0x42a   : > { %8016 = vmatpush.bf16.msrb.mxu1 %v13061_v5  ;;  %v13056_v5 = vld [vmem:[%s17496_s3 + $0x40] sm:$0xff]  ;;  %vm18308_vm10 = vnez %v18307_v60  ;;  %v13098_v60 = vld [vmem:[%s17496_s3 + $0x170] sm:$0xff] }
 0x42b   : > { %vm7654_vm6 = vcmp.ne.s32.totalorder %v7650_v15, %v18302_v22 }
 0x42d   : > { %7340 = vmatpush.bf16.msra.mxu2 %v15968_v36  ;;  %v13041_v36 = vld [vmem:[%s17498_s5 + $0x24] sm:$0xf0] }
 0x42e   : > { %8017 = vmatpush.bf16.msrb.mxu1 %v13060_v26 }
 0x431   : > { %7341 = vmatpush.bf16.msra.mxu2 %v15960_v53  ;;  %v11680_v53 = vor.u32 %v13041_v36, %v11679_v9  ;;  %v7578_v9 = vrot.slane %v7577_v37, 4  ;;  %v7597_v36 = vor.u32 %v7596_v1, %v7592_v6  ;;  %v13067_v37 = vld [vmem:[%s17496_s3 + $0x98] sm:$0xff]  ;;  %v8139_v1 = vrot.slane %v8135_v29, 4 }
 0x432   : > { %8018 = vmatpush.bf16.msrb.mxu1 %v13059_v33  ;;  %v18305_v33 = vmov 0 }
 0x433   : > { %7325 = vmatmul.bf16.gmra.mxu1 %v11680_v53  ;;  %v7588_v53 = vrot.slane %v7587_v0, 4 }
 0x435   : > { %7342 = vmatpush.bf16.msra.mxu2 %v15951_v41  ;;  %v13038_v41 = vld [vmem:[%s17498_s5 + $0x14] sm:$0xf] }
 0x436   : > { %v11676_v35 = vor.u32 %v13038_v41, %v11673_v48  ;;  %8019 = vmatpush.bf16.msrb.mxu1 %v13058_v30  ;;  %v13047_v48 = vld [vmem:[%s17496_s3 + $0x18] sm:$0xff]  ;;  %v8159_v30 = vshrl.u32 %v8127_v39, 16 }
 0x437   : > { %7868 = vmatpush.bf16.msra.mxu3 %v13047_v48  ;;  %v13066_v48 = vld [vmem:[%s17496_s3 + $0x90] sm:$0xff] }
 0x438   : > { %v16165_v13 = vrot.slane %v8159_v30, 7 }
 0x439   : > { %7343 = vmatpush.bf16.msra.mxu2 %v15936_v3  ;;  %v11688_v3 = vor.u32 %v13043_v34, %v11687_v21  ;;  %v18299_v21 = vld [vmem:[#allocation17_spill] sm:$0xff] }
 0x43a   : > { %8020 = vmatpush.bf16.msrb.mxu1 %v13057_v50  ;;  %vm18300_vm7 = vnez %v18299_v21 }
 0x43b   : > { %v7583_v34 = vsel %vm18300_vm7, %v7578_v9, %v7582_v62  ;;  %v16109_v40 = vsel %vm18300_vm7, %v7588_v53, %v7592_v6  ;;  %7869 = vmatpush.bf16.msra.mxu3 %v13046_v49  ;;  %v7425_v62 = vand.u32 7, %v18309_v14  ;;  %v8138_v6 = vor.u32 %v8136_v43, %v8135_v29 }
 0x43c   : > { %7344 = vmatmul.bf16.vlgmr.msra.gmra.mxu2 %v11668_v12  ;;  %v16090_v12 = vrot.slane %v7600_v31, 5  ;;  %v7656_v38 = vunpack.c.l.b16 %v7583_v34  ;;  %v7657_v54 = vunpack.c.h.b16 %v7583_v34  ;;  %v7664_v63 = vunpack.c.h.b16 %v16109_v40 }
 0x43d   : > { %8411 = vmatpush.bf16.msrb.mxu2 %v13071_v7  ;;  %v8164_v7 = vor.u32 %v8162_v25, %v16165_v13  ;;  %v7510_v41 = vadd.s32 4294967295, %v7425_v62 }
 0x43e   : > { %8021 = vmatpush.bf16.msrb.mxu1 %v13056_v5  ;;  %vm7660_vm8 = vcmp.ne.s32.totalorder %v7656_v38, %v18301_v2  ;;  %vm7661_vm3 = vcmp.ne.s32.totalorder %v7657_v54, %v18302_v22  ;;  %v8203_v38 = vunpack.c.l.b16 %v8138_v6  ;;  %v8204_v54 = vunpack.c.h.b16 %v8138_v6 }
 0x43f   : > { %vm16144_vm11 = vmpackc.low %vm7661_vm3, %vm7660_vm8  ;;  %7870 = vmatpush.bf16.msra.mxu3 %v13045_v52  ;;  %vm7518_vm15 = vcmp.ge.s32.totalorder %v7510_v41, 0  ;;  %v7663_v5 = vunpack.c.l.b16 %v16109_v40  ;;  %v18324_v6 = vmov 0 }
 0x440   : > { %v18306_v33 = vsel %vm16144_vm11, 4294967295, %v18305_v33  ;;  %vm7558_vm1 = vmpackc.low %vm7518_vm15, %vm7518_vm15  ;;  %vm16202_vm8 = vcmp.ne.s32.totalorder %v8204_v54, %v18302_v22  ;;  %vm16224_vm15 = vcmp.ne.s32.totalorder %v7664_v63, %v18302_v22 }
 0x441   : > { %8412 = vmatpush.bf16.msrb.mxu2 %v13070_v10  ;;  %vm16219_vm2 = vcmp.ne.s32.totalorder %v7663_v5, %v18301_v2 }
 0x443   : > { %7330 = vmatmul.bf16.gmra.mxu1 %v11688_v3  ;;  %v8141_v3 = vshrl.u32 %v16085_v28, 16  ;;  %7871 = vmatpush.bf16.msra.mxu3 %v13044_v56  ;;  %v8157_v28 = vrot.slane %v8152_v61, 4 }
 0x445   : > { %v8143_v26 = vrot.slane %v8141_v3, 7  ;;  %8413 = vmatpush.bf16.msrb.mxu2 %v13069_v58  ;;  %v16177_v34 = vsel %vm18308_vm10, %v8157_v28, %v8164_v7  ;;  %v8072_v3 = vadd.s32 1, %v7425_v62  ;;  %v18311_v58 = vld [vmem:[#allocation20_spill] sm:$0xff] }
 0x446   : > { %v7439_v4 = vand.u32 7, %v18311_v58 }
 0x447   : > { %v8148_v20 = vrot.slane %v8143_v26, 4  ;;  %v8146_v31 = vor.u32 %v8144_v47, %v8143_v26  ;;  %vm8088_vm0 = vcmp.lt.s32.totalorder %v8072_v3, 8 }
 0x448   : > { %vm8120_vm12 = vmpackc.low %vm8088_vm0, %vm8088_vm0 }
 0x449   : > { %8414 = vmatpush.bf16.msrb.mxu2 %v13068_v11  ;;  %v16162_v57 = vsel %vm18308_vm10, %v8148_v20, %v8155_v45  ;;  %v16182_v10 = vsel %vm18308_vm10, %v8139_v1, %v8146_v31  ;;  %v8128_v43 = vsel %vm8120_vm12, 65537, %v18296_v44  ;;  %v18326_v31 = vld [vmem:[#allocation19_spill] sm:$0xff] }
 0x44a   : > { %v8210_v40 = vunpack.c.l.b16 %v16182_v10  ;;  %v8168_v14 = vshrl.u32 %v8128_v43, 16  ;;  %v8211_v1 = vunpack.c.h.b16 %v16182_v10  ;;  %v8171_v10 = vshll.u32 %v8128_v43, 16 }
 0x44c   : > { %7349 = vmatmul.bf16.gmra.mxu2 %v11676_v35  ;;  %v7598_v35 = vrot.slane %v7597_v36, 4  ;;  %v18310_v36 = vld [vmem:[#allocation16_spill] sm:$0xff]  ;;  %vm16260_vm12 = vcmp.ne.s32.totalorder %v8210_v40, %v18301_v2  ;;  %v16268_v3 = vrot.slane %v8168_v14, 7  ;;  %v8074_v14 = vadd.s32 1, %v7439_v4 }
 0x44d   : > { %8415 = vmatpush.bf16.msrb.mxu2 %v13067_v37  ;;  %v7432_v53 = vand.u32 7, %v18310_v36  ;;  %v8059_v37 = vld [vmem:[#allocation4 + $0x4] sm:$0xf] }
 0x44e   : > { %v16116_v17 = vsel %vm18300_vm7, %v7598_v35, %v16090_v12  ;;  %v7604_v35 = vshrl.u32 %v16075_v23, 16  ;;  %v7566_v23 = vsel %vm7558_vm1, 65537, %v18296_v44 }
 0x44f   : > { %v7610_v49 = vshll.u32 %v7566_v23, 16  ;;  %v7614_v26 = vshrl.u32 %v7566_v23, 16  ;;  %v7670_v52 = vunpack.c.l.b16 %v16116_v17  ;;  %v7671_v20 = vunpack.c.h.b16 %v16116_v17 }
 0x450   : > { %v7606_v19 = vrot.slane %v7604_v35, 4  ;;  %v8073_v61 = vadd.s32 1, %v7432_v53 }
 0x451   : > { %8416 = vmatpush.bf16.msrb.mxu2 %v13066_v48  ;;  %v7612_v39 = vrot.slane %v7610_v49, 5  ;;  %v7616_v29 = vrot.slane %v7614_v26, 4  ;;  %vm16232_vm1 = vcmp.ne.s32.totalorder %v7670_v52, %v18301_v2  ;;  %v8224_v52 = vunpack.c.l.b16 %v16177_v34 }
 0x452   : > { %vm8089_vm3 = vcmp.lt.s32.totalorder %v8073_v61, 8  ;;  %v7607_v30 = vor.u32 %v7606_v19, %v16090_v12  ;;  %v13064_v12 = vld [vmem:[%s17496_s3 + $0x80] sm:$0xff]  ;;  %v8218_v19 = vunpack.c.h.b16 %v16162_v57  ;;  %v18337_v61 = vmov 0 }
 0x453   : > { %vm16212_vm14 = vmpackc.low %vm8089_vm3, %vm8089_vm3  ;;  %v7617_v28 = vor.u32 %v7616_v29, %v7612_v39 }
 0x454   : > { %v7608_v41 = vrot.slane %v7607_v30, 4 }
 0x455   : > { %8417 = vmatpush.bf16.msrb.mxu2 %v13065_v59  ;;  %v7618_v49 = vrot.slane %v7617_v28, 4 }
 0x456   : > { %v16301_v40 = vsel %vm18300_vm7, %v7608_v41, %v7612_v39 }
 0x459   : > { %8418 = vmatpush.bf16.msrb.mxu2 %v13064_v12 }
 0x45c   : > { %7354 = vmatmul.bf16.gmra.mxu2 %v11684_v42  ;;  %v7649_v42 = vunpack.c.l.b16 %v7573_v24  ;;  %v7713_v24 = vsel %vm16144_vm11, %v7498_v8, 0  ;;  %v8173_v8 = vor.u32 %v8171_v10, %v16268_v3 }
 0x45d   : > { %v7755_v50 = vunpack.c.l.b16 %v7713_v24 }
 0x45e   : > { %vm7653_vm9 = vcmp.ne.s32.totalorder %v7649_v42, %v18301_v2  ;;  %v7511_v42 = vadd.s32 4294967295, %v7432_v53 }
 0x45f   : > { %vm16137_vm5 = vmpackc.low %vm7654_vm6, %vm7653_vm9  ;;  %vm16197_vm6 = vcmp.ne.s32.totalorder %v8203_v38, %v18301_v2  ;;  %v8217_v38 = vunpack.c.l.b16 %v16162_v57 }
 0x460   : > { %v18304_v51 = vsel %vm16137_vm5, 4294967295, %v18303_v51  ;;  %v7712_v16 = vsel %vm16137_vm5, %v7497_v46, 0  ;;  %vm7519_vm13 = vcmp.ge.s32.totalorder %v7511_v42, 0  ;;  %vm16240_vm0 = vmpackc.low %vm16202_vm8, %vm16197_vm6  ;;  %v18331_v42 = vmov 0 }
 0x461   : > { %v7754_v0 = vunpack.c.l.b16 %v7712_v16  ;;  %vm7559_vm9 = vmpackc.low %vm7519_vm13, %vm7519_vm13  ;;  %v7512_v16 = vadd.s32 4294967295, %v7439_v4  ;;  %v18325_v6 = vsel %vm16240_vm0, 4294967295, %v18324_v6  ;;  %vm16247_vm13 = vcmp.ne.s32.totalorder %v7671_v20, %v18302_v22 }
 0x462   : > { %v16209_v45 = vsel %vm7559_vm9, 65537, %v18296_v44  ;;  %v8266_v35 = vsel %vm16240_vm0, %v8059_v37, 0  ;;  %vm16274_vm6 = vmpackc.low %vm16224_vm15, %vm16219_vm2  ;;  %vm16279_vm8 = vcmp.ne.s32.totalorder %v8211_v1, %v18302_v22  ;;  %v8166_v46 = vrot.slane %v16165_v13, 4 }
 0x463   : > { %v7763_v15 = vpack.c.b16 %v7755_v50, %v7754_v0  ;;  %v7446_v0 = vand.u32 7, %v18326_v31  ;;  %v7620_v7 = vshll.u32 %v16209_v45, 16  ;;  %vm7520_vm9 = vcmp.ge.s32.totalorder %v7512_v16, 0  ;;  %vm16309_vm2 = vmpackc.low %vm16279_vm8, %vm16260_vm12  ;;  %v13091_v50 = vld [vmem:[%s17496_s3 + $0x138] sm:$0xff] }
 0x464   : > { %v18332_v42 = vsel %vm16274_vm6, 4294967295, %v18331_v42  ;;  %vm7560_vm3 = vmpackc.low %vm7520_vm9, %vm7520_vm9  ;;  %v8309_v20 = vunpack.c.l.b16 %v8266_v35  ;;  %v18338_v61 = vsel %vm16309_vm2, 4294967295, %v18337_v61  ;;  %vm16317_vm15 = vcmp.ne.s32.totalorder %v8217_v38, %v18301_v2  ;;  %8768 = vmatpush.bf16.msra.mxu1 %v13091_v50  ;;  %v13088_v35 = vld [vmem:[%s17496_s3 + $0x120] sm:$0xff] }
 0x465   : > { %v7769_v55 = vshrl.u32 %v7763_v15, 16  ;;  %v7772_v24 = vshll.u32 %v7763_v15, 16  ;;  %v7513_v5 = vadd.s32 4294967295, %v7446_v0  ;;  %v16288_v26 = vrot.slane %v7620_v7, 5 }
 0x466   : > { %v7568_v39 = vsel %vm7560_vm3, 65537, %v18296_v44  ;;  %v7677_v16 = vunpack.c.l.b16 %v16301_v40  ;;  %vm16340_vm12 = vcmp.ne.s32.totalorder %v8224_v52, %v18301_v2  ;;  %v7678_v7 = vunpack.c.h.b16 %v16301_v40 }
 0x467   : > { %v16257_v36 = vrot.slane %v7769_v55, 3  ;;  %v16264_v48 = vrot.slane %v7772_v24, 4  ;;  %v7624_v55 = vshrl.u32 %v16209_v45, 16  ;;  %v8225_v45 = vunpack.c.h.b16 %v16177_v34 }
 0x468   : > { %v7623_v56 = vsel %vm18300_vm7, %v7618_v49, %v16288_v26  ;;  %v7630_v37 = vshll.u32 %v7568_v39, 16  ;;  %v7634_v1 = vshrl.u32 %v7568_v39, 16  ;;  %v16354_v53 = vsel %vm18308_vm10, %v8166_v46, %v8173_v8 }
 0x469   : > { %v7775_v57 = vor.u32 %v16264_v48, %v16257_v36  ;;  %v8175_v4 = vrot.slane %v16268_v3, 4  ;;  %v7626_v10 = vrot.slane %v7624_v55, 4  ;;  %v8075_v15 = vadd.s32 1, %v7446_v0  ;;  %v13090_v55 = vld [vmem:[%s17496_s3 + $0x130] sm:$0xff] }
 0x46a   : > { %vm8090_vm8 = vcmp.lt.s32.totalorder %v8074_v14, 8  ;;  %v16369_v52 = vrot.slane %v7630_v37, 5  ;;  %v7636_v40 = vrot.slane %v7634_v1, 4  ;;  %v7685_v46 = vunpack.c.h.b16 %v7623_v56  ;;  %8769 = vmatpush.bf16.msra.mxu1 %v13090_v55 }
 0x46b   : > { %vm16381_vm3 = vmpackc.low %vm8090_vm8, %vm8090_vm8  ;;  %vm16387_vm4 = vcmp.ne.s32.totalorder %v8225_v45, %v18302_v22  ;;  %v8231_v14 = vunpack.c.l.b16 %v16354_v53  ;;  %v8232_v1 = vunpack.c.h.b16 %v16354_v53  ;;  %v18368_v53 = vmov 0 }
 0x46c   : > { %7359 = vmatmul.bf16.gmra.mxu2 %v11692_v32 }
 0x48f   : > { %v16111_v32 = vpop.f32.mrf.mxu1 }
 0x497   : > { %v7318_v27 = vpop.f32.mrf.mxu1 }
 0x49f   : > { %v16188_v18 = vpop.f32.mrf.mxu1 }
 0x4a7   : > { %v7323_v23 = vpop.f32.mrf.mxu1 }
 0x4b0   : > { %v16367_v49 = vpop.f32.mrf.mxu1 }
 0x4bf   : > { %v7345_v9 = vpop.f32.mrf.mxu2 }
 0x4c0   : > { %v7346_v11 = vadd.f32 %v7345_v9, %v16111_v32  ;;  %v16255_v9 = vsel %vm16212_vm14, 65537, %v18296_v44  ;;  %vm16294_vm14 = vmpackc.low %vm16247_vm13, %vm16232_vm1  ;;  %vm7521_vm1 = vcmp.ge.s32.totalorder %v7513_v5, 0  ;;  %vm16326_vm13 = vcmp.ne.s32.totalorder %v8218_v19, %v18302_v22 }
 0x4c1   : > { %v8177_v54 = vshrl.u32 %v16255_v9, 16  ;;  %vm16359_vm9 = vmpackc.low %vm7521_vm1, %vm7521_vm1  ;;  %vm8091_vm1 = vcmp.lt.s32.totalorder %v8075_v15, 8 }
 0x4c2   : > { %vm16403_vm8 = vmpackc.low %vm8091_vm1, %vm8091_vm1 }
 0x4c3   : > { %vm16413_vm0 = vmpackc.low %vm16326_vm13, %vm16317_vm15  ;;  %vm16434_vm13 = vcmp.ne.s32.totalorder %v7685_v46, %v18302_v22 }
 0x4c4   : > { %vm16448_vm1 = vmpackc.low %vm16387_vm4, %vm16340_vm12 }
 0x4c7   : > { %v7347_v17 = vpop.f32.mrf.mxu2 }
 0x4c8   : > { %v7348_v47 = vadd.f32 %v7347_v17, %v7318_v27  ;;  %v8180_v17 = vshll.u32 %v16255_v9, 16  ;;  %v7684_v9 = vunpack.c.l.b16 %v7623_v56  ;;  %v18357_v56 = vmov 0 }
 0x4c9   : > { %v18358_v56 = vsel %vm16413_vm0, 4294967295, %v18357_v56 }
 0x4ca   : > { %v13260_v62 = vpack.c.bf16 %v7348_v47, %v7346_v11  ;;  %v16321_v11 = vrot.slane %v8177_v54, 7  ;;  %vm16429_vm15 = vcmp.ne.s32.totalorder %v7684_v9, %v18301_v2 }
 0x4cb   : > { %vm16477_vm12 = vmpackc.low %vm16434_vm13, %vm16429_vm15 }
 0x4cc   : > { %13277 = vst [vmem:[#allocation4 + $0x8] sm:$0xff] %v13260_v62   ;;  %v8182_v19 = vor.u32 %v8180_v17, %v16321_v11  ;;  %v7627_v17 = vor.u32 %v7626_v10, %v16288_v26  ;;  %v18369_v53 = vsel %vm16477_vm12, 4294967295, %v18368_v53 }
 0x4ce   : > { %v8183_v26 = vsel %vm18308_vm10, %v8175_v4, %v8182_v19  ;;  %v7628_v50 = vrot.slane %v7627_v17, 4  ;;  %v8184_v4 = vrot.slane %v16321_v11, 4  ;;  %v7328_v19 = vpop.f32.mrf.mxu1  ;;  %v9377_v17 = vld [vmem:[#allocation4 + $0x2c] sm:$0x1] }
 0x4cf   : > { %v7350_v63 = vpop.f32.mrf.mxu2  ;;  %v8239_v24 = vunpack.c.h.b16 %v8183_v26 }
 0x4d0   : > { %v7351_v38 = vadd.f32 %v7350_v63, %v16188_v18  ;;  %v16379_v18 = vsel %vm16359_vm9, 65537, %v18296_v44  ;;  %vm16397_vm9 = vcmp.ne.s32.totalorder %v7678_v7, %v18302_v22  ;;  %v7633_v46 = vsel %vm18300_vm7, %v7628_v50, %v16369_v52 }
 0x4d1   : > { %vm16515_vm15 = vcmp.ne.s32.totalorder %v8239_v24, %v18302_v22 }
 0x4d3   : > { %v7499_v29 = vld [vmem:[#allocation4 + $0x8] sm:$0xf]  ;;  %v7500_v47 = vld [vmem:[#allocation4 + $0xc] sm:$0xf] }
 0x4d4   : > { %v8060_v30 = vld [vmem:[#allocation4 + $0x8] sm:$0xf]  ;;  %v7714_v32 = vsel %vm16274_vm6, %v7499_v29, 0  ;;  %v7715_v27 = vsel %vm16294_vm14, %v7500_v47, 0  ;;  %v8061_v45 = vld [vmem:[#allocation4 + $0xc] sm:$0xf] }
 0x4d5   : > { %v8267_v34 = vsel %vm16309_vm2, %v8060_v30, 0  ;;  %v13052_v12 = vld [vmem:[#allocation4 + $0x4] sm:$0xff]  ;;  %v7756_v62 = vunpack.c.l.b16 %v7714_v32  ;;  %v7757_v25 = vunpack.c.l.b16 %v7715_v27  ;;  %vm16392_vm2 = vcmp.ne.s32.totalorder %v7677_v16, %v18301_v2 }
 0x4d6   : > { %v8310_v28 = vunpack.c.l.b16 %v8267_v34  ;;  %8022 = vmatmul.bf16.vlgmr.msrb.gmra.mxu1 %v13052_v12  ;;  %v7637_v16 = vor.u32 %v7636_v40, %v16369_v52  ;;  %v7640_v32 = vshll.u32 %v16379_v18, 16  ;;  %v16422_v27 = vsel %vm16381_vm3, 65537, %v18296_v44  ;;  %v13089_v34 = vld [vmem:[%s17496_s3 + $0x128] sm:$0xff]  ;;  %vm16464_vm4 = vmpackc.low %vm16397_vm9, %vm16392_vm2 }
 0x4d7   : > { %v7352_v41 = vpop.f32.mrf.mxu2  ;;  %v7764_v58 = vpack.c.b16 %v7757_v25, %v7756_v62  ;;  %vm18363_vm3 = vsmask.f32 4352  ;;  %8770 = vmatpush.bf16.msra.mxu1 %v13089_v34  ;;  %v8268_v36 = vsel %vm16413_vm0, %v8061_v45, 0  ;;  %v8186_v7 = vshrl.u32 %v16422_v27, 16  ;;  %v13078_v45 = vld [vmem:[%s17496_s3 + $0xf0] sm:$0xff] }
 0x4d8   : > { %v7353_v54 = vadd.f32 %v7352_v41, %v7323_v23  ;;  %v16374_v0 = vpack.c.b16 %v8310_v28, %v8309_v20  ;;  %v16456_v28 = vsel %vm16403_vm8, 65537, %v18296_v44  ;;  %v13079_v44 = vld [vmem:[%s17496_s3 + $0xf8] sm:$0xff]  ;;  %v7638_v41 = vrot.slane %v7637_v16, 4 }
 0x4d9   : > { %v7777_v3 = vshrl.u32 %v7764_v58, 16  ;;  %v7780_v5 = vshll.u32 %v7764_v58, 16  ;;  %v16481_v58 = vrot.slane %v7640_v32, 5  ;;  %8618 = vmatpush.bf16.msrb.mxu3 %v13079_v44  ;;  %v8189_v15 = vshll.u32 %v16422_v27, 16  ;;  %v13087_v16 = vld [vmem:[%s17496_s3 + $0x118] sm:$0xff]  ;;  %v13077_v44 = vld [vmem:[%s17496_s3 + $0xe8] sm:$0xff] }
 0x4da   : > { %v13265_v31 = vpack.c.bf16 %v7353_v54, %v7351_v38  ;;  %v8326_v43 = vshll.u32 %v16374_v0, 16  ;;  %v8324_v9 = vshrl.u32 %v16374_v0, 16  ;;  %v8195_v38 = vshrl.u32 %v16456_v28, 16 }
 0x4db   : > { %v7779_v23 = vrot.slane %v7777_v3, 3  ;;  %v7782_v8 = vrot.slane %v7780_v5, 4  ;;  %v7644_v54 = vshrl.u32 %v16379_v18, 16  ;;  %v8311_v5 = vunpack.c.l.b16 %v8268_v36  ;;  %8771 = vmatpush.bf16.msra.mxu1 %v13088_v35 }
 0x4dc   : > { %13278 = vst [vmem:[#allocation4 + $0x10] sm:$0xff] %v13265_v31   ;;  %v8328_v10 = vrot.slane %v8326_v43, 1  ;;  %vm16491_vm2 = vcmp.ne.s32.totalorder %v8231_v14, %v18301_v2  ;;  %vm16496_vm9 = vcmp.ne.s32.totalorder %v8232_v1, %v18302_v22  ;;  %v16519_v20 = vrot.slane %v8186_v7, 7  ;;  %v8458_v1 = vld [vmem:[#allocation4 + $0xc] sm:$0xf]  ;;  %v13099_v31 = vld [vmem:[%s17496_s3 + $0x178] sm:$0xff] }
 0x4dd   : > { %v16407_v30 = vor.u32 %v7782_v8, %v7779_v23  ;;  %v7643_v47 = vsel %vm18300_vm7, %v7638_v41, %v16481_v58  ;;  %v7691_v27 = vunpack.c.l.b16 %v7633_v46  ;;  %v7692_v34 = vunpack.c.h.b16 %v7633_v46  ;;  %8619 = vmatpush.bf16.msrb.mxu3 %v13078_v45  ;;  %8967 = vmatpush.bf16.msra.mxu2 %v13099_v31  ;;  %v13075_v8 = vld [vmem:[%s17496_s3 + $0xd8] sm:$0xff]  ;;  %v13097_v46 = vld [vmem:[%s17496_s3 + $0x168] sm:$0xff] }
 0x4de   : > { %v8329_v32 = vor.u32 %v8328_v10, %v8324_v9  ;;  %v7646_v43 = vrot.slane %v7644_v54, 4  ;;  %v8198_v21 = vshll.u32 %v16456_v28, 16  ;;  %v8191_v24 = vor.u32 %v8189_v15, %v16519_v20  ;;  %v13086_v28 = vld [vmem:[%s17496_s3 + $0x110] sm:$0xff]  ;;  %v8456_v15 = vld [vmem:[#allocation4 + $0x4] sm:$0x8] }
 0x4df   : > { %v7355_v62 = vpop.f32.mrf.mxu2  ;;  %v7784_v25 = vsel %vm18363_vm3, %v7775_v57, %v16407_v30  ;;  %v8238_v57 = vunpack.c.l.b16 %v8183_v26  ;;  %8772 = vmatpush.bf16.msra.mxu1 %v13087_v16  ;;  %v7699_v35 = vunpack.c.h.b16 %v7643_v47  ;;  %v8467_v54 = vsel %vm16274_vm6, %v8458_v1, 0  ;;  %vm16580_vm6 = vmpackc.low %vm16496_vm9, %vm16491_vm2 }
 0x4e0   : > { %7872 = vmatmul.bf16.vlgmr.msra.gmra.mxu3 %v7784_v25  ;;  %v16532_v25 = vrot.slane %v8195_v38, 7  ;;  %v7356_v50 = vadd.f32 %v7355_v62, %v16367_v49  ;;  %v8193_v49 = vrot.slane %v16519_v20, 4  ;;  %v7647_v62 = vor.u32 %v7646_v43, %v16481_v58  ;;  %v16572_v20 = vpop.f32.mrf.mxu1 }
 0x4e1   : > { %vm16510_vm8 = vcmp.ne.s32.totalorder %v8238_v57, %v18301_v2  ;;  %v7698_v57 = vunpack.c.l.b16 %v7643_v47  ;;  %8620 = vmatpush.bf16.msrb.mxu3 %v13077_v44  ;;  %vm16552_vm7 = vcmp.ne.s32.totalorder %v7691_v27, %v18301_v2  ;;  %vm16557_vm13 = vcmp.ne.s32.totalorder %v7692_v34, %v18302_v22  ;;  %8968 = vmatpush.bf16.msra.mxu2 %v13098_v60 }
 0x4e2   : > { %vm18382_vm3 = vsmask.f32 7424  ;;  %v8510_v45 = vunpack.c.l.b16 %v8467_v54  ;;  %vm18389_vm2 = vsmask.f32 4352  ;;  %vm16608_vm9 = vmpackc.low %vm16515_vm15, %vm16510_vm8  ;;  %v16614_v1 = vrot.slane %v7647_v62, 4 }
 0x4e3   : > { %v8062_v3 = vld [vmem:[#allocation4 + $0x10] sm:$0xf]  ;;  %v7502_v55 = vld [vmem:[#allocation4 + $0x14] sm:$0xf]  ;;  %8773 = vmatpush.bf16.msra.mxu1 %v13086_v28 }
 0x4e4   : > { %v7501_v40 = vld [vmem:[#allocation4 + $0x10] sm:$0xf]  ;;  %v8269_v18 = vsel %vm16448_vm1, %v8062_v3, 0  ;;  %v7717_v23 = vsel %vm16477_vm12, %v7502_v55, 0  ;;  %v8457_v55 = vld [vmem:[#allocation4 + $0x8] sm:$0xf]  ;;  %vm16585_vm12 = vcmp.ne.s32.totalorder %v7698_v57, %v18301_v2  ;;  %v7706_v31 = vunpack.c.h.b16 %v16614_v1 }
 0x4e5   : > { %v7716_v63 = vsel %vm16464_vm4, %v7501_v40, 0  ;;  %v13053_v52 = vld [vmem:[#allocation4 + $0xc] sm:$0xff]  ;;  %v8312_v39 = vunpack.c.l.b16 %v8269_v18  ;;  %v7759_v26 = vunpack.c.l.b16 %v7717_v23  ;;  %v8200_v40 = vor.u32 %v8198_v21, %v16532_v25  ;;  %v8816_v27 = vld [vmem:[#allocation4 + $0x14] sm:$0xf]  ;;  %8969 = vmatpush.bf16.msra.mxu2 %v13097_v46 }
 0x4e6   : > { %v7758_v29 = vunpack.c.l.b16 %v7716_v63  ;;  %8027 = vmatmul.bf16.gmra.mxu1 %v13053_v52  ;;  %v8459_v10 = vld [vmem:[#allocation4 + $0x10] sm:$0xf]  ;;  %v8192_v18 = vsel %vm18308_vm10, %v8184_v4, %v8191_v24  ;;  %v13076_v63 = vld [vmem:[%s17496_s3 + $0xe0] sm:$0xff]  ;;  %v8466_v0 = vsel %vm16144_vm11, %v8457_v55, 0  ;;  %v8825_v44 = vsel %vm16448_vm1, %v8816_v27, 0 }
 0x4e7   : > { %v7357_v13 = vpop.f32.mrf.mxu2  ;;  %v16530_v12 = vpack.c.b16 %v8312_v39, %v8311_v5  ;;  %v8468_v23 = vsel %vm16294_vm14, %v8459_v10, 0  ;;  %v8245_v21 = vunpack.c.l.b16 %v8192_v18  ;;  %8621 = vmatpush.bf16.msrb.mxu3 %v13076_v63  ;;  %v8868_v58 = vunpack.c.l.b16 %v8825_v44 }
 0x4e8   : > { %v7765_v14 = vpack.c.b16 %v7759_v26, %v7758_v29  ;;  %v7358_v36 = vadd.f32 %v7357_v13, %v7328_v19  ;;  %v8063_v29 = vld [vmem:[#allocation4 + $0x14] sm:$0xf]  ;;  %v8465_v26 = vsel %vm16137_vm5, %v8456_v15, 0  ;;  %v8511_v16 = vunpack.c.l.b16 %v8468_v23 }
 0x4e9   : > { %v8331_v7 = vshll.u32 %v16530_v12, 16  ;;  %v7705_v15 = vunpack.c.l.b16 %v16614_v1  ;;  %v8335_v4 = vshrl.u32 %v16530_v12, 16  ;;  %v8202_v27 = vrot.slane %v16532_v25, 4  ;;  %v13073_v1 = vld [vmem:[%s17496_s3 + $0xc8] sm:$0xff] }
 0x4ea   : > { %v7786_v9 = vshrl.u32 %v7765_v14, 16  ;;  %v7789_v41 = vshll.u32 %v7765_v14, 16  ;;  %v13270_v38 = vpack.c.bf16 %v7358_v36, %v7356_v50  ;;  %v8201_v14 = vsel %vm18308_vm10, %v8193_v49, %v8200_v40 }
 0x4eb   : > { %v16548_v19 = vrot.slane %v8331_v7, 1  ;;  %v8270_v50 = vsel %vm16580_vm6, %v8063_v29, 0  ;;  %v8246_v36 = vunpack.c.h.b16 %v8192_v18  ;;  %v16640_v57 = vpack.c.b16 %v8511_v16, %v8510_v45  ;;  %8622 = vmatpush.bf16.msrb.mxu3 %v13075_v8  ;;  %v13074_v29 = vld [vmem:[%s17496_s3 + $0xd0] sm:$0xff]  ;;  %v8460_v8 = vld [vmem:[#allocation4 + $0x14] sm:$0xf] }
 0x4ec   : > { %v7788_v3 = vrot.slane %v7786_v9, 3  ;;  %v7791_v5 = vrot.slane %v7789_v41, 4  ;;  %13279 = vst [vmem:[#allocation4 + $0x18] sm:$0xff] %v13270_v38   ;;  %v8252_v7 = vunpack.c.l.b16 %v8201_v14  ;;  %v8253_v9 = vunpack.c.h.b16 %v8201_v14 }
 0x4ed   : > { %v8334_v52 = vsel %vm18382_vm3, %v8329_v32, %v16548_v19  ;;  %vm16592_vm3 = vcmp.ne.s32.totalorder %v7699_v35, %v18302_v22  ;;  %v8815_v32 = vld [vmem:[#allocation4 + $0x10] sm:$0xf]  ;;  %v8508_v41 = vunpack.c.l.b16 %v8465_v26  ;;  %v8509_v35 = vunpack.c.l.b16 %v8466_v0  ;;  %v7333_v0 = vpop.f32.mrf.mxu1 }
 0x4ee   : > { %v16574_v39 = vor.u32 %v7791_v5, %v7788_v3  ;;  %8419 = vmatmul.bf16.vlgmr.msrb.gmra.mxu2 %v8334_v52  ;;  %vm16636_vm10 = vmpackc.low %vm16592_vm3, %vm16585_vm12  ;;  %v8824_v24 = vsel %vm16413_vm0, %v8815_v32, 0  ;;  %v8313_v10 = vunpack.c.l.b16 %v8270_v50  ;;  %vm16647_vm12 = vcmp.ne.s32.totalorder %v8245_v21, %v18301_v2  ;;  %v13096_v21 = vld [vmem:[%s17496_s3 + $0x160] sm:$0xff]  ;;  %v13085_v26 = vld [vmem:[%s17496_s3 + $0x108] sm:$0xff] }
 0x4ef   : > { %v7360_v34 = vpop.f32.mrf.mxu2  ;;  %v8867_v54 = vunpack.c.l.b16 %v8824_v24  ;;  %vm16662_vm8 = vcmp.ne.s32.totalorder %v8246_v36, %v18302_v22  ;;  %vm16671_vm15 = vcmp.ne.s32.totalorder %v8252_v7, %v18301_v2  ;;  %8623 = vmatpush.bf16.msrb.mxu3 %v13074_v29  ;;  %v16696_v50 = vpack.c.b16 %v8509_v35, %v8508_v41  ;;  %8970 = vmatpush.bf16.msra.mxu2 %v13096_v21 }
 0x4f0   : > { %v7793_v43 = vsel %vm18389_vm2, %v16407_v30, %v16574_v39  ;;  %vm16622_vm2 = vmpackc.low %vm16557_vm13, %vm16552_vm7  ;;  %vm16676_vm7 = vcmp.ne.s32.totalorder %v8253_v9, %v18302_v22  ;;  %vm16684_vm13 = vcmp.ne.s32.totalorder %v7705_v15, %v18301_v2  ;;  %v8337_v25 = vor.u32 %v8335_v4, %v16548_v19  ;;  %8774 = vmatpush.bf16.msra.mxu1 %v13085_v26 }
 0x4f1   : > { %7877 = vmatmul.bf16.gmra.mxu3 %v7793_v43  ;;  %v7361_v43 = vadd.f32 %v7360_v34, %v16572_v20  ;;  %v16698_v60 = vpack.c.b16 %v8868_v58, %v8867_v54  ;;  %vm16703_vm3 = vcmp.ne.s32.totalorder %v7706_v31, %v18302_v22  ;;  %v8531_v9 = vshrl.u32 %v16640_v57, 16  ;;  %vm16728_vm0 = vmpackc.low %vm16662_vm8, %vm16647_vm12 }
 0x4f2   : > { %v8534_v41 = vshll.u32 %v16640_v57, 16  ;;  %v8469_v19 = vsel %vm16464_vm4, %v8460_v8, 0  ;;  %v16711_v15 = vunpack.c.l.b16 %v8202_v27  ;;  %v16713_v54 = vunpack.c.h.b16 %v8202_v27  ;;  %vm16746_vm12 = vmpackc.low %vm16676_vm7, %vm16671_vm15 }
 0x4f3   : > { %v8064_v28 = vld [vmem:[#allocation4 + $0x18] sm:$0xf]  ;;  %v7504_v49 = vld [vmem:[#allocation4 + $0x1c] sm:$0xf]  ;;  %8624 = vmatpush.bf16.msrb.mxu3 %v13073_v1  ;;  %v8887_v57 = vshll.u32 %v16698_v60, 16  ;;  %vm18408_vm11 = vnez %v18369_v53  ;;  %v8533_v29 = vrot.slane %v8531_v9, 3  ;;  %vm16762_vm8 = vmpackc.low %vm16703_vm3, %vm16684_vm13  ;;  %vm18419_vm3 = vnez %v18332_v42 }
 0x4f4   : > { %v7503_v38 = vld [vmem:[#allocation4 + $0x18] sm:$0xf]  ;;  %v8271_v3 = vsel %vm16608_vm9, %v8064_v28, 0  ;;  %v7719_v40 = vsel %vm16636_vm10, %v7504_v49, 0  ;;  %v8818_v49 = vld [vmem:[#allocation4 + $0x1c] sm:$0xf]  ;;  %vm8263_vm15 = vcmp.ne.s32.totalorder %v16711_v15, %v18301_v2  ;;  %vm8264_vm7 = vcmp.ne.s32.totalorder %v16713_v54, %v18302_v22 }
 0x4f5   : > { %v7718_v5 = vsel %vm16622_vm2, %v7503_v38, 0  ;;  %v13054_v55 = vld [vmem:[#allocation4 + $0x14] sm:$0xff]  ;;  %v8314_v18 = vunpack.c.l.b16 %v8271_v3  ;;  %v7761_v23 = vunpack.c.l.b16 %v7719_v40  ;;  %v13072_v3 = vld [vmem:[%s17496_s3 + $0xc0] sm:$0xff]  ;;  %vm18409_vm5 = vsmask.f32 7424  ;;  %vm16802_vm13 = vmpackc.low %vm8264_vm7, %vm8263_vm15 }
 0x4f6   : > { %v7760_v63 = vunpack.c.l.b16 %v7718_v5  ;;  %8032 = vmatmul.bf16.gmra.mxu1 %v13054_v55  ;;  %v8461_v24 = vld [vmem:[#allocation4 + $0x18] sm:$0xf]  ;;  %v8065_v46 = vld [vmem:[#allocation4 + $0x1c] sm:$0xf]  ;;  %v8536_v4 = vrot.slane %v8534_v41, 4  ;;  %v8827_v62 = vsel %vm16608_vm9, %v8818_v49, 0 }
 0x4f7   : > { %v7362_v45 = vpop.f32.mrf.mxu2  ;;  %v16681_v16 = vpack.c.b16 %v8314_v18, %v8313_v10  ;;  %v8817_v35 = vld [vmem:[#allocation4 + $0x18] sm:$0xf]  ;;  %v8470_v5 = vsel %vm18408_vm11, %v8461_v24, 0  ;;  %v8512_v18 = vunpack.c.l.b16 %v8469_v19  ;;  %8625 = vmatpush.bf16.msrb.mxu3 %v13072_v3  ;;  %v8870_v27 = vunpack.c.l.b16 %v8827_v62  ;;  %v8462_v47 = vld [vmem:[#allocation4 + $0x1c] sm:$0xf]  ;;  %v13093_v49 = vld [vmem:[%s17496_s3 + $0x148] sm:$0xff] }
 0x4f8   : > { %v7766_v32 = vpack.c.b16 %v7761_v23, %v7760_v63  ;;  %v7363_v14 = vadd.f32 %v7362_v45, %v7333_v0  ;;  %v8513_v63 = vunpack.c.l.b16 %v8470_v5  ;;  %v13095_v23 = vld [vmem:[%s17496_s3 + $0x158] sm:$0xff]  ;;  %v8826_v31 = vsel %vm16580_vm6, %v8817_v35, 0  ;;  %v9015_v41 = vld [vmem:[#allocation4 + $0x14] sm:$0xf] }
 0x4f9   : > { %v8339_v36 = vshll.u32 %v16681_v16, 16  ;;  %8971 = vmatpush.bf16.msra.mxu2 %v13095_v23  ;;  %v16766_v21 = vrot.slane %v8887_v57, 1  ;;  %v8523_v12 = vshrl.u32 %v16696_v50, 16  ;;  %v16776_v7 = vor.u32 %v8536_v4, %v8533_v29 }
 0x4fa   : > { %v7795_v20 = vshrl.u32 %v7766_v32, 16  ;;  %v7798_v34 = vshll.u32 %v7766_v32, 16  ;;  %v13275_v44 = vpack.c.bf16 %v7363_v14, %v7361_v43  ;;  %v8519_v45 = vpack.c.b16 %v8513_v63, %v8512_v18 }
 0x4fb   : > { %v8341_v28 = vrot.slane %v8339_v36, 1  ;;  %v8869_v32 = vunpack.c.l.b16 %v8826_v31  ;;  %v8272_v43 = vsel %vm16728_vm0, %v8065_v46, 0  ;;  %v8343_v36 = vshrl.u32 %v16681_v16, 16 }
 0x4fc   : > { %v7797_v10 = vrot.slane %v7795_v20, 3  ;;  %v7800_v38 = vrot.slane %v7798_v34, 4  ;;  %13280 = vst [vmem:[#allocation4 + $0x20] sm:$0xff] %v13275_v44   ;;  %v8540_v1 = vshrl.u32 %v8519_v45, 16  ;;  %v8543_v8 = vshll.u32 %v8519_v45, 16  ;;  %v13127_v45 = vld [vmem:[%s17496_s3 + $0x238] sm:$0xff] }
 0x4fd   : > { %v8342_v40 = vsel %vm18409_vm5, %v8337_v25, %v8341_v28  ;;  %vm18412_vm5 = vsmask.f32 4352  ;;  %v16768_v25 = vpack.c.b16 %v8870_v27, %v8869_v32  ;;  %v9014_v20 = vld [vmem:[#allocation4 + $0x10] sm:$0xf]  ;;  %v8315_v24 = vunpack.c.l.b16 %v8272_v43  ;;  %v13092_v43 = vld [vmem:[%s17496_s3 + $0x140] sm:$0xff] }
 0x4fe   : > { %v16722_v55 = vor.u32 %v7800_v38, %v7797_v10  ;;  %8424 = vmatmul.bf16.gmra.mxu2 %v8342_v40  ;;  %v8891_v9 = vshrl.u32 %v16698_v60, 16  ;;  %v8471_v16 = vsel %vm16622_vm2, %v8462_v47, 0  ;;  %v8345_v10 = vor.u32 %v8343_v36, %v8341_v28  ;;  %vm18422_vm7 = vmmov %vm18412_vm5 }
 0x4ff   : > { %v8542_v3 = vrot.slane %v8540_v1, 3  ;;  %v8545_v5 = vrot.slane %v8543_v8, 4  ;;  %v8895_v28 = vshll.u32 %v16768_v25, 16  ;;  %v8514_v23 = vunpack.c.l.b16 %v8471_v16  ;;  %v8821_v16 = vld [vmem:[#allocation4 + $0x28] sm:$0x1] }
 0x500   : > { %v7802_v52 = vsel %vm18412_vm5, %v16574_v39, %v16722_v55  ;;  %v13094_v39 = vld [vmem:[%s17496_s3 + $0x150] sm:$0xff]  ;;  %v8893_v40 = vor.u32 %v8891_v9, %v16766_v21  ;;  %v9023_v27 = vsel %vm18419_vm3, %v9014_v20, 0  ;;  %v9024_v22 = vsel %vm16294_vm14, %v9015_v41, 0 }
 0x501   : > { %7882 = vmatmul.bf16.gmra.mxu3 %v7802_v52  ;;  %8972 = vmatpush.bf16.msra.mxu2 %v13094_v39  ;;  %v8546_v32 = vor.u32 %v8545_v5, %v8542_v3  ;;  %v8897_v39 = vrot.slane %v8895_v28, 1  ;;  %vm18420_vm15 = vsmask.f32 7424  ;;  %v8814_v5 = vld [vmem:[#allocation4 + $0xc] sm:$0xf]  ;;  %vm18423_vm3 = vnez %v18325_v6 }
 0x502   : > { %vm18421_vm14 = vmmov %vm18420_vm15 }
 0x503   : > { %v8066_v34 = vld [vmem:[#allocation4 + $0x20] sm:$0xf]  ;;  %v8820_v29 = vld [vmem:[#allocation4 + $0x24] sm:$0xf]  ;;  %v16820_v8 = vsel %vm18412_vm5, %v16776_v7, %v8546_v32  ;;  %v16823_v36 = vsel %vm18420_vm15, %v8893_v40, %v8897_v39  ;;  %vm18424_vm5 = vnez %v18338_v61  ;;  %vm18425_vm15 = vmmov %vm18422_vm7 }
 0x504   : > { %v7505_v44 = vld [vmem:[#allocation4 + $0x20] sm:$0xf]  ;;  %v8273_v35 = vsel %vm16746_vm12, %v8066_v34, 0  ;;  %v8067_v52 = vld [vmem:[#allocation4 + $0x24] sm:$0x1]  ;;  %v8829_v2 = vsel %vm16746_vm12, %v8820_v29, 0 }
 0x505   : > { %v7720_v38 = vsel %vm16762_vm8, %v7505_v44, 0  ;;  %v13055_v19 = vld [vmem:[#allocation4 + $0x1c] sm:$0xff]  ;;  %v8316_v57 = vunpack.c.l.b16 %v8273_v35  ;;  %8973 = vmatpush.bf16.msra.mxu2 %v13093_v49  ;;  %v8274_v42 = vsel %vm16802_vm13, %v8067_v52, 0  ;;  %v8464_v34 = vld [vmem:[#allocation4 + $0x24] sm:$0xf]  ;;  %v8872_v9 = vunpack.c.l.b16 %v8829_v2 }
 0x506   : > { %v7762_v60 = vunpack.c.l.b16 %v7720_v38  ;;  %v8463_v46 = vld [vmem:[#allocation4 + $0x20] sm:$0xf]  ;;  %8037 = vmatmul.bf16.gmra.mxu1 %v13055_v19  ;;  %v9066_v38 = vunpack.c.l.b16 %v9023_v27  ;;  %v9067_v19 = vunpack.c.l.b16 %v9024_v22  ;;  %v8899_v29 = vshrl.u32 %v16768_v25, 16 }
 0x507   : > { %v8819_v18 = vld [vmem:[#allocation4 + $0x20] sm:$0xf]  ;;  %v8472_v63 = vsel %vm16636_vm10, %v8463_v46, 0  ;;  %v16794_v31 = vpack.c.b16 %v8316_v57, %v8315_v24  ;;  %v8317_v57 = vunpack.c.l.b16 %v8274_v42  ;;  %v13084_v46 = vld [vmem:[%s17496_s3 + $0x100] sm:$0xff]  ;;  %v8823_v27 = vsel %vm18424_vm5, %v8814_v5, 0 }
 0x508   : > { %v8828_v4 = vsel %vm16728_vm0, %v8819_v18, 0  ;;  %v7767_v62 = vpack.c.b16 %v7762_v60, %v7762_v60  ;;  %v8515_v26 = vunpack.c.l.b16 %v8472_v63  ;;  %v8813_v60 = vld [vmem:[#allocation4 + $0x8] sm:$0xf]  ;;  %v8473_v63 = vsel %vm16762_vm8, %v8464_v34, 0  ;;  %8775 = vmatpush.bf16.msra.mxu1 %v13084_v46 }
 0x509   : > { %v8347_v15 = vshll.u32 %v16794_v31, 16  ;;  %v8871_v1 = vunpack.c.l.b16 %v8828_v4  ;;  %8974 = vmatpush.bf16.msra.mxu2 %v13092_v43  ;;  %v8822_v52 = vsel %vm18423_vm3, %v8813_v60, 0  ;;  %v8901_v2 = vor.u32 %v8899_v29, %v8897_v39  ;;  %v9017_v60 = vld [vmem:[#allocation4 + $0x1c] sm:$0xf] }
 0x50a   : > { %v7804_v54 = vshrl.u32 %v7767_v62, 16  ;;  %v7807_v47 = vshll.u32 %v7767_v62, 16  ;;  %v8520_v20 = vpack.c.b16 %v8515_v26, %v8514_v23  ;;  %v8830_v23 = vsel %vm16802_vm13, %v8821_v16, 0  ;;  %v13080_v16 = vld [vmem:[#allocation4 + $0x8] sm:$0xff] }
 0x50b   : > { %v8349_v24 = vrot.slane %v8347_v15, 1  ;;  %v8877_v40 = vpack.c.b16 %v8872_v9, %v8871_v1  ;;  %v8516_v62 = vunpack.c.l.b16 %v8473_v63  ;;  %v8873_v26 = vunpack.c.l.b16 %v8830_v23 }
 0x50c   : > { %v7806_v59 = vrot.slane %v7804_v54, 3  ;;  %v7809_v44 = vrot.slane %v7807_v47, 4  ;;  %v8549_v41 = vshrl.u32 %v8520_v20, 16  ;;  %v8552_v35 = vshll.u32 %v8520_v20, 16 }
 0x50d   : > { %v8350_v49 = vsel %vm18421_vm14, %v8345_v10, %v8349_v24  ;;  %v8903_v4 = vshll.u32 %v8877_v40, 16  ;;  %v8521_v15 = vpack.c.b16 %v8516_v62, %v8516_v62  ;;  %v9074_v54 = vpack.c.b16 %v9067_v19, %v9066_v38  ;;  %v9372_v19 = vld [vmem:[#allocation4 + $0x18] sm:$0xf]  ;;  %9523 = vmatpush.bf16.msrb.mxu2 %v13127_v45 }
 0x50e   : > { %v7810_v3 = vor.u32 %v7809_v44, %v7806_v59  ;;  %8429 = vmatmul.bf16.gmra.mxu2 %v8350_v49  ;;  %v8551_v18 = vrot.slane %v8549_v41, 3  ;;  %v8554_v28 = vrot.slane %v8552_v35, 4  ;;  %v8878_v47 = vpack.c.b16 %v8873_v26, %v8873_v26 }
 0x50f   : > { %v8905_v22 = vrot.slane %v8903_v4, 1  ;;  %v8907_v1 = vshrl.u32 %v8877_v40, 16  ;;  %v8322_v42 = vpack.c.b16 %v8317_v57, %v8317_v57  ;;  %v8558_v34 = vshrl.u32 %v8521_v15, 16 }
 0x510   : > { %v7811_v10 = vsel %vm18422_vm7, %v16722_v55, %v7810_v3  ;;  %v8555_v43 = vor.u32 %v8554_v28, %v8551_v18  ;;  %v8526_v55 = vshll.u32 %v16696_v50, 16  ;;  %v8561_v59 = vshll.u32 %v8521_v15, 16  ;;  %v9016_v3 = vld [vmem:[#allocation4 + $0x18] sm:$0xf]  ;;  %vm18426_vm7 = vmmov %vm18421_vm14 }
 0x511   : > { %7887 = vmatmul.bf16.gmra.mxu3 %v7811_v10  ;;  %v16845_v20 = vsel %vm18421_vm14, %v8901_v2, %v8905_v22  ;;  %v8865_v44 = vunpack.c.l.b16 %v8822_v52  ;;  %v8866_v9 = vunpack.c.l.b16 %v8823_v27  ;;  %v8909_v39 = vor.u32 %v8907_v1, %v8905_v22  ;;  %v9371_v10 = vld [vmem:[#allocation4 + $0x14] sm:$0xf] }
 0x512   : > { %v16842_v25 = vsel %vm18425_vm15, %v8546_v32, %v8555_v43  ;;  %v8911_v41 = vshll.u32 %v8878_v47, 16  ;;  %v8560_v35 = vrot.slane %v8558_v34, 3  ;;  %v8563_v38 = vrot.slane %v8561_v59, 4  ;;  %v9373_v59 = vld [vmem:[#allocation4 + $0x1c] sm:$0xf] }
 0x513   : > { %v8351_v49 = vshrl.u32 %v16794_v31, 16  ;;  %v8355_v57 = vshll.u32 %v8322_v42, 16  ;;  %v8525_v5 = vrot.slane %v8523_v12, 3  ;;  %v8528_v40 = vrot.slane %v8526_v55, 4 }
 0x514   : > { %v8913_v32 = vrot.slane %v8911_v41, 1  ;;  %v8564_v46 = vor.u32 %v8563_v38, %v8560_v35  ;;  %v8874_v28 = vpack.c.b16 %v8866_v9, %v8865_v44  ;;  %v9087_v23 = vshrl.u32 %v9074_v54, 16 }
 0x515   : > { %v8353_v18 = vor.u32 %v8351_v49, %v8349_v24  ;;  %v9381_v31 = vsel %vm16448_vm1, %v9372_v19, 0  ;;  %v9025_v4 = vsel %vm16464_vm4, %v9016_v3, 0  ;;  %v9026_v50 = vsel %vm18408_vm11, %v9017_v60, 0  ;;  %vm18428_vm11 = vmmov %vm18425_vm15  ;;  %v9374_v49 = vld [vmem:[#allocation4 + $0x20] sm:$0xf] }
 0x516   : > { %8776 = vmatmul.bf16.vlgmr.msra.gmra.mxu1 %v13080_v16  ;;  %v16851_v63 = vsel %vm18426_vm7, %v8909_v39, %v8913_v32  ;;  %v16854_v29 = vsel %vm18425_vm15, %v8555_v43, %v8564_v46  ;;  %v9090_v12 = vshll.u32 %v9074_v54, 16  ;;  %v9068_v24 = vunpack.c.l.b16 %v9025_v4  ;;  %vm18429_vm1 = vmmov %vm18428_vm11  ;;  %v9018_v32 = vld [vmem:[#allocation4 + $0x20] sm:$0xf]  ;;  %v9019_v3 = vld [vmem:[#allocation4 + $0x24] sm:$0xf] }
 0x517   : > { %v9069_v62 = vunpack.c.l.b16 %v9026_v50  ;;  %v8357_v52 = vrot.slane %v8355_v57, 1  ;;  %vm18427_vm14 = vnez %v18358_v56  ;;  %v9424_v26 = vunpack.c.l.b16 %v9381_v31  ;;  %v13107_v56 = vld [vmem:[%s17496_s3 + $0x1b8] sm:$0xff]  ;;  %v9020_v31 = vld [vmem:[#allocation4 + $0x28] sm:$0xf]  ;;  %vm18432_vm4 = vmmov %vm18429_vm1 }
 0x518   : > { %v9380_v27 = vsel %vm18427_vm14, %v9371_v10, 0  ;;  %v8529_v22 = vor.u32 %v8528_v40, %v8525_v5  ;;  %v8882_v37 = vshll.u32 %v8874_v28, 16  ;;  %v9089_v15 = vrot.slane %v9087_v23, 3  ;;  %9174 = vmatpush.bf16.msra.mxu3 %v13107_v56  ;;  %v9375_v40 = vld [vmem:[#allocation4 + $0x24] sm:$0xf] }
 0x519   : > { %v9075_v2 = vpack.c.b16 %v9069_v62, %v9068_v24  ;;  %v8358_v43 = vsel %vm18426_vm7, %v8353_v18, %v8357_v52  ;;  %v9092_v48 = vrot.slane %v9090_v12, 4  ;;  %v9423_v55 = vunpack.c.l.b16 %v9380_v27  ;;  %v9376_v23 = vld [vmem:[#allocation4 + $0x28] sm:$0xf] }
 0x51a   : > { %v8538_v54 = vsel %vm18428_vm11, %v8529_v22, %v16776_v7  ;;  %v8884_v44 = vrot.slane %v8882_v37, 1  ;;  %v8880_v39 = vshrl.u32 %v8874_v28, 16  ;;  %v9382_v41 = vsel %vm16580_vm6, %v9373_v59, 0  ;;  %v13081_v7 = vld [vmem:[#allocation4 + $0x10] sm:$0xff]  ;;  %vm18430_vm6 = vmmov %vm18426_vm7  ;;  %v13119_v59 = vld [vmem:[%s17496_s3 + $0x1f8] sm:$0xff] }
 0x51b   : > { %v9096_v47 = vshrl.u32 %v9075_v2, 16  ;;  %v9099_v53 = vshll.u32 %v9075_v2, 16  ;;  %v9431_v1 = vpack.c.b16 %v9424_v26, %v9423_v55  ;;  %v16870_v9 = vor.u32 %v9092_v48, %v9089_v15  ;;  %9324 = vmatpush.bf16.msrb.mxu1 %v13119_v59 }
 0x51c   : > { %v8885_v19 = vor.u32 %v8884_v44, %v8880_v39  ;;  %v9383_v60 = vsel %vm16608_vm9, %v9374_v49, 0  ;;  %v9425_v57 = vunpack.c.l.b16 %v9382_v41  ;;  %v9027_v11 = vsel %vm16622_vm2, %v9018_v32, 0  ;;  %vm18434_vm2 = vmmov %vm18429_vm1 }
 0x51d   : > { %v9098_v42 = vrot.slane %v9096_v47, 3  ;;  %v9101_v34 = vrot.slane %v9099_v53, 4  ;;  %v9443_v35 = vshll.u32 %v9431_v1, 16  ;;  %v9028_v5 = vsel %vm16636_vm10, %v9019_v3, 0  ;;  %v13105_v3 = vld [vmem:[%s17496_s3 + $0x1a8] sm:$0xff] }
 0x51e   : > { %8434 = vmatmul.bf16.gmra.mxu2 %v8358_v43  ;;  %v9426_v46 = vunpack.c.l.b16 %v9383_v60  ;;  %v9070_v18 = vunpack.c.l.b16 %v9027_v11  ;;  %v9071_v28 = vunpack.c.l.b16 %v9028_v5  ;;  %v9384_v10 = vsel %vm16728_vm0, %v9375_v40, 0  ;;  %vm18431_vm0 = vmmov %vm18430_vm6  ;;  %v13118_v60 = vld [vmem:[%s17496_s3 + $0x1f0] sm:$0xff] }
 0x51f   : > { %v16872_v16 = vor.u32 %v9101_v34, %v9098_v42  ;;  %v16889_v4 = vrot.slane %v9443_v35, 1  ;;  %v9385_v13 = vsel %vm16746_vm12, %v9376_v23, 0  ;;  %v9427_v50 = vunpack.c.l.b16 %v9384_v10  ;;  %v13126_v35 = vld [vmem:[%s17496_s3 + $0x230] sm:$0xff]  ;;  %vm18433_vm9 = vmmov %vm18431_vm0  ;;  %9325 = vmatpush.bf16.msrb.mxu1 %v13118_v60  ;;  %v13117_v10 = vld [vmem:[%s17496_s3 + $0x1e8] sm:$0xff] }
 0x520   : > { %v9029_v30 = vsel %vm16762_vm8, %v9020_v31, 0  ;;  %v9432_v12 = vpack.c.b16 %v9426_v46, %v9425_v57  ;;  %v9076_v24 = vpack.c.b16 %v9071_v28, %v9070_v18  ;;  %v9428_v62 = vunpack.c.l.b16 %v9385_v13  ;;  %v13082_v46 = vld [vmem:[#allocation4 + $0x18] sm:$0xff]  ;;  %9524 = vmatpush.bf16.msrb.mxu2 %v13126_v35  ;;  %v13125_v18 = vld [vmem:[%s17496_s3 + $0x228] sm:$0xff]  ;;  %vm18435_vm10 = vmmov %vm18431_vm0 }
 0x521   : > { %8626 = vmatmul.bf16.vlgmr.msrb.gmra.mxu3 %v8538_v54  ;;  %v16879_v38 = vsel %vm18429_vm1, %v16870_v9, %v16872_v16  ;;  %v9072_v52 = vunpack.c.l.b16 %v9029_v30  ;;  %v8890_v27 = vsel %vm18430_vm6, %v8885_v19, %v16766_v21  ;;  %v9447_v58 = vshrl.u32 %v9431_v1, 16  ;;  %v13106_v21 = vld [vmem:[%s17496_s3 + $0x1b0] sm:$0xff]  ;;  %v13124_v31 = vld [vmem:[%s17496_s3 + $0x220] sm:$0xff]  ;;  %v13103_v13 = vld [vmem:[%s17496_s3 + $0x198] sm:$0xff] }
 0x522   : > { %v9386_v26 = vsel %vm16802_vm13, %v9377_v17, 0  ;;  %v9451_v2 = vshll.u32 %v9432_v12, 16  ;;  %v9105_v43 = vshrl.u32 %v9076_v24, 16  ;;  %v9108_v0 = vshll.u32 %v9076_v24, 16  ;;  %9175 = vmatpush.bf16.msra.mxu3 %v13106_v21  ;;  %v13116_v30 = vld [vmem:[%s17496_s3 + $0x1e0] sm:$0xff]  ;;  %v13123_v17 = vld [vmem:[%s17496_s3 + $0x218] sm:$0xff]  ;;  %vm18438_vm13 = vmmov %vm18429_vm1 }
 0x523   : > { %v9433_v22 = vpack.c.b16 %v9428_v62, %v9427_v50  ;;  %v9449_v37 = vor.u32 %v9447_v58, %v16889_v4  ;;  %v9455_v14 = vshrl.u32 %v9432_v12, 16  ;;  %v9077_v15 = vpack.c.b16 %v9072_v52, %v9072_v52  ;;  %9326 = vmatpush.bf16.msrb.mxu1 %v13117_v10  ;;  %v13102_v50 = vld [vmem:[%s17496_s3 + $0x190] sm:$0xff]  ;;  %v13115_v12 = vld [vmem:[%s17496_s3 + $0x1d8] sm:$0xff]  ;;  %v13100_v52 = vld [vmem:[%s17496_s3 + $0x180] sm:$0xff] }
 0x524   : > { %v9429_v48 = vunpack.c.l.b16 %v9386_v26  ;;  %v9453_v55 = vrot.slane %v9451_v2, 1  ;;  %v9107_v47 = vrot.slane %v9105_v43, 3  ;;  %v9110_v53 = vrot.slane %v9108_v0, 4  ;;  %9525 = vmatpush.bf16.msrb.mxu2 %v13125_v18  ;;  %v13122_v24 = vld [vmem:[%s17496_s3 + $0x210] sm:$0xff]  ;;  %v13083_v62 = vld [vmem:[#allocation4 + $0x20] sm:$0xff]  ;;  %v13113_v2 = vld [vmem:[%s17496_s3 + $0x1c8] sm:$0xff] }
 0x525   : > { %v9459_v54 = vshll.u32 %v9433_v22, 16  ;;  %v9114_v56 = vshrl.u32 %v9077_v15, 16  ;;  %v9117_v1 = vshll.u32 %v9077_v15, 16  ;;  %v9463_v34 = vshrl.u32 %v9433_v22, 16  ;;  %v9012_v58 = vld [vmem:[#allocation4 + $0x8] sm:$0x8] }
 0x526   : > { %8781 = vmatmul.bf16.gmra.mxu1 %v13081_v7  ;;  %v9434_v42 = vpack.c.b16 %v9429_v48, %v9429_v48  ;;  %v16910_v44 = vsel %vm18431_vm0, %v9449_v37, %v9453_v55  ;;  %v9111_v39 = vor.u32 %v9110_v53, %v9107_v47  ;;  %v9457_v41 = vor.u32 %v9455_v14, %v9453_v55  ;;  %v9013_v26 = vld [vmem:[#allocation4 + $0xc] sm:$0xf]  ;;  %v13110_v18 = vld [vmem:[#allocation4 + $0x1c] sm:$0xff] }
 0x527   : > { %v9461_v7 = vrot.slane %v9459_v54, 1  ;;  %v9116_v19 = vrot.slane %v9114_v56, 3  ;;  %v9119_v49 = vrot.slane %v9117_v1, 4  ;;  %9176 = vmatpush.bf16.msra.mxu3 %v13105_v3  ;;  %9327 = vmatpush.bf16.msrb.mxu1 %v13116_v30  ;;  %v13120_v43 = vld [vmem:[%s17496_s3 + $0x200] sm:$0xff]  ;;  %vm18436_vm12 = vnez %v18304_v51 }
 0x528   : > { %v9467_v32 = vshll.u32 %v9434_v42, 16  ;;  %9526 = vmatpush.bf16.msrb.mxu2 %v13124_v31  ;;  %v9021_v0 = vsel %vm18436_vm12, %v9012_v58, 0  ;;  %vm18437_vm8 = vnez %v18306_v33  ;;  %v13112_v15 = vld [vmem:[%s17496_s3 + $0x1c0] sm:$0xff]  ;;  %v9370_v33 = vld [vmem:[#allocation4 + $0x10] sm:$0xf] }
 0x529   : > { %v16927_v57 = vsel %vm18433_vm9, %v9457_v41, %v9461_v7  ;;  %v9465_v11 = vor.u32 %v9463_v34, %v9461_v7  ;;  %v9120_v5 = vor.u32 %v9119_v49, %v9116_v19  ;;  %v9022_v22 = vsel %vm18437_vm8, %v9013_v26, 0  ;;  %v13108_v51 = vld [vmem:[#allocation4 + $0xc] sm:$0xff]  ;;  %v13109_v19 = vld [vmem:[#allocation4 + $0x14] sm:$0xff] }
 0x52a   : > { %v9469_v40 = vrot.slane %v9467_v32, 1  ;;  %v9064_v37 = vunpack.c.l.b16 %v9021_v0  ;;  %v9065_v14 = vunpack.c.l.b16 %v9022_v22  ;;  %v9369_v54 = vld [vmem:[#allocation4 + $0xc] sm:$0xf]  ;;  %v9379_v21 = vsel %vm18424_vm5, %v9370_v33, 0 }
 0x52b   : > { %v16933_v28 = vsel %vm18434_vm2, %v9111_v39, %v9120_v5  ;;  %9328 = vmatpush.bf16.msrb.mxu1 %v13115_v12  ;;  %v9378_v56 = vsel %vm18423_vm3, %v9369_v54, 0  ;;  %v9422_v1 = vunpack.c.l.b16 %v9379_v21  ;;  %vm18439_vm3 = vmmov %vm18431_vm0  ;;  %vm18440_vm5 = vcmask 1046528  }
 0x52c   : > { %v16936_v23 = vsel %vm18435_vm10, %v9465_v11, %v9469_v40  ;;  %9527 = vmatpush.bf16.msrb.mxu2 %v13123_v17  ;;  %v9073_v48 = vpack.c.b16 %v9065_v14, %v9064_v37  ;;  %v9421_v34 = vunpack.c.l.b16 %v9378_v56  ;;  %vm18441_vm15 = vmmov %vm18440_vm5 }
 0x52d   : > { %vm18442_vm14 = vmmov %vm18440_vm5 }
 0x52e   : > { %8975 = vmatmul.bf16.vlgmr.msra.gmra.mxu2 %v8890_v27  ;;  %v13121_v27 = vld [vmem:[%s17496_s3 + $0x208] sm:$0xff]  ;;  %v9079_v47 = vshrl.u32 %v9073_v48, 16  ;;  %v9082_v53 = vshll.u32 %v9073_v48, 16  ;;  %vm18443_vm7 = vmmov %vm18440_vm5 }
 0x52f   : > { %vm18444_vm11 = vmmov %vm18440_vm5 }
 0x530   : > { %9528 = vmatpush.bf16.msrb.mxu2 %v13122_v24  ;;  %v9081_v45 = vrot.slane %v9079_v47, 3  ;;  %vm18445_vm1 = vmmov %vm18440_vm5 }
 0x531   : > { %8631 = vmatmul.bf16.gmra.mxu3 %v16820_v8  ;;  %v16924_v8 = vsel %vm18432_vm4, %v16872_v16, %v9111_v39  ;;  %v13104_v16 = vld [vmem:[%s17496_s3 + $0x1a0] sm:$0xff]  ;;  %v9430_v39 = vpack.c.b16 %v9422_v1, %v9421_v34  ;;  %vm18446_vm6 = vmmov %vm18445_vm1  ;;  %vm9656_vm4 = vcmask 523264  }
 0x532   : > { %9177 = vmatpush.bf16.msra.mxu3 %v13104_v16  ;;  %vm18447_vm0 = vmmov %vm18445_vm1 }
 0x533   : > { %v9438_v61 = vshll.u32 %v9430_v39, 16  ;;  %v9436_v49 = vshrl.u32 %v9430_v39, 16 }
 0x534   : > { %9529 = vmatpush.bf16.msrb.mxu2 %v13121_v27 }
 0x535   : > { %v9440_v6 = vrot.slane %v9438_v61, 1 }
 0x536   : > { %8786 = vmatmul.bf16.gmra.mxu1 %v13082_v46  ;;  %9178 = vmatpush.bf16.msra.mxu3 %v13103_v13 }
 0x537   : > { %v9441_v32 = vor.u32 %v9440_v6, %v9436_v49 }
 0x538   : > { %9530 = vmatpush.bf16.msrb.mxu2 %v13120_v43 }
 0x539   : > { %v9446_v11 = vsel %vm18439_vm3, %v9441_v32, %v16889_v4 }
 0x53a   : > { %9179 = vmatpush.bf16.msra.mxu3 %v13102_v50 }
 0x53e   : > { %8980 = vmatmul.bf16.gmra.mxu2 %v16823_v36  ;;  %v13101_v36 = vld [vmem:[%s17496_s3 + $0x188] sm:$0xff] }
 0x53f   : > { %9180 = vmatpush.bf16.msra.mxu3 %v13101_v36 }
 0x541   : > { %8636 = vmatmul.bf16.gmra.mxu3 %v16842_v25  ;;  %v13114_v25 = vld [vmem:[%s17496_s3 + $0x1d0] sm:$0xff] }
 0x542   : > { %9329 = vmatpush.bf16.msrb.mxu1 %v13114_v25 }
 0x543   : > { %9181 = vmatpush.bf16.msra.mxu3 %v13100_v52 }
 0x546   : > { %8791 = vmatmul.bf16.gmra.mxu1 %v13083_v62 }
 0x547   : > { %9330 = vmatpush.bf16.msrb.mxu1 %v13113_v2 }
 0x54b   : > { %9331 = vmatpush.bf16.msrb.mxu1 %v13112_v15 }
 0x54e   : > { %8985 = vmatmul.bf16.gmra.mxu2 %v16845_v20  ;;  %v9084_v20 = vrot.slane %v9082_v53, 4 }
 0x551   : > { %8641 = vmatmul.bf16.gmra.mxu3 %v16854_v29  ;;  %v9085_v29 = vor.u32 %v9084_v20, %v9081_v45 }
 0x553   : > { %v8023_v55 = vpop.f32.mrf.mxu1  ;;  %v9094_v59 = vsel %vm18438_vm13, %v9085_v29, %v16870_v9 }
 0x556   : > { %9332 = vmatmul.bf16.vlgmr.msrb.gmra.mxu1 %v13108_v51 }
 0x55b   : > { %v16998_v42 = vpop.f32.mrf.mxu1 }
 0x55e   : > { %8990 = vmatmul.bf16.gmra.mxu2 %v16851_v63 }
 0x561   : > { %9182 = vmatmul.bf16.vlgmr.msra.gmra.mxu3 %v9094_v59 }
 0x563   : > { %v7873_v41 = vpop.f32.mrf.mxu3  ;;  %v8028_v7 = vpop.f32.mrf.mxu1 }
 0x564   : > { %v8043_v35 = vadd.f32 %v8023_v55, %v7873_v41 }
 0x566   : > { %9337 = vmatmul.bf16.gmra.mxu1 %v13109_v19 }
 0x56b   : > { %v7875_v3 = vpop.f32.mrf.mxu3  ;;  %v8030_v60 = vpop.f32.mrf.mxu1 }
 0x56c   : > { %v8044_v48 = vadd.f32 %v16998_v42, %v7875_v3 }
 0x56e   : > { %9531 = vmatmul.bf16.vlgmr.msrb.gmra.mxu2 %v9446_v11 }
 0x571   : > { %9187 = vmatmul.bf16.gmra.mxu3 %v16879_v38  ;;  %v8420_v63 = vpop.f32.mrf.mxu2  ;;  %v13111_v38 = vld [vmem:[#allocation4 + $0x24] sm:$0xff] }
 0x572   : > { %v8440_v9 = vadd.f32 %v8420_v63, %v8043_v35 }
 0x573   : > { %v8033_v40 = vpop.f32.mrf.mxu1 }
 0x574   : > { %v7878_v5 = vpop.f32.mrf.mxu3 }
 0x575   : > { %v8045_v46 = vadd.f32 %v8028_v7, %v7878_v5 }
 0x576   : > { %9342 = vmatmul.bf16.gmra.mxu1 %v13110_v18 }
 0x579   : > { %v8422_v16 = vpop.f32.mrf.mxu2 }
 0x57a   : > { %v8441_v51 = vadd.f32 %v8422_v16, %v8044_v48 }
 0x57b   : > { %v8035_v31 = vpop.f32.mrf.mxu1 }
 0x57c   : > { %v7880_v10 = vpop.f32.mrf.mxu3 }
 0x57e   : > { %9536 = vmatmul.bf16.gmra.mxu2 %v16910_v44 }
 0x581   : > { %9192 = vmatmul.bf16.gmra.mxu3 %v16924_v8  ;;  %v8425_v13 = vpop.f32.mrf.mxu2 }
 0x582   : > { %v8442_v50 = vadd.f32 %v8425_v13, %v8045_v46 }
 0x583   : > { %v8038_v30 = vpop.f32.mrf.mxu1 }
 0x584   : > { %v7883_v4 = vpop.f32.mrf.mxu3 }
 0x585   : > { %v8047_v17 = vadd.f32 %v8033_v40, %v7883_v4 }
 0x586   : > { %9347 = vmatmul.bf16.gmra.mxu1 %v13111_v38 }
 0x589   : > { %v8427_v12 = vpop.f32.mrf.mxu2 }
 0x58b   : > { %v17008_v24 = vpop.f32.mrf.mxu1 }
 0x58c   : > { %v7885_v36 = vpop.f32.mrf.mxu3 }
 0x58d   : > { %v8048_v6 = vadd.f32 %v8035_v31, %v7885_v36 }
 0x58e   : > { %9541 = vmatmul.bf16.gmra.mxu2 %v16927_v57 }
 0x591   : > { %9197 = vmatmul.bf16.gmra.mxu3 %v16933_v28  ;;  %v8430_v62 = vpop.f32.mrf.mxu2 }
 0x592   : > { %v8444_v25 = vadd.f32 %v8430_v62, %v8047_v17 }
 0x593   : > { %v8777_v52 = vpop.f32.mrf.mxu1 }
 0x594   : > { %v7888_v44 = vpop.f32.mrf.mxu3 }
 0x595   : > { %v8049_v8 = vadd.f32 %v8038_v30, %v7888_v44 }
 0x599   : > { %v8432_v27 = vpop.f32.mrf.mxu2 }
 0x59a   : > { %v8445_v32 = vadd.f32 %v8432_v27, %v8048_v6 }
 0x59b   : > { %v8779_v26 = vpop.f32.mrf.mxu1 }
 0x59c   : > { %v17012_v58 = vpop.f32.mrf.mxu3 }
 0x59e   : > { %9546 = vmatmul.bf16.gmra.mxu2 %v16936_v23  ;;  %v8046_v23 = vadd.f32 %v8030_v60, %v7880_v10 }
 0x5a0   : > { %v8443_v1 = vadd.f32 %v8427_v12, %v8046_v23 }
 0x5a1   : > { %v8435_v2 = vpop.f32.mrf.mxu2 }
 0x5a2   : > { %v8446_v43 = vadd.f32 %v8435_v2, %v8049_v8 }
 0x5a3   : > { %v8782_v37 = vpop.f32.mrf.mxu1 }
 0x5a4   : > { %v8627_v0 = vpop.f32.mrf.mxu3 }
 0x5a5   : > { %v8647_v22 = vadd.f32 %v8627_v0, %v8440_v9 }
 0x5a7   : > { %v8797_v14 = vadd.f32 %v8777_v52, %v8647_v22 }
 0x5a9   : > { %v17015_v57 = vpop.f32.mrf.mxu2 }
 0x5ab   : > { %v8784_v15 = vpop.f32.mrf.mxu1 }
 0x5ac   : > { %v8629_v28 = vpop.f32.mrf.mxu3 }
 0x5ad   : > { %v8648_v33 = vadd.f32 %v8629_v28, %v8441_v51 }
 0x5af   : > { %v8798_v45 = vadd.f32 %v8779_v26, %v8648_v33  ;;  %v17025_v26 = vld [vmem:[%s17497_s4] ss:$0 sm:$0xff] }
 0x5b1   : > { %v8976_v55 = vpop.f32.mrf.mxu2 }
 0x5b2   : > { %v8996_v47 = vadd.f32 %v8976_v55, %v8797_v14 }
 0x5b3   : > { %v8787_v56 = vpop.f32.mrf.mxu1 }
 0x5b4   : > { %v8632_v53 = vpop.f32.mrf.mxu3 }
 0x5b5   : > { %v8649_v54 = vadd.f32 %v8632_v53, %v8442_v50 }
 0x5b7   : > { %v8799_v21 = vadd.f32 %v8782_v37, %v8649_v54 }
 0x5b9   : > { %v8978_v20 = vpop.f32.mrf.mxu2 }
 0x5ba   : > { %v8997_v29 = vadd.f32 %v8978_v20, %v8798_v45 }
 0x5bb   : > { %v8789_v42 = vpop.f32.mrf.mxu1 }
 0x5bc   : > { %v8634_v34 = vpop.f32.mrf.mxu3 }
 0x5bd   : > { %v8650_v59 = vadd.f32 %v8634_v34, %v8443_v1 }
 0x5bf   : > { %v8800_v39 = vadd.f32 %v8784_v15, %v8650_v59 }
 0x5c1   : > { %v8981_v41 = vpop.f32.mrf.mxu2 }
 0x5c2   : > { %v8998_v61 = vadd.f32 %v8981_v41, %v8799_v21 }
 0x5c3   : > { %v8792_v63 = vpop.f32.mrf.mxu1 }
 0x5c4   : > { %v8637_v7 = vpop.f32.mrf.mxu3 }
 0x5c5   : > { %v8651_v35 = vadd.f32 %v8637_v7, %v8444_v25 }
 0x5c7   : > { %v8801_v19 = vadd.f32 %v8787_v56, %v8651_v35 }
 0x5c9   : > { %v8983_v49 = vpop.f32.mrf.mxu2 }
 0x5ca   : > { %v8999_v3 = vadd.f32 %v8983_v49, %v8800_v39 }
 0x5cb   : > { %v17018_v10 = vpop.f32.mrf.mxu1 }
 0x5cc   : > { %v8639_v11 = vpop.f32.mrf.mxu3 }
 0x5cd   : > { %v8652_v60 = vadd.f32 %v8639_v11, %v8445_v32 }
 0x5cf   : > { %v8802_v9 = vadd.f32 %v8789_v42, %v8652_v60 }
 0x5d1   : > { %v8986_v5 = vpop.f32.mrf.mxu2 }
 0x5d2   : > { %v9000_v40 = vadd.f32 %v8986_v5, %v8801_v19  ;;  %v8050_v5 = vadd.f32 %v17008_v24, %v17012_v58 }
 0x5d3   : > { %v9333_v17 = vpop.f32.mrf.mxu1 }
 0x5d4   : > { %v8642_v46 = vpop.f32.mrf.mxu3 }
 0x5d5   : > { %v8653_v18 = vadd.f32 %v8642_v46, %v8446_v43 }
 0x5d7   : > { %v8803_v16 = vadd.f32 %v8792_v63, %v8653_v18 }
 0x5d9   : > { %v8988_v13 = vpop.f32.mrf.mxu2 }
 0x5da   : > { %v9001_v50 = vadd.f32 %v8988_v13, %v8802_v9  ;;  %v8447_v13 = vadd.f32 %v17015_v57, %v8050_v5  ;;  %v13149_v5 = vld [vmem:[%s17500_s7 + $0xa0] sm:$0xff] }
 0x5db   : > { %v9335_v62 = vpop.f32.mrf.mxu1 }
 0x5dc   : > { %v8644_v4 = vpop.f32.mrf.mxu3 }
 0x5e1   : > { %v8991_v30 = vpop.f32.mrf.mxu2 }
 0x5e2   : > { %v9002_v31 = vadd.f32 %v8991_v30, %v8803_v16 }
 0x5e3   : > { %v9338_v43 = vpop.f32.mrf.mxu1 }
 0x5e4   : > { %v9183_v38 = vpop.f32.mrf.mxu3 }
 0x5e5   : > { %v9203_v25 = vadd.f32 %v9183_v38, %v8996_v47  ;;  %v8654_v38 = vadd.f32 %v8644_v4, %v8447_v13 }
 0x5e7   : > { %v9353_v52 = vadd.f32 %v9333_v17, %v9203_v25  ;;  %v8804_v58 = vadd.f32 %v17018_v10, %v8654_v38  ;;  %v13147_v38 = vld [vmem:[%s17500_s7 + $0x90] sm:$0xff] }
 0x5e9   : > { %v17020_v12 = vpop.f32.mrf.mxu2 }
 0x5eb   : > { %v9340_v51 = vpop.f32.mrf.mxu1 }
 0x5ec   : > { %v9185_v36 = vpop.f32.mrf.mxu3 }
 0x5ed   : > { %v9204_v2 = vadd.f32 %v9185_v36, %v8997_v29 }
 0x5ef   : > { %v9354_v22 = vadd.f32 %v9335_v62, %v9204_v2 }
 0x5f1   : > { %v9532_v44 = vpop.f32.mrf.mxu2 }
 0x5f2   : > { %v9552_v27 = vadd.f32 %v9532_v44, %v9353_v52 }
 0x5f3   : > { %v9343_v56 = vpop.f32.mrf.mxu1 }
 0x5f4   : > { %v9188_v8 = vpop.f32.mrf.mxu3  ;;  %v9580_v0 = vadd.f32 %v17025_v26, %v9552_v27 }
 0x5f5   : > { %v9205_v45 = vadd.f32 %v9188_v8, %v8998_v61 }
 0x5f6   : > { %v9588_v15 = vmax.f32 %v9580_v0, 0.0 }
 0x5f7   : > { %v9355_v34 = vadd.f32 %v9338_v43, %v9205_v45 }
 0x5f8   : > { %v17029_v47 = vrot.slane %v9588_v15, 1 }
 0x5f9   : > { %v9534_v37 = vpop.f32.mrf.mxu2 }
 0x5fa   : > { %v9553_v14 = vadd.f32 %v9534_v37, %v9354_v22  ;;  %v9003_v22 = vadd.f32 %v17020_v12, %v8804_v58  ;;  %v13184_v58 = vld [vmem:[%s17500_s7 + $0x1b8] sm:$0xff] }
 0x5fb   : > { %v9345_v32 = vpop.f32.mrf.mxu1 }
 0x5fc   : > { %v9190_v28 = vpop.f32.mrf.mxu3  ;;  %v9581_v48 = vadd.f32 %v17025_v26, %v9553_v14 }
 0x5fd   : > { %v9206_v23 = vadd.f32 %v9190_v28, %v8999_v3 }
 0x5fe   : > { %v9589_v55 = vmax.f32 %v9581_v48, 0.0 }
 0x5ff   : > { %v9356_v1 = vadd.f32 %v9340_v51, %v9206_v23 }
 0x600   : > { %v9605_v53 = vrot.slane %v9589_v55, 1 }
 0x601   : > { %v9537_v33 = vpop.f32.mrf.mxu2 }
 0x602   : > { %v9606_v54 = vsel %vm18440_vm5, %v17029_v47, %v9605_v53  ;;  %v9554_v41 = vadd.f32 %v9537_v33, %v9355_v34 }
 0x603   : > { %v17034_v6 = vmax.f32 %v9588_v15, %v9606_v54  ;;  %v13144_v54 = vld [vmem:[%s17500_s7 + $0x78] sm:$0xff] }
 0x604   : > { %v9193_v21 = vpop.f32.mrf.mxu3  ;;  %v9582_v49 = vadd.f32 %v17025_v26, %v9554_v41  ;;  %9827 = vmatpush.bf16.msrb.mxu0 %v13144_v54  ;;  %v13142_v41 = vld [vmem:[%s17500_s7 + $0x68] sm:$0xff]  ;;  %v13189_v54 = vld [vmem:[%s17500_s7 + $0x1e0] sm:$0xff] }
 0x605   : > { %v9207_v29 = vadd.f32 %v9193_v21, %v9000_v40 }
 0x606   : > { %v9590_v63 = vmax.f32 %v9582_v49, 0.0  ;;  %v13159_v49 = vld [vmem:[%s17500_s7 + $0xf0] sm:$0xff] }
 0x607   : > { %v9357_v7 = vadd.f32 %v9343_v56, %v9207_v29 }
 0x608   : > { %v9607_v17 = vrot.slane %v9590_v63, 1 }
 0x609   : > { %v9539_v20 = vpop.f32.mrf.mxu2 }
 0x60a   : > { %v9555_v59 = vadd.f32 %v9539_v20, %v9356_v1  ;;  %v9608_v4 = vsel %vm18443_vm7, %v9605_v53, %v9607_v17  ;;  %v13143_v20 = vld [vmem:[%s17500_s7 + $0x70] sm:$0xff]  ;;  %v13152_v1 = vld [vmem:[%s17500_s7 + $0xb8] sm:$0xff] }
 0x60b   : > { %v9630_v14 = vmax.f32 %v9589_v55, %v9608_v4  ;;  %9828 = vmatpush.bf16.msrb.mxu0 %v13143_v20  ;;  %9908 = vmatpush.bf16.msra.mxu1 %v13152_v1  ;;  %v13183_v4 = vld [vmem:[%s17500_s7 + $0x1b0] sm:$0xff]  ;;  %v13168_v20 = vld [vmem:[%s17500_s7 + $0x138] sm:$0xff]  ;;  %v13166_v1 = vld [vmem:[%s17500_s7 + $0x128] sm:$0xff] }
 0x60c   : > { %v9195_v39 = vpop.f32.mrf.mxu3  ;;  %v9583_v42 = vadd.f32 %v17025_v26, %v9555_v59  ;;  %v13160_v59 = vld [vmem:[%s17500_s7 + $0xf8] sm:$0xff] }
 0x60d   : > { %v9208_v3 = vadd.f32 %v9195_v39, %v9001_v50  ;;  %v9348_v50 = vpop.f32.mrf.mxu1  ;;  %v9637_v51 = vmax.f32 %v17034_v6, %v9630_v14  ;;  %9989 = vmatpush.bf16.msra.mxu2 %v13160_v59  ;;  %v13163_v59 = vld [vmem:[%s17500_s7 + $0x110] sm:$0xff] }
 0x60e   : > { %v9591_v11 = vmax.f32 %v9583_v42, 0.0 }
 0x60f   : > { %v9358_v40 = vadd.f32 %v9345_v32, %v9208_v3  ;;  %9829 = vmatpush.bf16.msrb.mxu0 %v13142_v41  ;;  %v13141_v32 = vld [vmem:[%s17500_s7 + $0x60] sm:$0xff]  ;;  %v13162_v41 = vld [vmem:[%s17500_s7 + $0x108] sm:$0xff] }
 0x610   : > { %v9609_v46 = vrot.slane %v9591_v11, 1 }
 0x611   : > { %v9542_v35 = vpop.f32.mrf.mxu2  ;;  %9990 = vmatpush.bf16.msra.mxu2 %v13159_v49  ;;  %v13170_v49 = vld [vmem:[%s17500_s7 + $0x148] sm:$0xff] }
 0x612   : > { %v9556_v19 = vadd.f32 %v9542_v35, %v9357_v7  ;;  %v9610_v25 = vsel %vm18441_vm15, %v9607_v17, %v9609_v46  ;;  %v13151_v7 = vld [vmem:[%s17500_s7 + $0xb0] sm:$0xff]  ;;  %v13140_v17 = vld [vmem:[%s17500_s7 + $0x58] sm:$0xff] }
 0x613   : > { %v9631_v8 = vmax.f32 %v9590_v63, %v9610_v25  ;;  %9909 = vmatpush.bf16.msra.mxu1 %v13151_v7  ;;  %9830 = vmatpush.bf16.msrb.mxu0 %v13141_v32  ;;  %v13136_v25 = vld [vmem:[%s17500_s7 + $0x38] sm:$0xff]  ;;  %v13171_v7 = vld [vmem:[%s17500_s7 + $0x150] sm:$0xff]  ;;  %v13186_v32 = vld [vmem:[%s17500_s7 + $0x1c8] sm:$0xff] }
 0x614   : > { %v9584_v61 = vadd.f32 %v17025_v26, %v9556_v19  ;;  %v9198_v9 = vpop.f32.mrf.mxu3 }
 0x615   : > { %v9209_v62 = vadd.f32 %v9198_v9, %v9002_v31  ;;  %v9638_v10 = vmax.f32 %v9630_v14, %v9631_v8  ;;  %v9350_v12 = vpop.f32.mrf.mxu1  ;;  %v13182_v14 = vld [vmem:[%s17500_s7 + $0x1a8] sm:$0xff] }
 0x616   : > { %v9592_v60 = vmax.f32 %v9584_v61, 0.0  ;;  %v13150_v61 = vld [vmem:[%s17500_s7 + $0xa8] sm:$0xff] }
 0x617   : > { %v9359_v2 = vadd.f32 %v9348_v50, %v9209_v62  ;;  %v17053_v53 = vpack.c.bf16 %v9638_v10, %v9637_v51  ;;  %9910 = vmatpush.bf16.msra.mxu1 %v13150_v61  ;;  %9831 = vmatpush.bf16.msrb.mxu0 %v13140_v17  ;;  %v13155_v62 = vld [vmem:[%s17500_s7 + $0xd0] sm:$0xff]  ;;  %v13146_v50 = vld [vmem:[%s17500_s7 + $0x88] sm:$0xff]  ;;  %v13181_v51 = vld [vmem:[%s17500_s7 + $0x1a0] sm:$0xff] }
 0x618   : > { %v9611_v18 = vrot.slane %v9592_v60, 1  ;;  %v13132_v10 = vld [vmem:[%s17500_s7 + $0x18] sm:$0xff]  ;;  %v13177_v61 = vld [vmem:[%s17500_s7 + $0x180] sm:$0xff] }
 0x619   : > { %v9544_v16 = vpop.f32.mrf.mxu2 }
 0x61a   : > { %v9557_v30 = vadd.f32 %v9544_v16, %v9358_v40  ;;  %v9612_v44 = vsel %vm18442_vm14, %v9609_v46, %v9611_v18 }
 0x61b   : > { %v9632_v24 = vmax.f32 %v9591_v11, %v9612_v44  ;;  %9911 = vmatpush.bf16.msra.mxu1 %v13149_v5  ;;  %v13138_v44 = vld [vmem:[%s17500_s7 + $0x48] sm:$0xff]  ;;  %v13199_v5 = vld [vmem:[%s17500_s7 + $0x230] sm:$0xff] }
 0x61c   : > { %v9585_v36 = vadd.f32 %v17025_v26, %v9557_v30  ;;  %v9200_v0 = vpop.f32.mrf.mxu3  ;;  %v13148_v30 = vld [vmem:[%s17500_s7 + $0x98] sm:$0xff] }
 0x61d   : > { %v9639_v43 = vmax.f32 %v9631_v8, %v9632_v24  ;;  %v9210_v48 = vadd.f32 %v9200_v0, %v9003_v22  ;;  %v13145_v8 = vld [vmem:[%s17500_s7 + $0x80] sm:$0xff]  ;;  %v13192_v0 = vld [vmem:[%s17500_s7 + $0x1f8] sm:$0xff]  ;;  %v13134_v22 = vld [vmem:[%s17500_s7 + $0x28] sm:$0xff] }
 0x61e   : > { %v9593_v52 = vmax.f32 %v9585_v36, 0.0  ;;  %v13139_v36 = vld [vmem:[%s17500_s7 + $0x50] sm:$0xff] }
 0x61f   : > { %v9360_v55 = vadd.f32 %v9350_v12, %v9210_v48  ;;  %9912 = vmatpush.bf16.msra.mxu1 %v13148_v30  ;;  %9832 = vmatpush.bf16.msrb.mxu0 %v13139_v36  ;;  %v13190_v48 = vld [vmem:[%s17500_s7 + $0x1e8] sm:$0xff]  ;;  %v13172_v12 = vld [vmem:[%s17500_s7 + $0x158] sm:$0xff]  ;;  %v13223_v36 = vld [vmem:[%s17500_s7 + $0x2f0] sm:$0xff] }
 0x620   : > { %v9613_v27 = vrot.slane %v9593_v52, 1  ;;  %v13198_v30 = vld [vmem:[%s17500_s7 + $0x228] sm:$0xff] }
 0x621   : > { %v9547_v57 = vpop.f32.mrf.mxu2 }
 0x622   : > { %v9558_v31 = vadd.f32 %v9547_v57, %v9359_v2  ;;  %v9614_v37 = vsel %vm18444_vm11, %v9611_v18, %v9613_v27  ;;  %v13153_v2 = vld [vmem:[%s17500_s7 + $0xc0] sm:$0xff]  ;;  %v13176_v57 = vld [vmem:[%s17500_s7 + $0x178] sm:$0xff] }
 0x623   : > { %v9633_v28 = vmax.f32 %v9592_v60, %v9614_v37  ;;  %v13158_v60 = vld [vmem:[%s17500_s7 + $0xe8] sm:$0xff]  ;;  %9913 = vmatpush.bf16.msra.mxu1 %v13147_v38  ;;  %9833 = vmatpush.bf16.msrb.mxu0 %v13138_v44  ;;  %v13191_v37 = vld [vmem:[%s17500_s7 + $0x1f0] sm:$0xff] }
 0x624   : > { %v9586_v15 = vadd.f32 %v17025_v26, %v9558_v31  ;;  %9991 = vmatpush.bf16.msra.mxu2 %v13158_v60  ;;  %v13175_v31 = vld [vmem:[%s17500_s7 + $0x170] sm:$0xff]  ;;  %v13200_v60 = vld [vmem:[%s17500_s7 + $0x238] sm:$0xff]  ;;  %v13222_v44 = vld [vmem:[%s17500_s7 + $0x2e8] sm:$0xff] }
 0x625   : > { %v9640_v33 = vmax.f32 %v9632_v24, %v9633_v28  ;;  %v13128_v24 = vld [vmem:[%s17499_s6] sm:$0xff]  ;;  %v13207_v38 = vld [vmem:[%s17500_s7 + $0x270] sm:$0xff] }
 0x626   : > { %v9594_v21 = vmax.f32 %v9586_v15, 0.0  ;;  %v13174_v15 = vld [vmem:[%s17500_s7 + $0x168] sm:$0xff] }
 0x627   : > { %v9648_v23 = vpack.c.bf16 %v9640_v33, %v9639_v43  ;;  %9914 = vmatpush.bf16.msra.mxu1 %v13146_v50  ;;  %v13135_v43 = vld [vmem:[%s17500_s7 + $0x30] sm:$0xff]  ;;  %v13173_v33 = vld [vmem:[%s17500_s7 + $0x160] sm:$0xff]  ;;  %v13214_v50 = vld [vmem:[%s17500_s7 + $0x2a8] sm:$0xff] }
 0x628   : > { %v9615_v45 = vrot.slane %v9594_v21, 1 }
 0x629   : > { %v9549_v56 = vpop.f32.mrf.mxu2 }
 0x62a   : > { %v9559_v29 = vadd.f32 %v9549_v56, %v9360_v55  ;;  %v9616_v34 = vsel %vm18445_vm1, %v9613_v27, %v9615_v45  ;;  %v13137_v27 = vld [vmem:[%s17500_s7 + $0x40] sm:$0xff]  ;;  %v13167_v56 = vld [vmem:[%s17500_s7 + $0x130] sm:$0xff] }
 0x62b   : > { %v9634_v39 = vmax.f32 %v9593_v52, %v9616_v34  ;;  %v13154_v52 = vld [vmem:[%s17500_s7 + $0xc8] sm:$0xff]  ;;  %9915 = vmatpush.bf16.msra.mxu1 %v13145_v8  ;;  %9834 = vmatpush.bf16.msrb.mxu0 %v13137_v27  ;;  %v13129_v55 = vld [vmem:[%s17500_s7] sm:$0xff]  ;;  %v13164_v34 = vld [vmem:[%s17500_s7 + $0x118] sm:$0xff] }
 0x62c   : > { %v9587_v42 = vadd.f32 %v17025_v26, %v9559_v29  ;;  %v13165_v29 = vld [vmem:[%s17500_s7 + $0x120] sm:$0xff] }
 0x62d   : > { %v9641_v35 = vmax.f32 %v9633_v28, %v9634_v39  ;;  %v13133_v28 = vld [vmem:[%s17500_s7 + $0x20] sm:$0xff] }
 0x62e   : > { %v9595_v19 = vmax.f32 %v9587_v42, 0.0  ;;  %v13187_v42 = vld [vmem:[%s17500_s7 + $0x1d0] sm:$0xff]  ;;  %v13221_v27 = vld [vmem:[%s17500_s7 + $0x2e0] sm:$0xff] }
 0x62f   : > { %10232 = vmatpush.bf16.msrb.mxu1 %v13184_v58  ;;  %10151 = vmatpush.bf16.msra.mxu0 %v13176_v57  ;;  %v13205_v58 = vld [vmem:[%s17500_s7 + $0x260] sm:$0xff]  ;;  %v13204_v57 = vld [vmem:[%s17500_s7 + $0x258] sm:$0xff] }
 0x630   : > { %v9617_v3 = vrot.slane %v9595_v19, 1 }
 0x632   : > { %v9618_v26 = vsel %vm18446_vm6, %v9615_v45, %v9617_v3  ;;  %v9628_v11 = vsel %vm18447_vm0, %v9617_v3, %v17029_v47  ;;  %v13157_v47 = vld [vmem:[%s17500_s7 + $0xe0] sm:$0xff]  ;;  %v13130_v45 = vld [vmem:[%s17500_s7 + $0x8] sm:$0xff] }
 0x633   : > { %v9635_v63 = vmax.f32 %v9594_v21, %v9618_v26  ;;  %v9636_v9 = vmax.f32 %v9595_v19, %v9628_v11  ;;  %9992 = vmatpush.bf16.msra.mxu2 %v13157_v47  ;;  %10233 = vmatpush.bf16.msrb.mxu1 %v13183_v4  ;;  %v13180_v21 = vld [vmem:[%s17500_s7 + $0x198] sm:$0xff]  ;;  %v13161_v19 = vld [vmem:[%s17500_s7 + $0x100] sm:$0xff] }
 0x634   : > { %10152 = vmatpush.bf16.msra.mxu0 %v13175_v31  ;;  %v13169_v3 = vld [vmem:[%s17500_s7 + $0x140] sm:$0xff]  ;;  %v13220_v31 = vld [vmem:[%s17500_s7 + $0x2d8] sm:$0xff] }
 0x635   : > { %v9643_v40 = vmax.f32 %v9635_v63, %v9636_v9  ;;  %v9644_v46 = vmax.f32 %v9636_v9, %v17034_v6  ;;  %v9642_v18 = vmax.f32 %v9634_v39, %v9635_v63  ;;  %v13156_v6 = vld [vmem:[%s17500_s7 + $0xd8] sm:$0xff]  ;;  %v13179_v39 = vld [vmem:[%s17500_s7 + $0x190] sm:$0xff]  ;;  %v13185_v26 = vld [vmem:[%s17500_s7 + $0x1c0] sm:$0xff] }
 0x637   : > { %v9650_v16 = vpack.c.bf16 %v9644_v46, %v9643_v40  ;;  %v9649_v13 = vpack.c.bf16 %v9642_v18, %v9641_v35  ;;  %9993 = vmatpush.bf16.msra.mxu2 %v13156_v6  ;;  %10234 = vmatpush.bf16.msrb.mxu1 %v13182_v14  ;;  %v13178_v35 = vld [vmem:[%s17500_s7 + $0x188] sm:$0xff]  ;;  %v13216_v46 = vld [vmem:[%s17500_s7 + $0x2b8] sm:$0xff]  ;;  %v13215_v6 = vld [vmem:[%s17500_s7 + $0x2b0] sm:$0xff] }
 0x638   : > { %10153 = vmatpush.bf16.msra.mxu0 %v13174_v15  ;;  %v13208_v18 = vld [vmem:[%s17500_s7 + $0x278] sm:$0xff]  ;;  %v13203_v15 = vld [vmem:[%s17500_s7 + $0x250] sm:$0xff] }
 0x639   : > { %9664 = vmatpush.bf16.msrb.mxu3 %v9650_v16 }
 0x63b   : > { %9994 = vmatpush.bf16.msra.mxu2 %v13155_v62  ;;  %10235 = vmatpush.bf16.msrb.mxu1 %v13181_v51  ;;  %v13197_v62 = vld [vmem:[%s17500_s7 + $0x220] sm:$0xff]  ;;  %v13219_v51 = vld [vmem:[%s17500_s7 + $0x2d0] sm:$0xff] }
 0x63c   : > { %10154 = vmatpush.bf16.msra.mxu0 %v13173_v33  ;;  %v13232_v33 = vld [vmem:[%s17500_s7 + $0x338] sm:$0xff] }
 0x63d   : > { %9665 = vmatpush.bf16.msrb.mxu3 %v9649_v13  ;;  %v13224_v13 = vld [vmem:[%s17500_s7 + $0x2f8] sm:$0xff] }
 0x63f   : > { %9995 = vmatpush.bf16.msra.mxu2 %v13154_v52  ;;  %10236 = vmatpush.bf16.msrb.mxu1 %v13180_v21  ;;  %v13196_v52 = vld [vmem:[%s17500_s7 + $0x218] sm:$0xff]  ;;  %v13202_v21 = vld [vmem:[%s17500_s7 + $0x248] sm:$0xff] }
 0x640   : > { %10155 = vmatpush.bf16.msra.mxu0 %v13172_v12  ;;  %v13218_v12 = vld [vmem:[%s17500_s7 + $0x2c8] sm:$0xff] }
 0x641   : > { %9666 = vmatpush.bf16.msrb.mxu3 %v9648_v23  ;;  %v13188_v23 = vld [vmem:[%s17500_s7 + $0x1d8] sm:$0xff] }
 0x643   : > { %9996 = vmatpush.bf16.msra.mxu2 %v13153_v2  ;;  %10237 = vmatpush.bf16.msrb.mxu1 %v13179_v39  ;;  %v13195_v2 = vld [vmem:[%s17500_s7 + $0x210] sm:$0xff] }
 0x644   : > { %10156 = vmatpush.bf16.msra.mxu0 %v13171_v7  ;;  %v13239_v7 = vld [vmem:[%s17500_s7 + $0x370] sm:$0xff] }
 0x645   : > { %9667 = vmatpush.bf16.msrb.mxu3 %v17053_v53  ;;  %v13131_v53 = vld [vmem:[%s17500_s7 + $0x10] sm:$0xff] }
 0x647   : > { %10313 = vmatpush.bf16.msrb.mxu2 %v13192_v0  ;;  %10238 = vmatpush.bf16.msrb.mxu1 %v13178_v35  ;;  %v13255_v35 = vld [vmem:[%s17500_s7 + $0x3f0] sm:$0xff] }
 0x648   : > { %12161 = vmatmul.msk.bf16.vlgmr.msrb.gmra.mxu3 %vm9656_vm4, %v13128_v24  ;;  %10157 = vmatpush.bf16.msra.mxu0 %v13170_v49  ;;  %v13213_v24 = vld [vmem:[%s17500_s7 + $0x2a0] sm:$0xff] }
 0x649   : > { %9741 = vmatpush.bf16.msra.mxu3 %v13136_v25  ;;  %v13206_v25 = vld [vmem:[%s17500_s7 + $0x268] sm:$0xff] }
 0x64b   : > { %10314 = vmatpush.bf16.msrb.mxu2 %v13191_v37  ;;  %10239 = vmatpush.bf16.msrb.mxu1 %v13177_v61  ;;  %v13194_v37 = vld [vmem:[%s17500_s7 + $0x208] sm:$0xff] }
 0x64c   : > { %10158 = vmatpush.bf16.msra.mxu0 %v13169_v3  ;;  %v13238_v61 = vld [vmem:[%s17500_s7 + $0x368] sm:$0xff] }
 0x64d   : > { %9742 = vmatpush.bf16.msra.mxu3 %v13135_v43  ;;  %v13212_v43 = vld [vmem:[%s17500_s7 + $0x298] sm:$0xff]  ;;  %v13254_v3 = vld [vmem:[%s17500_s7 + $0x3e8] sm:$0xff] }
 0x64f   : > { %10315 = vmatpush.bf16.msrb.mxu2 %v13190_v48 }
 0x651   : > { %9743 = vmatpush.bf16.msra.mxu3 %v13134_v22 }
 0x653   : > { %10316 = vmatpush.bf16.msrb.mxu2 %v13189_v54  ;;  %v13210_v54 = vld [vmem:[%s17500_s7 + $0x288] sm:$0xff] }
 0x655   : > { %9744 = vmatpush.bf16.msra.mxu3 %v13133_v28  ;;  %v13211_v28 = vld [vmem:[%s17500_s7 + $0x290] sm:$0xff] }
 0x657   : > { %10317 = vmatpush.bf16.msrb.mxu2 %v13188_v23  ;;  %v13231_v23 = vld [vmem:[%s17500_s7 + $0x330] sm:$0xff] }
 0x659   : > { %9745 = vmatpush.bf16.msra.mxu3 %v13132_v10  ;;  %v13193_v10 = vld [vmem:[%s17500_s7 + $0x200] sm:$0xff] }
 0x65b   : > { %10318 = vmatpush.bf16.msrb.mxu2 %v13187_v42 }
 0x65d   : > { %9746 = vmatpush.bf16.msra.mxu3 %v13131_v53 }
 0x65f   : > { %10319 = vmatpush.bf16.msrb.mxu2 %v13186_v32  ;;  %v13246_v32 = vld [vmem:[%s17500_s7 + $0x3a8] sm:$0xff] }
 0x661   : > { %9747 = vmatpush.bf16.msra.mxu3 %v13130_v45  ;;  %v13209_v45 = vld [vmem:[%s17500_s7 + $0x280] sm:$0xff] }
 0x663   : > { %10320 = vmatpush.bf16.msrb.mxu2 %v13185_v26  ;;  %v13228_v26 = vld [vmem:[%s17500_s7 + $0x318] sm:$0xff] }
 0x665   : > { %9748 = vmatpush.bf16.msra.mxu3 %v13129_v55  ;;  %v13201_v55 = vld [vmem:[%s17500_s7 + $0x240] sm:$0xff] }
 0x669   : > { %10070 = vmatpush.bf16.msrb.mxu3 %v13168_v20 }
 0x66d   : > { %10071 = vmatpush.bf16.msrb.mxu3 %v13167_v56  ;;  %v13248_v56 = vld [vmem:[%s17500_s7 + $0x3b8] sm:$0xff] }
 0x671   : > { %10072 = vmatpush.bf16.msrb.mxu3 %v13166_v1  ;;  %v13240_v1 = vld [vmem:[%s17500_s7 + $0x378] sm:$0xff] }
 0x675   : > { %10073 = vmatpush.bf16.msrb.mxu3 %v13165_v29  ;;  %v13217_v29 = vld [vmem:[%s17500_s7 + $0x2c0] sm:$0xff] }
 0x679   : > { %10074 = vmatpush.bf16.msrb.mxu3 %v13164_v34  ;;  %v13256_v34 = vld [vmem:[%s17500_s7 + $0x3f8] sm:$0xff] }
 0x67d   : > { %10075 = vmatpush.bf16.msrb.mxu3 %v13163_v59  ;;  %v13230_v59 = vld [vmem:[%s17500_s7 + $0x328] sm:$0xff] }
 0x681   : > { %10076 = vmatpush.bf16.msrb.mxu3 %v13162_v41  ;;  %v13247_v41 = vld [vmem:[%s17500_s7 + $0x3b0] sm:$0xff] }
 0x685   : > { %10077 = vmatpush.bf16.msrb.mxu3 %v13161_v19  ;;  %v13229_v19 = vld [vmem:[%s17500_s7 + $0x320] sm:$0xff] }
 0x6cb   : > { %v9669_v11 = vpop.f32.mrf.mxu3 }
 0x6cc   : > { %v9674_v63 = vpack.c.bf16 %v9669_v11, %v9669_v11  ;;  %v13245_v11 = vld [vmem:[%s17500_s7 + $0x3a0] sm:$0xff] }
 0x6ce   : > { %v9773_v9 = vunpack.c.l.b16 %v9674_v63  ;;  %9749 = vmatmul.bf16.vlgmr.msra.gmra.mxu3 %v9674_v63  ;;  %v13253_v63 = vld [vmem:[%s17500_s7 + $0x3e0] sm:$0xff] }
 0x6cf   : > { %10392 = vmatpush.bf16.msra.mxu3 %v13200_v60  ;;  %v13237_v60 = vld [vmem:[%s17500_s7 + $0x360] sm:$0xff] }
 0x6d0   : > { %v9774_v40 = vpack.c.b16 %v9773_v9, %v9773_v9  ;;  %v13227_v9 = vld [vmem:[%s17500_s7 + $0x310] sm:$0xff] }
 0x6d2   : > { %v9776_v47 = vshrl.u32 %v9774_v40, 16  ;;  %v9858_v16 = vrot.slane %v9774_v40, 1  ;;  %v10020_v8 = vrot.slane %v9774_v40, 2  ;;  %v10182_v0 = vrot.slane %v9774_v40, 3  ;;  %v13236_v40 = vld [vmem:[%s17500_s7 + $0x358] sm:$0xff] }
 0x6d3   : > { %10393 = vmatpush.bf16.msra.mxu3 %v13199_v5  ;;  %v9671_v22 = vpop.f32.mrf.mxu3  ;;  %v13244_v5 = vld [vmem:[%s17500_s7 + $0x398] sm:$0xff] }
 0x6d4   : > { %9916 = vmatmul.bf16.vlgmr.msra.gmra.mxu1 %v9858_v16  ;;  %9835 = vmatmul.bf16.vlgmr.msrb.gmra.mxu0 %v9776_v47  ;;  %v9939_v17 = vrot.slane %v9776_v47, 1  ;;  %v10101_v4 = vrot.slane %v9776_v47, 2  ;;  %v10263_v14 = vrot.slane %v9776_v47, 3  ;;  %v9675_v48 = vpack.c.bf16 %v9671_v22, %v9671_v22  ;;  %v13243_v47 = vld [vmem:[%s17500_s7 + $0x390] sm:$0xff] }
 0x6d5   : > { %10559 = vmatpush.bf16.msra.mxu1 %v13216_v46  ;;  %10478 = vmatpush.bf16.msrb.mxu0 %v13208_v18  ;;  %v13252_v46 = vld [vmem:[%s17500_s7 + $0x3d8] sm:$0xff]  ;;  %v13226_v18 = vld [vmem:[%s17500_s7 + $0x308] sm:$0xff]  ;;  %v13235_v16 = vld [vmem:[%s17500_s7 + $0x350] sm:$0xff] }
 0x6d6   : > { %9997 = vmatmul.bf16.vlgmr.msra.gmra.mxu2 %v9939_v17  ;;  %v10424_v53 = vunpack.c.l.b16 %v9675_v48  ;;  %v13242_v17 = vld [vmem:[%s17500_s7 + $0x388] sm:$0xff] }
 0x6d7   : > { %10640 = vmatpush.bf16.msra.mxu2 %v13224_v13  ;;  %10394 = vmatpush.bf16.msra.mxu3 %v13198_v30  ;;  %v13251_v13 = vld [vmem:[%s17500_s7 + $0x3d0] sm:$0xff]  ;;  %v13225_v30 = vld [vmem:[%s17500_s7 + $0x300] sm:$0xff] }
 0x6d8   : > { %v17353_v20 = vpack.c.b16 %v10424_v53, %v10424_v53 }
 0x6d9   : > { %10560 = vmatpush.bf16.msra.mxu1 %v13215_v6  ;;  %10479 = vmatpush.bf16.msrb.mxu0 %v13207_v38  ;;  %v13234_v6 = vld [vmem:[%s17500_s7 + $0x348] sm:$0xff] }
 0x6da   : > { %v17371_v39 = vshrl.u32 %v17353_v20, 16  ;;  %v10509_v42 = vrot.slane %v17353_v20, 1  ;;  %v13250_v38 = vld [vmem:[%s17500_s7 + $0x3c8] sm:$0xff] }
 0x6db   : > { %10641 = vmatpush.bf16.msra.mxu2 %v13223_v36  ;;  %10395 = vmatpush.bf16.msra.mxu3 %v13197_v62  ;;  %v10671_v36 = vrot.slane %v17353_v20, 2  ;;  %v13241_v62 = vld [vmem:[%s17500_s7 + $0x380] sm:$0xff] }
 0x6dc   : > { %v10590_v49 = vrot.slane %v17371_v39, 1 }
 0x6dd   : > { %10561 = vmatpush.bf16.msra.mxu1 %v13214_v50  ;;  %10480 = vmatpush.bf16.msrb.mxu0 %v13206_v25  ;;  %v13233_v50 = vld [vmem:[%s17500_s7 + $0x340] sm:$0xff] }
 0x6de   : > { %10078 = vmatmul.bf16.vlgmr.msrb.gmra.mxu3 %v10020_v8  ;;  %v13249_v25 = vld [vmem:[%s17500_s7 + $0x3c0] sm:$0xff]  ;;  %v10914_v8 = vrot.slane %v17371_v39, 3 }
 0x6df   : > { %10642 = vmatpush.bf16.msra.mxu2 %v13222_v44  ;;  %10396 = vmatpush.bf16.msra.mxu3 %v13196_v52  ;;  %v10833_v44 = vrot.slane %v17353_v20, 3  ;;  %v10752_v52 = vrot.slane %v17371_v39, 2 }
 0x6e1   : > { %10562 = vmatpush.bf16.msra.mxu1 %v13213_v24  ;;  %10481 = vmatpush.bf16.msrb.mxu0 %v13205_v58 }
 0x6e3   : > { %10643 = vmatpush.bf16.msra.mxu2 %v13221_v27  ;;  %10397 = vmatpush.bf16.msra.mxu3 %v13195_v2 }
 0x6e4   : > { %10240 = vmatmul.bf16.vlgmr.msrb.gmra.mxu1 %v10182_v0  ;;  %10159 = vmatmul.bf16.vlgmr.msra.gmra.mxu0 %v10101_v4 }
 0x6e5   : > { %10563 = vmatpush.bf16.msra.mxu1 %v13212_v43  ;;  %10482 = vmatpush.bf16.msrb.mxu0 %v13204_v57 }
 0x6e6   : > { %10321 = vmatmul.bf16.vlgmr.msrb.gmra.mxu2 %v10263_v14  ;;  %v9676_v14 = vld [vmem:[%s17501_s8] sm:$0x1] }
 0x6e7   : > { %10644 = vmatpush.bf16.msra.mxu2 %v13220_v31  ;;  %10398 = vmatpush.bf16.msra.mxu3 %v13194_v37 }
 0x6e9   : > { %10564 = vmatpush.bf16.msra.mxu1 %v13211_v28  ;;  %10483 = vmatpush.bf16.msrb.mxu0 %v13203_v15 }
 0x6eb   : > { %10645 = vmatpush.bf16.msra.mxu2 %v13219_v51  ;;  %10399 = vmatpush.bf16.msra.mxu3 %v13193_v10 }
 0x6ed   : > { %10565 = vmatpush.bf16.msra.mxu1 %v13210_v54  ;;  %10484 = vmatpush.bf16.msrb.mxu0 %v13202_v21 }
 0x6ee   : > { %10400 = vmatmul.bf16.vlgmr.msra.gmra.mxu3 %v9675_v48 }
 0x6ef   : > { %10721 = vmatpush.bf16.msrb.mxu3 %v13232_v33  ;;  %10646 = vmatpush.bf16.msra.mxu2 %v13218_v12 }
 0x6f1   : > { %10566 = vmatpush.bf16.msra.mxu1 %v13209_v45  ;;  %10485 = vmatpush.bf16.msrb.mxu0 %v13201_v55 }
 0x6f3   : > { %10722 = vmatpush.bf16.msrb.mxu3 %v13231_v23  ;;  %10647 = vmatpush.bf16.msra.mxu2 %v13217_v29 }
 0x6f4   : > { %10567 = vmatmul.bf16.vlgmr.msra.gmra.mxu1 %v10509_v42  ;;  %10486 = vmatmul.bf16.vlgmr.msrb.gmra.mxu0 %v17371_v39 }
 0x6f5   : > { %10883 = vmatpush.bf16.msrb.mxu1 %v13248_v56  ;;  %10802 = vmatpush.bf16.msra.mxu0 %v13240_v1 }
 0x6f6   : > { %10648 = vmatmul.bf16.vlgmr.msra.gmra.mxu2 %v10590_v49 }
 0x6f7   : > { %10964 = vmatpush.bf16.msrb.mxu2 %v13256_v34  ;;  %10723 = vmatpush.bf16.msrb.mxu3 %v13230_v59 }
 0x6f9   : > { %10884 = vmatpush.bf16.msrb.mxu1 %v13247_v41  ;;  %10803 = vmatpush.bf16.msra.mxu0 %v13239_v7 }
 0x6fb   : > { %10965 = vmatpush.bf16.msrb.mxu2 %v13255_v35  ;;  %10724 = vmatpush.bf16.msrb.mxu3 %v13229_v19 }
 0x6fd   : > { %10885 = vmatpush.bf16.msrb.mxu1 %v13246_v32  ;;  %10804 = vmatpush.bf16.msra.mxu0 %v13238_v61 }
 0x6ff   : > { %10966 = vmatpush.bf16.msrb.mxu2 %v13254_v3  ;;  %10725 = vmatpush.bf16.msrb.mxu3 %v13228_v26 }
 0x701   : > { %10886 = vmatpush.bf16.msrb.mxu1 %v13245_v11  ;;  %10805 = vmatpush.bf16.msra.mxu0 %v13237_v60 }
 0x703   : > { %10967 = vmatpush.bf16.msrb.mxu2 %v13253_v63  ;;  %10726 = vmatpush.bf16.msrb.mxu3 %v13227_v9 }
 0x705   : > { %10887 = vmatpush.bf16.msrb.mxu1 %v13244_v5  ;;  %10806 = vmatpush.bf16.msra.mxu0 %v13236_v40 }
 0x707   : > { %10968 = vmatpush.bf16.msrb.mxu2 %v13252_v46  ;;  %10727 = vmatpush.bf16.msrb.mxu3 %v13226_v18 }
 0x709   : > { %10888 = vmatpush.bf16.msrb.mxu1 %v13243_v47  ;;  %10807 = vmatpush.bf16.msra.mxu0 %v13235_v16 }
 0x70b   : > { %10969 = vmatpush.bf16.msrb.mxu2 %v13251_v13  ;;  %10728 = vmatpush.bf16.msrb.mxu3 %v13225_v30 }
 0x70d   : > { %10889 = vmatpush.bf16.msrb.mxu1 %v13242_v17  ;;  %10808 = vmatpush.bf16.msra.mxu0 %v13234_v6 }
 0x70e   : > { %10729 = vmatmul.bf16.vlgmr.msrb.gmra.mxu3 %v10671_v36 }
 0x70f   : > { %10970 = vmatpush.bf16.msrb.mxu2 %v13250_v38 }
 0x711   : > { %10890 = vmatpush.bf16.msrb.mxu1 %v13241_v62  ;;  %10809 = vmatpush.bf16.msra.mxu0 %v13233_v50 }
 0x713   : > { %10971 = vmatpush.bf16.msrb.mxu2 %v13249_v25 }
 0x714   : > { %10891 = vmatmul.bf16.vlgmr.msrb.gmra.mxu1 %v10833_v44  ;;  %10810 = vmatmul.bf16.vlgmr.msra.gmra.mxu0 %v10752_v52 }
 0x716   : > { %10972 = vmatmul.bf16.vlgmr.msrb.gmra.mxu2 %v10914_v8 }
 0x751   : > { %v9917_v24 = vpop.f32.mrf.mxu1  ;;  %v9836_v58 = vpop.f32.mrf.mxu0 }
 0x752   : > { %v9750_v27 = vpop.f32.mrf.mxu3 }
 0x753   : > { %v9754_v10 = vadd.f32 %v9750_v27, %v9676_v14 }
 0x755   : > { %v9840_v33 = vadd.f32 %v9836_v58, %v9754_v10 }
 0x757   : > { %v9921_v23 = vadd.f32 %v9917_v24, %v9840_v33 }
 0x759   : > { %v9919_v2 = vpop.f32.mrf.mxu1  ;;  %v9998_v43 = vpop.f32.mrf.mxu2 }
 0x75a   : > { %v9838_v57 = vpop.f32.mrf.mxu0  ;;  %v9752_v0 = vpop.f32.mrf.mxu3  ;;  %v10002_v45 = vadd.f32 %v9998_v43, %v9921_v23 }
 0x761   : > { %v10000_v4 = vpop.f32.mrf.mxu2  ;;  %v10241_v22 = vpop.f32.mrf.mxu1 }
 0x762   : > { %v10160_v31 = vpop.f32.mrf.mxu0  ;;  %v10079_v37 = vpop.f32.mrf.mxu3 }
 0x763   : > { %v10083_v55 = vadd.f32 %v10079_v37, %v10002_v45 }
 0x765   : > { %v10164_v34 = vadd.f32 %v10160_v31, %v10083_v55 }
 0x767   : > { %v10245_v59 = vadd.f32 %v10241_v22, %v10164_v34 }
 0x769   : > { %v10243_v28 = vpop.f32.mrf.mxu1  ;;  %v10322_v15 = vpop.f32.mrf.mxu2 }
 0x76a   : > { %v10162_v48 = vpop.f32.mrf.mxu0  ;;  %v10081_v51 = vpop.f32.mrf.mxu3  ;;  %v10326_v39 = vadd.f32 %v10322_v15, %v10245_v59 }
 0x771   : > { %v10324_v54 = vpop.f32.mrf.mxu2  ;;  %v10568_v21 = vpop.f32.mrf.mxu1 }
 0x772   : > { %v10487_v53 = vpop.f32.mrf.mxu0  ;;  %v10401_v12 = vpop.f32.mrf.mxu3 }
 0x773   : > { %v10405_v7 = vadd.f32 %v10401_v12, %v10326_v39 }
 0x775   : > { %v10491_v42 = vadd.f32 %v10487_v53, %v10405_v7 }
 0x777   : > { %v10572_v35 = vadd.f32 %v10568_v21, %v10491_v42 }
 0x779   : > { %v10570_v20 = vpop.f32.mrf.mxu1  ;;  %v10649_v56 = vpop.f32.mrf.mxu2 }
 0x77a   : > { %v10489_v1 = vpop.f32.mrf.mxu0  ;;  %v10403_v29 = vpop.f32.mrf.mxu3  ;;  %v10653_v19 = vadd.f32 %v10649_v56, %v10572_v35 }
 0x781   : > { %v10651_v41 = vpop.f32.mrf.mxu2 }
 0x791   : > { %v10892_v49 = vpop.f32.mrf.mxu1  ;;  %v10811_v32 = vpop.f32.mrf.mxu0 }
 0x792   : > { %v10730_v61 = vpop.f32.mrf.mxu3 }
 0x793   : > { %v10734_v3 = vadd.f32 %v10730_v61, %v10653_v19 }
 0x795   : > { %v10815_v26 = vadd.f32 %v10811_v32, %v10734_v3 }
 0x797   : > { %v10896_v11 = vadd.f32 %v10892_v49, %v10815_v26 }
 0x799   : > { %v10894_v60 = vpop.f32.mrf.mxu1  ;;  %v10973_v63 = vpop.f32.mrf.mxu2 }
 0x79a   : > { %v10977_v9 = vadd.f32 %v10973_v63, %v10896_v11  ;;  %v10813_v5 = vpop.f32.mrf.mxu0  ;;  %v10732_v40 = vpop.f32.mrf.mxu3 }
 0x79c   : > { %10978 = vst [vmem:[%s325_s16] sm:$0x1] %v10977_v9 }
 0x79d   : > { %13351 = shalt.err (!%p13348_p3)
}
 0x79e   : > { %13281 = dma.vmem_to_hbm [thread:$0]  (%p13478_p5), %s10991_s26, 16, %s10993_s27, %s10980_s17  }
 0x7a1   : > { %v10975_v46 = vpop.f32.mrf.mxu2 }
 0x7a2 PF: > { %p13287_p4 = scmp.ge.s32.totalorder %s13386_s12, 2  ;;  %s11004_s24 = sand.u32 1, %s13374_s30  }
 0x7a3   : > { %s11005_s14 = scalar_lea.sflag [#allocation7], %s11004_s24 }
 0x7a4   : > { %p13284_p7 = pnand %p13287_p4, %p13482_p6 }
 0x7a6   : > { %p13285_p8 = pneg %p13284_p7 }
 0x7a8   : > { %13369 = dma.done.wait (%p13285_p8), %s11005_s14, 16  }
 0x7a9   : > { %13371 = vsyncadd (%p13285_p8), %s11005_s14, 4294967280  ;;  %p19_p9 = scmp.ge.s32.totalorder %s13465_s15, 4   ;;  %s18448_s30 = smov %s13378_s10 }
 0x7aa   : > { %s18449_s10 = smov %s13382_s11  ;;  %s18450_s11 = smov %s13476_s18 }
 0x7ab   : > { %s18451_s12 = smov %s13465_s15  ;;  %21 = sbr.rel (!%p19_p9) target bundleno = 3 (0x3), region = 122 }
 0x7b0   :  { %11010 = vsyncpa [#allocation7], 1 }
 0x7b1   :  { %11012 = vsyncpa [#allocation7 + $0x1], 1 }

</bundles_post_ra>
